<compile_context>
chip_gen: v6e
topology: v6e:2x2x1
jax: 0.10.0
libtpu: 0.0.40
codegen_flags: <defaults>
</compile_context>

<pallas_src>
import functools

import jax
import jax.numpy as jnp
from jax import lax
from jax.experimental import pallas as pl
from jax.experimental.pallas import tpu as pltpu

# --------------------------- small, module-consistent config ---------------------------
B = 2                         # batch
C = 3                         # RGB channels
IMG_H, IMG_W = 16, 8          # stands in for SIZE_TRAIN = [256, 128]
PATCH = 4                     # stands in for patch_size = 16 / STRIDE_SIZE = [16, 16]
D = 64                        # stands in for in_planes = 768
HEADS = 4                     # stands in for 12 heads
HEAD_DIM = D // HEADS
MLP_HIDDEN = 4 * D            # mlp_ratio = 4
DEPTH = 3                     # stands in for depth = 12 (>= 2 so base uses blocks[:-1])
CAM_NUM, VIEW_NUM = 4, 2      # SIE_CAMERA / SIE_VIEW enabled
SIE_COE = 3.0
SHIFT_NUM = 5
SHUFFLE_GROUPS = 2
DIVIDE_LENGTH = 4
LN_EPS = 1e-6                 # TransReID ViT LayerNorm eps

HP, WP = IMG_H // PATCH, IMG_W // PATCH
NUM_PATCHES = HP * WP         # 8
SEQ_LEN = NUM_PATCHES + 1     # 9  (cls token + patches)
PATCH_LEN = NUM_PATCHES // DIVIDE_LENGTH   # 2
LOC_LEN = PATCH_LEN + 1                    # 3  (token + local patches)
ATTN_SCALE = HEAD_DIM ** -0.5
SQRT1_2 = 0.7071067811865476


# --------------------------------- in-kernel math helpers ---------------------------------
def _ln(x, g, b):
    """LayerNorm over the last axis; g/b broadcast as (1, D)."""
    mu = jnp.mean(x, axis=-1, keepdims=True)
    var = jnp.mean(jnp.square(x - mu), axis=-1, keepdims=True)
    return (x - mu) * lax.rsqrt(var + LN_EPS) * g + b


def _erf_poly(x):
    # Abramowitz & Stegun 7.1.26 (max abs err ~1.5e-7): exact-erf GELU parity without
    # relying on an erf lowering inside Mosaic; exp lands on the EUP slot.
    a1, a2, a3, a4, a5 = 0.254829592, -0.284496736, 1.421413741, -1.453152027, 1.061405429
    p = 0.3275911
    ax = jnp.abs(x)
    t = 1.0 / (1.0 + p * ax)
    poly = ((((a5 * t + a4) * t + a3) * t + a2) * t + a1) * t
    y = 1.0 - poly * jnp.exp(-ax * ax)
    return jnp.where(x >= 0.0, y, -y)


def _gelu(x):
    return 0.5 * x * (1.0 + _erf_poly(x * SQRT1_2))


def _block_body(x2, ln1g, ln1b, wqkv, bqkv, wproj, bproj,
                ln2g, ln2b, wfc1, bfc1, wfc2, bfc2, *, n_seq, seq_len):
    """One timm/TransReID transformer block on head-concatenated 2-D activations.

    x2: (n_seq * seq_len, D); each consecutive group of `seq_len` rows is an independent
    attention sequence (batch element / JPM branch). Dropout/DropPath are identity (eval).
    """
    h = _ln(x2, ln1g, ln1b)
    qkv = jnp.dot(h, wqkv, preferred_element_type=jnp.float32) + bqkv      # (rows, 3D)

    seq_outs = []
    for s in range(n_seq):                       # static unroll: all sequences in one kernel
        r0 = s * seq_len
        blk = qkv[r0:r0 + seq_len, :]            # (L, 3D) static slice
        heads = []
        for hh in range(HEADS):                  # static unroll over heads
            c = hh * HEAD_DIM
            q = blk[:, c:c + HEAD_DIM]
            k = blk[:, D + c:D + c + HEAD_DIM]
            v = blk[:, 2 * D + c:2 * D + c + HEAD_DIM]
            sc = lax.dot_general(q, k, (((1,), (1,)), ((), ())),
                                 preferred_element_type=jnp.float32) * ATTN_SCALE
            sc = sc - jnp.max(sc, axis=-1, keepdims=True)
            e = jnp.exp(sc)
            inv = pl.reciprocal(jnp.sum(e, axis=-1, keepdims=True), approx=True)
            heads.append(jnp.dot(e * inv, v, preferred_element_type=jnp.float32))
        seq_outs.append(jnp.concatenate(heads, axis=-1))                   # (L, D) lane-dense
    a = jnp.concatenate(seq_outs, axis=0)                                  # (rows, D)

    x2 = x2 + jnp.dot(a, wproj, preferred_element_type=jnp.float32) + bproj
    h2 = _ln(x2, ln2g, ln2b)
    hid = jnp.dot(h2, wfc1, preferred_element_type=jnp.float32) + bfc1
    hid = _gelu(hid)
    return x2 + jnp.dot(hid, wfc2, preferred_element_type=jnp.float32) + bfc2


# ------------------------------------- Pallas kernels -------------------------------------
def _backbone_kernel(xp_ref, pw_ref, pb_ref, cls_ref, add_ref,
                     ln1g_ref, ln1b_ref, wqkv_ref, bqkv_ref, wproj_ref, bproj_ref,
                     ln2g_ref, ln2b_ref, wfc1_ref, bfc1_ref, wfc2_ref, bfc2_ref,
                     o_ref):
    """grid = (DEPTH-1,): step 0 builds the embeddings into o_ref, every step applies one
    transformer block in place; o_ref (constant index_map) carries activations in VMEM."""

    @pl.when(pl.program_id(0) == 0)
    def _():
        # patch embed (stride == patch conv as a matmul) + cls token + pos + SIE_COE * sie
        tok = jnp.dot(xp_ref[...], pw_ref[...],
                      preferred_element_type=jnp.float32) + pb_ref[...]    # (B*NP, D)
        for b in range(B):
            r0 = b * SEQ_LEN
            o_ref[r0:r0 + 1, :] = cls_ref[...] + add_ref[r0:r0 + 1, :]
            o_ref[r0 + 1:r0 + SEQ_LEN, :] = (
                tok[b * NUM_PATCHES:(b + 1) * NUM_PATCHES, :]
                + add_ref[r0 + 1:r0 + SEQ_LEN, :])

    o_ref[...] = _block_body(
        o_ref[...],
        ln1g_ref[0], ln1b_ref[0], wqkv_ref[0], bqkv_ref[0], wproj_ref[0], bproj_ref[0],
        ln2g_ref[0], ln2b_ref[0], wfc1_ref[0], bfc1_ref[0], wfc2_ref[0], bfc2_ref[0],
        n_seq=B, seq_len=SEQ_LEN)


def _block_norm_kernel(x_ref,
                       ln1g_ref, ln1b_ref, wqkv_ref, bqkv_ref, wproj_ref, bproj_ref,
                       ln2g_ref, ln2b_ref, wfc1_ref, bfc1_ref, wfc2_ref, bfc2_ref,
                       ng_ref, nb_ref, o_ref, *, n_seq, seq_len):
    """nn.Sequential(block, layer_norm) — i.e. self.b1 / self.b2 — fully fused."""
    y = _block_body(
        x_ref[...],
        ln1g_ref[...], ln1b_ref[...], wqkv_ref[...], bqkv_ref[...],
        wproj_ref[...], bproj_ref[...],
        ln2g_ref[...], ln2b_ref[...], wfc1_ref[...], bfc1_ref[...],
        wfc2_ref[...], bfc2_ref[...],
        n_seq=n_seq, seq_len=seq_len)
    o_ref[...] = _ln(y, ng_ref[...], nb_ref[...])


# ------------------------------------- kernel wrappers -------------------------------------
_BLK_KEYS = ('ln1_g', 'ln1_b', 'w_qkv', 'b_qkv', 'w_proj', 'b_proj',
             'ln2_g', 'ln2_b', 'w_fc1', 'b_fc1', 'w_fc2', 'b_fc2')


def backbone_forward(xp, add2, P):
    """Embeddings + blocks[:-1] in a single pallas_call (grid over blocks)."""
    def full(arr):   # whole array resident, constant block index across the grid
        return pl.BlockSpec(arr.shape, lambda i, n=arr.ndim: (0,) * n)

    def stacked(arr):  # one block's parameters per grid step (pipelined weight DMA)
        return pl.BlockSpec((1,) + arr.shape[1:],
                            lambda i, n=arr.ndim - 1: (i,) + (0,) * n)

    static_args = [xp, P['patch_w'], P['patch_b'], P['cls_token'], add2]
    block_args = [P['blocks'][k] for k in _BLK_KEYS]

    return pl.pallas_call(
        _backbone_kernel,
        out_shape=jax.ShapeDtypeStruct((B * SEQ_LEN, D), jnp.float32),
        grid=(DEPTH - 1,),
        in_specs=[full(a) for a in static_args] + [stacked(a) for a in block_args],
        out_specs=pl.BlockSpec((B * SEQ_LEN, D), lambda i: (0, 0)),
        compiler_params=pltpu.CompilerParams(dimension_semantics=("arbitrary",)),
    )(*static_args, *block_args)


def block_norm_fused(x2d, bp, *, n_seq, seq_len):
    """One fused block + final LayerNorm call; all operands fully VMEM-resident."""
    rows = x2d.shape[0]
    kern = functools.partial(_block_norm_kernel, n_seq=n_seq, seq_len=seq_len)
    return pl.pallas_call(
        kern,
        out_shape=jax.ShapeDtypeStruct((rows, D), jnp.float32),
    )(x2d, *[bp[k] for k in _BLK_KEYS], bp['norm_g'], bp['norm_b'])


# ------------------------------------- glue (tiny JAX) -------------------------------------
def shuffle_unit(features, shift, group, begin=1):
    Bb, L, Dd = features.shape
    fr = jnp.concatenate(
        [features[:, begin - 1 + shift:], features[:, begin:begin - 1 + shift]], axis=1)
    n = fr.shape[1]
    # TODO(synk): the torch try/except padding branch (non-divisible patch count) is not
    #             reproduced; shapes here are chosen so it never triggers.
    x = fr.reshape(Bb, group, n // group, Dd)
    x = jnp.transpose(x, (0, 2, 1, 3)).reshape(Bb, n, Dd)
    return x


def forward(x, cam_label, view_label, P):
    """Eval-mode forward of build_transformer_local (rearrange=True, neck_feat='before'):
    returns cat([global_feat, lf1/4, lf2/4, lf3/4, lf4/4], dim=1) of shape (B, 5*D)."""
    # patch unfold (non-overlapping conv == matmul) + additive embedding term, both tiny
    xp = x.reshape(B, C, HP, PATCH, WP, PATCH)
    xp = jnp.transpose(xp, (0, 2, 4, 1, 3, 5)).reshape(B * NUM_PATCHES, C * PATCH * PATCH)
    sie = P['sie_embed'][cam_label * VIEW_NUM + view_label]                 # (B, D)
    add2 = (P['pos_embed'][None] + SIE_COE * sie[:, None, :]).reshape(B * SEQ_LEN, D)

    features2 = backbone_forward(xp, add2, P)                               # (B*L, D)
    features = features2.reshape(B, SEQ_LEN, D)

    # ---- b1 (global branch) ----
    b1_out = block_norm_fused(features2, P['b1'], n_seq=B, seq_len=SEQ_LEN)
    global_feat = b1_out.reshape(B, SEQ_LEN, D)[:, 0]                       # (B, D)

    # ---- JPM local branches through b2, all 4 batched into ONE kernel call ----
    token = features[:, 0:1]                                                # (B, 1, D)
    xs = shuffle_unit(features, SHIFT_NUM, SHUFFLE_GROUPS)                  # rearrange=True
    branches = [jnp.concatenate(
        [token, xs[:, i * PATCH_LEN:(i + 1) * PATCH_LEN]], axis=1)          # (B, LOC_LEN, D)
        for i in range(DIVIDE_LENGTH)]
    loc_in = jnp.stack(branches, axis=0).reshape(DIVIDE_LENGTH * B * LOC_LEN, D)
    loc_out = block_norm_fused(loc_in, P['b2'],
                               n_seq=DIVIDE_LENGTH * B, seq_len=LOC_LEN)
    loc_out = loc_out.reshape(DIVIDE_LENGTH, B, LOC_LEN, D)
    local_feats = [loc_out[i, :, 0, :] / 4.0 for i in range(DIVIDE_LENGTH)]

    # BatchNorm bottlenecks / Linear classifiers feed only the training branch; the
    # eval / neck_feat='before' branch returns the raw features below.
    return jnp.concatenate([global_feat] + local_feats, axis=1)


# ----------------------------------- deterministic parameters -----------------------------------
def init_params(key):
    keys = iter(jax.random.split(key, 64))

    def nrm(shape, std=0.02):
        return (std * jax.random.normal(next(keys), shape)).astype(jnp.float32)

    blocks = {
        'ln1_g': jnp.ones((DEPTH, 1, D), jnp.float32),
        'ln1_b': jnp.zeros((DEPTH, 1, D), jnp.float32),
        'w_qkv': nrm((DEPTH, D, 3 * D)),
        'b_qkv': jnp.zeros((DEPTH, 1, 3 * D), jnp.float32),
        'w_proj': nrm((DEPTH, D, D)),
        'b_proj': jnp.zeros((DEPTH, 1, D), jnp.float32),
        'ln2_g': jnp.ones((DEPTH, 1, D), jnp.float32),
        'ln2_b': jnp.zeros((DEPTH, 1, D), jnp.float32),
        'w_fc1': nrm((DEPTH, D, MLP_HIDDEN)),
        'b_fc1': jnp.zeros((DEPTH, 1, MLP_HIDDEN), jnp.float32),
        'w_fc2': nrm((DEPTH, MLP_HIDDEN, D)),
        'b_fc2': jnp.zeros((DEPTH, 1, D), jnp.float32),
    }
    P = {
        'patch_w': nrm((C * PATCH * PATCH, D)),   # conv weight (D, C, p, p) flattened^T
        'patch_b': jnp.zeros((1, D), jnp.float32),
        'cls_token': nrm((1, D)),
        'pos_embed': nrm((SEQ_LEN, D)),
        'sie_embed': nrm((CAM_NUM * VIEW_NUM, D)),
        'norm_g': jnp.ones((1, D), jnp.float32),
        'norm_b': jnp.zeros((1, D), jnp.float32),
        'blocks': blocks,
    }

    # b1 / b2 are independent deepcopies of (last base block, base norm) in the torch module;
    # they are kept as SEPARATE parameter sets here (identical values at init, as in torch).
    def copy_last_block():
        bp = {k: blocks[k][DEPTH - 1] for k in _BLK_KEYS}
        bp['norm_g'] = P['norm_g']
        bp['norm_b'] = P['norm_b']
        return bp

    P['b1'] = copy_last_block()
    P['b2'] = copy_last_block()
    return P


# ----------------------------------- main -----------------------------------
if __name__ == "__main__":
    key = jax.random.PRNGKey(0)
    kp, kx, kc, kv = jax.random.split(key, 4)

    P = init_params(kp)
    x = jax.random.normal(kx, (B, C, IMG_H, IMG_W), dtype=jnp.float32)   # NCHW, like PyTorch
    cam_label = jax.random.randint(kc, (B,), 0, CAM_NUM)
    view_label = jax.random.randint(kv, (B,), 0, VIEW_NUM)

    fwd = jax.jit(forward)
    out = jax.block_until_ready(fwd(x, cam_label, view_label, P))
    assert out.shape == (B, 5 * D) and out.dtype == jnp.float32
    print("KERNEL_OK")
</pallas_src>

<mosaic_0001>
module attributes {stable_mosaic.version = 11 : i64} {
  func.func @_backbone_kernel(%arg0: i32, %arg1: memref<16x48xf32, #tpu.memory_space<vmem>>, %arg2: memref<48x64xf32, #tpu.memory_space<vmem>>, %arg3: memref<1x64xf32, #tpu.memory_space<vmem>>, %arg4: memref<1x64xf32, #tpu.memory_space<vmem>>, %arg5: memref<18x64xf32, #tpu.memory_space<vmem>>, %arg6: memref<1x1x64xf32, #tpu.memory_space<vmem>>, %arg7: memref<1x1x64xf32, #tpu.memory_space<vmem>>, %arg8: memref<1x64x192xf32, #tpu.memory_space<vmem>>, %arg9: memref<1x1x192xf32, #tpu.memory_space<vmem>>, %arg10: memref<1x64x64xf32, #tpu.memory_space<vmem>>, %arg11: memref<1x1x64xf32, #tpu.memory_space<vmem>>, %arg12: memref<1x1x64xf32, #tpu.memory_space<vmem>>, %arg13: memref<1x1x64xf32, #tpu.memory_space<vmem>>, %arg14: memref<1x64x256xf32, #tpu.memory_space<vmem>>, %arg15: memref<1x1x256xf32, #tpu.memory_space<vmem>>, %arg16: memref<1x256x64xf32, #tpu.memory_space<vmem>>, %arg17: memref<1x1x64xf32, #tpu.memory_space<vmem>>, %arg18: memref<18x64xf32, #tpu.memory_space<vmem>>) attributes {dimension_semantics = [#tpu.dimension_semantics<arbitrary>], iteration_bounds = array<i64: 2>, scalar_prefetch = 0 : i64, scratch_operands = 0 : i64, tpu.core_type = #tpu.core_type<tc>, window_params = [{pipeline_mode = #tpu.pipeline_mode<synchronous>, transform_indices = @transform_0, window_bounds = array<i64: 16, 48>}, {pipeline_mode = #tpu.pipeline_mode<synchronous>, transform_indices = @transform_1, window_bounds = array<i64: 48, 64>}, {pipeline_mode = #tpu.pipeline_mode<synchronous>, transform_indices = @transform_2, window_bounds = array<i64: 1, 64>}, {pipeline_mode = #tpu.pipeline_mode<synchronous>, transform_indices = @transform_3, window_bounds = array<i64: 1, 64>}, {pipeline_mode = #tpu.pipeline_mode<synchronous>, transform_indices = @transform_4, window_bounds = array<i64: 18, 64>}, {transform_indices = @transform_5, window_bounds = array<i64: 1, 1, 64>}, {transform_indices = @transform_6, window_bounds = array<i64: 1, 1, 64>}, {transform_indices = @transform_7, window_bounds = array<i64: 1, 64, 192>}, {transform_indices = @transform_8, window_bounds = array<i64: 1, 1, 192>}, {transform_indices = @transform_9, window_bounds = array<i64: 1, 64, 64>}, {transform_indices = @transform_10, window_bounds = array<i64: 1, 1, 64>}, {transform_indices = @transform_11, window_bounds = array<i64: 1, 1, 64>}, {transform_indices = @transform_12, window_bounds = array<i64: 1, 1, 64>}, {transform_indices = @transform_13, window_bounds = array<i64: 1, 64, 256>}, {transform_indices = @transform_14, window_bounds = array<i64: 1, 1, 256>}, {transform_indices = @transform_15, window_bounds = array<i64: 1, 256, 64>}, {transform_indices = @transform_16, window_bounds = array<i64: 1, 1, 64>}, {pipeline_mode = #tpu.pipeline_mode<synchronous>, transform_indices = @transform_17, window_bounds = array<i64: 18, 64>}]} {
    %c0_i32 = arith.constant 0 : i32
    %0 = arith.cmpi eq, %arg0, %c0_i32 : i32
    %1 = arith.extui %0 : i1 to i32
    %c0_i32_0 = arith.constant 0 : i32
    %2 = arith.cmpi ne, %1, %c0_i32_0 : i32
    scf.if %2 {
      %c0_108 = arith.constant 0 : index
      %c0_109 = arith.constant 0 : index
      %268 = vector.load %arg1[%c0_108, %c0_109] : memref<16x48xf32, #tpu.memory_space<vmem>>, vector<16x48xf32>
      %c0_110 = arith.constant 0 : index
      %c0_111 = arith.constant 0 : index
      %269 = vector.load %arg2[%c0_110, %c0_111] : memref<48x64xf32, #tpu.memory_space<vmem>>, vector<48x64xf32>
      %cst_112 = arith.constant dense<0.000000e+00> : vector<16x64xf32>
      %270 = tpu.matmul %268, %269, %cst_112 {dimension_numbers = #tpu.dot_dimension_numbers<[1], [0], [0], [1], [0, 0, 1, 1], [], []>} : vector<16x48xf32>, vector<48x64xf32>, vector<16x64xf32> -> vector<16x64xf32>
      %c0_113 = arith.constant 0 : index
      %c0_114 = arith.constant 0 : index
      %271 = vector.load %arg3[%c0_113, %c0_114] : memref<1x64xf32, #tpu.memory_space<vmem>>, vector<1x64xf32>
      %272 = vector.broadcast %271 : vector<1x64xf32> to vector<16x64xf32>
      %273 = arith.addf %270, %272 : vector<16x64xf32>
      %c0_115 = arith.constant 0 : index
      %c0_116 = arith.constant 0 : index
      %274 = vector.load %arg4[%c0_115, %c0_116] : memref<1x64xf32, #tpu.memory_space<vmem>>, vector<1x64xf32>
      %c0_117 = arith.constant 0 : index
      %c0_118 = arith.constant 0 : index
      %275 = vector.load %arg5[%c0_117, %c0_118] : memref<18x64xf32, #tpu.memory_space<vmem>>, vector<1x64xf32>
      %276 = arith.addf %274, %275 : vector<1x64xf32>
      %c0_119 = arith.constant 0 : index
      %c0_120 = arith.constant 0 : index
      %277 = vector.load %arg18[%c0_119, %c0_120] : memref<18x64xf32, #tpu.memory_space<vmem>>, vector<1x64xf32>
      tpu.vector_store %arg18[%c0_119, %c0_120], %276 {strides = array<i32>} : memref<18x64xf32, #tpu.memory_space<vmem>>, vector<1x64xf32>,
      %278 = vector.extract_strided_slice %273 {offsets = [0, 0], sizes = [8, 64], strides = [1, 1]} : vector<16x64xf32> to vector<8x64xf32>
      %c1 = arith.constant 1 : index
      %c0_121 = arith.constant 0 : index
      %279 = vector.load %arg5[%c1, %c0_121] : memref<18x64xf32, #tpu.memory_space<vmem>>, vector<8x64xf32>
      %280 = arith.addf %278, %279 : vector<8x64xf32>
      %c1_122 = arith.constant 1 : index
      %c0_123 = arith.constant 0 : index
      %281 = vector.load %arg18[%c1_122, %c0_123] : memref<18x64xf32, #tpu.memory_space<vmem>>, vector<8x64xf32>
      tpu.vector_store %arg18[%c1_122, %c0_123], %280 {strides = array<i32>} : memref<18x64xf32, #tpu.memory_space<vmem>>, vector<8x64xf32>,
      %c0_124 = arith.constant 0 : index
      %c0_125 = arith.constant 0 : index
      %282 = vector.load %arg4[%c0_124, %c0_125] : memref<1x64xf32, #tpu.memory_space<vmem>>, vector<1x64xf32>
      %c9 = arith.constant 9 : index
      %c0_126 = arith.constant 0 : index
      %283 = vector.load %arg5[%c9, %c0_126] : memref<18x64xf32, #tpu.memory_space<vmem>>, vector<1x64xf32>
      %284 = arith.addf %282, %283 : vector<1x64xf32>
      %c9_127 = arith.constant 9 : index
      %c0_128 = arith.constant 0 : index
      %285 = vector.load %arg18[%c9_127, %c0_128] : memref<18x64xf32, #tpu.memory_space<vmem>>, vector<1x64xf32>
      tpu.vector_store %arg18[%c9_127, %c0_128], %284 {strides = array<i32>} : memref<18x64xf32, #tpu.memory_space<vmem>>, vector<1x64xf32>,
      %286 = vector.extract_strided_slice %273 {offsets = [8, 0], sizes = [8, 64], strides = [1, 1]} : vector<16x64xf32> to vector<8x64xf32>
      %c10 = arith.constant 10 : index
      %c0_129 = arith.constant 0 : index
      %287 = vector.load %arg5[%c10, %c0_129] : memref<18x64xf32, #tpu.memory_space<vmem>>, vector<8x64xf32>
      %288 = arith.addf %286, %287 : vector<8x64xf32>
      %c10_130 = arith.constant 10 : index
      %c0_131 = arith.constant 0 : index
      %289 = vector.load %arg18[%c10_130, %c0_131] : memref<18x64xf32, #tpu.memory_space<vmem>>, vector<8x64xf32>
      tpu.vector_store %arg18[%c10_130, %c0_131], %288 {strides = array<i32>} : memref<18x64xf32, #tpu.memory_space<vmem>>, vector<8x64xf32>,
    } else {
    }
    %c0 = arith.constant 0 : index
    %c0_1 = arith.constant 0 : index
    %3 = vector.load %arg18[%c0, %c0_1] : memref<18x64xf32, #tpu.memory_space<vmem>>, vector<18x64xf32>
    %c0_2 = arith.constant 0 : index
    %c0_3 = arith.constant 0 : index
    %c0_4 = arith.constant 0 : index
    %4 = vector.load %arg6[%c0_2, %c0_3, %c0_4] : memref<1x1x64xf32, #tpu.memory_space<vmem>>, vector<1x1x64xf32>
    %5 = vector.shape_cast %4 : vector<1x1x64xf32> to vector<1x64xf32>
    %c0_5 = arith.constant 0 : index
    %c0_6 = arith.constant 0 : index
    %c0_7 = arith.constant 0 : index
    %6 = vector.load %arg7[%c0_5, %c0_6, %c0_7] : memref<1x1x64xf32, #tpu.memory_space<vmem>>, vector<1x1x64xf32>
    %7 = vector.shape_cast %6 : vector<1x1x64xf32> to vector<1x64xf32>
    %c0_8 = arith.constant 0 : index
    %c0_9 = arith.constant 0 : index
    %c0_10 = arith.constant 0 : index
    %8 = vector.load %arg8[%c0_8, %c0_9, %c0_10] : memref<1x64x192xf32, #tpu.memory_space<vmem>>, vector<1x64x192xf32>
    %9 = vector.shape_cast %8 : vector<1x64x192xf32> to vector<64x192xf32>
    %c0_11 = arith.constant 0 : index
    %c0_12 = arith.constant 0 : index
    %c0_13 = arith.constant 0 : index
    %10 = vector.load %arg9[%c0_11, %c0_12, %c0_13] : memref<1x1x192xf32, #tpu.memory_space<vmem>>, vector<1x1x192xf32>
    %11 = vector.shape_cast %10 : vector<1x1x192xf32> to vector<1x192xf32>
    %c0_14 = arith.constant 0 : index
    %c0_15 = arith.constant 0 : index
    %c0_16 = arith.constant 0 : index
    %12 = vector.load %arg10[%c0_14, %c0_15, %c0_16] : memref<1x64x64xf32, #tpu.memory_space<vmem>>, vector<1x64x64xf32>
    %13 = vector.shape_cast %12 : vector<1x64x64xf32> to vector<64x64xf32>
    %c0_17 = arith.constant 0 : index
    %c0_18 = arith.constant 0 : index
    %c0_19 = arith.constant 0 : index
    %14 = vector.load %arg11[%c0_17, %c0_18, %c0_19] : memref<1x1x64xf32, #tpu.memory_space<vmem>>, vector<1x1x64xf32>
    %15 = vector.shape_cast %14 : vector<1x1x64xf32> to vector<1x64xf32>
    %c0_20 = arith.constant 0 : index
    %c0_21 = arith.constant 0 : index
    %c0_22 = arith.constant 0 : index
    %16 = vector.load %arg12[%c0_20, %c0_21, %c0_22] : memref<1x1x64xf32, #tpu.memory_space<vmem>>, vector<1x1x64xf32>
    %17 = vector.shape_cast %16 : vector<1x1x64xf32> to vector<1x64xf32>
    %c0_23 = arith.constant 0 : index
    %c0_24 = arith.constant 0 : index
    %c0_25 = arith.constant 0 : index
    %18 = vector.load %arg13[%c0_23, %c0_24, %c0_25] : memref<1x1x64xf32, #tpu.memory_space<vmem>>, vector<1x1x64xf32>
    %19 = vector.shape_cast %18 : vector<1x1x64xf32> to vector<1x64xf32>
    %c0_26 = arith.constant 0 : index
    %c0_27 = arith.constant 0 : index
    %c0_28 = arith.constant 0 : index
    %20 = vector.load %arg14[%c0_26, %c0_27, %c0_28] : memref<1x64x256xf32, #tpu.memory_space<vmem>>, vector<1x64x256xf32>
    %21 = vector.shape_cast %20 : vector<1x64x256xf32> to vector<64x256xf32>
    %c0_29 = arith.constant 0 : index
    %c0_30 = arith.constant 0 : index
    %c0_31 = arith.constant 0 : index
    %22 = vector.load %arg15[%c0_29, %c0_30, %c0_31] : memref<1x1x256xf32, #tpu.memory_space<vmem>>, vector<1x1x256xf32>
    %23 = vector.shape_cast %22 : vector<1x1x256xf32> to vector<1x256xf32>
    %c0_32 = arith.constant 0 : index
    %c0_33 = arith.constant 0 : index
    %c0_34 = arith.constant 0 : index
    %24 = vector.load %arg16[%c0_32, %c0_33, %c0_34] : memref<1x256x64xf32, #tpu.memory_space<vmem>>, vector<1x256x64xf32>
    %25 = vector.shape_cast %24 : vector<1x256x64xf32> to vector<256x64xf32>
    %c0_35 = arith.constant 0 : index
    %c0_36 = arith.constant 0 : index
    %c0_37 = arith.constant 0 : index
    %26 = vector.load %arg17[%c0_35, %c0_36, %c0_37] : memref<1x1x64xf32, #tpu.memory_space<vmem>>, vector<1x1x64xf32>
    %27 = vector.shape_cast %26 : vector<1x1x64xf32> to vector<1x64xf32>
    %cst = arith.constant dense<0.000000e+00> : vector<18xf32>
    %28 = vector.multi_reduction <add>, %3, %cst [1] : vector<18x64xf32> to vector<18xf32>
    %29 = vector.shape_cast %28 : vector<18xf32> to vector<18x1xf32>
    %cst_38 = arith.constant 6.400000e+01 : f32
    %30 = vector.broadcast %cst_38 : f32 to vector<18x1xf32>
    %31 = arith.divf %29, %30 : vector<18x1xf32>
    %32 = vector.broadcast %31 : vector<18x1xf32> to vector<18x64xf32>
    %33 = arith.subf %3, %32 : vector<18x64xf32>
    %34 = arith.mulf %33, %33 : vector<18x64xf32>
    %cst_39 = arith.constant dense<0.000000e+00> : vector<18xf32>
    %35 = vector.multi_reduction <add>, %34, %cst_39 [1] : vector<18x64xf32> to vector<18xf32>
    %36 = vector.shape_cast %35 : vector<18xf32> to vector<18x1xf32>
    %cst_40 = arith.constant 6.400000e+01 : f32
    %37 = vector.broadcast %cst_40 : f32 to vector<18x1xf32>
    %38 = arith.divf %36, %37 : vector<18x1xf32>
    %39 = vector.broadcast %31 : vector<18x1xf32> to vector<18x64xf32>
    %40 = arith.subf %3, %39 : vector<18x64xf32>
    %cst_41 = arith.constant 9.99999997E-7 : f32
    %41 = vector.broadcast %cst_41 : f32 to vector<18x1xf32>
    %42 = arith.addf %38, %41 : vector<18x1xf32>
    %43 = math.rsqrt %42 : vector<18x1xf32>
    %44 = vector.broadcast %43 : vector<18x1xf32> to vector<18x64xf32>
    %45 = arith.mulf %40, %44 : vector<18x64xf32>
    %46 = vector.broadcast %5 : vector<1x64xf32> to vector<18x64xf32>
    %47 = arith.mulf %45, %46 : vector<18x64xf32>
    %48 = vector.broadcast %7 : vector<1x64xf32> to vector<18x64xf32>
    %49 = arith.addf %47, %48 : vector<18x64xf32>
    %cst_42 = arith.constant dense<0.000000e+00> : vector<18x192xf32>
    %50 = tpu.matmul %49, %9, %cst_42 {dimension_numbers = #tpu.dot_dimension_numbers<[1], [0], [0], [1], [0, 0, 1, 1], [], []>} : vector<18x64xf32>, vector<64x192xf32>, vector<18x192xf32> -> vector<18x192xf32>
    %51 = vector.broadcast %11 : vector<1x192xf32> to vector<18x192xf32>
    %52 = arith.addf %50, %51 : vector<18x192xf32>
    %53 = vector.extract_strided_slice %52 {offsets = [0, 0], sizes = [9, 192], strides = [1, 1]} : vector<18x192xf32> to vector<9x192xf32>
    %54 = vector.extract_strided_slice %53 {offsets = [0, 0], sizes = [9, 16], strides = [1, 1]} : vector<9x192xf32> to vector<9x16xf32>
    %55 = vector.extract_strided_slice %53 {offsets = [0, 64], sizes = [9, 16], strides = [1, 1]} : vector<9x192xf32> to vector<9x16xf32>
    %56 = vector.extract_strided_slice %53 {offsets = [0, 128], sizes = [9, 16], strides = [1, 1]} : vector<9x192xf32> to vector<9x16xf32>
    %cst_43 = arith.constant dense<0.000000e+00> : vector<9x9xf32>
    %57 = tpu.matmul %54, %55, %cst_43 {dimension_numbers = #tpu.dot_dimension_numbers<[1], [1], [0], [0], [0, 0, 1, 0], [], []>} : vector<9x16xf32>, vector<9x16xf32>, vector<9x9xf32> -> vector<9x9xf32>
    %cst_44 = arith.constant 2.500000e-01 : f32
    %58 = vector.broadcast %cst_44 : f32 to vector<9x9xf32>
    %59 = arith.mulf %57, %58 : vector<9x9xf32>
    %cst_45 = arith.constant dense<0xFF800000> : vector<9xf32>
    %60 = vector.multi_reduction <maximumf>, %59, %cst_45 [1] : vector<9x9xf32> to vector<9xf32>
    %61 = vector.shape_cast %60 : vector<9xf32> to vector<9x1xf32>
    %62 = vector.broadcast %61 : vector<9x1xf32> to vector<9x9xf32>
    %63 = arith.subf %59, %62 : vector<9x9xf32>
    %64 = math.exp %63 : vector<9x9xf32>
    %cst_46 = arith.constant dense<0.000000e+00> : vector<9xf32>
    %65 = vector.multi_reduction <add>, %64, %cst_46 [1] : vector<9x9xf32> to vector<9xf32>
    %66 = vector.shape_cast %65 : vector<9xf32> to vector<9x1xf32>
    %67 = tpu.reciprocal %66 {approx = true} : vector<9x1xf32> -> vector<9x1xf32>
    %68 = vector.broadcast %67 : vector<9x1xf32> to vector<9x9xf32>
    %69 = arith.mulf %64, %68 : vector<9x9xf32>
    %cst_47 = arith.constant dense<0.000000e+00> : vector<9x16xf32>
    %70 = tpu.matmul %69, %56, %cst_47 {dimension_numbers = #tpu.dot_dimension_numbers<[1], [0], [0], [1], [0, 0, 1, 1], [], []>} : vector<9x9xf32>, vector<9x16xf32>, vector<9x16xf32> -> vector<9x16xf32>
    %71 = vector.extract_strided_slice %53 {offsets = [0, 16], sizes = [9, 16], strides = [1, 1]} : vector<9x192xf32> to vector<9x16xf32>
    %72 = vector.extract_strided_slice %53 {offsets = [0, 80], sizes = [9, 16], strides = [1, 1]} : vector<9x192xf32> to vector<9x16xf32>
    %73 = vector.extract_strided_slice %53 {offsets = [0, 144], sizes = [9, 16], strides = [1, 1]} : vector<9x192xf32> to vector<9x16xf32>
    %cst_48 = arith.constant dense<0.000000e+00> : vector<9x9xf32>
    %74 = tpu.matmul %71, %72, %cst_48 {dimension_numbers = #tpu.dot_dimension_numbers<[1], [1], [0], [0], [0, 0, 1, 0], [], []>} : vector<9x16xf32>, vector<9x16xf32>, vector<9x9xf32> -> vector<9x9xf32>
    %cst_49 = arith.constant 2.500000e-01 : f32
    %75 = vector.broadcast %cst_49 : f32 to vector<9x9xf32>
    %76 = arith.mulf %74, %75 : vector<9x9xf32>
    %cst_50 = arith.constant dense<0xFF800000> : vector<9xf32>
    %77 = vector.multi_reduction <maximumf>, %76, %cst_50 [1] : vector<9x9xf32> to vector<9xf32>
    %78 = vector.shape_cast %77 : vector<9xf32> to vector<9x1xf32>
    %79 = vector.broadcast %78 : vector<9x1xf32> to vector<9x9xf32>
    %80 = arith.subf %76, %79 : vector<9x9xf32>
    %81 = math.exp %80 : vector<9x9xf32>
    %cst_51 = arith.constant dense<0.000000e+00> : vector<9xf32>
    %82 = vector.multi_reduction <add>, %81, %cst_51 [1] : vector<9x9xf32> to vector<9xf32>
    %83 = vector.shape_cast %82 : vector<9xf32> to vector<9x1xf32>
    %84 = tpu.reciprocal %83 {approx = true} : vector<9x1xf32> -> vector<9x1xf32>
    %85 = vector.broadcast %84 : vector<9x1xf32> to vector<9x9xf32>
    %86 = arith.mulf %81, %85 : vector<9x9xf32>
    %cst_52 = arith.constant dense<0.000000e+00> : vector<9x16xf32>
    %87 = tpu.matmul %86, %73, %cst_52 {dimension_numbers = #tpu.dot_dimension_numbers<[1], [0], [0], [1], [0, 0, 1, 1], [], []>} : vector<9x9xf32>, vector<9x16xf32>, vector<9x16xf32> -> vector<9x16xf32>
    %88 = vector.extract_strided_slice %53 {offsets = [0, 32], sizes = [9, 16], strides = [1, 1]} : vector<9x192xf32> to vector<9x16xf32>
    %89 = vector.extract_strided_slice %53 {offsets = [0, 96], sizes = [9, 16], strides = [1, 1]} : vector<9x192xf32> to vector<9x16xf32>
    %90 = vector.extract_strided_slice %53 {offsets = [0, 160], sizes = [9, 16], strides = [1, 1]} : vector<9x192xf32> to vector<9x16xf32>
    %cst_53 = arith.constant dense<0.000000e+00> : vector<9x9xf32>
    %91 = tpu.matmul %88, %89, %cst_53 {dimension_numbers = #tpu.dot_dimension_numbers<[1], [1], [0], [0], [0, 0, 1, 0], [], []>} : vector<9x16xf32>, vector<9x16xf32>, vector<9x9xf32> -> vector<9x9xf32>
    %cst_54 = arith.constant 2.500000e-01 : f32
    %92 = vector.broadcast %cst_54 : f32 to vector<9x9xf32>
    %93 = arith.mulf %91, %92 : vector<9x9xf32>
    %cst_55 = arith.constant dense<0xFF800000> : vector<9xf32>
    %94 = vector.multi_reduction <maximumf>, %93, %cst_55 [1] : vector<9x9xf32> to vector<9xf32>
    %95 = vector.shape_cast %94 : vector<9xf32> to vector<9x1xf32>
    %96 = vector.broadcast %95 : vector<9x1xf32> to vector<9x9xf32>
    %97 = arith.subf %93, %96 : vector<9x9xf32>
    %98 = math.exp %97 : vector<9x9xf32>
    %cst_56 = arith.constant dense<0.000000e+00> : vector<9xf32>
    %99 = vector.multi_reduction <add>, %98, %cst_56 [1] : vector<9x9xf32> to vector<9xf32>
    %100 = vector.shape_cast %99 : vector<9xf32> to vector<9x1xf32>
    %101 = tpu.reciprocal %100 {approx = true} : vector<9x1xf32> -> vector<9x1xf32>
    %102 = vector.broadcast %101 : vector<9x1xf32> to vector<9x9xf32>
    %103 = arith.mulf %98, %102 : vector<9x9xf32>
    %cst_57 = arith.constant dense<0.000000e+00> : vector<9x16xf32>
    %104 = tpu.matmul %103, %90, %cst_57 {dimension_numbers = #tpu.dot_dimension_numbers<[1], [0], [0], [1], [0, 0, 1, 1], [], []>} : vector<9x9xf32>, vector<9x16xf32>, vector<9x16xf32> -> vector<9x16xf32>
    %105 = vector.extract_strided_slice %53 {offsets = [0, 48], sizes = [9, 16], strides = [1, 1]} : vector<9x192xf32> to vector<9x16xf32>
    %106 = vector.extract_strided_slice %53 {offsets = [0, 112], sizes = [9, 16], strides = [1, 1]} : vector<9x192xf32> to vector<9x16xf32>
    %107 = vector.extract_strided_slice %53 {offsets = [0, 176], sizes = [9, 16], strides = [1, 1]} : vector<9x192xf32> to vector<9x16xf32>
    %cst_58 = arith.constant dense<0.000000e+00> : vector<9x9xf32>
    %108 = tpu.matmul %105, %106, %cst_58 {dimension_numbers = #tpu.dot_dimension_numbers<[1], [1], [0], [0], [0, 0, 1, 0], [], []>} : vector<9x16xf32>, vector<9x16xf32>, vector<9x9xf32> -> vector<9x9xf32>
    %cst_59 = arith.constant 2.500000e-01 : f32
    %109 = vector.broadcast %cst_59 : f32 to vector<9x9xf32>
    %110 = arith.mulf %108, %109 : vector<9x9xf32>
    %cst_60 = arith.constant dense<0xFF800000> : vector<9xf32>
    %111 = vector.multi_reduction <maximumf>, %110, %cst_60 [1] : vector<9x9xf32> to vector<9xf32>
    %112 = vector.shape_cast %111 : vector<9xf32> to vector<9x1xf32>
    %113 = vector.broadcast %112 : vector<9x1xf32> to vector<9x9xf32>
    %114 = arith.subf %110, %113 : vector<9x9xf32>
    %115 = math.exp %114 : vector<9x9xf32>
    %cst_61 = arith.constant dense<0.000000e+00> : vector<9xf32>
    %116 = vector.multi_reduction <add>, %115, %cst_61 [1] : vector<9x9xf32> to vector<9xf32>
    %117 = vector.shape_cast %116 : vector<9xf32> to vector<9x1xf32>
    %118 = tpu.reciprocal %117 {approx = true} : vector<9x1xf32> -> vector<9x1xf32>
    %119 = vector.broadcast %118 : vector<9x1xf32> to vector<9x9xf32>
    %120 = arith.mulf %115, %119 : vector<9x9xf32>
    %cst_62 = arith.constant dense<0.000000e+00> : vector<9x16xf32>
    %121 = tpu.matmul %120, %107, %cst_62 {dimension_numbers = #tpu.dot_dimension_numbers<[1], [0], [0], [1], [0, 0, 1, 1], [], []>} : vector<9x9xf32>, vector<9x16xf32>, vector<9x16xf32> -> vector<9x16xf32>
    %122 = tpu.concatenate %70, %87, %104, %121 in 1 : vector<9x16xf32>, vector<9x16xf32>, vector<9x16xf32>, vector<9x16xf32> -> vector<9x64xf32>
    %123 = vector.extract_strided_slice %52 {offsets = [9, 0], sizes = [9, 192], strides = [1, 1]} : vector<18x192xf32> to vector<9x192xf32>
    %124 = vector.extract_strided_slice %123 {offsets = [0, 0], sizes = [9, 16], strides = [1, 1]} : vector<9x192xf32> to vector<9x16xf32>
    %125 = vector.extract_strided_slice %123 {offsets = [0, 64], sizes = [9, 16], strides = [1, 1]} : vector<9x192xf32> to vector<9x16xf32>
    %126 = vector.extract_strided_slice %123 {offsets = [0, 128], sizes = [9, 16], strides = [1, 1]} : vector<9x192xf32> to vector<9x16xf32>
    %cst_63 = arith.constant dense<0.000000e+00> : vector<9x9xf32>
    %127 = tpu.matmul %124, %125, %cst_63 {dimension_numbers = #tpu.dot_dimension_numbers<[1], [1], [0], [0], [0, 0, 1, 0], [], []>} : vector<9x16xf32>, vector<9x16xf32>, vector<9x9xf32> -> vector<9x9xf32>
    %cst_64 = arith.constant 2.500000e-01 : f32
    %128 = vector.broadcast %cst_64 : f32 to vector<9x9xf32>
    %129 = arith.mulf %127, %128 : vector<9x9xf32>
    %cst_65 = arith.constant dense<0xFF800000> : vector<9xf32>
    %130 = vector.multi_reduction <maximumf>, %129, %cst_65 [1] : vector<9x9xf32> to vector<9xf32>
    %131 = vector.shape_cast %130 : vector<9xf32> to vector<9x1xf32>
    %132 = vector.broadcast %131 : vector<9x1xf32> to vector<9x9xf32>
    %133 = arith.subf %129, %132 : vector<9x9xf32>
    %134 = math.exp %133 : vector<9x9xf32>
    %cst_66 = arith.constant dense<0.000000e+00> : vector<9xf32>
    %135 = vector.multi_reduction <add>, %134, %cst_66 [1] : vector<9x9xf32> to vector<9xf32>
    %136 = vector.shape_cast %135 : vector<9xf32> to vector<9x1xf32>
    %137 = tpu.reciprocal %136 {approx = true} : vector<9x1xf32> -> vector<9x1xf32>
    %138 = vector.broadcast %137 : vector<9x1xf32> to vector<9x9xf32>
    %139 = arith.mulf %134, %138 : vector<9x9xf32>
    %cst_67 = arith.constant dense<0.000000e+00> : vector<9x16xf32>
    %140 = tpu.matmul %139, %126, %cst_67 {dimension_numbers = #tpu.dot_dimension_numbers<[1], [0], [0], [1], [0, 0, 1, 1], [], []>} : vector<9x9xf32>, vector<9x16xf32>, vector<9x16xf32> -> vector<9x16xf32>
    %141 = vector.extract_strided_slice %123 {offsets = [0, 16], sizes = [9, 16], strides = [1, 1]} : vector<9x192xf32> to vector<9x16xf32>
    %142 = vector.extract_strided_slice %123 {offsets = [0, 80], sizes = [9, 16], strides = [1, 1]} : vector<9x192xf32> to vector<9x16xf32>
    %143 = vector.extract_strided_slice %123 {offsets = [0, 144], sizes = [9, 16], strides = [1, 1]} : vector<9x192xf32> to vector<9x16xf32>
    %cst_68 = arith.constant dense<0.000000e+00> : vector<9x9xf32>
    %144 = tpu.matmul %141, %142, %cst_68 {dimension_numbers = #tpu.dot_dimension_numbers<[1], [1], [0], [0], [0, 0, 1, 0], [], []>} : vector<9x16xf32>, vector<9x16xf32>, vector<9x9xf32> -> vector<9x9xf32>
    %cst_69 = arith.constant 2.500000e-01 : f32
    %145 = vector.broadcast %cst_69 : f32 to vector<9x9xf32>
    %146 = arith.mulf %144, %145 : vector<9x9xf32>
    %cst_70 = arith.constant dense<0xFF800000> : vector<9xf32>
    %147 = vector.multi_reduction <maximumf>, %146, %cst_70 [1] : vector<9x9xf32> to vector<9xf32>
    %148 = vector.shape_cast %147 : vector<9xf32> to vector<9x1xf32>
    %149 = vector.broadcast %148 : vector<9x1xf32> to vector<9x9xf32>
    %150 = arith.subf %146, %149 : vector<9x9xf32>
    %151 = math.exp %150 : vector<9x9xf32>
    %cst_71 = arith.constant dense<0.000000e+00> : vector<9xf32>
    %152 = vector.multi_reduction <add>, %151, %cst_71 [1] : vector<9x9xf32> to vector<9xf32>
    %153 = vector.shape_cast %152 : vector<9xf32> to vector<9x1xf32>
    %154 = tpu.reciprocal %153 {approx = true} : vector<9x1xf32> -> vector<9x1xf32>
    %155 = vector.broadcast %154 : vector<9x1xf32> to vector<9x9xf32>
    %156 = arith.mulf %151, %155 : vector<9x9xf32>
    %cst_72 = arith.constant dense<0.000000e+00> : vector<9x16xf32>
    %157 = tpu.matmul %156, %143, %cst_72 {dimension_numbers = #tpu.dot_dimension_numbers<[1], [0], [0], [1], [0, 0, 1, 1], [], []>} : vector<9x9xf32>, vector<9x16xf32>, vector<9x16xf32> -> vector<9x16xf32>
    %158 = vector.extract_strided_slice %123 {offsets = [0, 32], sizes = [9, 16], strides = [1, 1]} : vector<9x192xf32> to vector<9x16xf32>
    %159 = vector.extract_strided_slice %123 {offsets = [0, 96], sizes = [9, 16], strides = [1, 1]} : vector<9x192xf32> to vector<9x16xf32>
    %160 = vector.extract_strided_slice %123 {offsets = [0, 160], sizes = [9, 16], strides = [1, 1]} : vector<9x192xf32> to vector<9x16xf32>
    %cst_73 = arith.constant dense<0.000000e+00> : vector<9x9xf32>
    %161 = tpu.matmul %158, %159, %cst_73 {dimension_numbers = #tpu.dot_dimension_numbers<[1], [1], [0], [0], [0, 0, 1, 0], [], []>} : vector<9x16xf32>, vector<9x16xf32>, vector<9x9xf32> -> vector<9x9xf32>
    %cst_74 = arith.constant 2.500000e-01 : f32
    %162 = vector.broadcast %cst_74 : f32 to vector<9x9xf32>
    %163 = arith.mulf %161, %162 : vector<9x9xf32>
    %cst_75 = arith.constant dense<0xFF800000> : vector<9xf32>
    %164 = vector.multi_reduction <maximumf>, %163, %cst_75 [1] : vector<9x9xf32> to vector<9xf32>
    %165 = vector.shape_cast %164 : vector<9xf32> to vector<9x1xf32>
    %166 = vector.broadcast %165 : vector<9x1xf32> to vector<9x9xf32>
    %167 = arith.subf %163, %166 : vector<9x9xf32>
    %168 = math.exp %167 : vector<9x9xf32>
    %cst_76 = arith.constant dense<0.000000e+00> : vector<9xf32>
    %169 = vector.multi_reduction <add>, %168, %cst_76 [1] : vector<9x9xf32> to vector<9xf32>
    %170 = vector.shape_cast %169 : vector<9xf32> to vector<9x1xf32>
    %171 = tpu.reciprocal %170 {approx = true} : vector<9x1xf32> -> vector<9x1xf32>
    %172 = vector.broadcast %171 : vector<9x1xf32> to vector<9x9xf32>
    %173 = arith.mulf %168, %172 : vector<9x9xf32>
    %cst_77 = arith.constant dense<0.000000e+00> : vector<9x16xf32>
    %174 = tpu.matmul %173, %160, %cst_77 {dimension_numbers = #tpu.dot_dimension_numbers<[1], [0], [0], [1], [0, 0, 1, 1], [], []>} : vector<9x9xf32>, vector<9x16xf32>, vector<9x16xf32> -> vector<9x16xf32>
    %175 = vector.extract_strided_slice %123 {offsets = [0, 48], sizes = [9, 16], strides = [1, 1]} : vector<9x192xf32> to vector<9x16xf32>
    %176 = vector.extract_strided_slice %123 {offsets = [0, 112], sizes = [9, 16], strides = [1, 1]} : vector<9x192xf32> to vector<9x16xf32>
    %177 = vector.extract_strided_slice %123 {offsets = [0, 176], sizes = [9, 16], strides = [1, 1]} : vector<9x192xf32> to vector<9x16xf32>
    %cst_78 = arith.constant dense<0.000000e+00> : vector<9x9xf32>
    %178 = tpu.matmul %175, %176, %cst_78 {dimension_numbers = #tpu.dot_dimension_numbers<[1], [1], [0], [0], [0, 0, 1, 0], [], []>} : vector<9x16xf32>, vector<9x16xf32>, vector<9x9xf32> -> vector<9x9xf32>
    %cst_79 = arith.constant 2.500000e-01 : f32
    %179 = vector.broadcast %cst_79 : f32 to vector<9x9xf32>
    %180 = arith.mulf %178, %179 : vector<9x9xf32>
    %cst_80 = arith.constant dense<0xFF800000> : vector<9xf32>
    %181 = vector.multi_reduction <maximumf>, %180, %cst_80 [1] : vector<9x9xf32> to vector<9xf32>
    %182 = vector.shape_cast %181 : vector<9xf32> to vector<9x1xf32>
    %183 = vector.broadcast %182 : vector<9x1xf32> to vector<9x9xf32>
    %184 = arith.subf %180, %183 : vector<9x9xf32>
    %185 = math.exp %184 : vector<9x9xf32>
    %cst_81 = arith.constant dense<0.000000e+00> : vector<9xf32>
    %186 = vector.multi_reduction <add>, %185, %cst_81 [1] : vector<9x9xf32> to vector<9xf32>
    %187 = vector.shape_cast %186 : vector<9xf32> to vector<9x1xf32>
    %188 = tpu.reciprocal %187 {approx = true} : vector<9x1xf32> -> vector<9x1xf32>
    %189 = vector.broadcast %188 : vector<9x1xf32> to vector<9x9xf32>
    %190 = arith.mulf %185, %189 : vector<9x9xf32>
    %cst_82 = arith.constant dense<0.000000e+00> : vector<9x16xf32>
    %191 = tpu.matmul %190, %177, %cst_82 {dimension_numbers = #tpu.dot_dimension_numbers<[1], [0], [0], [1], [0, 0, 1, 1], [], []>} : vector<9x9xf32>, vector<9x16xf32>, vector<9x16xf32> -> vector<9x16xf32>
    %192 = tpu.concatenate %140, %157, %174, %191 in 1 : vector<9x16xf32>, vector<9x16xf32>, vector<9x16xf32>, vector<9x16xf32> -> vector<9x64xf32>
    %193 = tpu.concatenate %122, %192 in 0 : vector<9x64xf32>, vector<9x64xf32> -> vector<18x64xf32>
    %cst_83 = arith.constant dense<0.000000e+00> : vector<18x64xf32>
    %194 = tpu.matmul %193, %13, %cst_83 {dimension_numbers = #tpu.dot_dimension_numbers<[1], [0], [0], [1], [0, 0, 1, 1], [], []>} : vector<18x64xf32>, vector<64x64xf32>, vector<18x64xf32> -> vector<18x64xf32>
    %195 = arith.addf %3, %194 : vector<18x64xf32>
    %196 = vector.broadcast %15 : vector<1x64xf32> to vector<18x64xf32>
    %197 = arith.addf %195, %196 : vector<18x64xf32>
    %cst_84 = arith.constant dense<0.000000e+00> : vector<18xf32>
    %198 = vector.multi_reduction <add>, %197, %cst_84 [1] : vector<18x64xf32> to vector<18xf32>
    %199 = vector.shape_cast %198 : vector<18xf32> to vector<18x1xf32>
    %cst_85 = arith.constant 6.400000e+01 : f32
    %200 = vector.broadcast %cst_85 : f32 to vector<18x1xf32>
    %201 = arith.divf %199, %200 : vector<18x1xf32>
    %202 = vector.broadcast %201 : vector<18x1xf32> to vector<18x64xf32>
    %203 = arith.subf %197, %202 : vector<18x64xf32>
    %204 = arith.mulf %203, %203 : vector<18x64xf32>
    %cst_86 = arith.constant dense<0.000000e+00> : vector<18xf32>
    %205 = vector.multi_reduction <add>, %204, %cst_86 [1] : vector<18x64xf32> to vector<18xf32>
    %206 = vector.shape_cast %205 : vector<18xf32> to vector<18x1xf32>
    %cst_87 = arith.constant 6.400000e+01 : f32
    %207 = vector.broadcast %cst_87 : f32 to vector<18x1xf32>
    %208 = arith.divf %206, %207 : vector<18x1xf32>
    %209 = vector.broadcast %201 : vector<18x1xf32> to vector<18x64xf32>
    %210 = arith.subf %197, %209 : vector<18x64xf32>
    %cst_88 = arith.constant 9.99999997E-7 : f32
    %211 = vector.broadcast %cst_88 : f32 to vector<18x1xf32>
    %212 = arith.addf %208, %211 : vector<18x1xf32>
    %213 = math.rsqrt %212 : vector<18x1xf32>
    %214 = vector.broadcast %213 : vector<18x1xf32> to vector<18x64xf32>
    %215 = arith.mulf %210, %214 : vector<18x64xf32>
    %216 = vector.broadcast %17 : vector<1x64xf32> to vector<18x64xf32>
    %217 = arith.mulf %215, %216 : vector<18x64xf32>
    %218 = vector.broadcast %19 : vector<1x64xf32> to vector<18x64xf32>
    %219 = arith.addf %217, %218 : vector<18x64xf32>
    %cst_89 = arith.constant dense<0.000000e+00> : vector<18x256xf32>
    %220 = tpu.matmul %219, %21, %cst_89 {dimension_numbers = #tpu.dot_dimension_numbers<[1], [0], [0], [1], [0, 0, 1, 1], [], []>} : vector<18x64xf32>, vector<64x256xf32>, vector<18x256xf32> -> vector<18x256xf32>
    %221 = vector.broadcast %23 : vector<1x256xf32> to vector<18x256xf32>
    %222 = arith.addf %220, %221 : vector<18x256xf32>
    %cst_90 = arith.constant 5.000000e-01 : f32
    %223 = vector.broadcast %cst_90 : f32 to vector<18x256xf32>
    %224 = arith.mulf %223, %222 : vector<18x256xf32>
    %cst_91 = arith.constant 0.707106769 : f32
    %225 = vector.broadcast %cst_91 : f32 to vector<18x256xf32>
    %226 = arith.mulf %222, %225 : vector<18x256xf32>
    %227 = math.absf %226 : vector<18x256xf32>
    %cst_92 = arith.constant 0.327591091 : f32
    %228 = vector.broadcast %cst_92 : f32 to vector<18x256xf32>
    %229 = arith.mulf %228, %227 : vector<18x256xf32>
    %cst_93 = arith.constant 1.000000e+00 : f32
    %230 = vector.broadcast %cst_93 : f32 to vector<18x256xf32>
    %231 = arith.addf %230, %229 : vector<18x256xf32>
    %cst_94 = arith.constant 1.000000e+00 : f32
    %232 = vector.broadcast %cst_94 : f32 to vector<18x256xf32>
    %233 = arith.divf %232, %231 : vector<18x256xf32>
    %cst_95 = arith.constant 1.06140542 : f32
    %234 = vector.broadcast %cst_95 : f32 to vector<18x256xf32>
    %235 = arith.mulf %234, %233 : vector<18x256xf32>
    %cst_96 = arith.constant -1.45315206 : f32
    %236 = vector.broadcast %cst_96 : f32 to vector<18x256xf32>
    %237 = arith.addf %235, %236 : vector<18x256xf32>
    %238 = arith.mulf %237, %233 : vector<18x256xf32>
    %cst_97 = arith.constant 1.42141378 : f32
    %239 = vector.broadcast %cst_97 : f32 to vector<18x256xf32>
    %240 = arith.addf %238, %239 : vector<18x256xf32>
    %241 = arith.mulf %240, %233 : vector<18x256xf32>
    %cst_98 = arith.constant -0.284496725 : f32
    %242 = vector.broadcast %cst_98 : f32 to vector<18x256xf32>
    %243 = arith.addf %241, %242 : vector<18x256xf32>
    %244 = arith.mulf %243, %233 : vector<18x256xf32>
    %cst_99 = arith.constant 0.254829586 : f32
    %245 = vector.broadcast %cst_99 : f32 to vector<18x256xf32>
    %246 = arith.addf %244, %245 : vector<18x256xf32>
    %247 = arith.mulf %246, %233 : vector<18x256xf32>
    %cst_100 = arith.constant 0.000000e+00 : f32
    %248 = vector.broadcast %cst_100 : f32 to vector<18x256xf32>
    %249 = arith.subf %248, %227 : vector<18x256xf32>
    %250 = arith.mulf %249, %227 : vector<18x256xf32>
    %251 = math.exp %250 : vector<18x256xf32>
    %252 = arith.mulf %247, %251 : vector<18x256xf32>
    %cst_101 = arith.constant 1.000000e+00 : f32
    %253 = vector.broadcast %cst_101 : f32 to vector<18x256xf32>
    %254 = arith.subf %253, %252 : vector<18x256xf32>
    %cst_102 = arith.constant 0.000000e+00 : f32
    %255 = vector.broadcast %cst_102 : f32 to vector<18x256xf32>
    %256 = arith.cmpf oge, %226, %255 : vector<18x256xf32>
    %cst_103 = arith.constant 0.000000e+00 : f32
    %257 = vector.broadcast %cst_103 : f32 to vector<18x256xf32>
    %258 = arith.subf %257, %254 : vector<18x256xf32>
    %259 = arith.select %256, %254, %258 : vector<18x256xi1>, vector<18x256xf32>
    %cst_104 = arith.constant 1.000000e+00 : f32
    %260 = vector.broadcast %cst_104 : f32 to vector<18x256xf32>
    %261 = arith.addf %260, %259 : vector<18x256xf32>
    %262 = arith.mulf %224, %261 : vector<18x256xf32>
    %cst_105 = arith.constant dense<0.000000e+00> : vector<18x64xf32>
    %263 = tpu.matmul %262, %25, %cst_105 {dimension_numbers = #tpu.dot_dimension_numbers<[1], [0], [0], [1], [0, 0, 1, 1], [], []>} : vector<18x256xf32>, vector<256x64xf32>, vector<18x64xf32> -> vector<18x64xf32>
    %264 = arith.addf %197, %263 : vector<18x64xf32>
    %265 = vector.broadcast %27 : vector<1x64xf32> to vector<18x64xf32>
    %266 = arith.addf %264, %265 : vector<18x64xf32>
    %c0_106 = arith.constant 0 : index
    %c0_107 = arith.constant 0 : index
    %267 = vector.load %arg18[%c0_106, %c0_107] : memref<18x64xf32, #tpu.memory_space<vmem>>, vector<18x64xf32>
    tpu.vector_store %arg18[%c0_106, %c0_107], %266 {strides = array<i32>} : memref<18x64xf32, #tpu.memory_space<vmem>>, vector<18x64xf32>,
    return
  }
  func.func @transform_0(%arg0: i32) -> (i32, i32) {
    %c0_i32 = arith.constant 0 : i32
    %c0_i32_0 = arith.constant 0 : i32
    %c0_i32_1 = arith.constant 0 : i32
    return %c0_i32, %c0_i32_0 : i32, i32
  }
  func.func @transform_1(%arg0: i32) -> (i32, i32) {
    %c0_i32 = arith.constant 0 : i32
    %c0_i32_0 = arith.constant 0 : i32
    %c0_i32_1 = arith.constant 0 : i32
    return %c0_i32, %c0_i32_0 : i32, i32
  }
  func.func @transform_2(%arg0: i32) -> (i32, i32) {
    %c0_i32 = arith.constant 0 : i32
    %c0_i32_0 = arith.constant 0 : i32
    %c0_i32_1 = arith.constant 0 : i32
    return %c0_i32, %c0_i32_0 : i32, i32
  }
  func.func @transform_3(%arg0: i32) -> (i32, i32) {
    %c0_i32 = arith.constant 0 : i32
    %c0_i32_0 = arith.constant 0 : i32
    %c0_i32_1 = arith.constant 0 : i32
    return %c0_i32, %c0_i32_0 : i32, i32
  }
  func.func @transform_4(%arg0: i32) -> (i32, i32) {
    %c0_i32 = arith.constant 0 : i32
    %c0_i32_0 = arith.constant 0 : i32
    %c0_i32_1 = arith.constant 0 : i32
    return %c0_i32, %c0_i32_0 : i32, i32
  }
  func.func @transform_5(%arg0: i32) -> (i32, i32, i32) {
    %c0_i32 = arith.constant 0 : i32
    %c0_i32_0 = arith.constant 0 : i32
    %c0_i32_1 = arith.constant 0 : i32
    return %arg0, %c0_i32, %c0_i32_0 : i32, i32, i32
  }
  func.func @transform_6(%arg0: i32) -> (i32, i32, i32) {
    %c0_i32 = arith.constant 0 : i32
    %c0_i32_0 = arith.constant 0 : i32
    %c0_i32_1 = arith.constant 0 : i32
    return %arg0, %c0_i32, %c0_i32_0 : i32, i32, i32
  }
  func.func @transform_7(%arg0: i32) -> (i32, i32, i32) {
    %c0_i32 = arith.constant 0 : i32
    %c0_i32_0 = arith.constant 0 : i32
    %c0_i32_1 = arith.constant 0 : i32
    return %arg0, %c0_i32, %c0_i32_0 : i32, i32, i32
  }
  func.func @transform_8(%arg0: i32) -> (i32, i32, i32) {
    %c0_i32 = arith.constant 0 : i32
    %c0_i32_0 = arith.constant 0 : i32
    %c0_i32_1 = arith.constant 0 : i32
    return %arg0, %c0_i32, %c0_i32_0 : i32, i32, i32
  }
  func.func @transform_9(%arg0: i32) -> (i32, i32, i32) {
    %c0_i32 = arith.constant 0 : i32
    %c0_i32_0 = arith.constant 0 : i32
    %c0_i32_1 = arith.constant 0 : i32
    return %arg0, %c0_i32, %c0_i32_0 : i32, i32, i32
  }
  func.func @transform_10(%arg0: i32) -> (i32, i32, i32) {
    %c0_i32 = arith.constant 0 : i32
    %c0_i32_0 = arith.constant 0 : i32
    %c0_i32_1 = arith.constant 0 : i32
    return %arg0, %c0_i32, %c0_i32_0 : i32, i32, i32
  }
  func.func @transform_11(%arg0: i32) -> (i32, i32, i32) {
    %c0_i32 = arith.constant 0 : i32
    %c0_i32_0 = arith.constant 0 : i32
    %c0_i32_1 = arith.constant 0 : i32
    return %arg0, %c0_i32, %c0_i32_0 : i32, i32, i32
  }
  func.func @transform_12(%arg0: i32) -> (i32, i32, i32) {
    %c0_i32 = arith.constant 0 : i32
    %c0_i32_0 = arith.constant 0 : i32
    %c0_i32_1 = arith.constant 0 : i32
    return %arg0, %c0_i32, %c0_i32_0 : i32, i32, i32
  }
  func.func @transform_13(%arg0: i32) -> (i32, i32, i32) {
    %c0_i32 = arith.constant 0 : i32
    %c0_i32_0 = arith.constant 0 : i32
    %c0_i32_1 = arith.constant 0 : i32
    return %arg0, %c0_i32, %c0_i32_0 : i32, i32, i32
  }
  func.func @transform_14(%arg0: i32) -> (i32, i32, i32) {
    %c0_i32 = arith.constant 0 : i32
    %c0_i32_0 = arith.constant 0 : i32
    %c0_i32_1 = arith.constant 0 : i32
    return %arg0, %c0_i32, %c0_i32_0 : i32, i32, i32
  }
  func.func @transform_15(%arg0: i32) -> (i32, i32, i32) {
    %c0_i32 = arith.constant 0 : i32
    %c0_i32_0 = arith.constant 0 : i32
    %c0_i32_1 = arith.constant 0 : i32
    return %arg0, %c0_i32, %c0_i32_0 : i32, i32, i32
  }
  func.func @transform_16(%arg0: i32) -> (i32, i32, i32) {
    %c0_i32 = arith.constant 0 : i32
    %c0_i32_0 = arith.constant 0 : i32
    %c0_i32_1 = arith.constant 0 : i32
    return %arg0, %c0_i32, %c0_i32_0 : i32, i32, i32
  }
  func.func @transform_17(%arg0: i32) -> (i32, i32) {
    %c0_i32 = arith.constant 0 : i32
    %c0_i32_0 = arith.constant 0 : i32
    %c0_i32_1 = arith.constant 0 : i32
    return %c0_i32, %c0_i32_0 : i32, i32
  }
}

module attributes {stable_mosaic.version = 11 : i64} {
  func.func @_block_norm_kernel(%arg0: memref<18x64xf32, #tpu.memory_space<vmem>>, %arg1: memref<1x64xf32, #tpu.memory_space<vmem>>, %arg2: memref<1x64xf32, #tpu.memory_space<vmem>>, %arg3: memref<64x192xf32, #tpu.memory_space<vmem>>, %arg4: memref<1x192xf32, #tpu.memory_space<vmem>>, %arg5: memref<64x64xf32, #tpu.memory_space<vmem>>, %arg6: memref<1x64xf32, #tpu.memory_space<vmem>>, %arg7: memref<1x64xf32, #tpu.memory_space<vmem>>, %arg8: memref<1x64xf32, #tpu.memory_space<vmem>>, %arg9: memref<64x256xf32, #tpu.memory_space<vmem>>, %arg10: memref<1x256xf32, #tpu.memory_space<vmem>>, %arg11: memref<256x64xf32, #tpu.memory_space<vmem>>, %arg12: memref<1x64xf32, #tpu.memory_space<vmem>>, %arg13: memref<1x64xf32, #tpu.memory_space<vmem>>, %arg14: memref<1x64xf32, #tpu.memory_space<vmem>>, %arg15: memref<18x64xf32, #tpu.memory_space<vmem>>) attributes {dimension_semantics = [], scalar_prefetch = 0 : i64, scratch_operands = 0 : i64, tpu.core_type = #tpu.core_type<tc>} {
    %c0 = arith.constant 0 : index
    %c0_0 = arith.constant 0 : index
    %0 = vector.load %arg0[%c0, %c0_0] : memref<18x64xf32, #tpu.memory_space<vmem>>, vector<18x64xf32>
    %c0_1 = arith.constant 0 : index
    %c0_2 = arith.constant 0 : index
    %1 = vector.load %arg1[%c0_1, %c0_2] : memref<1x64xf32, #tpu.memory_space<vmem>>, vector<1x64xf32>
    %c0_3 = arith.constant 0 : index
    %c0_4 = arith.constant 0 : index
    %2 = vector.load %arg2[%c0_3, %c0_4] : memref<1x64xf32, #tpu.memory_space<vmem>>, vector<1x64xf32>
    %c0_5 = arith.constant 0 : index
    %c0_6 = arith.constant 0 : index
    %3 = vector.load %arg3[%c0_5, %c0_6] : memref<64x192xf32, #tpu.memory_space<vmem>>, vector<64x192xf32>
    %c0_7 = arith.constant 0 : index
    %c0_8 = arith.constant 0 : index
    %4 = vector.load %arg4[%c0_7, %c0_8] : memref<1x192xf32, #tpu.memory_space<vmem>>, vector<1x192xf32>
    %c0_9 = arith.constant 0 : index
    %c0_10 = arith.constant 0 : index
    %5 = vector.load %arg5[%c0_9, %c0_10] : memref<64x64xf32, #tpu.memory_space<vmem>>, vector<64x64xf32>
    %c0_11 = arith.constant 0 : index
    %c0_12 = arith.constant 0 : index
    %6 = vector.load %arg6[%c0_11, %c0_12] : memref<1x64xf32, #tpu.memory_space<vmem>>, vector<1x64xf32>
    %c0_13 = arith.constant 0 : index
    %c0_14 = arith.constant 0 : index
    %7 = vector.load %arg7[%c0_13, %c0_14] : memref<1x64xf32, #tpu.memory_space<vmem>>, vector<1x64xf32>
    %c0_15 = arith.constant 0 : index
    %c0_16 = arith.constant 0 : index
    %8 = vector.load %arg8[%c0_15, %c0_16] : memref<1x64xf32, #tpu.memory_space<vmem>>, vector<1x64xf32>
    %c0_17 = arith.constant 0 : index
    %c0_18 = arith.constant 0 : index
    %9 = vector.load %arg9[%c0_17, %c0_18] : memref<64x256xf32, #tpu.memory_space<vmem>>, vector<64x256xf32>
    %c0_19 = arith.constant 0 : index
    %c0_20 = arith.constant 0 : index
    %10 = vector.load %arg10[%c0_19, %c0_20] : memref<1x256xf32, #tpu.memory_space<vmem>>, vector<1x256xf32>
    %c0_21 = arith.constant 0 : index
    %c0_22 = arith.constant 0 : index
    %11 = vector.load %arg11[%c0_21, %c0_22] : memref<256x64xf32, #tpu.memory_space<vmem>>, vector<256x64xf32>
    %c0_23 = arith.constant 0 : index
    %c0_24 = arith.constant 0 : index
    %12 = vector.load %arg12[%c0_23, %c0_24] : memref<1x64xf32, #tpu.memory_space<vmem>>, vector<1x64xf32>
    %cst = arith.constant dense<0.000000e+00> : vector<18xf32>
    %13 = vector.multi_reduction <add>, %0, %cst [1] : vector<18x64xf32> to vector<18xf32>
    %14 = vector.shape_cast %13 : vector<18xf32> to vector<18x1xf32>
    %cst_25 = arith.constant 6.400000e+01 : f32
    %15 = vector.broadcast %cst_25 : f32 to vector<18x1xf32>
    %16 = arith.divf %14, %15 : vector<18x1xf32>
    %17 = vector.broadcast %16 : vector<18x1xf32> to vector<18x64xf32>
    %18 = arith.subf %0, %17 : vector<18x64xf32>
    %19 = arith.mulf %18, %18 : vector<18x64xf32>
    %cst_26 = arith.constant dense<0.000000e+00> : vector<18xf32>
    %20 = vector.multi_reduction <add>, %19, %cst_26 [1] : vector<18x64xf32> to vector<18xf32>
    %21 = vector.shape_cast %20 : vector<18xf32> to vector<18x1xf32>
    %cst_27 = arith.constant 6.400000e+01 : f32
    %22 = vector.broadcast %cst_27 : f32 to vector<18x1xf32>
    %23 = arith.divf %21, %22 : vector<18x1xf32>
    %24 = vector.broadcast %16 : vector<18x1xf32> to vector<18x64xf32>
    %25 = arith.subf %0, %24 : vector<18x64xf32>
    %cst_28 = arith.constant 9.99999997E-7 : f32
    %26 = vector.broadcast %cst_28 : f32 to vector<18x1xf32>
    %27 = arith.addf %23, %26 : vector<18x1xf32>
    %28 = math.rsqrt %27 : vector<18x1xf32>
    %29 = vector.broadcast %28 : vector<18x1xf32> to vector<18x64xf32>
    %30 = arith.mulf %25, %29 : vector<18x64xf32>
    %31 = vector.broadcast %1 : vector<1x64xf32> to vector<18x64xf32>
    %32 = arith.mulf %30, %31 : vector<18x64xf32>
    %33 = vector.broadcast %2 : vector<1x64xf32> to vector<18x64xf32>
    %34 = arith.addf %32, %33 : vector<18x64xf32>
    %cst_29 = arith.constant dense<0.000000e+00> : vector<18x192xf32>
    %35 = tpu.matmul %34, %3, %cst_29 {dimension_numbers = #tpu.dot_dimension_numbers<[1], [0], [0], [1], [0, 0, 1, 1], [], []>} : vector<18x64xf32>, vector<64x192xf32>, vector<18x192xf32> -> vector<18x192xf32>
    %36 = vector.broadcast %4 : vector<1x192xf32> to vector<18x192xf32>
    %37 = arith.addf %35, %36 : vector<18x192xf32>
    %38 = vector.extract_strided_slice %37 {offsets = [0, 0], sizes = [9, 192], strides = [1, 1]} : vector<18x192xf32> to vector<9x192xf32>
    %39 = vector.extract_strided_slice %38 {offsets = [0, 0], sizes = [9, 16], strides = [1, 1]} : vector<9x192xf32> to vector<9x16xf32>
    %40 = vector.extract_strided_slice %38 {offsets = [0, 64], sizes = [9, 16], strides = [1, 1]} : vector<9x192xf32> to vector<9x16xf32>
    %41 = vector.extract_strided_slice %38 {offsets = [0, 128], sizes = [9, 16], strides = [1, 1]} : vector<9x192xf32> to vector<9x16xf32>
    %cst_30 = arith.constant dense<0.000000e+00> : vector<9x9xf32>
    %42 = tpu.matmul %39, %40, %cst_30 {dimension_numbers = #tpu.dot_dimension_numbers<[1], [1], [0], [0], [0, 0, 1, 0], [], []>} : vector<9x16xf32>, vector<9x16xf32>, vector<9x9xf32> -> vector<9x9xf32>
    %cst_31 = arith.constant 2.500000e-01 : f32
    %43 = vector.broadcast %cst_31 : f32 to vector<9x9xf32>
    %44 = arith.mulf %42, %43 : vector<9x9xf32>
    %cst_32 = arith.constant dense<0xFF800000> : vector<9xf32>
    %45 = vector.multi_reduction <maximumf>, %44, %cst_32 [1] : vector<9x9xf32> to vector<9xf32>
    %46 = vector.shape_cast %45 : vector<9xf32> to vector<9x1xf32>
    %47 = vector.broadcast %46 : vector<9x1xf32> to vector<9x9xf32>
    %48 = arith.subf %44, %47 : vector<9x9xf32>
    %49 = math.exp %48 : vector<9x9xf32>
    %cst_33 = arith.constant dense<0.000000e+00> : vector<9xf32>
    %50 = vector.multi_reduction <add>, %49, %cst_33 [1] : vector<9x9xf32> to vector<9xf32>
    %51 = vector.shape_cast %50 : vector<9xf32> to vector<9x1xf32>
    %52 = tpu.reciprocal %51 {approx = true} : vector<9x1xf32> -> vector<9x1xf32>
    %53 = vector.broadcast %52 : vector<9x1xf32> to vector<9x9xf32>
    %54 = arith.mulf %49, %53 : vector<9x9xf32>
    %cst_34 = arith.constant dense<0.000000e+00> : vector<9x16xf32>
    %55 = tpu.matmul %54, %41, %cst_34 {dimension_numbers = #tpu.dot_dimension_numbers<[1], [0], [0], [1], [0, 0, 1, 1], [], []>} : vector<9x9xf32>, vector<9x16xf32>, vector<9x16xf32> -> vector<9x16xf32>
    %56 = vector.extract_strided_slice %38 {offsets = [0, 16], sizes = [9, 16], strides = [1, 1]} : vector<9x192xf32> to vector<9x16xf32>
    %57 = vector.extract_strided_slice %38 {offsets = [0, 80], sizes = [9, 16], strides = [1, 1]} : vector<9x192xf32> to vector<9x16xf32>
    %58 = vector.extract_strided_slice %38 {offsets = [0, 144], sizes = [9, 16], strides = [1, 1]} : vector<9x192xf32> to vector<9x16xf32>
    %cst_35 = arith.constant dense<0.000000e+00> : vector<9x9xf32>
    %59 = tpu.matmul %56, %57, %cst_35 {dimension_numbers = #tpu.dot_dimension_numbers<[1], [1], [0], [0], [0, 0, 1, 0], [], []>} : vector<9x16xf32>, vector<9x16xf32>, vector<9x9xf32> -> vector<9x9xf32>
    %cst_36 = arith.constant 2.500000e-01 : f32
    %60 = vector.broadcast %cst_36 : f32 to vector<9x9xf32>
    %61 = arith.mulf %59, %60 : vector<9x9xf32>
    %cst_37 = arith.constant dense<0xFF800000> : vector<9xf32>
    %62 = vector.multi_reduction <maximumf>, %61, %cst_37 [1] : vector<9x9xf32> to vector<9xf32>
    %63 = vector.shape_cast %62 : vector<9xf32> to vector<9x1xf32>
    %64 = vector.broadcast %63 : vector<9x1xf32> to vector<9x9xf32>
    %65 = arith.subf %61, %64 : vector<9x9xf32>
    %66 = math.exp %65 : vector<9x9xf32>
    %cst_38 = arith.constant dense<0.000000e+00> : vector<9xf32>
    %67 = vector.multi_reduction <add>, %66, %cst_38 [1] : vector<9x9xf32> to vector<9xf32>
    %68 = vector.shape_cast %67 : vector<9xf32> to vector<9x1xf32>
    %69 = tpu.reciprocal %68 {approx = true} : vector<9x1xf32> -> vector<9x1xf32>
    %70 = vector.broadcast %69 : vector<9x1xf32> to vector<9x9xf32>
    %71 = arith.mulf %66, %70 : vector<9x9xf32>
    %cst_39 = arith.constant dense<0.000000e+00> : vector<9x16xf32>
    %72 = tpu.matmul %71, %58, %cst_39 {dimension_numbers = #tpu.dot_dimension_numbers<[1], [0], [0], [1], [0, 0, 1, 1], [], []>} : vector<9x9xf32>, vector<9x16xf32>, vector<9x16xf32> -> vector<9x16xf32>
    %73 = vector.extract_strided_slice %38 {offsets = [0, 32], sizes = [9, 16], strides = [1, 1]} : vector<9x192xf32> to vector<9x16xf32>
    %74 = vector.extract_strided_slice %38 {offsets = [0, 96], sizes = [9, 16], strides = [1, 1]} : vector<9x192xf32> to vector<9x16xf32>
    %75 = vector.extract_strided_slice %38 {offsets = [0, 160], sizes = [9, 16], strides = [1, 1]} : vector<9x192xf32> to vector<9x16xf32>
    %cst_40 = arith.constant dense<0.000000e+00> : vector<9x9xf32>
    %76 = tpu.matmul %73, %74, %cst_40 {dimension_numbers = #tpu.dot_dimension_numbers<[1], [1], [0], [0], [0, 0, 1, 0], [], []>} : vector<9x16xf32>, vector<9x16xf32>, vector<9x9xf32> -> vector<9x9xf32>
    %cst_41 = arith.constant 2.500000e-01 : f32
    %77 = vector.broadcast %cst_41 : f32 to vector<9x9xf32>
    %78 = arith.mulf %76, %77 : vector<9x9xf32>
    %cst_42 = arith.constant dense<0xFF800000> : vector<9xf32>
    %79 = vector.multi_reduction <maximumf>, %78, %cst_42 [1] : vector<9x9xf32> to vector<9xf32>
    %80 = vector.shape_cast %79 : vector<9xf32> to vector<9x1xf32>
    %81 = vector.broadcast %80 : vector<9x1xf32> to vector<9x9xf32>
    %82 = arith.subf %78, %81 : vector<9x9xf32>
    %83 = math.exp %82 : vector<9x9xf32>
    %cst_43 = arith.constant dense<0.000000e+00> : vector<9xf32>
    %84 = vector.multi_reduction <add>, %83, %cst_43 [1] : vector<9x9xf32> to vector<9xf32>
    %85 = vector.shape_cast %84 : vector<9xf32> to vector<9x1xf32>
    %86 = tpu.reciprocal %85 {approx = true} : vector<9x1xf32> -> vector<9x1xf32>
    %87 = vector.broadcast %86 : vector<9x1xf32> to vector<9x9xf32>
    %88 = arith.mulf %83, %87 : vector<9x9xf32>
    %cst_44 = arith.constant dense<0.000000e+00> : vector<9x16xf32>
    %89 = tpu.matmul %88, %75, %cst_44 {dimension_numbers = #tpu.dot_dimension_numbers<[1], [0], [0], [1], [0, 0, 1, 1], [], []>} : vector<9x9xf32>, vector<9x16xf32>, vector<9x16xf32> -> vector<9x16xf32>
    %90 = vector.extract_strided_slice %38 {offsets = [0, 48], sizes = [9, 16], strides = [1, 1]} : vector<9x192xf32> to vector<9x16xf32>
    %91 = vector.extract_strided_slice %38 {offsets = [0, 112], sizes = [9, 16], strides = [1, 1]} : vector<9x192xf32> to vector<9x16xf32>
    %92 = vector.extract_strided_slice %38 {offsets = [0, 176], sizes = [9, 16], strides = [1, 1]} : vector<9x192xf32> to vector<9x16xf32>
    %cst_45 = arith.constant dense<0.000000e+00> : vector<9x9xf32>
    %93 = tpu.matmul %90, %91, %cst_45 {dimension_numbers = #tpu.dot_dimension_numbers<[1], [1], [0], [0], [0, 0, 1, 0], [], []>} : vector<9x16xf32>, vector<9x16xf32>, vector<9x9xf32> -> vector<9x9xf32>
    %cst_46 = arith.constant 2.500000e-01 : f32
    %94 = vector.broadcast %cst_46 : f32 to vector<9x9xf32>
    %95 = arith.mulf %93, %94 : vector<9x9xf32>
    %cst_47 = arith.constant dense<0xFF800000> : vector<9xf32>
    %96 = vector.multi_reduction <maximumf>, %95, %cst_47 [1] : vector<9x9xf32> to vector<9xf32>
    %97 = vector.shape_cast %96 : vector<9xf32> to vector<9x1xf32>
    %98 = vector.broadcast %97 : vector<9x1xf32> to vector<9x9xf32>
    %99 = arith.subf %95, %98 : vector<9x9xf32>
    %100 = math.exp %99 : vector<9x9xf32>
    %cst_48 = arith.constant dense<0.000000e+00> : vector<9xf32>
    %101 = vector.multi_reduction <add>, %100, %cst_48 [1] : vector<9x9xf32> to vector<9xf32>
    %102 = vector.shape_cast %101 : vector<9xf32> to vector<9x1xf32>
    %103 = tpu.reciprocal %102 {approx = true} : vector<9x1xf32> -> vector<9x1xf32>
    %104 = vector.broadcast %103 : vector<9x1xf32> to vector<9x9xf32>
    %105 = arith.mulf %100, %104 : vector<9x9xf32>
    %cst_49 = arith.constant dense<0.000000e+00> : vector<9x16xf32>
    %106 = tpu.matmul %105, %92, %cst_49 {dimension_numbers = #tpu.dot_dimension_numbers<[1], [0], [0], [1], [0, 0, 1, 1], [], []>} : vector<9x9xf32>, vector<9x16xf32>, vector<9x16xf32> -> vector<9x16xf32>
    %107 = tpu.concatenate %55, %72, %89, %106 in 1 : vector<9x16xf32>, vector<9x16xf32>, vector<9x16xf32>, vector<9x16xf32> -> vector<9x64xf32>
    %108 = vector.extract_strided_slice %37 {offsets = [9, 0], sizes = [9, 192], strides = [1, 1]} : vector<18x192xf32> to vector<9x192xf32>
    %109 = vector.extract_strided_slice %108 {offsets = [0, 0], sizes = [9, 16], strides = [1, 1]} : vector<9x192xf32> to vector<9x16xf32>
    %110 = vector.extract_strided_slice %108 {offsets = [0, 64], sizes = [9, 16], strides = [1, 1]} : vector<9x192xf32> to vector<9x16xf32>
    %111 = vector.extract_strided_slice %108 {offsets = [0, 128], sizes = [9, 16], strides = [1, 1]} : vector<9x192xf32> to vector<9x16xf32>
    %cst_50 = arith.constant dense<0.000000e+00> : vector<9x9xf32>
    %112 = tpu.matmul %109, %110, %cst_50 {dimension_numbers = #tpu.dot_dimension_numbers<[1], [1], [0], [0], [0, 0, 1, 0], [], []>} : vector<9x16xf32>, vector<9x16xf32>, vector<9x9xf32> -> vector<9x9xf32>
    %cst_51 = arith.constant 2.500000e-01 : f32
    %113 = vector.broadcast %cst_51 : f32 to vector<9x9xf32>
    %114 = arith.mulf %112, %113 : vector<9x9xf32>
    %cst_52 = arith.constant dense<0xFF800000> : vector<9xf32>
    %115 = vector.multi_reduction <maximumf>, %114, %cst_52 [1] : vector<9x9xf32> to vector<9xf32>
    %116 = vector.shape_cast %115 : vector<9xf32> to vector<9x1xf32>
    %117 = vector.broadcast %116 : vector<9x1xf32> to vector<9x9xf32>
    %118 = arith.subf %114, %117 : vector<9x9xf32>
    %119 = math.exp %118 : vector<9x9xf32>
    %cst_53 = arith.constant dense<0.000000e+00> : vector<9xf32>
    %120 = vector.multi_reduction <add>, %119, %cst_53 [1] : vector<9x9xf32> to vector<9xf32>
    %121 = vector.shape_cast %120 : vector<9xf32> to vector<9x1xf32>
    %122 = tpu.reciprocal %121 {approx = true} : vector<9x1xf32> -> vector<9x1xf32>
    %123 = vector.broadcast %122 : vector<9x1xf32> to vector<9x9xf32>
    %124 = arith.mulf %119, %123 : vector<9x9xf32>
    %cst_54 = arith.constant dense<0.000000e+00> : vector<9x16xf32>
    %125 = tpu.matmul %124, %111, %cst_54 {dimension_numbers = #tpu.dot_dimension_numbers<[1], [0], [0], [1], [0, 0, 1, 1], [], []>} : vector<9x9xf32>, vector<9x16xf32>, vector<9x16xf32> -> vector<9x16xf32>
    %126 = vector.extract_strided_slice %108 {offsets = [0, 16], sizes = [9, 16], strides = [1, 1]} : vector<9x192xf32> to vector<9x16xf32>
    %127 = vector.extract_strided_slice %108 {offsets = [0, 80], sizes = [9, 16], strides = [1, 1]} : vector<9x192xf32> to vector<9x16xf32>
    %128 = vector.extract_strided_slice %108 {offsets = [0, 144], sizes = [9, 16], strides = [1, 1]} : vector<9x192xf32> to vector<9x16xf32>
    %cst_55 = arith.constant dense<0.000000e+00> : vector<9x9xf32>
    %129 = tpu.matmul %126, %127, %cst_55 {dimension_numbers = #tpu.dot_dimension_numbers<[1], [1], [0], [0], [0, 0, 1, 0], [], []>} : vector<9x16xf32>, vector<9x16xf32>, vector<9x9xf32> -> vector<9x9xf32>
    %cst_56 = arith.constant 2.500000e-01 : f32
    %130 = vector.broadcast %cst_56 : f32 to vector<9x9xf32>
    %131 = arith.mulf %129, %130 : vector<9x9xf32>
    %cst_57 = arith.constant dense<0xFF800000> : vector<9xf32>
    %132 = vector.multi_reduction <maximumf>, %131, %cst_57 [1] : vector<9x9xf32> to vector<9xf32>
    %133 = vector.shape_cast %132 : vector<9xf32> to vector<9x1xf32>
    %134 = vector.broadcast %133 : vector<9x1xf32> to vector<9x9xf32>
    %135 = arith.subf %131, %134 : vector<9x9xf32>
    %136 = math.exp %135 : vector<9x9xf32>
    %cst_58 = arith.constant dense<0.000000e+00> : vector<9xf32>
    %137 = vector.multi_reduction <add>, %136, %cst_58 [1] : vector<9x9xf32> to vector<9xf32>
    %138 = vector.shape_cast %137 : vector<9xf32> to vector<9x1xf32>
    %139 = tpu.reciprocal %138 {approx = true} : vector<9x1xf32> -> vector<9x1xf32>
    %140 = vector.broadcast %139 : vector<9x1xf32> to vector<9x9xf32>
    %141 = arith.mulf %136, %140 : vector<9x9xf32>
    %cst_59 = arith.constant dense<0.000000e+00> : vector<9x16xf32>
    %142 = tpu.matmul %141, %128, %cst_59 {dimension_numbers = #tpu.dot_dimension_numbers<[1], [0], [0], [1], [0, 0, 1, 1], [], []>} : vector<9x9xf32>, vector<9x16xf32>, vector<9x16xf32> -> vector<9x16xf32>
    %143 = vector.extract_strided_slice %108 {offsets = [0, 32], sizes = [9, 16], strides = [1, 1]} : vector<9x192xf32> to vector<9x16xf32>
    %144 = vector.extract_strided_slice %108 {offsets = [0, 96], sizes = [9, 16], strides = [1, 1]} : vector<9x192xf32> to vector<9x16xf32>
    %145 = vector.extract_strided_slice %108 {offsets = [0, 160], sizes = [9, 16], strides = [1, 1]} : vector<9x192xf32> to vector<9x16xf32>
    %cst_60 = arith.constant dense<0.000000e+00> : vector<9x9xf32>
    %146 = tpu.matmul %143, %144, %cst_60 {dimension_numbers = #tpu.dot_dimension_numbers<[1], [1], [0], [0], [0, 0, 1, 0], [], []>} : vector<9x16xf32>, vector<9x16xf32>, vector<9x9xf32> -> vector<9x9xf32>
    %cst_61 = arith.constant 2.500000e-01 : f32
    %147 = vector.broadcast %cst_61 : f32 to vector<9x9xf32>
    %148 = arith.mulf %146, %147 : vector<9x9xf32>
    %cst_62 = arith.constant dense<0xFF800000> : vector<9xf32>
    %149 = vector.multi_reduction <maximumf>, %148, %cst_62 [1] : vector<9x9xf32> to vector<9xf32>
    %150 = vector.shape_cast %149 : vector<9xf32> to vector<9x1xf32>
    %151 = vector.broadcast %150 : vector<9x1xf32> to vector<9x9xf32>
    %152 = arith.subf %148, %151 : vector<9x9xf32>
    %153 = math.exp %152 : vector<9x9xf32>
    %cst_63 = arith.constant dense<0.000000e+00> : vector<9xf32>
    %154 = vector.multi_reduction <add>, %153, %cst_63 [1] : vector<9x9xf32> to vector<9xf32>
    %155 = vector.shape_cast %154 : vector<9xf32> to vector<9x1xf32>
    %156 = tpu.reciprocal %155 {approx = true} : vector<9x1xf32> -> vector<9x1xf32>
    %157 = vector.broadcast %156 : vector<9x1xf32> to vector<9x9xf32>
    %158 = arith.mulf %153, %157 : vector<9x9xf32>
    %cst_64 = arith.constant dense<0.000000e+00> : vector<9x16xf32>
    %159 = tpu.matmul %158, %145, %cst_64 {dimension_numbers = #tpu.dot_dimension_numbers<[1], [0], [0], [1], [0, 0, 1, 1], [], []>} : vector<9x9xf32>, vector<9x16xf32>, vector<9x16xf32> -> vector<9x16xf32>
    %160 = vector.extract_strided_slice %108 {offsets = [0, 48], sizes = [9, 16], strides = [1, 1]} : vector<9x192xf32> to vector<9x16xf32>
    %161 = vector.extract_strided_slice %108 {offsets = [0, 112], sizes = [9, 16], strides = [1, 1]} : vector<9x192xf32> to vector<9x16xf32>
    %162 = vector.extract_strided_slice %108 {offsets = [0, 176], sizes = [9, 16], strides = [1, 1]} : vector<9x192xf32> to vector<9x16xf32>
    %cst_65 = arith.constant dense<0.000000e+00> : vector<9x9xf32>
    %163 = tpu.matmul %160, %161, %cst_65 {dimension_numbers = #tpu.dot_dimension_numbers<[1], [1], [0], [0], [0, 0, 1, 0], [], []>} : vector<9x16xf32>, vector<9x16xf32>, vector<9x9xf32> -> vector<9x9xf32>
    %cst_66 = arith.constant 2.500000e-01 : f32
    %164 = vector.broadcast %cst_66 : f32 to vector<9x9xf32>
    %165 = arith.mulf %163, %164 : vector<9x9xf32>
    %cst_67 = arith.constant dense<0xFF800000> : vector<9xf32>
    %166 = vector.multi_reduction <maximumf>, %165, %cst_67 [1] : vector<9x9xf32> to vector<9xf32>
    %167 = vector.shape_cast %166 : vector<9xf32> to vector<9x1xf32>
    %168 = vector.broadcast %167 : vector<9x1xf32> to vector<9x9xf32>
    %169 = arith.subf %165, %168 : vector<9x9xf32>
    %170 = math.exp %169 : vector<9x9xf32>
    %cst_68 = arith.constant dense<0.000000e+00> : vector<9xf32>
    %171 = vector.multi_reduction <add>, %170, %cst_68 [1] : vector<9x9xf32> to vector<9xf32>
    %172 = vector.shape_cast %171 : vector<9xf32> to vector<9x1xf32>
    %173 = tpu.reciprocal %172 {approx = true} : vector<9x1xf32> -> vector<9x1xf32>
    %174 = vector.broadcast %173 : vector<9x1xf32> to vector<9x9xf32>
    %175 = arith.mulf %170, %174 : vector<9x9xf32>
    %cst_69 = arith.constant dense<0.000000e+00> : vector<9x16xf32>
    %176 = tpu.matmul %175, %162, %cst_69 {dimension_numbers = #tpu.dot_dimension_numbers<[1], [0], [0], [1], [0, 0, 1, 1], [], []>} : vector<9x9xf32>, vector<9x16xf32>, vector<9x16xf32> -> vector<9x16xf32>
    %177 = tpu.concatenate %125, %142, %159, %176 in 1 : vector<9x16xf32>, vector<9x16xf32>, vector<9x16xf32>, vector<9x16xf32> -> vector<9x64xf32>
    %178 = tpu.concatenate %107, %177 in 0 : vector<9x64xf32>, vector<9x64xf32> -> vector<18x64xf32>
    %cst_70 = arith.constant dense<0.000000e+00> : vector<18x64xf32>
    %179 = tpu.matmul %178, %5, %cst_70 {dimension_numbers = #tpu.dot_dimension_numbers<[1], [0], [0], [1], [0, 0, 1, 1], [], []>} : vector<18x64xf32>, vector<64x64xf32>, vector<18x64xf32> -> vector<18x64xf32>
    %180 = arith.addf %0, %179 : vector<18x64xf32>
    %181 = vector.broadcast %6 : vector<1x64xf32> to vector<18x64xf32>
    %182 = arith.addf %180, %181 : vector<18x64xf32>
    %cst_71 = arith.constant dense<0.000000e+00> : vector<18xf32>
    %183 = vector.multi_reduction <add>, %182, %cst_71 [1] : vector<18x64xf32> to vector<18xf32>
    %184 = vector.shape_cast %183 : vector<18xf32> to vector<18x1xf32>
    %cst_72 = arith.constant 6.400000e+01 : f32
    %185 = vector.broadcast %cst_72 : f32 to vector<18x1xf32>
    %186 = arith.divf %184, %185 : vector<18x1xf32>
    %187 = vector.broadcast %186 : vector<18x1xf32> to vector<18x64xf32>
    %188 = arith.subf %182, %187 : vector<18x64xf32>
    %189 = arith.mulf %188, %188 : vector<18x64xf32>
    %cst_73 = arith.constant dense<0.000000e+00> : vector<18xf32>
    %190 = vector.multi_reduction <add>, %189, %cst_73 [1] : vector<18x64xf32> to vector<18xf32>
    %191 = vector.shape_cast %190 : vector<18xf32> to vector<18x1xf32>
    %cst_74 = arith.constant 6.400000e+01 : f32
    %192 = vector.broadcast %cst_74 : f32 to vector<18x1xf32>
    %193 = arith.divf %191, %192 : vector<18x1xf32>
    %194 = vector.broadcast %186 : vector<18x1xf32> to vector<18x64xf32>
    %195 = arith.subf %182, %194 : vector<18x64xf32>
    %cst_75 = arith.constant 9.99999997E-7 : f32
    %196 = vector.broadcast %cst_75 : f32 to vector<18x1xf32>
    %197 = arith.addf %193, %196 : vector<18x1xf32>
    %198 = math.rsqrt %197 : vector<18x1xf32>
    %199 = vector.broadcast %198 : vector<18x1xf32> to vector<18x64xf32>
    %200 = arith.mulf %195, %199 : vector<18x64xf32>
    %201 = vector.broadcast %7 : vector<1x64xf32> to vector<18x64xf32>
    %202 = arith.mulf %200, %201 : vector<18x64xf32>
    %203 = vector.broadcast %8 : vector<1x64xf32> to vector<18x64xf32>
    %204 = arith.addf %202, %203 : vector<18x64xf32>
    %cst_76 = arith.constant dense<0.000000e+00> : vector<18x256xf32>
    %205 = tpu.matmul %204, %9, %cst_76 {dimension_numbers = #tpu.dot_dimension_numbers<[1], [0], [0], [1], [0, 0, 1, 1], [], []>} : vector<18x64xf32>, vector<64x256xf32>, vector<18x256xf32> -> vector<18x256xf32>
    %206 = vector.broadcast %10 : vector<1x256xf32> to vector<18x256xf32>
    %207 = arith.addf %205, %206 : vector<18x256xf32>
    %cst_77 = arith.constant 5.000000e-01 : f32
    %208 = vector.broadcast %cst_77 : f32 to vector<18x256xf32>
    %209 = arith.mulf %208, %207 : vector<18x256xf32>
    %cst_78 = arith.constant 0.707106769 : f32
    %210 = vector.broadcast %cst_78 : f32 to vector<18x256xf32>
    %211 = arith.mulf %207, %210 : vector<18x256xf32>
    %212 = math.absf %211 : vector<18x256xf32>
    %cst_79 = arith.constant 0.327591091 : f32
    %213 = vector.broadcast %cst_79 : f32 to vector<18x256xf32>
    %214 = arith.mulf %213, %212 : vector<18x256xf32>
    %cst_80 = arith.constant 1.000000e+00 : f32
    %215 = vector.broadcast %cst_80 : f32 to vector<18x256xf32>
    %216 = arith.addf %215, %214 : vector<18x256xf32>
    %cst_81 = arith.constant 1.000000e+00 : f32
    %217 = vector.broadcast %cst_81 : f32 to vector<18x256xf32>
    %218 = arith.divf %217, %216 : vector<18x256xf32>
    %cst_82 = arith.constant 1.06140542 : f32
    %219 = vector.broadcast %cst_82 : f32 to vector<18x256xf32>
    %220 = arith.mulf %219, %218 : vector<18x256xf32>
    %cst_83 = arith.constant -1.45315206 : f32
    %221 = vector.broadcast %cst_83 : f32 to vector<18x256xf32>
    %222 = arith.addf %220, %221 : vector<18x256xf32>
    %223 = arith.mulf %222, %218 : vector<18x256xf32>
    %cst_84 = arith.constant 1.42141378 : f32
    %224 = vector.broadcast %cst_84 : f32 to vector<18x256xf32>
    %225 = arith.addf %223, %224 : vector<18x256xf32>
    %226 = arith.mulf %225, %218 : vector<18x256xf32>
    %cst_85 = arith.constant -0.284496725 : f32
    %227 = vector.broadcast %cst_85 : f32 to vector<18x256xf32>
    %228 = arith.addf %226, %227 : vector<18x256xf32>
    %229 = arith.mulf %228, %218 : vector<18x256xf32>
    %cst_86 = arith.constant 0.254829586 : f32
    %230 = vector.broadcast %cst_86 : f32 to vector<18x256xf32>
    %231 = arith.addf %229, %230 : vector<18x256xf32>
    %232 = arith.mulf %231, %218 : vector<18x256xf32>
    %cst_87 = arith.constant 0.000000e+00 : f32
    %233 = vector.broadcast %cst_87 : f32 to vector<18x256xf32>
    %234 = arith.subf %233, %212 : vector<18x256xf32>
    %235 = arith.mulf %234, %212 : vector<18x256xf32>
    %236 = math.exp %235 : vector<18x256xf32>
    %237 = arith.mulf %232, %236 : vector<18x256xf32>
    %cst_88 = arith.constant 1.000000e+00 : f32
    %238 = vector.broadcast %cst_88 : f32 to vector<18x256xf32>
    %239 = arith.subf %238, %237 : vector<18x256xf32>
    %cst_89 = arith.constant 0.000000e+00 : f32
    %240 = vector.broadcast %cst_89 : f32 to vector<18x256xf32>
    %241 = arith.cmpf oge, %211, %240 : vector<18x256xf32>
    %cst_90 = arith.constant 0.000000e+00 : f32
    %242 = vector.broadcast %cst_90 : f32 to vector<18x256xf32>
    %243 = arith.subf %242, %239 : vector<18x256xf32>
    %244 = arith.select %241, %239, %243 : vector<18x256xi1>, vector<18x256xf32>
    %cst_91 = arith.constant 1.000000e+00 : f32
    %245 = vector.broadcast %cst_91 : f32 to vector<18x256xf32>
    %246 = arith.addf %245, %244 : vector<18x256xf32>
    %247 = arith.mulf %209, %246 : vector<18x256xf32>
    %cst_92 = arith.constant dense<0.000000e+00> : vector<18x64xf32>
    %248 = tpu.matmul %247, %11, %cst_92 {dimension_numbers = #tpu.dot_dimension_numbers<[1], [0], [0], [1], [0, 0, 1, 1], [], []>} : vector<18x256xf32>, vector<256x64xf32>, vector<18x64xf32> -> vector<18x64xf32>
    %249 = arith.addf %182, %248 : vector<18x64xf32>
    %250 = vector.broadcast %12 : vector<1x64xf32> to vector<18x64xf32>
    %251 = arith.addf %249, %250 : vector<18x64xf32>
    %c0_93 = arith.constant 0 : index
    %c0_94 = arith.constant 0 : index
    %252 = vector.load %arg13[%c0_93, %c0_94] : memref<1x64xf32, #tpu.memory_space<vmem>>, vector<1x64xf32>
    %c0_95 = arith.constant 0 : index
    %c0_96 = arith.constant 0 : index
    %253 = vector.load %arg14[%c0_95, %c0_96] : memref<1x64xf32, #tpu.memory_space<vmem>>, vector<1x64xf32>
    %cst_97 = arith.constant dense<0.000000e+00> : vector<18xf32>
    %254 = vector.multi_reduction <add>, %251, %cst_97 [1] : vector<18x64xf32> to vector<18xf32>
    %255 = vector.shape_cast %254 : vector<18xf32> to vector<18x1xf32>
    %cst_98 = arith.constant 6.400000e+01 : f32
    %256 = vector.broadcast %cst_98 : f32 to vector<18x1xf32>
    %257 = arith.divf %255, %256 : vector<18x1xf32>
    %258 = vector.broadcast %257 : vector<18x1xf32> to vector<18x64xf32>
    %259 = arith.subf %251, %258 : vector<18x64xf32>
    %260 = arith.mulf %259, %259 : vector<18x64xf32>
    %cst_99 = arith.constant dense<0.000000e+00> : vector<18xf32>
    %261 = vector.multi_reduction <add>, %260, %cst_99 [1] : vector<18x64xf32> to vector<18xf32>
    %262 = vector.shape_cast %261 : vector<18xf32> to vector<18x1xf32>
    %cst_100 = arith.constant 6.400000e+01 : f32
    %263 = vector.broadcast %cst_100 : f32 to vector<18x1xf32>
    %264 = arith.divf %262, %263 : vector<18x1xf32>
    %265 = vector.broadcast %257 : vector<18x1xf32> to vector<18x64xf32>
    %266 = arith.subf %251, %265 : vector<18x64xf32>
    %cst_101 = arith.constant 9.99999997E-7 : f32
    %267 = vector.broadcast %cst_101 : f32 to vector<18x1xf32>
    %268 = arith.addf %264, %267 : vector<18x1xf32>
    %269 = math.rsqrt %268 : vector<18x1xf32>
    %270 = vector.broadcast %269 : vector<18x1xf32> to vector<18x64xf32>
    %271 = arith.mulf %266, %270 : vector<18x64xf32>
    %272 = vector.broadcast %252 : vector<1x64xf32> to vector<18x64xf32>
    %273 = arith.mulf %271, %272 : vector<18x64xf32>
    %274 = vector.broadcast %253 : vector<1x64xf32> to vector<18x64xf32>
    %275 = arith.addf %273, %274 : vector<18x64xf32>
    %c0_102 = arith.constant 0 : index
    %c0_103 = arith.constant 0 : index
    %276 = vector.load %arg15[%c0_102, %c0_103] : memref<18x64xf32, #tpu.memory_space<vmem>>, vector<18x64xf32>
    tpu.vector_store %arg15[%c0_102, %c0_103], %275 {strides = array<i32>} : memref<18x64xf32, #tpu.memory_space<vmem>>, vector<18x64xf32>,
    return
  }
}

module attributes {stable_mosaic.version = 11 : i64} {
  func.func @_block_norm_kernel(%arg0: memref<24x64xf32, #tpu.memory_space<vmem>>, %arg1: memref<1x64xf32, #tpu.memory_space<vmem>>, %arg2: memref<1x64xf32, #tpu.memory_space<vmem>>, %arg3: memref<64x192xf32, #tpu.memory_space<vmem>>, %arg4: memref<1x192xf32, #tpu.memory_space<vmem>>, %arg5: memref<64x64xf32, #tpu.memory_space<vmem>>, %arg6: memref<1x64xf32, #tpu.memory_space<vmem>>, %arg7: memref<1x64xf32, #tpu.memory_space<vmem>>, %arg8: memref<1x64xf32, #tpu.memory_space<vmem>>, %arg9: memref<64x256xf32, #tpu.memory_space<vmem>>, %arg10: memref<1x256xf32, #tpu.memory_space<vmem>>, %arg11: memref<256x64xf32, #tpu.memory_space<vmem>>, %arg12: memref<1x64xf32, #tpu.memory_space<vmem>>, %arg13: memref<1x64xf32, #tpu.memory_space<vmem>>, %arg14: memref<1x64xf32, #tpu.memory_space<vmem>>, %arg15: memref<24x64xf32, #tpu.memory_space<vmem>>) attributes {dimension_semantics = [], scalar_prefetch = 0 : i64, scratch_operands = 0 : i64, tpu.core_type = #tpu.core_type<tc>} {
    %c0 = arith.constant 0 : index
    %c0_0 = arith.constant 0 : index
    %0 = vector.load %arg0[%c0, %c0_0] : memref<24x64xf32, #tpu.memory_space<vmem>>, vector<24x64xf32>
    %c0_1 = arith.constant 0 : index
    %c0_2 = arith.constant 0 : index
    %1 = vector.load %arg1[%c0_1, %c0_2] : memref<1x64xf32, #tpu.memory_space<vmem>>, vector<1x64xf32>
    %c0_3 = arith.constant 0 : index
    %c0_4 = arith.constant 0 : index
    %2 = vector.load %arg2[%c0_3, %c0_4] : memref<1x64xf32, #tpu.memory_space<vmem>>, vector<1x64xf32>
    %c0_5 = arith.constant 0 : index
    %c0_6 = arith.constant 0 : index
    %3 = vector.load %arg3[%c0_5, %c0_6] : memref<64x192xf32, #tpu.memory_space<vmem>>, vector<64x192xf32>
    %c0_7 = arith.constant 0 : index
    %c0_8 = arith.constant 0 : index
    %4 = vector.load %arg4[%c0_7, %c0_8] : memref<1x192xf32, #tpu.memory_space<vmem>>, vector<1x192xf32>
    %c0_9 = arith.constant 0 : index
    %c0_10 = arith.constant 0 : index
    %5 = vector.load %arg5[%c0_9, %c0_10] : memref<64x64xf32, #tpu.memory_space<vmem>>, vector<64x64xf32>
    %c0_11 = arith.constant 0 : index
    %c0_12 = arith.constant 0 : index
    %6 = vector.load %arg6[%c0_11, %c0_12] : memref<1x64xf32, #tpu.memory_space<vmem>>, vector<1x64xf32>
    %c0_13 = arith.constant 0 : index
    %c0_14 = arith.constant 0 : index
    %7 = vector.load %arg7[%c0_13, %c0_14] : memref<1x64xf32, #tpu.memory_space<vmem>>, vector<1x64xf32>
    %c0_15 = arith.constant 0 : index
    %c0_16 = arith.constant 0 : index
    %8 = vector.load %arg8[%c0_15, %c0_16] : memref<1x64xf32, #tpu.memory_space<vmem>>, vector<1x64xf32>
    %c0_17 = arith.constant 0 : index
    %c0_18 = arith.constant 0 : index
    %9 = vector.load %arg9[%c0_17, %c0_18] : memref<64x256xf32, #tpu.memory_space<vmem>>, vector<64x256xf32>
    %c0_19 = arith.constant 0 : index
    %c0_20 = arith.constant 0 : index
    %10 = vector.load %arg10[%c0_19, %c0_20] : memref<1x256xf32, #tpu.memory_space<vmem>>, vector<1x256xf32>
    %c0_21 = arith.constant 0 : index
    %c0_22 = arith.constant 0 : index
    %11 = vector.load %arg11[%c0_21, %c0_22] : memref<256x64xf32, #tpu.memory_space<vmem>>, vector<256x64xf32>
    %c0_23 = arith.constant 0 : index
    %c0_24 = arith.constant 0 : index
    %12 = vector.load %arg12[%c0_23, %c0_24] : memref<1x64xf32, #tpu.memory_space<vmem>>, vector<1x64xf32>
    %cst = arith.constant dense<0.000000e+00> : vector<24xf32>
    %13 = vector.multi_reduction <add>, %0, %cst [1] : vector<24x64xf32> to vector<24xf32>
    %14 = vector.shape_cast %13 : vector<24xf32> to vector<24x1xf32>
    %cst_25 = arith.constant 6.400000e+01 : f32
    %15 = vector.broadcast %cst_25 : f32 to vector<24x1xf32>
    %16 = arith.divf %14, %15 : vector<24x1xf32>
    %17 = vector.broadcast %16 : vector<24x1xf32> to vector<24x64xf32>
    %18 = arith.subf %0, %17 : vector<24x64xf32>
    %19 = arith.mulf %18, %18 : vector<24x64xf32>
    %cst_26 = arith.constant dense<0.000000e+00> : vector<24xf32>
    %20 = vector.multi_reduction <add>, %19, %cst_26 [1] : vector<24x64xf32> to vector<24xf32>
    %21 = vector.shape_cast %20 : vector<24xf32> to vector<24x1xf32>
    %cst_27 = arith.constant 6.400000e+01 : f32
    %22 = vector.broadcast %cst_27 : f32 to vector<24x1xf32>
    %23 = arith.divf %21, %22 : vector<24x1xf32>
    %24 = vector.broadcast %16 : vector<24x1xf32> to vector<24x64xf32>
    %25 = arith.subf %0, %24 : vector<24x64xf32>
    %cst_28 = arith.constant 9.99999997E-7 : f32
    %26 = vector.broadcast %cst_28 : f32 to vector<24x1xf32>
    %27 = arith.addf %23, %26 : vector<24x1xf32>
    %28 = math.rsqrt %27 : vector<24x1xf32>
    %29 = vector.broadcast %28 : vector<24x1xf32> to vector<24x64xf32>
    %30 = arith.mulf %25, %29 : vector<24x64xf32>
    %31 = vector.broadcast %1 : vector<1x64xf32> to vector<24x64xf32>
    %32 = arith.mulf %30, %31 : vector<24x64xf32>
    %33 = vector.broadcast %2 : vector<1x64xf32> to vector<24x64xf32>
    %34 = arith.addf %32, %33 : vector<24x64xf32>
    %cst_29 = arith.constant dense<0.000000e+00> : vector<24x192xf32>
    %35 = tpu.matmul %34, %3, %cst_29 {dimension_numbers = #tpu.dot_dimension_numbers<[1], [0], [0], [1], [0, 0, 1, 1], [], []>} : vector<24x64xf32>, vector<64x192xf32>, vector<24x192xf32> -> vector<24x192xf32>
    %36 = vector.broadcast %4 : vector<1x192xf32> to vector<24x192xf32>
    %37 = arith.addf %35, %36 : vector<24x192xf32>
    %38 = vector.extract_strided_slice %37 {offsets = [0, 0], sizes = [3, 192], strides = [1, 1]} : vector<24x192xf32> to vector<3x192xf32>
    %39 = vector.extract_strided_slice %38 {offsets = [0, 0], sizes = [3, 16], strides = [1, 1]} : vector<3x192xf32> to vector<3x16xf32>
    %40 = vector.extract_strided_slice %38 {offsets = [0, 64], sizes = [3, 16], strides = [1, 1]} : vector<3x192xf32> to vector<3x16xf32>
    %41 = vector.extract_strided_slice %38 {offsets = [0, 128], sizes = [3, 16], strides = [1, 1]} : vector<3x192xf32> to vector<3x16xf32>
    %cst_30 = arith.constant dense<0.000000e+00> : vector<3x3xf32>
    %42 = tpu.matmul %39, %40, %cst_30 {dimension_numbers = #tpu.dot_dimension_numbers<[1], [1], [0], [0], [0, 0, 1, 0], [], []>} : vector<3x16xf32>, vector<3x16xf32>, vector<3x3xf32> -> vector<3x3xf32>
    %cst_31 = arith.constant 2.500000e-01 : f32
    %43 = vector.broadcast %cst_31 : f32 to vector<3x3xf32>
    %44 = arith.mulf %42, %43 : vector<3x3xf32>
    %cst_32 = arith.constant dense<0xFF800000> : vector<3xf32>
    %45 = vector.multi_reduction <maximumf>, %44, %cst_32 [1] : vector<3x3xf32> to vector<3xf32>
    %46 = vector.shape_cast %45 : vector<3xf32> to vector<3x1xf32>
    %47 = vector.broadcast %46 : vector<3x1xf32> to vector<3x3xf32>
    %48 = arith.subf %44, %47 : vector<3x3xf32>
    %49 = math.exp %48 : vector<3x3xf32>
    %cst_33 = arith.constant dense<0.000000e+00> : vector<3xf32>
    %50 = vector.multi_reduction <add>, %49, %cst_33 [1] : vector<3x3xf32> to vector<3xf32>
    %51 = vector.shape_cast %50 : vector<3xf32> to vector<3x1xf32>
    %52 = tpu.reciprocal %51 {approx = true} : vector<3x1xf32> -> vector<3x1xf32>
    %53 = vector.broadcast %52 : vector<3x1xf32> to vector<3x3xf32>
    %54 = arith.mulf %49, %53 : vector<3x3xf32>
    %cst_34 = arith.constant dense<0.000000e+00> : vector<3x16xf32>
    %55 = tpu.matmul %54, %41, %cst_34 {dimension_numbers = #tpu.dot_dimension_numbers<[1], [0], [0], [1], [0, 0, 1, 1], [], []>} : vector<3x3xf32>, vector<3x16xf32>, vector<3x16xf32> -> vector<3x16xf32>
    %56 = vector.extract_strided_slice %38 {offsets = [0, 16], sizes = [3, 16], strides = [1, 1]} : vector<3x192xf32> to vector<3x16xf32>
    %57 = vector.extract_strided_slice %38 {offsets = [0, 80], sizes = [3, 16], strides = [1, 1]} : vector<3x192xf32> to vector<3x16xf32>
    %58 = vector.extract_strided_slice %38 {offsets = [0, 144], sizes = [3, 16], strides = [1, 1]} : vector<3x192xf32> to vector<3x16xf32>
    %cst_35 = arith.constant dense<0.000000e+00> : vector<3x3xf32>
    %59 = tpu.matmul %56, %57, %cst_35 {dimension_numbers = #tpu.dot_dimension_numbers<[1], [1], [0], [0], [0, 0, 1, 0], [], []>} : vector<3x16xf32>, vector<3x16xf32>, vector<3x3xf32> -> vector<3x3xf32>
    %cst_36 = arith.constant 2.500000e-01 : f32
    %60 = vector.broadcast %cst_36 : f32 to vector<3x3xf32>
    %61 = arith.mulf %59, %60 : vector<3x3xf32>
    %cst_37 = arith.constant dense<0xFF800000> : vector<3xf32>
    %62 = vector.multi_reduction <maximumf>, %61, %cst_37 [1] : vector<3x3xf32> to vector<3xf32>
    %63 = vector.shape_cast %62 : vector<3xf32> to vector<3x1xf32>
    %64 = vector.broadcast %63 : vector<3x1xf32> to vector<3x3xf32>
    %65 = arith.subf %61, %64 : vector<3x3xf32>
    %66 = math.exp %65 : vector<3x3xf32>
    %cst_38 = arith.constant dense<0.000000e+00> : vector<3xf32>
    %67 = vector.multi_reduction <add>, %66, %cst_38 [1] : vector<3x3xf32> to vector<3xf32>
    %68 = vector.shape_cast %67 : vector<3xf32> to vector<3x1xf32>
    %69 = tpu.reciprocal %68 {approx = true} : vector<3x1xf32> -> vector<3x1xf32>
    %70 = vector.broadcast %69 : vector<3x1xf32> to vector<3x3xf32>
    %71 = arith.mulf %66, %70 : vector<3x3xf32>
    %cst_39 = arith.constant dense<0.000000e+00> : vector<3x16xf32>
    %72 = tpu.matmul %71, %58, %cst_39 {dimension_numbers = #tpu.dot_dimension_numbers<[1], [0], [0], [1], [0, 0, 1, 1], [], []>} : vector<3x3xf32>, vector<3x16xf32>, vector<3x16xf32> -> vector<3x16xf32>
    %73 = vector.extract_strided_slice %38 {offsets = [0, 32], sizes = [3, 16], strides = [1, 1]} : vector<3x192xf32> to vector<3x16xf32>
    %74 = vector.extract_strided_slice %38 {offsets = [0, 96], sizes = [3, 16], strides = [1, 1]} : vector<3x192xf32> to vector<3x16xf32>
    %75 = vector.extract_strided_slice %38 {offsets = [0, 160], sizes = [3, 16], strides = [1, 1]} : vector<3x192xf32> to vector<3x16xf32>
    %cst_40 = arith.constant dense<0.000000e+00> : vector<3x3xf32>
    %76 = tpu.matmul %73, %74, %cst_40 {dimension_numbers = #tpu.dot_dimension_numbers<[1], [1], [0], [0], [0, 0, 1, 0], [], []>} : vector<3x16xf32>, vector<3x16xf32>, vector<3x3xf32> -> vector<3x3xf32>
    %cst_41 = arith.constant 2.500000e-01 : f32
    %77 = vector.broadcast %cst_41 : f32 to vector<3x3xf32>
    %78 = arith.mulf %76, %77 : vector<3x3xf32>
    %cst_42 = arith.constant dense<0xFF800000> : vector<3xf32>
    %79 = vector.multi_reduction <maximumf>, %78, %cst_42 [1] : vector<3x3xf32> to vector<3xf32>
    %80 = vector.shape_cast %79 : vector<3xf32> to vector<3x1xf32>
    %81 = vector.broadcast %80 : vector<3x1xf32> to vector<3x3xf32>
    %82 = arith.subf %78, %81 : vector<3x3xf32>
    %83 = math.exp %82 : vector<3x3xf32>
    %cst_43 = arith.constant dense<0.000000e+00> : vector<3xf32>
    %84 = vector.multi_reduction <add>, %83, %cst_43 [1] : vector<3x3xf32> to vector<3xf32>
    %85 = vector.shape_cast %84 : vector<3xf32> to vector<3x1xf32>
    %86 = tpu.reciprocal %85 {approx = true} : vector<3x1xf32> -> vector<3x1xf32>
    %87 = vector.broadcast %86 : vector<3x1xf32> to vector<3x3xf32>
    %88 = arith.mulf %83, %87 : vector<3x3xf32>
    %cst_44 = arith.constant dense<0.000000e+00> : vector<3x16xf32>
    %89 = tpu.matmul %88, %75, %cst_44 {dimension_numbers = #tpu.dot_dimension_numbers<[1], [0], [0], [1], [0, 0, 1, 1], [], []>} : vector<3x3xf32>, vector<3x16xf32>, vector<3x16xf32> -> vector<3x16xf32>
    %90 = vector.extract_strided_slice %38 {offsets = [0, 48], sizes = [3, 16], strides = [1, 1]} : vector<3x192xf32> to vector<3x16xf32>
    %91 = vector.extract_strided_slice %38 {offsets = [0, 112], sizes = [3, 16], strides = [1, 1]} : vector<3x192xf32> to vector<3x16xf32>
    %92 = vector.extract_strided_slice %38 {offsets = [0, 176], sizes = [3, 16], strides = [1, 1]} : vector<3x192xf32> to vector<3x16xf32>
    %cst_45 = arith.constant dense<0.000000e+00> : vector<3x3xf32>
    %93 = tpu.matmul %90, %91, %cst_45 {dimension_numbers = #tpu.dot_dimension_numbers<[1], [1], [0], [0], [0, 0, 1, 0], [], []>} : vector<3x16xf32>, vector<3x16xf32>, vector<3x3xf32> -> vector<3x3xf32>
    %cst_46 = arith.constant 2.500000e-01 : f32
    %94 = vector.broadcast %cst_46 : f32 to vector<3x3xf32>
    %95 = arith.mulf %93, %94 : vector<3x3xf32>
    %cst_47 = arith.constant dense<0xFF800000> : vector<3xf32>
    %96 = vector.multi_reduction <maximumf>, %95, %cst_47 [1] : vector<3x3xf32> to vector<3xf32>
    %97 = vector.shape_cast %96 : vector<3xf32> to vector<3x1xf32>
    %98 = vector.broadcast %97 : vector<3x1xf32> to vector<3x3xf32>
    %99 = arith.subf %95, %98 : vector<3x3xf32>
    %100 = math.exp %99 : vector<3x3xf32>
    %cst_48 = arith.constant dense<0.000000e+00> : vector<3xf32>
    %101 = vector.multi_reduction <add>, %100, %cst_48 [1] : vector<3x3xf32> to vector<3xf32>
    %102 = vector.shape_cast %101 : vector<3xf32> to vector<3x1xf32>
    %103 = tpu.reciprocal %102 {approx = true} : vector<3x1xf32> -> vector<3x1xf32>
    %104 = vector.broadcast %103 : vector<3x1xf32> to vector<3x3xf32>
    %105 = arith.mulf %100, %104 : vector<3x3xf32>
    %cst_49 = arith.constant dense<0.000000e+00> : vector<3x16xf32>
    %106 = tpu.matmul %105, %92, %cst_49 {dimension_numbers = #tpu.dot_dimension_numbers<[1], [0], [0], [1], [0, 0, 1, 1], [], []>} : vector<3x3xf32>, vector<3x16xf32>, vector<3x16xf32> -> vector<3x16xf32>
    %107 = tpu.concatenate %55, %72, %89, %106 in 1 : vector<3x16xf32>, vector<3x16xf32>, vector<3x16xf32>, vector<3x16xf32> -> vector<3x64xf32>
    %108 = vector.extract_strided_slice %37 {offsets = [3, 0], sizes = [3, 192], strides = [1, 1]} : vector<24x192xf32> to vector<3x192xf32>
    %109 = vector.extract_strided_slice %108 {offsets = [0, 0], sizes = [3, 16], strides = [1, 1]} : vector<3x192xf32> to vector<3x16xf32>
    %110 = vector.extract_strided_slice %108 {offsets = [0, 64], sizes = [3, 16], strides = [1, 1]} : vector<3x192xf32> to vector<3x16xf32>
    %111 = vector.extract_strided_slice %108 {offsets = [0, 128], sizes = [3, 16], strides = [1, 1]} : vector<3x192xf32> to vector<3x16xf32>
    %cst_50 = arith.constant dense<0.000000e+00> : vector<3x3xf32>
    %112 = tpu.matmul %109, %110, %cst_50 {dimension_numbers = #tpu.dot_dimension_numbers<[1], [1], [0], [0], [0, 0, 1, 0], [], []>} : vector<3x16xf32>, vector<3x16xf32>, vector<3x3xf32> -> vector<3x3xf32>
    %cst_51 = arith.constant 2.500000e-01 : f32
    %113 = vector.broadcast %cst_51 : f32 to vector<3x3xf32>
    %114 = arith.mulf %112, %113 : vector<3x3xf32>
    %cst_52 = arith.constant dense<0xFF800000> : vector<3xf32>
    %115 = vector.multi_reduction <maximumf>, %114, %cst_52 [1] : vector<3x3xf32> to vector<3xf32>
    %116 = vector.shape_cast %115 : vector<3xf32> to vector<3x1xf32>
    %117 = vector.broadcast %116 : vector<3x1xf32> to vector<3x3xf32>
    %118 = arith.subf %114, %117 : vector<3x3xf32>
    %119 = math.exp %118 : vector<3x3xf32>
    %cst_53 = arith.constant dense<0.000000e+00> : vector<3xf32>
    %120 = vector.multi_reduction <add>, %119, %cst_53 [1] : vector<3x3xf32> to vector<3xf32>
    %121 = vector.shape_cast %120 : vector<3xf32> to vector<3x1xf32>
    %122 = tpu.reciprocal %121 {approx = true} : vector<3x1xf32> -> vector<3x1xf32>
    %123 = vector.broadcast %122 : vector<3x1xf32> to vector<3x3xf32>
    %124 = arith.mulf %119, %123 : vector<3x3xf32>
    %cst_54 = arith.constant dense<0.000000e+00> : vector<3x16xf32>
    %125 = tpu.matmul %124, %111, %cst_54 {dimension_numbers = #tpu.dot_dimension_numbers<[1], [0], [0], [1], [0, 0, 1, 1], [], []>} : vector<3x3xf32>, vector<3x16xf32>, vector<3x16xf32> -> vector<3x16xf32>
    %126 = vector.extract_strided_slice %108 {offsets = [0, 16], sizes = [3, 16], strides = [1, 1]} : vector<3x192xf32> to vector<3x16xf32>
    %127 = vector.extract_strided_slice %108 {offsets = [0, 80], sizes = [3, 16], strides = [1, 1]} : vector<3x192xf32> to vector<3x16xf32>
    %128 = vector.extract_strided_slice %108 {offsets = [0, 144], sizes = [3, 16], strides = [1, 1]} : vector<3x192xf32> to vector<3x16xf32>
    %cst_55 = arith.constant dense<0.000000e+00> : vector<3x3xf32>
    %129 = tpu.matmul %126, %127, %cst_55 {dimension_numbers = #tpu.dot_dimension_numbers<[1], [1], [0], [0], [0, 0, 1, 0], [], []>} : vector<3x16xf32>, vector<3x16xf32>, vector<3x3xf32> -> vector<3x3xf32>
    %cst_56 = arith.constant 2.500000e-01 : f32
    %130 = vector.broadcast %cst_56 : f32 to vector<3x3xf32>
    %131 = arith.mulf %129, %130 : vector<3x3xf32>
    %cst_57 = arith.constant dense<0xFF800000> : vector<3xf32>
    %132 = vector.multi_reduction <maximumf>, %131, %cst_57 [1] : vector<3x3xf32> to vector<3xf32>
    %133 = vector.shape_cast %132 : vector<3xf32> to vector<3x1xf32>
    %134 = vector.broadcast %133 : vector<3x1xf32> to vector<3x3xf32>
    %135 = arith.subf %131, %134 : vector<3x3xf32>
    %136 = math.exp %135 : vector<3x3xf32>
    %cst_58 = arith.constant dense<0.000000e+00> : vector<3xf32>
    %137 = vector.multi_reduction <add>, %136, %cst_58 [1] : vector<3x3xf32> to vector<3xf32>
    %138 = vector.shape_cast %137 : vector<3xf32> to vector<3x1xf32>
    %139 = tpu.reciprocal %138 {approx = true} : vector<3x1xf32> -> vector<3x1xf32>
    %140 = vector.broadcast %139 : vector<3x1xf32> to vector<3x3xf32>
    %141 = arith.mulf %136, %140 : vector<3x3xf32>
    %cst_59 = arith.constant dense<0.000000e+00> : vector<3x16xf32>
    %142 = tpu.matmul %141, %128, %cst_59 {dimension_numbers = #tpu.dot_dimension_numbers<[1], [0], [0], [1], [0, 0, 1, 1], [], []>} : vector<3x3xf32>, vector<3x16xf32>, vector<3x16xf32> -> vector<3x16xf32>
    %143 = vector.extract_strided_slice %108 {offsets = [0, 32], sizes = [3, 16], strides = [1, 1]} : vector<3x192xf32> to vector<3x16xf32>
    %144 = vector.extract_strided_slice %108 {offsets = [0, 96], sizes = [3, 16], strides = [1, 1]} : vector<3x192xf32> to vector<3x16xf32>
    %145 = vector.extract_strided_slice %108 {offsets = [0, 160], sizes = [3, 16], strides = [1, 1]} : vector<3x192xf32> to vector<3x16xf32>
    %cst_60 = arith.constant dense<0.000000e+00> : vector<3x3xf32>
    %146 = tpu.matmul %143, %144, %cst_60 {dimension_numbers = #tpu.dot_dimension_numbers<[1], [1], [0], [0], [0, 0, 1, 0], [], []>} : vector<3x16xf32>, vector<3x16xf32>, vector<3x3xf32> -> vector<3x3xf32>
    %cst_61 = arith.constant 2.500000e-01 : f32
    %147 = vector.broadcast %cst_61 : f32 to vector<3x3xf32>
    %148 = arith.mulf %146, %147 : vector<3x3xf32>
    %cst_62 = arith.constant dense<0xFF800000> : vector<3xf32>
    %149 = vector.multi_reduction <maximumf>, %148, %cst_62 [1] : vector<3x3xf32> to vector<3xf32>
    %150 = vector.shape_cast %149 : vector<3xf32> to vector<3x1xf32>
    %151 = vector.broadcast %150 : vector<3x1xf32> to vector<3x3xf32>
    %152 = arith.subf %148, %151 : vector<3x3xf32>
    %153 = math.exp %152 : vector<3x3xf32>
    %cst_63 = arith.constant dense<0.000000e+00> : vector<3xf32>
    %154 = vector.multi_reduction <add>, %153, %cst_63 [1] : vector<3x3xf32> to vector<3xf32>
    %155 = vector.shape_cast %154 : vector<3xf32> to vector<3x1xf32>
    %156 = tpu.reciprocal %155 {approx = true} : vector<3x1xf32> -> vector<3x1xf32>
    %157 = vector.broadcast %156 : vector<3x1xf32> to vector<3x3xf32>
    %158 = arith.mulf %153, %157 : vector<3x3xf32>
    %cst_64 = arith.constant dense<0.000000e+00> : vector<3x16xf32>
    %159 = tpu.matmul %158, %145, %cst_64 {dimension_numbers = #tpu.dot_dimension_numbers<[1], [0], [0], [1], [0, 0, 1, 1], [], []>} : vector<3x3xf32>, vector<3x16xf32>, vector<3x16xf32> -> vector<3x16xf32>
    %160 = vector.extract_strided_slice %108 {offsets = [0, 48], sizes = [3, 16], strides = [1, 1]} : vector<3x192xf32> to vector<3x16xf32>
    %161 = vector.extract_strided_slice %108 {offsets = [0, 112], sizes = [3, 16], strides = [1, 1]} : vector<3x192xf32> to vector<3x16xf32>
    %162 = vector.extract_strided_slice %108 {offsets = [0, 176], sizes = [3, 16], strides = [1, 1]} : vector<3x192xf32> to vector<3x16xf32>
    %cst_65 = arith.constant dense<0.000000e+00> : vector<3x3xf32>
    %163 = tpu.matmul %160, %161, %cst_65 {dimension_numbers = #tpu.dot_dimension_numbers<[1], [1], [0], [0], [0, 0, 1, 0], [], []>} : vector<3x16xf32>, vector<3x16xf32>, vector<3x3xf32> -> vector<3x3xf32>
    %cst_66 = arith.constant 2.500000e-01 : f32
    %164 = vector.broadcast %cst_66 : f32 to vector<3x3xf32>
    %165 = arith.mulf %163, %164 : vector<3x3xf32>
    %cst_67 = arith.constant dense<0xFF800000> : vector<3xf32>
    %166 = vector.multi_reduction <maximumf>, %165, %cst_67 [1] : vector<3x3xf32> to vector<3xf32>
    %167 = vector.shape_cast %166 : vector<3xf32> to vector<3x1xf32>
    %168 = vector.broadcast %167 : vector<3x1xf32> to vector<3x3xf32>
    %169 = arith.subf %165, %168 : vector<3x3xf32>
    %170 = math.exp %169 : vector<3x3xf32>
    %cst_68 = arith.constant dense<0.000000e+00> : vector<3xf32>
    %171 = vector.multi_reduction <add>, %170, %cst_68 [1] : vector<3x3xf32> to vector<3xf32>
    %172 = vector.shape_cast %171 : vector<3xf32> to vector<3x1xf32>
    %173 = tpu.reciprocal %172 {approx = true} : vector<3x1xf32> -> vector<3x1xf32>
    %174 = vector.broadcast %173 : vector<3x1xf32> to vector<3x3xf32>
    %175 = arith.mulf %170, %174 : vector<3x3xf32>
    %cst_69 = arith.constant dense<0.000000e+00> : vector<3x16xf32>
    %176 = tpu.matmul %175, %162, %cst_69 {dimension_numbers = #tpu.dot_dimension_numbers<[1], [0], [0], [1], [0, 0, 1, 1], [], []>} : vector<3x3xf32>, vector<3x16xf32>, vector<3x16xf32> -> vector<3x16xf32>
    %177 = tpu.concatenate %125, %142, %159, %176 in 1 : vector<3x16xf32>, vector<3x16xf32>, vector<3x16xf32>, vector<3x16xf32> -> vector<3x64xf32>
    %178 = vector.extract_strided_slice %37 {offsets = [6, 0], sizes = [3, 192], strides = [1, 1]} : vector<24x192xf32> to vector<3x192xf32>
    %179 = vector.extract_strided_slice %178 {offsets = [0, 0], sizes = [3, 16], strides = [1, 1]} : vector<3x192xf32> to vector<3x16xf32>
    %180 = vector.extract_strided_slice %178 {offsets = [0, 64], sizes = [3, 16], strides = [1, 1]} : vector<3x192xf32> to vector<3x16xf32>
    %181 = vector.extract_strided_slice %178 {offsets = [0, 128], sizes = [3, 16], strides = [1, 1]} : vector<3x192xf32> to vector<3x16xf32>
    %cst_70 = arith.constant dense<0.000000e+00> : vector<3x3xf32>
    %182 = tpu.matmul %179, %180, %cst_70 {dimension_numbers = #tpu.dot_dimension_numbers<[1], [1], [0], [0], [0, 0, 1, 0], [], []>} : vector<3x16xf32>, vector<3x16xf32>, vector<3x3xf32> -> vector<3x3xf32>
    %cst_71 = arith.constant 2.500000e-01 : f32
    %183 = vector.broadcast %cst_71 : f32 to vector<3x3xf32>
    %184 = arith.mulf %182, %183 : vector<3x3xf32>
    %cst_72 = arith.constant dense<0xFF800000> : vector<3xf32>
    %185 = vector.multi_reduction <maximumf>, %184, %cst_72 [1] : vector<3x3xf32> to vector<3xf32>
    %186 = vector.shape_cast %185 : vector<3xf32> to vector<3x1xf32>
    %187 = vector.broadcast %186 : vector<3x1xf32> to vector<3x3xf32>
    %188 = arith.subf %184, %187 : vector<3x3xf32>
    %189 = math.exp %188 : vector<3x3xf32>
    %cst_73 = arith.constant dense<0.000000e+00> : vector<3xf32>
    %190 = vector.multi_reduction <add>, %189, %cst_73 [1] : vector<3x3xf32> to vector<3xf32>
    %191 = vector.shape_cast %190 : vector<3xf32> to vector<3x1xf32>
    %192 = tpu.reciprocal %191 {approx = true} : vector<3x1xf32> -> vector<3x1xf32>
    %193 = vector.broadcast %192 : vector<3x1xf32> to vector<3x3xf32>
    %194 = arith.mulf %189, %193 : vector<3x3xf32>
    %cst_74 = arith.constant dense<0.000000e+00> : vector<3x16xf32>
    %195 = tpu.matmul %194, %181, %cst_74 {dimension_numbers = #tpu.dot_dimension_numbers<[1], [0], [0], [1], [0, 0, 1, 1], [], []>} : vector<3x3xf32>, vector<3x16xf32>, vector<3x16xf32> -> vector<3x16xf32>
    %196 = vector.extract_strided_slice %178 {offsets = [0, 16], sizes = [3, 16], strides = [1, 1]} : vector<3x192xf32> to vector<3x16xf32>
    %197 = vector.extract_strided_slice %178 {offsets = [0, 80], sizes = [3, 16], strides = [1, 1]} : vector<3x192xf32> to vector<3x16xf32>
    %198 = vector.extract_strided_slice %178 {offsets = [0, 144], sizes = [3, 16], strides = [1, 1]} : vector<3x192xf32> to vector<3x16xf32>
    %cst_75 = arith.constant dense<0.000000e+00> : vector<3x3xf32>
    %199 = tpu.matmul %196, %197, %cst_75 {dimension_numbers = #tpu.dot_dimension_numbers<[1], [1], [0], [0], [0, 0, 1, 0], [], []>} : vector<3x16xf32>, vector<3x16xf32>, vector<3x3xf32> -> vector<3x3xf32>
    %cst_76 = arith.constant 2.500000e-01 : f32
    %200 = vector.broadcast %cst_76 : f32 to vector<3x3xf32>
    %201 = arith.mulf %199, %200 : vector<3x3xf32>
    %cst_77 = arith.constant dense<0xFF800000> : vector<3xf32>
    %202 = vector.multi_reduction <maximumf>, %201, %cst_77 [1] : vector<3x3xf32> to vector<3xf32>
    %203 = vector.shape_cast %202 : vector<3xf32> to vector<3x1xf32>
    %204 = vector.broadcast %203 : vector<3x1xf32> to vector<3x3xf32>
    %205 = arith.subf %201, %204 : vector<3x3xf32>
    %206 = math.exp %205 : vector<3x3xf32>
    %cst_78 = arith.constant dense<0.000000e+00> : vector<3xf32>
    %207 = vector.multi_reduction <add>, %206, %cst_78 [1] : vector<3x3xf32> to vector<3xf32>
    %208 = vector.shape_cast %207 : vector<3xf32> to vector<3x1xf32>
    %209 = tpu.reciprocal %208 {approx = true} : vector<3x1xf32> -> vector<3x1xf32>
    %210 = vector.broadcast %209 : vector<3x1xf32> to vector<3x3xf32>
    %211 = arith.mulf %206, %210 : vector<3x3xf32>
    %cst_79 = arith.constant dense<0.000000e+00> : vector<3x16xf32>
    %212 = tpu.matmul %211, %198, %cst_79 {dimension_numbers = #tpu.dot_dimension_numbers<[1], [0], [0], [1], [0, 0, 1, 1], [], []>} : vector<3x3xf32>, vector<3x16xf32>, vector<3x16xf32> -> vector<3x16xf32>
    %213 = vector.extract_strided_slice %178 {offsets = [0, 32], sizes = [3, 16], strides = [1, 1]} : vector<3x192xf32> to vector<3x16xf32>
    %214 = vector.extract_strided_slice %178 {offsets = [0, 96], sizes = [3, 16], strides = [1, 1]} : vector<3x192xf32> to vector<3x16xf32>
    %215 = vector.extract_strided_slice %178 {offsets = [0, 160], sizes = [3, 16], strides = [1, 1]} : vector<3x192xf32> to vector<3x16xf32>
    %cst_80 = arith.constant dense<0.000000e+00> : vector<3x3xf32>
    %216 = tpu.matmul %213, %214, %cst_80 {dimension_numbers = #tpu.dot_dimension_numbers<[1], [1], [0], [0], [0, 0, 1, 0], [], []>} : vector<3x16xf32>, vector<3x16xf32>, vector<3x3xf32> -> vector<3x3xf32>
    %cst_81 = arith.constant 2.500000e-01 : f32
    %217 = vector.broadcast %cst_81 : f32 to vector<3x3xf32>
    %218 = arith.mulf %216, %217 : vector<3x3xf32>
    %cst_82 = arith.constant dense<0xFF800000> : vector<3xf32>
    %219 = vector.multi_reduction <maximumf>, %218, %cst_82 [1] : vector<3x3xf32> to vector<3xf32>
    %220 = vector.shape_cast %219 : vector<3xf32> to vector<3x1xf32>
    %221 = vector.broadcast %220 : vector<3x1xf32> to vector<3x3xf32>
    %222 = arith.subf %218, %221 : vector<3x3xf32>
    %223 = math.exp %222 : vector<3x3xf32>
    %cst_83 = arith.constant dense<0.000000e+00> : vector<3xf32>
    %224 = vector.multi_reduction <add>, %223, %cst_83 [1] : vector<3x3xf32> to vector<3xf32>
    %225 = vector.shape_cast %224 : vector<3xf32> to vector<3x1xf32>
    %226 = tpu.reciprocal %225 {approx = true} : vector<3x1xf32> -> vector<3x1xf32>
    %227 = vector.broadcast %226 : vector<3x1xf32> to vector<3x3xf32>
    %228 = arith.mulf %223, %227 : vector<3x3xf32>
    %cst_84 = arith.constant dense<0.000000e+00> : vector<3x16xf32>
    %229 = tpu.matmul %228, %215, %cst_84 {dimension_numbers = #tpu.dot_dimension_numbers<[1], [0], [0], [1], [0, 0, 1, 1], [], []>} : vector<3x3xf32>, vector<3x16xf32>, vector<3x16xf32> -> vector<3x16xf32>
    %230 = vector.extract_strided_slice %178 {offsets = [0, 48], sizes = [3, 16], strides = [1, 1]} : vector<3x192xf32> to vector<3x16xf32>
    %231 = vector.extract_strided_slice %178 {offsets = [0, 112], sizes = [3, 16], strides = [1, 1]} : vector<3x192xf32> to vector<3x16xf32>
    %232 = vector.extract_strided_slice %178 {offsets = [0, 176], sizes = [3, 16], strides = [1, 1]} : vector<3x192xf32> to vector<3x16xf32>
    %cst_85 = arith.constant dense<0.000000e+00> : vector<3x3xf32>
    %233 = tpu.matmul %230, %231, %cst_85 {dimension_numbers = #tpu.dot_dimension_numbers<[1], [1], [0], [0], [0, 0, 1, 0], [], []>} : vector<3x16xf32>, vector<3x16xf32>, vector<3x3xf32> -> vector<3x3xf32>
    %cst_86 = arith.constant 2.500000e-01 : f32
    %234 = vector.broadcast %cst_86 : f32 to vector<3x3xf32>
    %235 = arith.mulf %233, %234 : vector<3x3xf32>
    %cst_87 = arith.constant dense<0xFF800000> : vector<3xf32>
    %236 = vector.multi_reduction <maximumf>, %235, %cst_87 [1] : vector<3x3xf32> to vector<3xf32>
    %237 = vector.shape_cast %236 : vector<3xf32> to vector<3x1xf32>
    %238 = vector.broadcast %237 : vector<3x1xf32> to vector<3x3xf32>
    %239 = arith.subf %235, %238 : vector<3x3xf32>
    %240 = math.exp %239 : vector<3x3xf32>
    %cst_88 = arith.constant dense<0.000000e+00> : vector<3xf32>
    %241 = vector.multi_reduction <add>, %240, %cst_88 [1] : vector<3x3xf32> to vector<3xf32>
    %242 = vector.shape_cast %241 : vector<3xf32> to vector<3x1xf32>
    %243 = tpu.reciprocal %242 {approx = true} : vector<3x1xf32> -> vector<3x1xf32>
    %244 = vector.broadcast %243 : vector<3x1xf32> to vector<3x3xf32>
    %245 = arith.mulf %240, %244 : vector<3x3xf32>
    %cst_89 = arith.constant dense<0.000000e+00> : vector<3x16xf32>
    %246 = tpu.matmul %245, %232, %cst_89 {dimension_numbers = #tpu.dot_dimension_numbers<[1], [0], [0], [1], [0, 0, 1, 1], [], []>} : vector<3x3xf32>, vector<3x16xf32>, vector<3x16xf32> -> vector<3x16xf32>
    %247 = tpu.concatenate %195, %212, %229, %246 in 1 : vector<3x16xf32>, vector<3x16xf32>, vector<3x16xf32>, vector<3x16xf32> -> vector<3x64xf32>
    %248 = vector.extract_strided_slice %37 {offsets = [9, 0], sizes = [3, 192], strides = [1, 1]} : vector<24x192xf32> to vector<3x192xf32>
    %249 = vector.extract_strided_slice %248 {offsets = [0, 0], sizes = [3, 16], strides = [1, 1]} : vector<3x192xf32> to vector<3x16xf32>
    %250 = vector.extract_strided_slice %248 {offsets = [0, 64], sizes = [3, 16], strides = [1, 1]} : vector<3x192xf32> to vector<3x16xf32>
    %251 = vector.extract_strided_slice %248 {offsets = [0, 128], sizes = [3, 16], strides = [1, 1]} : vector<3x192xf32> to vector<3x16xf32>
    %cst_90 = arith.constant dense<0.000000e+00> : vector<3x3xf32>
    %252 = tpu.matmul %249, %250, %cst_90 {dimension_numbers = #tpu.dot_dimension_numbers<[1], [1], [0], [0], [0, 0, 1, 0], [], []>} : vector<3x16xf32>, vector<3x16xf32>, vector<3x3xf32> -> vector<3x3xf32>
    %cst_91 = arith.constant 2.500000e-01 : f32
    %253 = vector.broadcast %cst_91 : f32 to vector<3x3xf32>
    %254 = arith.mulf %252, %253 : vector<3x3xf32>
    %cst_92 = arith.constant dense<0xFF800000> : vector<3xf32>
    %255 = vector.multi_reduction <maximumf>, %254, %cst_92 [1] : vector<3x3xf32> to vector<3xf32>
    %256 = vector.shape_cast %255 : vector<3xf32> to vector<3x1xf32>
    %257 = vector.broadcast %256 : vector<3x1xf32> to vector<3x3xf32>
    %258 = arith.subf %254, %257 : vector<3x3xf32>
    %259 = math.exp %258 : vector<3x3xf32>
    %cst_93 = arith.constant dense<0.000000e+00> : vector<3xf32>
    %260 = vector.multi_reduction <add>, %259, %cst_93 [1] : vector<3x3xf32> to vector<3xf32>
    %261 = vector.shape_cast %260 : vector<3xf32> to vector<3x1xf32>
    %262 = tpu.reciprocal %261 {approx = true} : vector<3x1xf32> -> vector<3x1xf32>
    %263 = vector.broadcast %262 : vector<3x1xf32> to vector<3x3xf32>
    %264 = arith.mulf %259, %263 : vector<3x3xf32>
    %cst_94 = arith.constant dense<0.000000e+00> : vector<3x16xf32>
    %265 = tpu.matmul %264, %251, %cst_94 {dimension_numbers = #tpu.dot_dimension_numbers<[1], [0], [0], [1], [0, 0, 1, 1], [], []>} : vector<3x3xf32>, vector<3x16xf32>, vector<3x16xf32> -> vector<3x16xf32>
    %266 = vector.extract_strided_slice %248 {offsets = [0, 16], sizes = [3, 16], strides = [1, 1]} : vector<3x192xf32> to vector<3x16xf32>
    %267 = vector.extract_strided_slice %248 {offsets = [0, 80], sizes = [3, 16], strides = [1, 1]} : vector<3x192xf32> to vector<3x16xf32>
    %268 = vector.extract_strided_slice %248 {offsets = [0, 144], sizes = [3, 16], strides = [1, 1]} : vector<3x192xf32> to vector<3x16xf32>
    %cst_95 = arith.constant dense<0.000000e+00> : vector<3x3xf32>
    %269 = tpu.matmul %266, %267, %cst_95 {dimension_numbers = #tpu.dot_dimension_numbers<[1], [1], [0], [0], [0, 0, 1, 0], [], []>} : vector<3x16xf32>, vector<3x16xf32>, vector<3x3xf32> -> vector<3x3xf32>
    %cst_96 = arith.constant 2.500000e-01 : f32
    %270 = vector.broadcast %cst_96 : f32 to vector<3x3xf32>
    %271 = arith.mulf %269, %270 : vector<3x3xf32>
    %cst_97 = arith.constant dense<0xFF800000> : vector<3xf32>
    %272 = vector.multi_reduction <maximumf>, %271, %cst_97 [1] : vector<3x3xf32> to vector<3xf32>
    %273 = vector.shape_cast %272 : vector<3xf32> to vector<3x1xf32>
    %274 = vector.broadcast %273 : vector<3x1xf32> to vector<3x3xf32>
    %275 = arith.subf %271, %274 : vector<3x3xf32>
    %276 = math.exp %275 : vector<3x3xf32>
    %cst_98 = arith.constant dense<0.000000e+00> : vector<3xf32>
    %277 = vector.multi_reduction <add>, %276, %cst_98 [1] : vector<3x3xf32> to vector<3xf32>
    %278 = vector.shape_cast %277 : vector<3xf32> to vector<3x1xf32>
    %279 = tpu.reciprocal %278 {approx = true} : vector<3x1xf32> -> vector<3x1xf32>
    %280 = vector.broadcast %279 : vector<3x1xf32> to vector<3x3xf32>
    %281 = arith.mulf %276, %280 : vector<3x3xf32>
    %cst_99 = arith.constant dense<0.000000e+00> : vector<3x16xf32>
    %282 = tpu.matmul %281, %268, %cst_99 {dimension_numbers = #tpu.dot_dimension_numbers<[1], [0], [0], [1], [0, 0, 1, 1], [], []>} : vector<3x3xf32>, vector<3x16xf32>, vector<3x16xf32> -> vector<3x16xf32>
    %283 = vector.extract_strided_slice %248 {offsets = [0, 32], sizes = [3, 16], strides = [1, 1]} : vector<3x192xf32> to vector<3x16xf32>
    %284 = vector.extract_strided_slice %248 {offsets = [0, 96], sizes = [3, 16], strides = [1, 1]} : vector<3x192xf32> to vector<3x16xf32>
    %285 = vector.extract_strided_slice %248 {offsets = [0, 160], sizes = [3, 16], strides = [1, 1]} : vector<3x192xf32> to vector<3x16xf32>
    %cst_100 = arith.constant dense<0.000000e+00> : vector<3x3xf32>
    %286 = tpu.matmul %283, %284, %cst_100 {dimension_numbers = #tpu.dot_dimension_numbers<[1], [1], [0], [0], [0, 0, 1, 0], [], []>} : vector<3x16xf32>, vector<3x16xf32>, vector<3x3xf32> -> vector<3x3xf32>
    %cst_101 = arith.constant 2.500000e-01 : f32
    %287 = vector.broadcast %cst_101 : f32 to vector<3x3xf32>
    %288 = arith.mulf %286, %287 : vector<3x3xf32>
    %cst_102 = arith.constant dense<0xFF800000> : vector<3xf32>
    %289 = vector.multi_reduction <maximumf>, %288, %cst_102 [1] : vector<3x3xf32> to vector<3xf32>
    %290 = vector.shape_cast %289 : vector<3xf32> to vector<3x1xf32>
    %291 = vector.broadcast %290 : vector<3x1xf32> to vector<3x3xf32>
    %292 = arith.subf %288, %291 : vector<3x3xf32>
    %293 = math.exp %292 : vector<3x3xf32>
    %cst_103 = arith.constant dense<0.000000e+00> : vector<3xf32>
    %294 = vector.multi_reduction <add>, %293, %cst_103 [1] : vector<3x3xf32> to vector<3xf32>
    %295 = vector.shape_cast %294 : vector<3xf32> to vector<3x1xf32>
    %296 = tpu.reciprocal %295 {approx = true} : vector<3x1xf32> -> vector<3x1xf32>
    %297 = vector.broadcast %296 : vector<3x1xf32> to vector<3x3xf32>
    %298 = arith.mulf %293, %297 : vector<3x3xf32>
    %cst_104 = arith.constant dense<0.000000e+00> : vector<3x16xf32>
    %299 = tpu.matmul %298, %285, %cst_104 {dimension_numbers = #tpu.dot_dimension_numbers<[1], [0], [0], [1], [0, 0, 1, 1], [], []>} : vector<3x3xf32>, vector<3x16xf32>, vector<3x16xf32> -> vector<3x16xf32>
    %300 = vector.extract_strided_slice %248 {offsets = [0, 48], sizes = [3, 16], strides = [1, 1]} : vector<3x192xf32> to vector<3x16xf32>
    %301 = vector.extract_strided_slice %248 {offsets = [0, 112], sizes = [3, 16], strides = [1, 1]} : vector<3x192xf32> to vector<3x16xf32>
    %302 = vector.extract_strided_slice %248 {offsets = [0, 176], sizes = [3, 16], strides = [1, 1]} : vector<3x192xf32> to vector<3x16xf32>
    %cst_105 = arith.constant dense<0.000000e+00> : vector<3x3xf32>
    %303 = tpu.matmul %300, %301, %cst_105 {dimension_numbers = #tpu.dot_dimension_numbers<[1], [1], [0], [0], [0, 0, 1, 0], [], []>} : vector<3x16xf32>, vector<3x16xf32>, vector<3x3xf32> -> vector<3x3xf32>
    %cst_106 = arith.constant 2.500000e-01 : f32
    %304 = vector.broadcast %cst_106 : f32 to vector<3x3xf32>
    %305 = arith.mulf %303, %304 : vector<3x3xf32>
    %cst_107 = arith.constant dense<0xFF800000> : vector<3xf32>
    %306 = vector.multi_reduction <maximumf>, %305, %cst_107 [1] : vector<3x3xf32> to vector<3xf32>
    %307 = vector.shape_cast %306 : vector<3xf32> to vector<3x1xf32>
    %308 = vector.broadcast %307 : vector<3x1xf32> to vector<3x3xf32>
    %309 = arith.subf %305, %308 : vector<3x3xf32>
    %310 = math.exp %309 : vector<3x3xf32>
    %cst_108 = arith.constant dense<0.000000e+00> : vector<3xf32>
    %311 = vector.multi_reduction <add>, %310, %cst_108 [1] : vector<3x3xf32> to vector<3xf32>
    %312 = vector.shape_cast %311 : vector<3xf32> to vector<3x1xf32>
    %313 = tpu.reciprocal %312 {approx = true} : vector<3x1xf32> -> vector<3x1xf32>
    %314 = vector.broadcast %313 : vector<3x1xf32> to vector<3x3xf32>
    %315 = arith.mulf %310, %314 : vector<3x3xf32>
    %cst_109 = arith.constant dense<0.000000e+00> : vector<3x16xf32>
    %316 = tpu.matmul %315, %302, %cst_109 {dimension_numbers = #tpu.dot_dimension_numbers<[1], [0], [0], [1], [0, 0, 1, 1], [], []>} : vector<3x3xf32>, vector<3x16xf32>, vector<3x16xf32> -> vector<3x16xf32>
    %317 = tpu.concatenate %265, %282, %299, %316 in 1 : vector<3x16xf32>, vector<3x16xf32>, vector<3x16xf32>, vector<3x16xf32> -> vector<3x64xf32>
    %318 = vector.extract_strided_slice %37 {offsets = [12, 0], sizes = [3, 192], strides = [1, 1]} : vector<24x192xf32> to vector<3x192xf32>
    %319 = vector.extract_strided_slice %318 {offsets = [0, 0], sizes = [3, 16], strides = [1, 1]} : vector<3x192xf32> to vector<3x16xf32>
    %320 = vector.extract_strided_slice %318 {offsets = [0, 64], sizes = [3, 16], strides = [1, 1]} : vector<3x192xf32> to vector<3x16xf32>
    %321 = vector.extract_strided_slice %318 {offsets = [0, 128], sizes = [3, 16], strides = [1, 1]} : vector<3x192xf32> to vector<3x16xf32>
    %cst_110 = arith.constant dense<0.000000e+00> : vector<3x3xf32>
    %322 = tpu.matmul %319, %320, %cst_110 {dimension_numbers = #tpu.dot_dimension_numbers<[1], [1], [0], [0], [0, 0, 1, 0], [], []>} : vector<3x16xf32>, vector<3x16xf32>, vector<3x3xf32> -> vector<3x3xf32>
    %cst_111 = arith.constant 2.500000e-01 : f32
    %323 = vector.broadcast %cst_111 : f32 to vector<3x3xf32>
    %324 = arith.mulf %322, %323 : vector<3x3xf32>
    %cst_112 = arith.constant dense<0xFF800000> : vector<3xf32>
    %325 = vector.multi_reduction <maximumf>, %324, %cst_112 [1] : vector<3x3xf32> to vector<3xf32>
    %326 = vector.shape_cast %325 : vector<3xf32> to vector<3x1xf32>
    %327 = vector.broadcast %326 : vector<3x1xf32> to vector<3x3xf32>
    %328 = arith.subf %324, %327 : vector<3x3xf32>
    %329 = math.exp %328 : vector<3x3xf32>
    %cst_113 = arith.constant dense<0.000000e+00> : vector<3xf32>
    %330 = vector.multi_reduction <add>, %329, %cst_113 [1] : vector<3x3xf32> to vector<3xf32>
    %331 = vector.shape_cast %330 : vector<3xf32> to vector<3x1xf32>
    %332 = tpu.reciprocal %331 {approx = true} : vector<3x1xf32> -> vector<3x1xf32>
    %333 = vector.broadcast %332 : vector<3x1xf32> to vector<3x3xf32>
    %334 = arith.mulf %329, %333 : vector<3x3xf32>
    %cst_114 = arith.constant dense<0.000000e+00> : vector<3x16xf32>
    %335 = tpu.matmul %334, %321, %cst_114 {dimension_numbers = #tpu.dot_dimension_numbers<[1], [0], [0], [1], [0, 0, 1, 1], [], []>} : vector<3x3xf32>, vector<3x16xf32>, vector<3x16xf32> -> vector<3x16xf32>
    %336 = vector.extract_strided_slice %318 {offsets = [0, 16], sizes = [3, 16], strides = [1, 1]} : vector<3x192xf32> to vector<3x16xf32>
    %337 = vector.extract_strided_slice %318 {offsets = [0, 80], sizes = [3, 16], strides = [1, 1]} : vector<3x192xf32> to vector<3x16xf32>
    %338 = vector.extract_strided_slice %318 {offsets = [0, 144], sizes = [3, 16], strides = [1, 1]} : vector<3x192xf32> to vector<3x16xf32>
    %cst_115 = arith.constant dense<0.000000e+00> : vector<3x3xf32>
    %339 = tpu.matmul %336, %337, %cst_115 {dimension_numbers = #tpu.dot_dimension_numbers<[1], [1], [0], [0], [0, 0, 1, 0], [], []>} : vector<3x16xf32>, vector<3x16xf32>, vector<3x3xf32> -> vector<3x3xf32>
    %cst_116 = arith.constant 2.500000e-01 : f32
    %340 = vector.broadcast %cst_116 : f32 to vector<3x3xf32>
    %341 = arith.mulf %339, %340 : vector<3x3xf32>
    %cst_117 = arith.constant dense<0xFF800000> : vector<3xf32>
    %342 = vector.multi_reduction <maximumf>, %341, %cst_117 [1] : vector<3x3xf32> to vector<3xf32>
    %343 = vector.shape_cast %342 : vector<3xf32> to vector<3x1xf32>
    %344 = vector.broadcast %343 : vector<3x1xf32> to vector<3x3xf32>
    %345 = arith.subf %341, %344 : vector<3x3xf32>
    %346 = math.exp %345 : vector<3x3xf32>
    %cst_118 = arith.constant dense<0.000000e+00> : vector<3xf32>
    %347 = vector.multi_reduction <add>, %346, %cst_118 [1] : vector<3x3xf32> to vector<3xf32>
    %348 = vector.shape_cast %347 : vector<3xf32> to vector<3x1xf32>
    %349 = tpu.reciprocal %348 {approx = true} : vector<3x1xf32> -> vector<3x1xf32>
    %350 = vector.broadcast %349 : vector<3x1xf32> to vector<3x3xf32>
    %351 = arith.mulf %346, %350 : vector<3x3xf32>
    %cst_119 = arith.constant dense<0.000000e+00> : vector<3x16xf32>
    %352 = tpu.matmul %351, %338, %cst_119 {dimension_numbers = #tpu.dot_dimension_numbers<[1], [0], [0], [1], [0, 0, 1, 1], [], []>} : vector<3x3xf32>, vector<3x16xf32>, vector<3x16xf32> -> vector<3x16xf32>
    %353 = vector.extract_strided_slice %318 {offsets = [0, 32], sizes = [3, 16], strides = [1, 1]} : vector<3x192xf32> to vector<3x16xf32>
    %354 = vector.extract_strided_slice %318 {offsets = [0, 96], sizes = [3, 16], strides = [1, 1]} : vector<3x192xf32> to vector<3x16xf32>
    %355 = vector.extract_strided_slice %318 {offsets = [0, 160], sizes = [3, 16], strides = [1, 1]} : vector<3x192xf32> to vector<3x16xf32>
    %cst_120 = arith.constant dense<0.000000e+00> : vector<3x3xf32>
    %356 = tpu.matmul %353, %354, %cst_120 {dimension_numbers = #tpu.dot_dimension_numbers<[1], [1], [0], [0], [0, 0, 1, 0], [], []>} : vector<3x16xf32>, vector<3x16xf32>, vector<3x3xf32> -> vector<3x3xf32>
    %cst_121 = arith.constant 2.500000e-01 : f32
    %357 = vector.broadcast %cst_121 : f32 to vector<3x3xf32>
    %358 = arith.mulf %356, %357 : vector<3x3xf32>
    %cst_122 = arith.constant dense<0xFF800000> : vector<3xf32>
    %359 = vector.multi_reduction <maximumf>, %358, %cst_122 [1] : vector<3x3xf32> to vector<3xf32>
    %360 = vector.shape_cast %359 : vector<3xf32> to vector<3x1xf32>
    %361 = vector.broadcast %360 : vector<3x1xf32> to vector<3x3xf32>
    %362 = arith.subf %358, %361 : vector<3x3xf32>
    %363 = math.exp %362 : vector<3x3xf32>
    %cst_123 = arith.constant dense<0.000000e+00> : vector<3xf32>
    %364 = vector.multi_reduction <add>, %363, %cst_123 [1] : vector<3x3xf32> to vector<3xf32>
    %365 = vector.shape_cast %364 : vector<3xf32> to vector<3x1xf32>
    %366 = tpu.reciprocal %365 {approx = true} : vector<3x1xf32> -> vector<3x1xf32>
    %367 = vector.broadcast %366 : vector<3x1xf32> to vector<3x3xf32>
    %368 = arith.mulf %363, %367 : vector<3x3xf32>
    %cst_124 = arith.constant dense<0.000000e+00> : vector<3x16xf32>
    %369 = tpu.matmul %368, %355, %cst_124 {dimension_numbers = #tpu.dot_dimension_numbers<[1], [0], [0], [1], [0, 0, 1, 1], [], []>} : vector<3x3xf32>, vector<3x16xf32>, vector<3x16xf32> -> vector<3x16xf32>
    %370 = vector.extract_strided_slice %318 {offsets = [0, 48], sizes = [3, 16], strides = [1, 1]} : vector<3x192xf32> to vector<3x16xf32>
    %371 = vector.extract_strided_slice %318 {offsets = [0, 112], sizes = [3, 16], strides = [1, 1]} : vector<3x192xf32> to vector<3x16xf32>
    %372 = vector.extract_strided_slice %318 {offsets = [0, 176], sizes = [3, 16], strides = [1, 1]} : vector<3x192xf32> to vector<3x16xf32>
    %cst_125 = arith.constant dense<0.000000e+00> : vector<3x3xf32>
    %373 = tpu.matmul %370, %371, %cst_125 {dimension_numbers = #tpu.dot_dimension_numbers<[1], [1], [0], [0], [0, 0, 1, 0], [], []>} : vector<3x16xf32>, vector<3x16xf32>, vector<3x3xf32> -> vector<3x3xf32>
    %cst_126 = arith.constant 2.500000e-01 : f32
    %374 = vector.broadcast %cst_126 : f32 to vector<3x3xf32>
    %375 = arith.mulf %373, %374 : vector<3x3xf32>
    %cst_127 = arith.constant dense<0xFF800000> : vector<3xf32>
    %376 = vector.multi_reduction <maximumf>, %375, %cst_127 [1] : vector<3x3xf32> to vector<3xf32>
    %377 = vector.shape_cast %376 : vector<3xf32> to vector<3x1xf32>
    %378 = vector.broadcast %377 : vector<3x1xf32> to vector<3x3xf32>
    %379 = arith.subf %375, %378 : vector<3x3xf32>
    %380 = math.exp %379 : vector<3x3xf32>
    %cst_128 = arith.constant dense<0.000000e+00> : vector<3xf32>
    %381 = vector.multi_reduction <add>, %380, %cst_128 [1] : vector<3x3xf32> to vector<3xf32>
    %382 = vector.shape_cast %381 : vector<3xf32> to vector<3x1xf32>
    %383 = tpu.reciprocal %382 {approx = true} : vector<3x1xf32> -> vector<3x1xf32>
    %384 = vector.broadcast %383 : vector<3x1xf32> to vector<3x3xf32>
    %385 = arith.mulf %380, %384 : vector<3x3xf32>
    %cst_129 = arith.constant dense<0.000000e+00> : vector<3x16xf32>
    %386 = tpu.matmul %385, %372, %cst_129 {dimension_numbers = #tpu.dot_dimension_numbers<[1], [0], [0], [1], [0, 0, 1, 1], [], []>} : vector<3x3xf32>, vector<3x16xf32>, vector<3x16xf32> -> vector<3x16xf32>
    %387 = tpu.concatenate %335, %352, %369, %386 in 1 : vector<3x16xf32>, vector<3x16xf32>, vector<3x16xf32>, vector<3x16xf32> -> vector<3x64xf32>
    %388 = vector.extract_strided_slice %37 {offsets = [15, 0], sizes = [3, 192], strides = [1, 1]} : vector<24x192xf32> to vector<3x192xf32>
    %389 = vector.extract_strided_slice %388 {offsets = [0, 0], sizes = [3, 16], strides = [1, 1]} : vector<3x192xf32> to vector<3x16xf32>
    %390 = vector.extract_strided_slice %388 {offsets = [0, 64], sizes = [3, 16], strides = [1, 1]} : vector<3x192xf32> to vector<3x16xf32>
    %391 = vector.extract_strided_slice %388 {offsets = [0, 128], sizes = [3, 16], strides = [1, 1]} : vector<3x192xf32> to vector<3x16xf32>
    %cst_130 = arith.constant dense<0.000000e+00> : vector<3x3xf32>
    %392 = tpu.matmul %389, %390, %cst_130 {dimension_numbers = #tpu.dot_dimension_numbers<[1], [1], [0], [0], [0, 0, 1, 0], [], []>} : vector<3x16xf32>, vector<3x16xf32>, vector<3x3xf32> -> vector<3x3xf32>
    %cst_131 = arith.constant 2.500000e-01 : f32
    %393 = vector.broadcast %cst_131 : f32 to vector<3x3xf32>
    %394 = arith.mulf %392, %393 : vector<3x3xf32>
    %cst_132 = arith.constant dense<0xFF800000> : vector<3xf32>
    %395 = vector.multi_reduction <maximumf>, %394, %cst_132 [1] : vector<3x3xf32> to vector<3xf32>
    %396 = vector.shape_cast %395 : vector<3xf32> to vector<3x1xf32>
    %397 = vector.broadcast %396 : vector<3x1xf32> to vector<3x3xf32>
    %398 = arith.subf %394, %397 : vector<3x3xf32>
    %399 = math.exp %398 : vector<3x3xf32>
    %cst_133 = arith.constant dense<0.000000e+00> : vector<3xf32>
    %400 = vector.multi_reduction <add>, %399, %cst_133 [1] : vector<3x3xf32> to vector<3xf32>
    %401 = vector.shape_cast %400 : vector<3xf32> to vector<3x1xf32>
    %402 = tpu.reciprocal %401 {approx = true} : vector<3x1xf32> -> vector<3x1xf32>
    %403 = vector.broadcast %402 : vector<3x1xf32> to vector<3x3xf32>
    %404 = arith.mulf %399, %403 : vector<3x3xf32>
    %cst_134 = arith.constant dense<0.000000e+00> : vector<3x16xf32>
    %405 = tpu.matmul %404, %391, %cst_134 {dimension_numbers = #tpu.dot_dimension_numbers<[1], [0], [0], [1], [0, 0, 1, 1], [], []>} : vector<3x3xf32>, vector<3x16xf32>, vector<3x16xf32> -> vector<3x16xf32>
    %406 = vector.extract_strided_slice %388 {offsets = [0, 16], sizes = [3, 16], strides = [1, 1]} : vector<3x192xf32> to vector<3x16xf32>
    %407 = vector.extract_strided_slice %388 {offsets = [0, 80], sizes = [3, 16], strides = [1, 1]} : vector<3x192xf32> to vector<3x16xf32>
    %408 = vector.extract_strided_slice %388 {offsets = [0, 144], sizes = [3, 16], strides = [1, 1]} : vector<3x192xf32> to vector<3x16xf32>
    %cst_135 = arith.constant dense<0.000000e+00> : vector<3x3xf32>
    %409 = tpu.matmul %406, %407, %cst_135 {dimension_numbers = #tpu.dot_dimension_numbers<[1], [1], [0], [0], [0, 0, 1, 0], [], []>} : vector<3x16xf32>, vector<3x16xf32>, vector<3x3xf32> -> vector<3x3xf32>
    %cst_136 = arith.constant 2.500000e-01 : f32
    %410 = vector.broadcast %cst_136 : f32 to vector<3x3xf32>
    %411 = arith.mulf %409, %410 : vector<3x3xf32>
    %cst_137 = arith.constant dense<0xFF800000> : vector<3xf32>
    %412 = vector.multi_reduction <maximumf>, %411, %cst_137 [1] : vector<3x3xf32> to vector<3xf32>
    %413 = vector.shape_cast %412 : vector<3xf32> to vector<3x1xf32>
    %414 = vector.broadcast %413 : vector<3x1xf32> to vector<3x3xf32>
    %415 = arith.subf %411, %414 : vector<3x3xf32>
    %416 = math.exp %415 : vector<3x3xf32>
    %cst_138 = arith.constant dense<0.000000e+00> : vector<3xf32>
    %417 = vector.multi_reduction <add>, %416, %cst_138 [1] : vector<3x3xf32> to vector<3xf32>
    %418 = vector.shape_cast %417 : vector<3xf32> to vector<3x1xf32>
    %419 = tpu.reciprocal %418 {approx = true} : vector<3x1xf32> -> vector<3x1xf32>
    %420 = vector.broadcast %419 : vector<3x1xf32> to vector<3x3xf32>
    %421 = arith.mulf %416, %420 : vector<3x3xf32>
    %cst_139 = arith.constant dense<0.000000e+00> : vector<3x16xf32>
    %422 = tpu.matmul %421, %408, %cst_139 {dimension_numbers = #tpu.dot_dimension_numbers<[1], [0], [0], [1], [0, 0, 1, 1], [], []>} : vector<3x3xf32>, vector<3x16xf32>, vector<3x16xf32> -> vector<3x16xf32>
    %423 = vector.extract_strided_slice %388 {offsets = [0, 32], sizes = [3, 16], strides = [1, 1]} : vector<3x192xf32> to vector<3x16xf32>
    %424 = vector.extract_strided_slice %388 {offsets = [0, 96], sizes = [3, 16], strides = [1, 1]} : vector<3x192xf32> to vector<3x16xf32>
    %425 = vector.extract_strided_slice %388 {offsets = [0, 160], sizes = [3, 16], strides = [1, 1]} : vector<3x192xf32> to vector<3x16xf32>
    %cst_140 = arith.constant dense<0.000000e+00> : vector<3x3xf32>
    %426 = tpu.matmul %423, %424, %cst_140 {dimension_numbers = #tpu.dot_dimension_numbers<[1], [1], [0], [0], [0, 0, 1, 0], [], []>} : vector<3x16xf32>, vector<3x16xf32>, vector<3x3xf32> -> vector<3x3xf32>
    %cst_141 = arith.constant 2.500000e-01 : f32
    %427 = vector.broadcast %cst_141 : f32 to vector<3x3xf32>
    %428 = arith.mulf %426, %427 : vector<3x3xf32>
    %cst_142 = arith.constant dense<0xFF800000> : vector<3xf32>
    %429 = vector.multi_reduction <maximumf>, %428, %cst_142 [1] : vector<3x3xf32> to vector<3xf32>
    %430 = vector.shape_cast %429 : vector<3xf32> to vector<3x1xf32>
    %431 = vector.broadcast %430 : vector<3x1xf32> to vector<3x3xf32>
    %432 = arith.subf %428, %431 : vector<3x3xf32>
    %433 = math.exp %432 : vector<3x3xf32>
    %cst_143 = arith.constant dense<0.000000e+00> : vector<3xf32>
    %434 = vector.multi_reduction <add>, %433, %cst_143 [1] : vector<3x3xf32> to vector<3xf32>
    %435 = vector.shape_cast %434 : vector<3xf32> to vector<3x1xf32>
    %436 = tpu.reciprocal %435 {approx = true} : vector<3x1xf32> -> vector<3x1xf32>
    %437 = vector.broadcast %436 : vector<3x1xf32> to vector<3x3xf32>
    %438 = arith.mulf %433, %437 : vector<3x3xf32>
    %cst_144 = arith.constant dense<0.000000e+00> : vector<3x16xf32>
    %439 = tpu.matmul %438, %425, %cst_144 {dimension_numbers = #tpu.dot_dimension_numbers<[1], [0], [0], [1], [0, 0, 1, 1], [], []>} : vector<3x3xf32>, vector<3x16xf32>, vector<3x16xf32> -> vector<3x16xf32>
    %440 = vector.extract_strided_slice %388 {offsets = [0, 48], sizes = [3, 16], strides = [1, 1]} : vector<3x192xf32> to vector<3x16xf32>
    %441 = vector.extract_strided_slice %388 {offsets = [0, 112], sizes = [3, 16], strides = [1, 1]} : vector<3x192xf32> to vector<3x16xf32>
    %442 = vector.extract_strided_slice %388 {offsets = [0, 176], sizes = [3, 16], strides = [1, 1]} : vector<3x192xf32> to vector<3x16xf32>
    %cst_145 = arith.constant dense<0.000000e+00> : vector<3x3xf32>
    %443 = tpu.matmul %440, %441, %cst_145 {dimension_numbers = #tpu.dot_dimension_numbers<[1], [1], [0], [0], [0, 0, 1, 0], [], []>} : vector<3x16xf32>, vector<3x16xf32>, vector<3x3xf32> -> vector<3x3xf32>
    %cst_146 = arith.constant 2.500000e-01 : f32
    %444 = vector.broadcast %cst_146 : f32 to vector<3x3xf32>
    %445 = arith.mulf %443, %444 : vector<3x3xf32>
    %cst_147 = arith.constant dense<0xFF800000> : vector<3xf32>
    %446 = vector.multi_reduction <maximumf>, %445, %cst_147 [1] : vector<3x3xf32> to vector<3xf32>
    %447 = vector.shape_cast %446 : vector<3xf32> to vector<3x1xf32>
    %448 = vector.broadcast %447 : vector<3x1xf32> to vector<3x3xf32>
    %449 = arith.subf %445, %448 : vector<3x3xf32>
    %450 = math.exp %449 : vector<3x3xf32>
    %cst_148 = arith.constant dense<0.000000e+00> : vector<3xf32>
    %451 = vector.multi_reduction <add>, %450, %cst_148 [1] : vector<3x3xf32> to vector<3xf32>
    %452 = vector.shape_cast %451 : vector<3xf32> to vector<3x1xf32>
    %453 = tpu.reciprocal %452 {approx = true} : vector<3x1xf32> -> vector<3x1xf32>
    %454 = vector.broadcast %453 : vector<3x1xf32> to vector<3x3xf32>
    %455 = arith.mulf %450, %454 : vector<3x3xf32>
    %cst_149 = arith.constant dense<0.000000e+00> : vector<3x16xf32>
    %456 = tpu.matmul %455, %442, %cst_149 {dimension_numbers = #tpu.dot_dimension_numbers<[1], [0], [0], [1], [0, 0, 1, 1], [], []>} : vector<3x3xf32>, vector<3x16xf32>, vector<3x16xf32> -> vector<3x16xf32>
    %457 = tpu.concatenate %405, %422, %439, %456 in 1 : vector<3x16xf32>, vector<3x16xf32>, vector<3x16xf32>, vector<3x16xf32> -> vector<3x64xf32>
    %458 = vector.extract_strided_slice %37 {offsets = [18, 0], sizes = [3, 192], strides = [1, 1]} : vector<24x192xf32> to vector<3x192xf32>
    %459 = vector.extract_strided_slice %458 {offsets = [0, 0], sizes = [3, 16], strides = [1, 1]} : vector<3x192xf32> to vector<3x16xf32>
    %460 = vector.extract_strided_slice %458 {offsets = [0, 64], sizes = [3, 16], strides = [1, 1]} : vector<3x192xf32> to vector<3x16xf32>
    %461 = vector.extract_strided_slice %458 {offsets = [0, 128], sizes = [3, 16], strides = [1, 1]} : vector<3x192xf32> to vector<3x16xf32>
    %cst_150 = arith.constant dense<0.000000e+00> : vector<3x3xf32>
    %462 = tpu.matmul %459, %460, %cst_150 {dimension_numbers = #tpu.dot_dimension_numbers<[1], [1], [0], [0], [0, 0, 1, 0], [], []>} : vector<3x16xf32>, vector<3x16xf32>, vector<3x3xf32> -> vector<3x3xf32>
    %cst_151 = arith.constant 2.500000e-01 : f32
    %463 = vector.broadcast %cst_151 : f32 to vector<3x3xf32>
    %464 = arith.mulf %462, %463 : vector<3x3xf32>
    %cst_152 = arith.constant dense<0xFF800000> : vector<3xf32>
    %465 = vector.multi_reduction <maximumf>, %464, %cst_152 [1] : vector<3x3xf32> to vector<3xf32>
    %466 = vector.shape_cast %465 : vector<3xf32> to vector<3x1xf32>
    %467 = vector.broadcast %466 : vector<3x1xf32> to vector<3x3xf32>
    %468 = arith.subf %464, %467 : vector<3x3xf32>
    %469 = math.exp %468 : vector<3x3xf32>
    %cst_153 = arith.constant dense<0.000000e+00> : vector<3xf32>
    %470 = vector.multi_reduction <add>, %469, %cst_153 [1] : vector<3x3xf32> to vector<3xf32>
    %471 = vector.shape_cast %470 : vector<3xf32> to vector<3x1xf32>
    %472 = tpu.reciprocal %471 {approx = true} : vector<3x1xf32> -> vector<3x1xf32>
    %473 = vector.broadcast %472 : vector<3x1xf32> to vector<3x3xf32>
    %474 = arith.mulf %469, %473 : vector<3x3xf32>
    %cst_154 = arith.constant dense<0.000000e+00> : vector<3x16xf32>
    %475 = tpu.matmul %474, %461, %cst_154 {dimension_numbers = #tpu.dot_dimension_numbers<[1], [0], [0], [1], [0, 0, 1, 1], [], []>} : vector<3x3xf32>, vector<3x16xf32>, vector<3x16xf32> -> vector<3x16xf32>
    %476 = vector.extract_strided_slice %458 {offsets = [0, 16], sizes = [3, 16], strides = [1, 1]} : vector<3x192xf32> to vector<3x16xf32>
    %477 = vector.extract_strided_slice %458 {offsets = [0, 80], sizes = [3, 16], strides = [1, 1]} : vector<3x192xf32> to vector<3x16xf32>
    %478 = vector.extract_strided_slice %458 {offsets = [0, 144], sizes = [3, 16], strides = [1, 1]} : vector<3x192xf32> to vector<3x16xf32>
    %cst_155 = arith.constant dense<0.000000e+00> : vector<3x3xf32>
    %479 = tpu.matmul %476, %477, %cst_155 {dimension_numbers = #tpu.dot_dimension_numbers<[1], [1], [0], [0], [0, 0, 1, 0], [], []>} : vector<3x16xf32>, vector<3x16xf32>, vector<3x3xf32> -> vector<3x3xf32>
    %cst_156 = arith.constant 2.500000e-01 : f32
    %480 = vector.broadcast %cst_156 : f32 to vector<3x3xf32>
    %481 = arith.mulf %479, %480 : vector<3x3xf32>
    %cst_157 = arith.constant dense<0xFF800000> : vector<3xf32>
    %482 = vector.multi_reduction <maximumf>, %481, %cst_157 [1] : vector<3x3xf32> to vector<3xf32>
    %483 = vector.shape_cast %482 : vector<3xf32> to vector<3x1xf32>
    %484 = vector.broadcast %483 : vector<3x1xf32> to vector<3x3xf32>
    %485 = arith.subf %481, %484 : vector<3x3xf32>
    %486 = math.exp %485 : vector<3x3xf32>
    %cst_158 = arith.constant dense<0.000000e+00> : vector<3xf32>
    %487 = vector.multi_reduction <add>, %486, %cst_158 [1] : vector<3x3xf32> to vector<3xf32>
    %488 = vector.shape_cast %487 : vector<3xf32> to vector<3x1xf32>
    %489 = tpu.reciprocal %488 {approx = true} : vector<3x1xf32> -> vector<3x1xf32>
    %490 = vector.broadcast %489 : vector<3x1xf32> to vector<3x3xf32>
    %491 = arith.mulf %486, %490 : vector<3x3xf32>
    %cst_159 = arith.constant dense<0.000000e+00> : vector<3x16xf32>
    %492 = tpu.matmul %491, %478, %cst_159 {dimension_numbers = #tpu.dot_dimension_numbers<[1], [0], [0], [1], [0, 0, 1, 1], [], []>} : vector<3x3xf32>, vector<3x16xf32>, vector<3x16xf32> -> vector<3x16xf32>
    %493 = vector.extract_strided_slice %458 {offsets = [0, 32], sizes = [3, 16], strides = [1, 1]} : vector<3x192xf32> to vector<3x16xf32>
    %494 = vector.extract_strided_slice %458 {offsets = [0, 96], sizes = [3, 16], strides = [1, 1]} : vector<3x192xf32> to vector<3x16xf32>
    %495 = vector.extract_strided_slice %458 {offsets = [0, 160], sizes = [3, 16], strides = [1, 1]} : vector<3x192xf32> to vector<3x16xf32>
    %cst_160 = arith.constant dense<0.000000e+00> : vector<3x3xf32>
    %496 = tpu.matmul %493, %494, %cst_160 {dimension_numbers = #tpu.dot_dimension_numbers<[1], [1], [0], [0], [0, 0, 1, 0], [], []>} : vector<3x16xf32>, vector<3x16xf32>, vector<3x3xf32> -> vector<3x3xf32>
    %cst_161 = arith.constant 2.500000e-01 : f32
    %497 = vector.broadcast %cst_161 : f32 to vector<3x3xf32>
    %498 = arith.mulf %496, %497 : vector<3x3xf32>
    %cst_162 = arith.constant dense<0xFF800000> : vector<3xf32>
    %499 = vector.multi_reduction <maximumf>, %498, %cst_162 [1] : vector<3x3xf32> to vector<3xf32>
    %500 = vector.shape_cast %499 : vector<3xf32> to vector<3x1xf32>
    %501 = vector.broadcast %500 : vector<3x1xf32> to vector<3x3xf32>
    %502 = arith.subf %498, %501 : vector<3x3xf32>
    %503 = math.exp %502 : vector<3x3xf32>
    %cst_163 = arith.constant dense<0.000000e+00> : vector<3xf32>
    %504 = vector.multi_reduction <add>, %503, %cst_163 [1] : vector<3x3xf32> to vector<3xf32>
    %505 = vector.shape_cast %504 : vector<3xf32> to vector<3x1xf32>
    %506 = tpu.reciprocal %505 {approx = true} : vector<3x1xf32> -> vector<3x1xf32>
    %507 = vector.broadcast %506 : vector<3x1xf32> to vector<3x3xf32>
    %508 = arith.mulf %503, %507 : vector<3x3xf32>
    %cst_164 = arith.constant dense<0.000000e+00> : vector<3x16xf32>
    %509 = tpu.matmul %508, %495, %cst_164 {dimension_numbers = #tpu.dot_dimension_numbers<[1], [0], [0], [1], [0, 0, 1, 1], [], []>} : vector<3x3xf32>, vector<3x16xf32>, vector<3x16xf32> -> vector<3x16xf32>
    %510 = vector.extract_strided_slice %458 {offsets = [0, 48], sizes = [3, 16], strides = [1, 1]} : vector<3x192xf32> to vector<3x16xf32>
    %511 = vector.extract_strided_slice %458 {offsets = [0, 112], sizes = [3, 16], strides = [1, 1]} : vector<3x192xf32> to vector<3x16xf32>
    %512 = vector.extract_strided_slice %458 {offsets = [0, 176], sizes = [3, 16], strides = [1, 1]} : vector<3x192xf32> to vector<3x16xf32>
    %cst_165 = arith.constant dense<0.000000e+00> : vector<3x3xf32>
    %513 = tpu.matmul %510, %511, %cst_165 {dimension_numbers = #tpu.dot_dimension_numbers<[1], [1], [0], [0], [0, 0, 1, 0], [], []>} : vector<3x16xf32>, vector<3x16xf32>, vector<3x3xf32> -> vector<3x3xf32>
    %cst_166 = arith.constant 2.500000e-01 : f32
    %514 = vector.broadcast %cst_166 : f32 to vector<3x3xf32>
    %515 = arith.mulf %513, %514 : vector<3x3xf32>
    %cst_167 = arith.constant dense<0xFF800000> : vector<3xf32>
    %516 = vector.multi_reduction <maximumf>, %515, %cst_167 [1] : vector<3x3xf32> to vector<3xf32>
    %517 = vector.shape_cast %516 : vector<3xf32> to vector<3x1xf32>
    %518 = vector.broadcast %517 : vector<3x1xf32> to vector<3x3xf32>
    %519 = arith.subf %515, %518 : vector<3x3xf32>
    %520 = math.exp %519 : vector<3x3xf32>
    %cst_168 = arith.constant dense<0.000000e+00> : vector<3xf32>
    %521 = vector.multi_reduction <add>, %520, %cst_168 [1] : vector<3x3xf32> to vector<3xf32>
    %522 = vector.shape_cast %521 : vector<3xf32> to vector<3x1xf32>
    %523 = tpu.reciprocal %522 {approx = true} : vector<3x1xf32> -> vector<3x1xf32>
    %524 = vector.broadcast %523 : vector<3x1xf32> to vector<3x3xf32>
    %525 = arith.mulf %520, %524 : vector<3x3xf32>
    %cst_169 = arith.constant dense<0.000000e+00> : vector<3x16xf32>
    %526 = tpu.matmul %525, %512, %cst_169 {dimension_numbers = #tpu.dot_dimension_numbers<[1], [0], [0], [1], [0, 0, 1, 1], [], []>} : vector<3x3xf32>, vector<3x16xf32>, vector<3x16xf32> -> vector<3x16xf32>
    %527 = tpu.concatenate %475, %492, %509, %526 in 1 : vector<3x16xf32>, vector<3x16xf32>, vector<3x16xf32>, vector<3x16xf32> -> vector<3x64xf32>
    %528 = vector.extract_strided_slice %37 {offsets = [21, 0], sizes = [3, 192], strides = [1, 1]} : vector<24x192xf32> to vector<3x192xf32>
    %529 = vector.extract_strided_slice %528 {offsets = [0, 0], sizes = [3, 16], strides = [1, 1]} : vector<3x192xf32> to vector<3x16xf32>
    %530 = vector.extract_strided_slice %528 {offsets = [0, 64], sizes = [3, 16], strides = [1, 1]} : vector<3x192xf32> to vector<3x16xf32>
    %531 = vector.extract_strided_slice %528 {offsets = [0, 128], sizes = [3, 16], strides = [1, 1]} : vector<3x192xf32> to vector<3x16xf32>
    %cst_170 = arith.constant dense<0.000000e+00> : vector<3x3xf32>
    %532 = tpu.matmul %529, %530, %cst_170 {dimension_numbers = #tpu.dot_dimension_numbers<[1], [1], [0], [0], [0, 0, 1, 0], [], []>} : vector<3x16xf32>, vector<3x16xf32>, vector<3x3xf32> -> vector<3x3xf32>
    %cst_171 = arith.constant 2.500000e-01 : f32
    %533 = vector.broadcast %cst_171 : f32 to vector<3x3xf32>
    %534 = arith.mulf %532, %533 : vector<3x3xf32>
    %cst_172 = arith.constant dense<0xFF800000> : vector<3xf32>
    %535 = vector.multi_reduction <maximumf>, %534, %cst_172 [1] : vector<3x3xf32> to vector<3xf32>
    %536 = vector.shape_cast %535 : vector<3xf32> to vector<3x1xf32>
    %537 = vector.broadcast %536 : vector<3x1xf32> to vector<3x3xf32>
    %538 = arith.subf %534, %537 : vector<3x3xf32>
    %539 = math.exp %538 : vector<3x3xf32>
    %cst_173 = arith.constant dense<0.000000e+00> : vector<3xf32>
    %540 = vector.multi_reduction <add>, %539, %cst_173 [1] : vector<3x3xf32> to vector<3xf32>
    %541 = vector.shape_cast %540 : vector<3xf32> to vector<3x1xf32>
    %542 = tpu.reciprocal %541 {approx = true} : vector<3x1xf32> -> vector<3x1xf32>
    %543 = vector.broadcast %542 : vector<3x1xf32> to vector<3x3xf32>
    %544 = arith.mulf %539, %543 : vector<3x3xf32>
    %cst_174 = arith.constant dense<0.000000e+00> : vector<3x16xf32>
    %545 = tpu.matmul %544, %531, %cst_174 {dimension_numbers = #tpu.dot_dimension_numbers<[1], [0], [0], [1], [0, 0, 1, 1], [], []>} : vector<3x3xf32>, vector<3x16xf32>, vector<3x16xf32> -> vector<3x16xf32>
    %546 = vector.extract_strided_slice %528 {offsets = [0, 16], sizes = [3, 16], strides = [1, 1]} : vector<3x192xf32> to vector<3x16xf32>
    %547 = vector.extract_strided_slice %528 {offsets = [0, 80], sizes = [3, 16], strides = [1, 1]} : vector<3x192xf32> to vector<3x16xf32>
    %548 = vector.extract_strided_slice %528 {offsets = [0, 144], sizes = [3, 16], strides = [1, 1]} : vector<3x192xf32> to vector<3x16xf32>
    %cst_175 = arith.constant dense<0.000000e+00> : vector<3x3xf32>
    %549 = tpu.matmul %546, %547, %cst_175 {dimension_numbers = #tpu.dot_dimension_numbers<[1], [1], [0], [0], [0, 0, 1, 0], [], []>} : vector<3x16xf32>, vector<3x16xf32>, vector<3x3xf32> -> vector<3x3xf32>
    %cst_176 = arith.constant 2.500000e-01 : f32
    %550 = vector.broadcast %cst_176 : f32 to vector<3x3xf32>
    %551 = arith.mulf %549, %550 : vector<3x3xf32>
    %cst_177 = arith.constant dense<0xFF800000> : vector<3xf32>
    %552 = vector.multi_reduction <maximumf>, %551, %cst_177 [1] : vector<3x3xf32> to vector<3xf32>
    %553 = vector.shape_cast %552 : vector<3xf32> to vector<3x1xf32>
    %554 = vector.broadcast %553 : vector<3x1xf32> to vector<3x3xf32>
    %555 = arith.subf %551, %554 : vector<3x3xf32>
    %556 = math.exp %555 : vector<3x3xf32>
    %cst_178 = arith.constant dense<0.000000e+00> : vector<3xf32>
    %557 = vector.multi_reduction <add>, %556, %cst_178 [1] : vector<3x3xf32> to vector<3xf32>
    %558 = vector.shape_cast %557 : vector<3xf32> to vector<3x1xf32>
    %559 = tpu.reciprocal %558 {approx = true} : vector<3x1xf32> -> vector<3x1xf32>
    %560 = vector.broadcast %559 : vector<3x1xf32> to vector<3x3xf32>
    %561 = arith.mulf %556, %560 : vector<3x3xf32>
    %cst_179 = arith.constant dense<0.000000e+00> : vector<3x16xf32>
    %562 = tpu.matmul %561, %548, %cst_179 {dimension_numbers = #tpu.dot_dimension_numbers<[1], [0], [0], [1], [0, 0, 1, 1], [], []>} : vector<3x3xf32>, vector<3x16xf32>, vector<3x16xf32> -> vector<3x16xf32>
    %563 = vector.extract_strided_slice %528 {offsets = [0, 32], sizes = [3, 16], strides = [1, 1]} : vector<3x192xf32> to vector<3x16xf32>
    %564 = vector.extract_strided_slice %528 {offsets = [0, 96], sizes = [3, 16], strides = [1, 1]} : vector<3x192xf32> to vector<3x16xf32>
    %565 = vector.extract_strided_slice %528 {offsets = [0, 160], sizes = [3, 16], strides = [1, 1]} : vector<3x192xf32> to vector<3x16xf32>
    %cst_180 = arith.constant dense<0.000000e+00> : vector<3x3xf32>
    %566 = tpu.matmul %563, %564, %cst_180 {dimension_numbers = #tpu.dot_dimension_numbers<[1], [1], [0], [0], [0, 0, 1, 0], [], []>} : vector<3x16xf32>, vector<3x16xf32>, vector<3x3xf32> -> vector<3x3xf32>
    %cst_181 = arith.constant 2.500000e-01 : f32
    %567 = vector.broadcast %cst_181 : f32 to vector<3x3xf32>
    %568 = arith.mulf %566, %567 : vector<3x3xf32>
    %cst_182 = arith.constant dense<0xFF800000> : vector<3xf32>
    %569 = vector.multi_reduction <maximumf>, %568, %cst_182 [1] : vector<3x3xf32> to vector<3xf32>
    %570 = vector.shape_cast %569 : vector<3xf32> to vector<3x1xf32>
    %571 = vector.broadcast %570 : vector<3x1xf32> to vector<3x3xf32>
    %572 = arith.subf %568, %571 : vector<3x3xf32>
    %573 = math.exp %572 : vector<3x3xf32>
    %cst_183 = arith.constant dense<0.000000e+00> : vector<3xf32>
    %574 = vector.multi_reduction <add>, %573, %cst_183 [1] : vector<3x3xf32> to vector<3xf32>
    %575 = vector.shape_cast %574 : vector<3xf32> to vector<3x1xf32>
    %576 = tpu.reciprocal %575 {approx = true} : vector<3x1xf32> -> vector<3x1xf32>
    %577 = vector.broadcast %576 : vector<3x1xf32> to vector<3x3xf32>
    %578 = arith.mulf %573, %577 : vector<3x3xf32>
    %cst_184 = arith.constant dense<0.000000e+00> : vector<3x16xf32>
    %579 = tpu.matmul %578, %565, %cst_184 {dimension_numbers = #tpu.dot_dimension_numbers<[1], [0], [0], [1], [0, 0, 1, 1], [], []>} : vector<3x3xf32>, vector<3x16xf32>, vector<3x16xf32> -> vector<3x16xf32>
    %580 = vector.extract_strided_slice %528 {offsets = [0, 48], sizes = [3, 16], strides = [1, 1]} : vector<3x192xf32> to vector<3x16xf32>
    %581 = vector.extract_strided_slice %528 {offsets = [0, 112], sizes = [3, 16], strides = [1, 1]} : vector<3x192xf32> to vector<3x16xf32>
    %582 = vector.extract_strided_slice %528 {offsets = [0, 176], sizes = [3, 16], strides = [1, 1]} : vector<3x192xf32> to vector<3x16xf32>
    %cst_185 = arith.constant dense<0.000000e+00> : vector<3x3xf32>
    %583 = tpu.matmul %580, %581, %cst_185 {dimension_numbers = #tpu.dot_dimension_numbers<[1], [1], [0], [0], [0, 0, 1, 0], [], []>} : vector<3x16xf32>, vector<3x16xf32>, vector<3x3xf32> -> vector<3x3xf32>
    %cst_186 = arith.constant 2.500000e-01 : f32
    %584 = vector.broadcast %cst_186 : f32 to vector<3x3xf32>
    %585 = arith.mulf %583, %584 : vector<3x3xf32>
    %cst_187 = arith.constant dense<0xFF800000> : vector<3xf32>
    %586 = vector.multi_reduction <maximumf>, %585, %cst_187 [1] : vector<3x3xf32> to vector<3xf32>
    %587 = vector.shape_cast %586 : vector<3xf32> to vector<3x1xf32>
    %588 = vector.broadcast %587 : vector<3x1xf32> to vector<3x3xf32>
    %589 = arith.subf %585, %588 : vector<3x3xf32>
    %590 = math.exp %589 : vector<3x3xf32>
    %cst_188 = arith.constant dense<0.000000e+00> : vector<3xf32>
    %591 = vector.multi_reduction <add>, %590, %cst_188 [1] : vector<3x3xf32> to vector<3xf32>
    %592 = vector.shape_cast %591 : vector<3xf32> to vector<3x1xf32>
    %593 = tpu.reciprocal %592 {approx = true} : vector<3x1xf32> -> vector<3x1xf32>
    %594 = vector.broadcast %593 : vector<3x1xf32> to vector<3x3xf32>
    %595 = arith.mulf %590, %594 : vector<3x3xf32>
    %cst_189 = arith.constant dense<0.000000e+00> : vector<3x16xf32>
    %596 = tpu.matmul %595, %582, %cst_189 {dimension_numbers = #tpu.dot_dimension_numbers<[1], [0], [0], [1], [0, 0, 1, 1], [], []>} : vector<3x3xf32>, vector<3x16xf32>, vector<3x16xf32> -> vector<3x16xf32>
    %597 = tpu.concatenate %545, %562, %579, %596 in 1 : vector<3x16xf32>, vector<3x16xf32>, vector<3x16xf32>, vector<3x16xf32> -> vector<3x64xf32>
    %598 = tpu.concatenate %107, %177, %247, %317, %387, %457, %527, %597 in 0 : vector<3x64xf32>, vector<3x64xf32>, vector<3x64xf32>, vector<3x64xf32>, vector<3x64xf32>, vector<3x64xf32>, vector<3x64xf32>, vector<3x64xf32> -> vector<24x64xf32>
    %cst_190 = arith.constant dense<0.000000e+00> : vector<24x64xf32>
    %599 = tpu.matmul %598, %5, %cst_190 {dimension_numbers = #tpu.dot_dimension_numbers<[1], [0], [0], [1], [0, 0, 1, 1], [], []>} : vector<24x64xf32>, vector<64x64xf32>, vector<24x64xf32> -> vector<24x64xf32>
    %600 = arith.addf %0, %599 : vector<24x64xf32>
    %601 = vector.broadcast %6 : vector<1x64xf32> to vector<24x64xf32>
    %602 = arith.addf %600, %601 : vector<24x64xf32>
    %cst_191 = arith.constant dense<0.000000e+00> : vector<24xf32>
    %603 = vector.multi_reduction <add>, %602, %cst_191 [1] : vector<24x64xf32> to vector<24xf32>
    %604 = vector.shape_cast %603 : vector<24xf32> to vector<24x1xf32>
    %cst_192 = arith.constant 6.400000e+01 : f32
    %605 = vector.broadcast %cst_192 : f32 to vector<24x1xf32>
    %606 = arith.divf %604, %605 : vector<24x1xf32>
    %607 = vector.broadcast %606 : vector<24x1xf32> to vector<24x64xf32>
    %608 = arith.subf %602, %607 : vector<24x64xf32>
    %609 = arith.mulf %608, %608 : vector<24x64xf32>
    %cst_193 = arith.constant dense<0.000000e+00> : vector<24xf32>
    %610 = vector.multi_reduction <add>, %609, %cst_193 [1] : vector<24x64xf32> to vector<24xf32>
    %611 = vector.shape_cast %610 : vector<24xf32> to vector<24x1xf32>
    %cst_194 = arith.constant 6.400000e+01 : f32
    %612 = vector.broadcast %cst_194 : f32 to vector<24x1xf32>
    %613 = arith.divf %611, %612 : vector<24x1xf32>
    %614 = vector.broadcast %606 : vector<24x1xf32> to vector<24x64xf32>
    %615 = arith.subf %602, %614 : vector<24x64xf32>
    %cst_195 = arith.constant 9.99999997E-7 : f32
    %616 = vector.broadcast %cst_195 : f32 to vector<24x1xf32>
    %617 = arith.addf %613, %616 : vector<24x1xf32>
    %618 = math.rsqrt %617 : vector<24x1xf32>
    %619 = vector.broadcast %618 : vector<24x1xf32> to vector<24x64xf32>
    %620 = arith.mulf %615, %619 : vector<24x64xf32>
    %621 = vector.broadcast %7 : vector<1x64xf32> to vector<24x64xf32>
    %622 = arith.mulf %620, %621 : vector<24x64xf32>
    %623 = vector.broadcast %8 : vector<1x64xf32> to vector<24x64xf32>
    %624 = arith.addf %622, %623 : vector<24x64xf32>
    %cst_196 = arith.constant dense<0.000000e+00> : vector<24x256xf32>
    %625 = tpu.matmul %624, %9, %cst_196 {dimension_numbers = #tpu.dot_dimension_numbers<[1], [0], [0], [1], [0, 0, 1, 1], [], []>} : vector<24x64xf32>, vector<64x256xf32>, vector<24x256xf32> -> vector<24x256xf32>
    %626 = vector.broadcast %10 : vector<1x256xf32> to vector<24x256xf32>
    %627 = arith.addf %625, %626 : vector<24x256xf32>
    %cst_197 = arith.constant 5.000000e-01 : f32
    %628 = vector.broadcast %cst_197 : f32 to vector<24x256xf32>
    %629 = arith.mulf %628, %627 : vector<24x256xf32>
    %cst_198 = arith.constant 0.707106769 : f32
    %630 = vector.broadcast %cst_198 : f32 to vector<24x256xf32>
    %631 = arith.mulf %627, %630 : vector<24x256xf32>
    %632 = math.absf %631 : vector<24x256xf32>
    %cst_199 = arith.constant 0.327591091 : f32
    %633 = vector.broadcast %cst_199 : f32 to vector<24x256xf32>
    %634 = arith.mulf %633, %632 : vector<24x256xf32>
    %cst_200 = arith.constant 1.000000e+00 : f32
    %635 = vector.broadcast %cst_200 : f32 to vector<24x256xf32>
    %636 = arith.addf %635, %634 : vector<24x256xf32>
    %cst_201 = arith.constant 1.000000e+00 : f32
    %637 = vector.broadcast %cst_201 : f32 to vector<24x256xf32>
    %638 = arith.divf %637, %636 : vector<24x256xf32>
    %cst_202 = arith.constant 1.06140542 : f32
    %639 = vector.broadcast %cst_202 : f32 to vector<24x256xf32>
    %640 = arith.mulf %639, %638 : vector<24x256xf32>
    %cst_203 = arith.constant -1.45315206 : f32
    %641 = vector.broadcast %cst_203 : f32 to vector<24x256xf32>
    %642 = arith.addf %640, %641 : vector<24x256xf32>
    %643 = arith.mulf %642, %638 : vector<24x256xf32>
    %cst_204 = arith.constant 1.42141378 : f32
    %644 = vector.broadcast %cst_204 : f32 to vector<24x256xf32>
    %645 = arith.addf %643, %644 : vector<24x256xf32>
    %646 = arith.mulf %645, %638 : vector<24x256xf32>
    %cst_205 = arith.constant -0.284496725 : f32
    %647 = vector.broadcast %cst_205 : f32 to vector<24x256xf32>
    %648 = arith.addf %646, %647 : vector<24x256xf32>
    %649 = arith.mulf %648, %638 : vector<24x256xf32>
    %cst_206 = arith.constant 0.254829586 : f32
    %650 = vector.broadcast %cst_206 : f32 to vector<24x256xf32>
    %651 = arith.addf %649, %650 : vector<24x256xf32>
    %652 = arith.mulf %651, %638 : vector<24x256xf32>
    %cst_207 = arith.constant 0.000000e+00 : f32
    %653 = vector.broadcast %cst_207 : f32 to vector<24x256xf32>
    %654 = arith.subf %653, %632 : vector<24x256xf32>
    %655 = arith.mulf %654, %632 : vector<24x256xf32>
    %656 = math.exp %655 : vector<24x256xf32>
    %657 = arith.mulf %652, %656 : vector<24x256xf32>
    %cst_208 = arith.constant 1.000000e+00 : f32
    %658 = vector.broadcast %cst_208 : f32 to vector<24x256xf32>
    %659 = arith.subf %658, %657 : vector<24x256xf32>
    %cst_209 = arith.constant 0.000000e+00 : f32
    %660 = vector.broadcast %cst_209 : f32 to vector<24x256xf32>
    %661 = arith.cmpf oge, %631, %660 : vector<24x256xf32>
    %cst_210 = arith.constant 0.000000e+00 : f32
    %662 = vector.broadcast %cst_210 : f32 to vector<24x256xf32>
    %663 = arith.subf %662, %659 : vector<24x256xf32>
    %664 = arith.select %661, %659, %663 : vector<24x256xi1>, vector<24x256xf32>
    %cst_211 = arith.constant 1.000000e+00 : f32
    %665 = vector.broadcast %cst_211 : f32 to vector<24x256xf32>
    %666 = arith.addf %665, %664 : vector<24x256xf32>
    %667 = arith.mulf %629, %666 : vector<24x256xf32>
    %cst_212 = arith.constant dense<0.000000e+00> : vector<24x64xf32>
    %668 = tpu.matmul %667, %11, %cst_212 {dimension_numbers = #tpu.dot_dimension_numbers<[1], [0], [0], [1], [0, 0, 1, 1], [], []>} : vector<24x256xf32>, vector<256x64xf32>, vector<24x64xf32> -> vector<24x64xf32>
    %669 = arith.addf %602, %668 : vector<24x64xf32>
    %670 = vector.broadcast %12 : vector<1x64xf32> to vector<24x64xf32>
    %671 = arith.addf %669, %670 : vector<24x64xf32>
    %c0_213 = arith.constant 0 : index
    %c0_214 = arith.constant 0 : index
    %672 = vector.load %arg13[%c0_213, %c0_214] : memref<1x64xf32, #tpu.memory_space<vmem>>, vector<1x64xf32>
    %c0_215 = arith.constant 0 : index
    %c0_216 = arith.constant 0 : index
    %673 = vector.load %arg14[%c0_215, %c0_216] : memref<1x64xf32, #tpu.memory_space<vmem>>, vector<1x64xf32>
    %cst_217 = arith.constant dense<0.000000e+00> : vector<24xf32>
    %674 = vector.multi_reduction <add>, %671, %cst_217 [1] : vector<24x64xf32> to vector<24xf32>
    %675 = vector.shape_cast %674 : vector<24xf32> to vector<24x1xf32>
    %cst_218 = arith.constant 6.400000e+01 : f32
    %676 = vector.broadcast %cst_218 : f32 to vector<24x1xf32>
    %677 = arith.divf %675, %676 : vector<24x1xf32>
    %678 = vector.broadcast %677 : vector<24x1xf32> to vector<24x64xf32>
    %679 = arith.subf %671, %678 : vector<24x64xf32>
    %680 = arith.mulf %679, %679 : vector<24x64xf32>
    %cst_219 = arith.constant dense<0.000000e+00> : vector<24xf32>
    %681 = vector.multi_reduction <add>, %680, %cst_219 [1] : vector<24x64xf32> to vector<24xf32>
    %682 = vector.shape_cast %681 : vector<24xf32> to vector<24x1xf32>
    %cst_220 = arith.constant 6.400000e+01 : f32
    %683 = vector.broadcast %cst_220 : f32 to vector<24x1xf32>
    %684 = arith.divf %682, %683 : vector<24x1xf32>
    %685 = vector.broadcast %677 : vector<24x1xf32> to vector<24x64xf32>
    %686 = arith.subf %671, %685 : vector<24x64xf32>
    %cst_221 = arith.constant 9.99999997E-7 : f32
    %687 = vector.broadcast %cst_221 : f32 to vector<24x1xf32>
    %688 = arith.addf %684, %687 : vector<24x1xf32>
    %689 = math.rsqrt %688 : vector<24x1xf32>
    %690 = vector.broadcast %689 : vector<24x1xf32> to vector<24x64xf32>
    %691 = arith.mulf %686, %690 : vector<24x64xf32>
    %692 = vector.broadcast %672 : vector<1x64xf32> to vector<24x64xf32>
    %693 = arith.mulf %691, %692 : vector<24x64xf32>
    %694 = vector.broadcast %673 : vector<1x64xf32> to vector<24x64xf32>
    %695 = arith.addf %693, %694 : vector<24x64xf32>
    %c0_222 = arith.constant 0 : index
    %c0_223 = arith.constant 0 : index
    %696 = vector.load %arg15[%c0_222, %c0_223] : memref<24x64xf32, #tpu.memory_space<vmem>>, vector<24x64xf32>
    tpu.vector_store %arg15[%c0_222, %c0_223], %695 {strides = array<i32>} : memref<24x64xf32, #tpu.memory_space<vmem>>, vector<24x64xf32>,
    return
  }
}

</mosaic_0001>

<bundles_post_ra>
// kernel: forward.4
= control target key start
LH: loop header
LB: loop body
LE: loop exit
PB: predicated region body
PF: predicated region fallthrough
CT: control target
= control target key end

     0   :  { %vm133_vm0 = vcmask 523264   ;;  %v3013_v19 = vmov 0.0   ;;  %v194_v47 = vlaneseq  ;;  %vm302_vm1 = vcmask 130048   ;;  %s3014_s27 = smov 64   ;;  %s3015_s29 = smov 48   ;;  %s3848_s0 = inlined_call_operand.vmem [shape: f32[18,64], index: 0, kind: input, shape index: {}]   ;;  %s3849_s3 = inlined_call_operand.vmem [shape: f32[64,192], index: 3, kind: input, shape index: {}]   ;;  %s3850_s1 = inlined_call_operand.vmem [shape: f32[1,64], index: 1, kind: input, shape index: {}]   ;;  %s3851_s2 = inlined_call_operand.vmem [shape: f32[1,64], index: 2, kind: input, shape index: {}]   ;;  %s3852_s4 = inlined_call_operand.vmem [shape: f32[1,192], index: 4, kind: input, shape index: {}]   ;;  %s3853_s5 = inlined_call_operand.vmem [shape: f32[64,64], index: 5, kind: input, shape index: {}]   ;;  %s3854_s6 = inlined_call_operand.vmem [shape: f32[1,64], index: 6, kind: input, shape index: {}]   ;;  %s3855_s9 = inlined_call_operand.vmem [shape: f32[64,256], index: 9, kind: input, shape index: {}]   ;;  %s3856_s7 = inlined_call_operand.vmem [shape: f32[1,64], index: 7, kind: input, shape index: {}]   ;;  %s3857_s8 = inlined_call_operand.vmem [shape: f32[1,64], index: 8, kind: input, shape index: {}]   ;;  %s3858_s11 = inlined_call_operand.vmem [shape: f32[256,64], index: 11, kind: input, shape index: {}]   ;;  %s3859_s10 = inlined_call_operand.vmem [shape: f32[1,256], index: 10, kind: input, shape index: {}]   ;;  %s3860_s12 = inlined_call_operand.vmem [shape: f32[1,64], index: 12, kind: input, shape index: {}]   ;;  %s3861_s13 = inlined_call_operand.vmem [shape: f32[1,64], index: 13, kind: input, shape index: {}]   ;;  %s3862_s14 = inlined_call_operand.vmem [shape: f32[1,64], index: 14, kind: input, shape index: {}]   ;;  %s3863_s15 = inlined_call_operand.vmem [shape: f32[18,64], index: 15, kind: output, shape index: {}]  }
   0x1   :  { %v50_v0 = vld [vmem:[%s3848_s0] sm:$0xff]  ;;  %v51_v1 = vld [vmem:[%s3848_s0 + $0x8] sm:$0xff]  ;;  %v70_v14 = vld [vmem:[%s3849_s3 + $0x78] sm:$0xff]  ;;  %277 = vmatprep.mubr.f32.mxu0 %v3013_v19  ;;  %vm418_vm2 = vcmask 1040384   ;;  %vm392_vm3 = vcmask 65536   ;;  %vm388_vm4 = vcmask 72704  }
   0x2   :  { %v134_v2 = vsel %vm133_vm0, %v50_v0, 0.0  ;;  %v137_v3 = vsel %vm133_vm0, %v51_v1, 0.0  ;;  %229 = vmatprep.subr.mxu0 %v70_v14  ;;  %v69_v15 = vld [vmem:[%s3849_s3 + $0x70] sm:$0xff]  ;;  %v68_v16 = vld [vmem:[%s3849_s3 + $0x68] sm:$0xff]  ;;  %v67_v17 = vld [vmem:[%s3849_s3 + $0x60] sm:$0xff]  ;;  %v3179_v48 = vshrl.u32 %v194_v47, 7 }
   0x3   :  { %135 = vadd.xlane.f32.xlu0 %v134_v2  ;;  %230 = vmatpush1.msra.mxu0 %v69_v15  ;;  %v66_v18 = vld [vmem:[%s3849_s3 + $0x58] sm:$0xff]  ;;  %v65_v20 = vld [vmem:[%s3849_s3 + $0x50] sm:$0xff]  ;;  %v64_v21 = vld [vmem:[%s3849_s3 + $0x48] sm:$0xff]  ;;  %vm140_vm5 = vcmask 517120   ;;  %s3016_s30 = smov 32   ;;  %s3017_s16 = smov 112  }
   0x4   :  { %231 = vmatprep.subr.mxu0 %v68_v16  ;;  %v63_v22 = vld [vmem:[%s3849_s3 + $0x40] sm:$0xff]  ;;  %v62_v23 = vld [vmem:[%s3849_s3 + $0x38] sm:$0xff]  ;;  %v61_v24 = vld [vmem:[%s3849_s3 + $0x30] sm:$0xff]  ;;  %v196_v49 = vsub.s32 0, %v3179_v48  ;;  %v200_v57 = vsub.s32 1, %v3179_v48  ;;  %s3018_s17 = smov 96  }
   0x5   :  { %232 = vmatpush1.msra.mxu0 %v67_v17  ;;  %v60_v25 = vld [vmem:[%s3849_s3 + $0x28] sm:$0xff]  ;;  %v59_v26 = vld [vmem:[%s3849_s3 + $0x20] sm:$0xff]  ;;  %v58_v27 = vld [vmem:[%s3849_s3 + $0x18] sm:$0xff]  ;;  %s3019_s18 = smov 80   ;;  %s3020_s19 = smov 16   ;;  %vm1140_vm6 = vcmask 1046528  }
   0x6   :  { %233 = vmatprep.subr.mxu0 %v66_v18  ;;  %v57_v28 = vld [vmem:[%s3849_s3 + $0x10] sm:$0xff]  ;;  %v56_v29 = vld [vmem:[%s3849_s3 + $0x8] sm:$0xff]  ;;  %v55_v30 = vld [vmem:[%s3849_s3] sm:$0xff]  ;;  %vm3021_vm7 = vmmov 0   ;;  %vm1133_vm8 = vcmask 261120   ;;  %vm1136_vm9 = vcmask 392192  }
   0x7   :  { %138 = vadd.xlane.f32.xlu0 %v137_v3  ;;  %234 = vmatpush1.msra.mxu0 %v65_v20  ;;  %v3164_v38 = vld [vmem:[%s3850_s1] ss:$0 sm:$0xff]  ;;  %v52_v3 = vld [vmem:[%s3848_s0 + $0x10] sm:$0x3] }
   0x8   :  { %235 = vmatprep.subr.mxu0 %v64_v21  ;;  %v3169_v40 = vld [vmem:[%s3851_s2] ss:$0 sm:$0xff] }
   0x9   :  { %236 = vmatpush1.msra.mxu0 %v63_v22  ;;  %v71_v50 = vld [vmem:[%s3852_s4] sm:$0x3] }
   0xa   :  { %237 = vmatprep.subr.mxu0 %v62_v23  ;;  %v3187_v51 = vrot.slane %v71_v50, %v196_v49  ;;  %v3206_v61 = vrot.slane %v71_v50, %v200_v57 }
   0xb   :  { %238 = vmatpush1.msra.mxu0 %v61_v24 }
   0xc   :  { %239 = vmatprep.subr.mxu0 %v60_v25 }
   0xd   :  { %240 = vmatpush1.msra.mxu0 %v59_v26 }
   0xe   :  { %241 = vmatprep.subr.mxu0 %v58_v27 }
   0xf   :  { %242 = vmatpush1.msra.mxu0 %v57_v28 }
  0x10   :  { %243 = vmatprep.subr.mxu0 %v56_v29 }
  0x11   :  { %244 = vmatpush1.msra.mxu0 %v55_v30 }
  0x8c   :  { %v136_v4 = vpop.xlane.xlu0 %135 }
  0x8d   :  { %v145_v5 = vmul.f32 0.015625, %v136_v4 }
  0x8f   :  { %v148_v6 = vsub.f32 %v50_v0, %v145_v5 }
  0x90   :  { %v139_v7 = vpop.xlane.xlu0 %138 }
  0x91   :  { %v146_v8 = vmul.f32 0.015625, %v139_v7  ;;  %v151_v9 = vmul.f32 %v148_v6, %v148_v6  ;;  %v141_v7 = vsel %vm140_vm5, %v52_v3, 0.0 }
  0x93   :  { %v149_v10 = vsub.f32 %v51_v1, %v146_v8  ;;  %v154_v11 = vsel %vm133_vm0, %v151_v9, 0.0 }
  0x94   :  { %155 = vadd.xlane.f32.xlu1 %v154_v11 }
  0x95   :  { %v152_v12 = vmul.f32 %v149_v10, %v149_v10 }
  0x97   :  { %v157_v13 = vsel %vm133_vm0, %v152_v12, 0.0 }
  0x98   :  { %158 = vadd.xlane.f32.xlu1 %v157_v13 }
 0x11d   :  { %v156_v31 = vpop.xlane.xlu1 %155 }
 0x11e   :  { %v163_v32 = vmul.f32 0.015625, %v156_v31 }
 0x120   :  { %v166_v33 = vadd.f32 1e-06, %v163_v32 }
 0x121   :  { %v159_v34 = vpop.xlane.xlu1 %158 }
 0x122   :  { %2904 = vrsqrt.f32 %v166_v33  ;;  %v164_v35 = vmul.f32 0.015625, %v159_v34 }
 0x124   :  { %v167_v36 = vadd.f32 1e-06, %v164_v35 }
 0x126   :  { %2906 = vrsqrt.f32 %v167_v36 }
 0x12f   :  { %v2905_v37 = vpop.eup %2904 }
 0x130   :  { %v172_v39 = vmul.f32 %v2905_v37, %v148_v6 }
 0x132   :  { %v181_v41 = vmul.f32 %v3164_v38, %v172_v39 }
 0x133   :  { %v2907_v42 = vpop.eup %2906 }
 0x134   :  { %v190_v43 = vadd.f32 %v3169_v40, %v181_v41  ;;  %v173_v44 = vmul.f32 %v2907_v42, %v149_v10 }
 0x136   :  { %2571 = vmatmul.mubr.msk.f32.vlgmr.msra.gmra.mxu0 %vm133_vm0, %v190_v43  ;;  %v182_v45 = vmul.f32 %v3164_v38, %v173_v44 }
 0x137   :  { %283 = vmatprep.mubr.f32.mxu0 %v3013_v19 }
 0x138   :  { %v191_v46 = vadd.f32 %v3169_v40, %v182_v45 }
 0x13a   :  { %2572 = vmatmul.mubr.msk.f32.gmra.mxu0 %vm133_vm0, %v191_v46 }
 0x13b   :  { %289 = vmatprep.mubr.f32.mxu0 %v3013_v19 }
 0x1f6   :  { %v279_v52 = vpop.f32.mrf.mxu0 }
 0x1f7   :  { %v3190_v53 = vadd.f32 %v279_v52, %v3187_v51 }
 0x1f8   :  { %v281_v54 = vpop.f32.mrf.mxu0 }
 0x1f9   :  { %2762 = vmatprep.mubr.msk.f32.mxu1 %vm302_vm1, %v3190_v53  ;;  %298 = vrot.lane.b32.xlu1 %v3190_v53, %s3014_s27  ;;  %v3216_v63 = vadd.f32 %v281_v54, %v3206_v61 }
 0x1fa   :  { %v285_v55 = vpop.f32.mrf.mxu0 }
 0x1fb   :  { %v3197_v56 = vadd.f32 %v285_v55, %v3187_v51 }
 0x1fc   :  { %v287_v59 = vpop.f32.mrf.mxu0 }
 0x1fd   :  { %300 = vrot.lane.b32.xlu0 %v3197_v56, %s3014_s27  ;;  %v3210_v62 = vadd.f32 %v287_v59, %v3206_v61 }
 0x1ff   :  { %v1256_v59 = vrot.slane %v3210_v62, 1 }
 0x26b   :  { %v299_v60 = vpop.permute.xlu1 %298 }
 0x26f   :  { %v301_v58 = vpop.permute.xlu0 %300 }
 0x270   :  { %2758 = vmatprep.subr.msk.mxu1 %vm302_vm1, %v301_v58 }
 0x271   :  { %2759 = vmatpush3.xpose.msk.msra.mxu1 %vm302_vm1, %v301_v58 }
 0x272   :  { %2760 = vmatprep.subr.msk.mxu1 %vm302_vm1, %v299_v60 }
 0x275   :  { %2761 = vmatpush3.xpose.msk.msra.mxu1 %vm302_vm1, %v299_v60 }
 0x276   :  { %2765 = vmatprep.subr.msk.mxu1 %vm418_vm2, %v3210_v62 }
 0x278   :  { %2763 = vmatmul.mubr.msk.f32.vlgmr.msra.gmra.mxu1 %vm302_vm1, %v3197_v56 }
 0x279   :  { %2766 = vmatpush3.msk.msra.mxu1 %vm418_vm2, %v3210_v62 }
 0x27a   :  { %2767 = vmatprep.subr.mxu1 %v3216_v63 }
 0x27b   :  { %2768 = vmatpush3.msra.mxu1 %v3216_v63 }
 0x338   :  { %v2764_v0 = vpop.f32.mrf.mxu1 }
 0x339   :  { %v387_v1 = vmul.f32 0.25, %v2764_v0 }
 0x33a   :  { %v377_v2 = vpop.f32.mrf.mxu1 }
 0x33b   :  { %v386_v4 = vmul.f32 0.25, %v377_v2  ;;  %v393_v5 = vsel %vm392_vm3, %v387_v1, -inf }
 0x33c   :  { %394 = vmax.xlane.f32.xlu0 %v393_v5 }
 0x33d   :  { %v389_v6 = vsel %vm388_vm4, %v386_v4, -inf }
 0x33e   :  { %390 = vmax.xlane.f32.xlu1 %v389_v6 }
 0x340   :  { %142 = vadd.xlane.f32.xlu0 %v141_v7 }
 0x356   :  { %503 = vrot.lane.b32.xlu0 %v3197_v56, %s3015_s29 }
 0x3c5   :  { %v395_v8 = vpop.xlane.xlu0 %394 }
 0x3c6   :  { %v397_v21 = vsub.f32 %v387_v1, %v395_v8 }
 0x3c7   :  { %v391_v9 = vpop.xlane.xlu1 %390 }
 0x3c8   :  { %v396_v10 = vsub.f32 %v386_v4, %v391_v9  ;;  %v400_v22 = vmul.f32 1.442695, %v397_v21 }
 0x3c9   :  { %v143_v11 = vpop.xlane.xlu0 %142 }
 0x3ca   :  { %v398_v12 = vmul.f32 1.442695, %v396_v10  ;;  %v147_v13 = vmul.f32 0.015625, %v143_v11 }
 0x3cc   :  { %2908 = vpow2.f32 %v398_v12  ;;  %v150_v14 = vsub.f32 %v52_v3, %v147_v13 }
 0x3cd   :  { %v3232_v15 = vpop.permute.xlu0 %503  ;;  %2910 = vpow2.f32 %v400_v22 }
 0x3ce   :  { %2772 = vmatprep.subr.msk.mxu1 %vm302_vm1, %v3232_v15  ;;  %v153_v16 = vmul.f32 %v150_v14, %v150_v14 }
 0x3d0   :  { %v160_v17 = vsel %vm140_vm5, %v153_v16, 0.0 }
 0x3d1   :  { %161 = vadd.xlane.f32.xlu1 %v160_v17 }
 0x3d9   :  { %v2909_v18 = vpop.eup %2908 }
 0x3da   :  { %v402_v20 = vsel %vm388_vm4, %v2909_v18, 0.0  ;;  %v2911_v23 = vpop.eup %2910 }
 0x3db   :  { %403 = vadd.xlane.f32.xlu0 %v402_v20  ;;  %v405_v24 = vsel %vm392_vm3, %v2911_v23, 0.0 }
 0x3e2   :  { %707 = vrot.lane.b32.xlu1 %v3197_v56, %s3016_s30 }
 0x3e6   :  { %501 = vrot.lane.b32.xlu1 %v3190_v53, %s3015_s29 }
 0x3ea   :  { %705 = vrot.lane.b32.xlu1 %v3190_v53, %s3016_s30 }
 0x3f1   :  { %497 = vrot.lane.b32.xlu0 %v3190_v53, %s3017_s16 }
 0x3f5   :  { %701 = vrot.lane.b32.xlu0 %v3190_v53, %s3018_s17 }
 0x3f9   :  { %703 = vrot.lane.b32.xlu0 %v3197_v56, %s3018_s17 }
 0x3fd   :  { %904 = vrot.lane.b32.xlu0 %v3190_v53, %s3019_s18 }
 0x40e   :  { %406 = vadd.xlane.f32.xlu1 %v405_v24 }
 0x41f   :  { %499 = vrot.lane.b32.xlu1 %v3197_v56, %s3017_s16 }
 0x423   :  { %910 = vrot.lane.b32.xlu1 %v3197_v56, %s3020_s19 }
 0x427   :  { %908 = vrot.lane.b32.xlu1 %v3190_v53, %s3020_s19 }
 0x42b   :  { %906 = vrot.lane.b32.xlu1 %v3197_v56, %s3019_s18 }
 0x45a   :  { %v162_v25 = vpop.xlane.xlu1 %161 }
 0x45b   :  { %v165_v26 = vmul.f32 0.015625, %v162_v25 }
 0x45d   :  { %v168_v27 = vadd.f32 1e-06, %v165_v26 }
 0x45e   :  { %v708_v28 = vpop.permute.xlu1 %707 }
 0x45f   :  { %2912 = vrsqrt.f32 %v168_v27  ;;  %2786 = vmatprep.subr.msk.mxu0 %vm302_vm1, %v708_v28 }
 0x460   :  { %2787 = vmatpush3.xpose.msk.msra.mxu0 %vm302_vm1, %v708_v28 }
 0x462   :  { %v502_v29 = vpop.permute.xlu1 %501 }
 0x464   :  { %v404_v30 = vpop.xlane.xlu0 %403 }
 0x465   :  { %2914 = vrcp.f32 %v404_v30 }
 0x466   :  { %v706_v31 = vpop.permute.xlu1 %705 }
 0x467   :  { %2788 = vmatprep.subr.msk.mxu0 %vm302_vm1, %v706_v31 }
 0x468   :  { %v498_v32 = vpop.permute.xlu0 %497  ;;  %2789 = vmatpush3.xpose.msk.msra.mxu0 %vm302_vm1, %v706_v31 }
 0x46c   :  { %v2913_v33 = vpop.eup %2912  ;;  %v702_v34 = vpop.permute.xlu0 %701 }
 0x46d   :  { %v174_v35 = vmul.f32 %v2913_v33, %v150_v14 }
 0x46f   :  { %v183_v36 = vmul.f32 %v3164_v38, %v174_v35 }
 0x470   :  { %v704_v37 = vpop.permute.xlu0 %703 }
 0x471   :  { %v192_v39 = vadd.f32 %v3169_v40, %v183_v36 }
 0x472   :  { %v2915_v41 = vpop.eup %2914 }
 0x473   :  { %2573 = vmatmul.mubr.msk.f32.gmra.mxu0 %vm133_vm0, %v192_v39  ;;  %v410_v42 = vmul.f32 %v2915_v41, %v2909_v18 }
 0x474   :  { %2790 = vmatprep.mubr.msk.f32.mxu0 %vm302_vm1, %v702_v34  ;;  %v905_v43 = vpop.permute.xlu0 %904 }
 0x475   :  { %2769 = vmatprep.mubr.msk.f32.mxu1 %vm388_vm4, %v410_v42 }
 0x477   :  { %2791 = vmatmul.mubr.msk.f32.vlgmr.msra.gmra.mxu0 %vm302_vm1, %v704_v37 }
 0x478   :  { %2804 = vmatprep.mubr.msk.f32.mxu0 %vm302_vm1, %v905_v43 }
 0x497   :  { %v407_v44 = vpop.xlane.xlu1 %406 }
 0x498   :  { %2916 = vrcp.f32 %v407_v44 }
 0x49b   :  { %v500_v45 = vpop.permute.xlu1 %499 }
 0x49f   :  { %v911_v38 = vpop.permute.xlu1 %910 }
 0x4a0   :  { %2800 = vmatprep.subr.msk.mxu0 %vm302_vm1, %v911_v38 }
 0x4a1   :  { %2801 = vmatpush3.xpose.msk.msra.mxu0 %vm302_vm1, %v911_v38 }
 0x4a3   :  { %v909_v40 = vpop.permute.xlu1 %908 }
 0x4a4   :  { %2802 = vmatprep.subr.msk.mxu0 %vm302_vm1, %v909_v40 }
 0x4a5   :  { %v2917_v46 = vpop.eup %2916  ;;  %2803 = vmatpush3.xpose.msk.msra.mxu0 %vm302_vm1, %v909_v40 }
 0x4a6   :  { %v411_v47 = vmul.f32 %v2917_v46, %v2911_v23 }
 0x4a7   :  { %v907_v50 = vpop.permute.xlu1 %906 }
 0x4a8   :  { %2770 = vmatmul.mubr.msk.f32.vlgmr.msra.gmra.mxu1 %vm388_vm4, %v411_v47  ;;  %2805 = vmatmul.mubr.msk.f32.vlgmr.msra.gmra.mxu0 %vm302_vm1, %v907_v50 }
 0x4a9   :  { %2773 = vmatpush3.xpose.msk.msra.mxu1 %vm302_vm1, %v3232_v15  ;;  %2776 = vmatprep.mubr.msk.f32.mxu1 %vm302_vm1, %v498_v32 }
 0x4aa   :  { %2774 = vmatprep.subr.msk.mxu1 %vm302_vm1, %v502_v29 }
 0x4ad   :  { %2775 = vmatpush3.xpose.msk.msra.mxu1 %vm302_vm1, %v502_v29 }
 0x4b0   :  { %2777 = vmatmul.mubr.msk.f32.vlgmr.msra.gmra.mxu1 %vm302_vm1, %v500_v45 }
 0x533   :  { %v3284_v52 = vpop.f32.mrf.mxu0 }
 0x535   :  { %v293_v53 = vpop.f32.mrf.mxu0 }
 0x536   :  { %v294_v54 = vadd.f32 %v293_v53, %v3206_v61  ;;  %v292_v53 = vadd.f32 %v3284_v52, %v3187_v51 }
 0x537   :  { %v2792_v55 = vpop.f32.mrf.mxu0 }
 0x538   :  { %v3287_v58 = vrot.slane %v294_v54, 1  ;;  %v793_v11 = vmul.f32 0.25, %v2792_v55  ;;  %v3334_v54 = vrot.slane %v292_v53, 1  ;;  %v1141_v55 = vrot.slane %v3197_v56, 1 }
 0x539   :  { %v783_v60 = vpop.f32.mrf.mxu0 }
 0x53a   :  { %v792_v0 = vmul.f32 0.25, %v783_v60  ;;  %2821 = vmatprep.subr.msk.mxu0 %vm418_vm2, %v3287_v58  ;;  %v3294_v1 = vsel %vm1140_vm6, %v1256_v59, %v3287_v58  ;;  %v797_v16 = vsel %vm392_vm3, %v793_v11, -inf  ;;  %v3343_v59 = vsel %vm1140_vm6, %v1141_v55, %v3334_v54 }
 0x53b   :  { %2822 = vmatpush3.msk.msra.mxu0 %vm418_vm2, %v3287_v58 }
 0x53c   :  { %2823 = vmatprep.subr.mxu0 %v3294_v1  ;;  %v794_v61 = vsel %vm388_vm4, %v792_v0, -inf }
 0x53d   :  { %795 = vmax.xlane.f32.xlu0 %v794_v61  ;;  %2824 = vmatpush3.msra.mxu0 %v3294_v1 }
 0x568   :  { %v3301_v2 = vpop.f32.mrf.mxu1  ;;  %v2806_v4 = vpop.f32.mrf.mxu0 }
 0x569   :  { %v996_v8 = vmul.f32 0.25, %v2806_v4 }
 0x56a   :  { %v3303_v3 = vpop.f32.mrf.mxu1  ;;  %v986_v13 = vpop.f32.mrf.mxu0 }
 0x56b   :  { %v1000_v14 = vsel %vm392_vm3, %v996_v8, -inf  ;;  %v995_v15 = vmul.f32 0.25, %v986_v13 }
 0x56d   :  { %v997_v17 = vsel %vm388_vm4, %v995_v15, -inf }
 0x570   :  { %v2778_v5 = vpop.f32.mrf.mxu1 }
 0x571   :  { %v589_v6 = vmul.f32 0.25, %v2778_v5 }
 0x572   :  { %v579_v7 = vpop.f32.mrf.mxu1 }
 0x573   :  { %v588_v9 = vmul.f32 0.25, %v579_v7  ;;  %v593_v10 = vsel %vm392_vm3, %v589_v6, -inf }
 0x574   :  { %594 = vmax.xlane.f32.xlu1 %v593_v10 }
 0x575   :  { %v590_v12 = vsel %vm388_vm4, %v588_v9, -inf }
 0x576   :  { %591 = vmax.xlane.f32.xlu0 %v590_v12 }
 0x578   :  { %1001 = vmax.xlane.f32.xlu1 %v1000_v14 }
 0x57a   :  { %798 = vmax.xlane.f32.xlu0 %v797_v16 }
 0x57e   :  { %998 = vmax.xlane.f32.xlu0 %v997_v17 }
 0x5c6   :  { %v796_v18 = vpop.xlane.xlu0 %795 }
 0x5c7   :  { %v800_v20 = vsub.f32 %v792_v0, %v796_v18 }
 0x5c9   :  { %v802_v21 = vmul.f32 1.442695, %v800_v20 }
 0x5cb   :  { %2918 = vpow2.f32 %v802_v21 }
 0x5d8   :  { %v3310_v22 = vpop.eup %2918 }
 0x5d9   :  { %v806_v23 = vsel %vm388_vm4, %v3310_v22, 0.0 }
 0x5da   :  { %807 = vadd.xlane.f32.xlu0 %v806_v23 }
 0x5fd   :  { %v595_v24 = vpop.xlane.xlu1 %594 }
 0x5fe   :  { %v597_v30 = vsub.f32 %v589_v6, %v595_v24 }
 0x5ff   :  { %v592_v25 = vpop.xlane.xlu0 %591 }
 0x600   :  { %v596_v31 = vsub.f32 %v588_v9, %v592_v25  ;;  %v600_v36 = vmul.f32 1.442695, %v597_v30 }
 0x601   :  { %v1002_v26 = vpop.xlane.xlu1 %1001 }
 0x602   :  { %v1004_v27 = vsub.f32 %v996_v8, %v1002_v26  ;;  %v598_v37 = vmul.f32 1.442695, %v596_v31 }
 0x603   :  { %v799_v28 = vpop.xlane.xlu0 %798 }
 0x604   :  { %v801_v29 = vsub.f32 %v793_v11, %v799_v28  ;;  %v1007_v32 = vmul.f32 1.442695, %v1004_v27 }
 0x606   :  { %v804_v33 = vmul.f32 1.442695, %v801_v29 }
 0x607   :  { %v999_v34 = vpop.xlane.xlu0 %998 }
 0x608   :  { %2920 = vpow2.f32 %v804_v33  ;;  %v1003_v35 = vsub.f32 %v995_v15, %v999_v34 }
 0x609   :  { %2922 = vpow2.f32 %v1007_v32 }
 0x60a   :  { %v1005_v39 = vmul.f32 1.442695, %v1003_v35 }
 0x60c   :  { %2924 = vpow2.f32 %v1005_v39 }
 0x60d   :  { %2926 = vpow2.f32 %v600_v36 }
 0x60e   :  { %2928 = vpow2.f32 %v598_v37 }
 0x615   :  { %v2921_v41 = vpop.eup %2920 }
 0x616   :  { %v809_v42 = vsel %vm392_vm3, %v2921_v41, 0.0  ;;  %v3315_v43 = vpop.eup %2922 }
 0x617   :  { %810 = vadd.xlane.f32.xlu1 %v809_v42  ;;  %v1012_v40 = vsel %vm392_vm3, %v3315_v43, 0.0 }
 0x619   :  { %v2925_v44 = vpop.eup %2924 }
 0x61a   :  { %v2927_v45 = vpop.eup %2926  ;;  %v1009_v38 = vsel %vm388_vm4, %v2925_v44, 0.0 }
 0x61b   :  { %v2929_v46 = vpop.eup %2928  ;;  %1010 = vadd.xlane.f32.xlu0 %v1009_v38  ;;  %1013 = vadd.xlane.f32.xlu1 %v1012_v40  ;;  %v605_v50 = vsel %vm392_vm3, %v2927_v45, 0.0 }
 0x61c   :  { %v602_v47 = vsel %vm388_vm4, %v2929_v46, 0.0 }
 0x61f   :  { %603 = vadd.xlane.f32.xlu0 %v602_v47  ;;  %606 = vadd.xlane.f32.xlu1 %v605_v50 }
 0x630   :  { %613 = vrot.lane.b32.xlu1 %v3216_v63, %s3017_s16 }
 0x634   :  { %818 = vrot.lane.b32.xlu1 %v3210_v62, %s3018_s17 }
 0x635   :  { %615 = vrot.lane.b32.xlu0 %v3210_v62, %s3017_s16 }
 0x638   :  { %816 = vrot.lane.b32.xlu1 %v3216_v63, %s3018_s17 }
 0x639   :  { %1021 = vrot.lane.b32.xlu0 %v3210_v62, %s3019_s18 }
 0x63c   :  { %1019 = vrot.lane.b32.xlu1 %v3216_v63, %s3019_s18 }
 0x63d   :  { %1146 = vrot.lane.b32.xlu0 %v3334_v54, %s3014_s27 }
 0x640   :  { %1144 = vrot.lane.b32.xlu1 %v3343_v59, %s3014_s27 }
 0x663   :  { %v808_v51 = vpop.xlane.xlu0 %807 }
 0x664   :  { %2930 = vrcp.f32 %v808_v51 }
 0x671   :  { %v2931_v5 = vpop.eup %2930 }
 0x672   :  { %v814_v12 = vmul.f32 %v2931_v5, %v3310_v22 }
 0x6a0   :  { %v811_v52 = vpop.xlane.xlu1 %810 }
 0x6a4   :  { %v1011_v62 = vpop.xlane.xlu0 %1010  ;;  %v1014_v60 = vpop.xlane.xlu1 %1013 }
 0x6a8   :  { %v604_v0 = vpop.xlane.xlu0 %603  ;;  %v607_v61 = vpop.xlane.xlu1 %606 }
 0x6a9   :  { %2932 = vrcp.f32 %v604_v0 }
 0x6aa   :  { %2934 = vrcp.f32 %v607_v61 }
 0x6ab   :  { %2936 = vrcp.f32 %v811_v52 }
 0x6ac   :  { %v616_v56 = vpop.permute.xlu0 %615  ;;  %v614_v63 = vpop.permute.xlu1 %613  ;;  %2938 = vrcp.f32 %v1011_v62 }
 0x6ad   :  { %2779 = vmatprep.subr.msk.mxu1 %vm418_vm2, %v616_v56  ;;  %2940 = vrcp.f32 %v1014_v60 }
 0x6ae   :  { %2780 = vmatpush3.msk.msra.mxu1 %vm418_vm2, %v616_v56 }
 0x6af   :  { %2781 = vmatprep.subr.mxu1 %v614_v63 }
 0x6b0   :  { %2782 = vmatpush3.msra.mxu1 %v614_v63  ;;  %v819_v4 = vpop.permute.xlu1 %818  ;;  %v1022_v14 = vpop.permute.xlu0 %1021 }
 0x6b1   :  { %2793 = vmatprep.subr.msk.mxu1 %vm418_vm2, %v819_v4 }
 0x6b4   :  { %v817_v8 = vpop.permute.xlu1 %816  ;;  %v1147_v21 = vpop.permute.xlu0 %1146 }
 0x6b6   :  { %v2933_v6 = vpop.eup %2932 }
 0x6b7   :  { %v2935_v7 = vpop.eup %2934  ;;  %v610_v9 = vmul.f32 %v2933_v6, %v2929_v46 }
 0x6b8   :  { %v611_v10 = vmul.f32 %v2935_v7, %v2927_v45  ;;  %v2937_v11 = vpop.eup %2936  ;;  %v1020_v17 = vpop.permute.xlu1 %1019 }
 0x6b9   :  { %2783 = vmatprep.mubr.msk.f32.mxu1 %vm388_vm4, %v610_v9  ;;  %v2939_v13 = vpop.eup %2938  ;;  %v815_v15 = vmul.f32 %v2937_v11, %v2921_v41 }
 0x6ba   :  { %2784 = vmatmul.mubr.msk.f32.vlgmr.msra.gmra.mxu1 %vm388_vm4, %v611_v10  ;;  %v2941_v16 = vpop.eup %2940  ;;  %v1017_v18 = vmul.f32 %v2939_v13, %v2925_v44 }
 0x6bb   :  { %2794 = vmatpush3.msk.msra.mxu1 %vm418_vm2, %v819_v4  ;;  %2797 = vmatprep.mubr.msk.f32.mxu1 %vm388_vm4, %v814_v12  ;;  %v1018_v20 = vmul.f32 %v2941_v16, %v3315_v43 }
 0x6bc   :  { %2795 = vmatprep.subr.mxu1 %v817_v8  ;;  %v1145_v22 = vpop.permute.xlu1 %1144 }
 0x6bd   :  { %2796 = vmatpush3.msra.mxu1 %v817_v8 }
 0x6be   :  { %2807 = vmatprep.subr.msk.mxu1 %vm418_vm2, %v1022_v14  ;;  %2798 = vmatmul.mubr.msk.f32.vlgmr.msra.gmra.mxu1 %vm388_vm4, %v815_v15 }
 0x6bf   :  { %2808 = vmatpush3.msk.msra.mxu1 %vm418_vm2, %v1022_v14  ;;  %2811 = vmatprep.mubr.msk.f32.mxu1 %vm388_vm4, %v1017_v18 }
 0x6c0   :  { %2809 = vmatprep.subr.mxu1 %v1020_v17 }
 0x6c1   :  { %2810 = vmatpush3.msra.mxu1 %v1020_v17 }
 0x6c2   :  { %2814 = vmatprep.subr.msk.mxu1 %vm302_vm1, %v1147_v21  ;;  %2812 = vmatmul.mubr.msk.f32.vlgmr.msra.gmra.mxu1 %vm388_vm4, %v1018_v20 }
 0x6c3   :  { %2815 = vmatpush3.xpose.msk.msra.mxu1 %vm302_vm1, %v1147_v21  ;;  %2818 = vmatprep.mubr.msk.f32.mxu1 %vm302_vm1, %v3343_v59 }
 0x6c4   :  { %2816 = vmatprep.subr.msk.mxu1 %vm302_vm1, %v1145_v22 }
 0x6c7   :  { %2817 = vmatpush3.xpose.msk.msra.mxu1 %vm302_vm1, %v1145_v22 }
 0x6ca   :  { %2819 = vmatmul.mubr.msk.f32.vlgmr.msra.gmra.mxu1 %vm302_vm1, %v3334_v54 }
 0x77a   :  { %v3369_v23 = vpop.f32.mrf.mxu1 }
 0x77c   :  { %v3371_v24 = vpop.f32.mrf.mxu1 }
 0x77e   :  { %v3373_v25 = vpop.f32.mrf.mxu1 }
 0x780   :  { %v3375_v26 = vpop.f32.mrf.mxu1 }
 0x782   :  { %v3377_v27 = vpop.f32.mrf.mxu1 }
 0x784   :  { %v3379_v28 = vpop.f32.mrf.mxu1 }
 0x78a   :  { %v2820_v29 = vpop.f32.mrf.mxu1 }
 0x78b   :  { %v1232_v30 = vmul.f32 0.25, %v2820_v29 }
 0x78c   :  { %v1222_v31 = vpop.f32.mrf.mxu1 }
 0x78d   :  { %v1231_v32 = vmul.f32 0.25, %v1222_v31  ;;  %v1236_v33 = vsel %vm392_vm3, %v1232_v30, -inf }
 0x78e   :  { %1237 = vmax.xlane.f32.xlu1 %v1236_v33 }
 0x78f   :  { %v1233_v34 = vsel %vm388_vm4, %v1231_v32, -inf }
 0x790   :  { %1234 = vmax.xlane.f32.xlu0 %v1233_v34 }
 0x79f   :  { %1347 = vrot.lane.b32.xlu1 %v3343_v59, %s3015_s29 }
 0x7a3   :  { %1343 = vrot.lane.b32.xlu1 %v3343_v59, %s3017_s16 }
 0x7a7   :  { %1345 = vrot.lane.b32.xlu1 %v3334_v54, %s3017_s16 }
 0x817   :  { %v1238_v35 = vpop.xlane.xlu1 %1237 }
 0x818   :  { %v1240_v36 = vsub.f32 %v1232_v30, %v1238_v35 }
 0x819   :  { %v1235_v37 = vpop.xlane.xlu0 %1234 }
 0x81a   :  { %v1243_v39 = vmul.f32 1.442695, %v1240_v36  ;;  %v1239_v41 = vsub.f32 %v1231_v32, %v1235_v37 }
 0x81b   :  { %v1348_v50 = vpop.permute.xlu1 %1347 }
 0x81c   :  { %2942 = vpow2.f32 %v1243_v39  ;;  %v1241_v42 = vmul.f32 1.442695, %v1239_v41 }
 0x81e   :  { %2944 = vpow2.f32 %v1241_v42 }
 0x81f   :  { %v1344_v62 = vpop.permute.xlu1 %1343 }
 0x823   :  { %v1346_v60 = vpop.permute.xlu1 %1345 }
 0x829   :  { %v2943_v43 = vpop.eup %2942 }
 0x82a   :  { %v1248_v44 = vsel %vm392_vm3, %v2943_v43, 0.0 }
 0x82b   :  { %v2945_v45 = vpop.eup %2944  ;;  %1249 = vadd.xlane.f32.xlu0 %v1248_v44 }
 0x82c   :  { %v1245_v38 = vsel %vm388_vm4, %v2945_v45, 0.0 }
 0x82f   :  { %1246 = vadd.xlane.f32.xlu0 %v1245_v38 }
 0x845   :  { %1349 = vrot.lane.b32.xlu0 %v3334_v54, %s3015_s29 }
 0x8b4   :  { %v1250_v40 = vpop.xlane.xlu0 %1249 }
 0x8b5   :  { %2946 = vrcp.f32 %v1250_v40 }
 0x8b8   :  { %v1247_v46 = vpop.xlane.xlu0 %1246 }
 0x8b9   :  { %2948 = vrcp.f32 %v1247_v46 }
 0x8bc   :  { %v1350_v47 = vpop.permute.xlu0 %1349 }
 0x8bd   :  { %2828 = vmatprep.subr.msk.mxu0 %vm302_vm1, %v1350_v47 }
 0x8c2   :  { %v2947_v53 = vpop.eup %2946 }
 0x8c3   :  { %v1254_v52 = vmul.f32 %v2947_v53, %v2943_v43 }
 0x8c6   :  { %v2949_v55 = vpop.eup %2948 }
 0x8c7   :  { %v1253_v51 = vmul.f32 %v2949_v55, %v2945_v45 }
 0x8c9   :  { %2825 = vmatprep.mubr.msk.f32.mxu0 %vm388_vm4, %v1253_v51 }
 0x8ca   :  { %2826 = vmatmul.mubr.msk.f32.vlgmr.msra.gmra.mxu0 %vm388_vm4, %v1254_v52 }
 0x8cb   :  { %2829 = vmatpush3.xpose.msk.msra.mxu0 %vm302_vm1, %v1350_v47  ;;  %2832 = vmatprep.mubr.msk.f32.mxu0 %vm302_vm1, %v1344_v62 }
 0x8cc   :  { %2830 = vmatprep.subr.msk.mxu0 %vm302_vm1, %v1348_v50 }
 0x8cf   :  { %2831 = vmatpush3.xpose.msk.msra.mxu0 %vm302_vm1, %v1348_v50 }
 0x8d2   :  { %2833 = vmatmul.mubr.msk.f32.vlgmr.msra.gmra.mxu0 %vm302_vm1, %v1346_v60 }
 0x98a   :  { %v3401_v0 = vpop.f32.mrf.mxu0 }
 0x98c   :  { %v3403_v61 = vpop.f32.mrf.mxu0 }
 0x992   :  { %v2834_v56 = vpop.f32.mrf.mxu0 }
 0x993   :  { %v1435_v63 = vmul.f32 0.25, %v2834_v56 }
 0x994   :  { %v1425_v4 = vpop.f32.mrf.mxu0 }
 0x995   :  { %v1434_v5 = vmul.f32 0.25, %v1425_v4  ;;  %v1439_v6 = vsel %vm392_vm3, %v1435_v63, -inf }
 0x996   :  { %1440 = vmax.xlane.f32.xlu1 %v1439_v6 }
 0x997   :  { %v1436_v7 = vsel %vm388_vm4, %v1434_v5, -inf }
 0x998   :  { %1437 = vmax.xlane.f32.xlu0 %v1436_v7 }
 0x9a7   :  { %1458 = vrot.lane.b32.xlu1 %v3294_v1, %s3017_s16 }
 0x9ab   :  { %1552 = vrot.lane.b32.xlu1 %v3334_v54, %s3016_s30 }
 0x9af   :  { %1550 = vrot.lane.b32.xlu1 %v3343_v59, %s3016_s30 }
 0x9b3   :  { %1548 = vrot.lane.b32.xlu1 %v3334_v54, %s3018_s17 }
 0xa1f   :  { %v1441_v8 = vpop.xlane.xlu1 %1440 }
 0xa20   :  { %v1443_v9 = vsub.f32 %v1435_v63, %v1441_v8 }
 0xa21   :  { %v1438_v10 = vpop.xlane.xlu0 %1437 }
 0xa22   :  { %v1446_v11 = vmul.f32 1.442695, %v1443_v9  ;;  %v1442_v12 = vsub.f32 %v1434_v5, %v1438_v10 }
 0xa23   :  { %v1459_v21 = vpop.permute.xlu1 %1458 }
 0xa24   :  { %2950 = vpow2.f32 %v1446_v11  ;;  %v1444_v13 = vmul.f32 1.442695, %v1442_v12 }
 0xa26   :  { %2952 = vpow2.f32 %v1444_v13 }
 0xa27   :  { %v1553_v29 = vpop.permute.xlu1 %1552 }
 0xa2b   :  { %v1551_v35 = vpop.permute.xlu1 %1550 }
 0xa2f   :  { %v1549_v36 = vpop.permute.xlu1 %1548 }
 0xa31   :  { %v2951_v14 = vpop.eup %2950 }
 0xa32   :  { %v1451_v15 = vsel %vm392_vm3, %v2951_v14, 0.0 }
 0xa33   :  { %v2953_v16 = vpop.eup %2952  ;;  %1452 = vadd.xlane.f32.xlu0 %v1451_v15 }
 0xa34   :  { %v1448_v17 = vsel %vm388_vm4, %v2953_v16, 0.0 }
 0xa37   :  { %1449 = vadd.xlane.f32.xlu0 %v1448_v17 }
 0xa4d   :  { %1460 = vrot.lane.b32.xlu0 %v3287_v58, %s3017_s16 }
 0xa51   :  { %1546 = vrot.lane.b32.xlu0 %v3343_v59, %s3018_s17 }
 0xabc   :  { %v1453_v18 = vpop.xlane.xlu0 %1452 }
 0xabd   :  { %2954 = vrcp.f32 %v1453_v18 }
 0xac0   :  { %v1450_v20 = vpop.xlane.xlu0 %1449 }
 0xac1   :  { %2956 = vrcp.f32 %v1450_v20 }
 0xac4   :  { %v1461_v22 = vpop.permute.xlu0 %1460 }
 0xac5   :  { %2835 = vmatprep.subr.msk.mxu1 %vm418_vm2, %v1461_v22 }
 0xac6   :  { %2836 = vmatpush3.msk.msra.mxu1 %vm418_vm2, %v1461_v22  ;;  %v78_v22 = vld [vmem:[%s3853_s5 + $0x30] sm:$0xff] }
 0xac7   :  { %2837 = vmatprep.subr.mxu1 %v1459_v21 }
 0xac8   :  { %2838 = vmatpush3.msra.mxu1 %v1459_v21  ;;  %v1547_v34 = vpop.permute.xlu0 %1546  ;;  %v79_v21 = vld [vmem:[%s3853_s5 + $0x38] sm:$0xff] }
 0xac9   :  { %2842 = vmatprep.subr.msk.mxu1 %vm302_vm1, %v1553_v29 }
 0xaca   :  { %v2955_v30 = vpop.eup %2954 }
 0xacb   :  { %v1457_v33 = vmul.f32 %v2955_v30, %v2951_v14  ;;  %v76_v30 = vld [vmem:[%s3853_s5 + $0x20] sm:$0xff] }
 0xace   :  { %v2957_v31 = vpop.eup %2956 }
 0xacf   :  { %v1456_v32 = vmul.f32 %v2957_v31, %v2953_v16  ;;  %v75_v31 = vld [vmem:[%s3853_s5 + $0x18] sm:$0xff] }
 0xad1   :  { %2839 = vmatprep.mubr.msk.f32.mxu1 %vm388_vm4, %v1456_v32  ;;  %v73_v32 = vld [vmem:[%s3853_s5 + $0x8] sm:$0xff] }
 0xad2   :  { %2840 = vmatmul.mubr.msk.f32.vlgmr.msra.gmra.mxu1 %vm388_vm4, %v1457_v33 }
 0xad3   :  { %2843 = vmatpush3.xpose.msk.msra.mxu1 %vm302_vm1, %v1553_v29  ;;  %2846 = vmatprep.mubr.msk.f32.mxu1 %vm302_vm1, %v1547_v34  ;;  %v77_v29 = vld [vmem:[%s3853_s5 + $0x28] sm:$0xff] }
 0xad4   :  { %2844 = vmatprep.subr.msk.mxu1 %vm302_vm1, %v1551_v35 }
 0xad7   :  { %2845 = vmatpush3.xpose.msk.msra.mxu1 %vm302_vm1, %v1551_v35 }
 0xada   :  { %2847 = vmatmul.mubr.msk.f32.vlgmr.msra.gmra.mxu1 %vm302_vm1, %v1549_v36 }
 0xb92   :  { %v3431_v37 = vpop.f32.mrf.mxu1 }
 0xb94   :  { %v3433_v39 = vpop.f32.mrf.mxu1 }
 0xb9a   :  { %v2848_v41 = vpop.f32.mrf.mxu1 }
 0xb9b   :  { %v1638_v42 = vmul.f32 0.25, %v2848_v41 }
 0xb9c   :  { %v1628_v43 = vpop.f32.mrf.mxu1 }
 0xb9d   :  { %v1637_v44 = vmul.f32 0.25, %v1628_v43  ;;  %v1642_v45 = vsel %vm392_vm3, %v1638_v42, -inf }
 0xb9e   :  { %1643 = vmax.xlane.f32.xlu1 %v1642_v45 }
 0xb9f   :  { %v1639_v38 = vsel %vm388_vm4, %v1637_v44, -inf }
 0xba0   :  { %1640 = vmax.xlane.f32.xlu0 %v1639_v38 }
 0xbaf   :  { %1661 = vrot.lane.b32.xlu1 %v3294_v1, %s3018_s17 }
 0xbb3   :  { %1755 = vrot.lane.b32.xlu1 %v3334_v54, %s3020_s19 }
 0xbb7   :  { %1753 = vrot.lane.b32.xlu1 %v3343_v59, %s3020_s19 }
 0xbbb   :  { %1751 = vrot.lane.b32.xlu1 %v3334_v54, %s3019_s18 }
 0xc27   :  { %v1644_v40 = vpop.xlane.xlu1 %1643 }
 0xc28   :  { %v1646_v46 = vsub.f32 %v1638_v42, %v1644_v40 }
 0xc29   :  { %v1641_v47 = vpop.xlane.xlu0 %1640 }
 0xc2a   :  { %v1649_v50 = vmul.f32 1.442695, %v1646_v46  ;;  %v1645_v53 = vsub.f32 %v1637_v44, %v1641_v47 }
 0xc2b   :  { %v1662_v63 = vpop.permute.xlu1 %1661 }
 0xc2c   :  { %2958 = vpow2.f32 %v1649_v50  ;;  %v1647_v55 = vmul.f32 1.442695, %v1645_v53 }
 0xc2e   :  { %2960 = vpow2.f32 %v1647_v55 }
 0xc2f   :  { %v1756_v5 = vpop.permute.xlu1 %1755 }
 0xc33   :  { %v1754_v10 = vpop.permute.xlu1 %1753 }
 0xc37   :  { %v1752_v11 = vpop.permute.xlu1 %1751 }
 0xc39   :  { %v2959_v51 = vpop.eup %2958 }
 0xc3a   :  { %v1654_v52 = vsel %vm392_vm3, %v2959_v51, 0.0 }
 0xc3b   :  { %v2961_v62 = vpop.eup %2960  ;;  %1655 = vadd.xlane.f32.xlu0 %v1654_v52 }
 0xc3c   :  { %v1651_v60 = vsel %vm388_vm4, %v2961_v62, 0.0 }
 0xc3f   :  { %1652 = vadd.xlane.f32.xlu0 %v1651_v60  ;;  %v3010_v60 = vld [vmem:[%s3848_s0] sm:$0xff] }
 0xc55   :  { %1663 = vrot.lane.b32.xlu0 %v3287_v58, %s3018_s17 }
 0xc59   :  { %1749 = vrot.lane.b32.xlu0 %v3343_v59, %s3019_s18 }
 0xcc4   :  { %v1656_v54 = vpop.xlane.xlu0 %1655 }
 0xcc5   :  { %2962 = vrcp.f32 %v1656_v54 }
 0xcc8   :  { %v1653_v56 = vpop.xlane.xlu0 %1652 }
 0xcc9   :  { %2964 = vrcp.f32 %v1653_v56  ;;  %v2633_v56 = vld [vmem:[%s3854_s6] ss:$0 sm:$0xff] }
 0xccc   :  { %v1664_v4 = vpop.permute.xlu0 %1663 }
 0xccd   :  { %2849 = vmatprep.subr.msk.mxu0 %vm418_vm2, %v1664_v4 }
 0xcce   :  { %2850 = vmatpush3.msk.msra.mxu0 %vm418_vm2, %v1664_v4 }
 0xccf   :  { %2851 = vmatprep.subr.mxu0 %v1662_v63 }
 0xcd0   :  { %2852 = vmatpush3.msra.mxu0 %v1662_v63  ;;  %v1750_v59 = vpop.permute.xlu0 %1749 }
 0xcd1   :  { %2856 = vmatprep.subr.msk.mxu0 %vm302_vm1, %v1756_v5 }
 0xcd2   :  { %v2963_v6 = vpop.eup %2962 }
 0xcd3   :  { %v1660_v9 = vmul.f32 %v2963_v6, %v2959_v51 }
 0xcd6   :  { %v2965_v7 = vpop.eup %2964 }
 0xcd7   :  { %v1659_v8 = vmul.f32 %v2965_v7, %v2961_v62 }
 0xcd9   :  { %2853 = vmatprep.mubr.msk.f32.mxu0 %vm388_vm4, %v1659_v8 }
 0xcda   :  { %2854 = vmatmul.mubr.msk.f32.vlgmr.msra.gmra.mxu0 %vm388_vm4, %v1660_v9 }
 0xcdb   :  { %2857 = vmatpush3.xpose.msk.msra.mxu0 %vm302_vm1, %v1756_v5  ;;  %2860 = vmatprep.mubr.msk.f32.mxu0 %vm302_vm1, %v1750_v59 }
 0xcdc   :  { %2858 = vmatprep.subr.msk.mxu0 %vm302_vm1, %v1754_v10 }
 0xcdf   :  { %2859 = vmatpush3.xpose.msk.msra.mxu0 %vm302_vm1, %v1754_v10 }
 0xce0   :  { %2870 = vmatprep.subr.mxu0 %v3013_v19 }
 0xce2   :  { %2861 = vmatmul.mubr.msk.f32.vlgmr.msra.gmra.mxu0 %vm302_vm1, %v1752_v11 }
 0xce3   :  { %2871 = vmatpush3.msra.mxu0 %v79_v21  ;;  %2886 = vmatprep.mubr.msk.f32.mxu0 %vm3021_vm7, %v3013_v19 }
 0xce4   :  { %2872 = vmatprep.subr.mxu0 %v3013_v19 }
 0xce5   :  { %2873 = vmatpush3.msra.mxu0 %v78_v22 }
 0xce6   :  { %2874 = vmatprep.subr.mxu0 %v3013_v19 }
 0xce7   :  { %2875 = vmatpush3.msra.mxu0 %v77_v29 }
 0xce8   :  { %2876 = vmatprep.subr.mxu0 %v3013_v19 }
 0xce9   :  { %2877 = vmatpush3.msra.mxu0 %v76_v30 }
 0xcea   :  { %2878 = vmatprep.subr.mxu0 %v3013_v19 }
 0xceb   :  { %2879 = vmatpush3.msra.mxu0 %v75_v31 }
 0xcec   :  { %2880 = vmatprep.subr.mxu0 %v3013_v19 }
 0xd9a   :  { %v3462_v12 = vpop.f32.mrf.mxu0 }
 0xd9c   :  { %v3464_v13 = vpop.f32.mrf.mxu0 }
 0xda2   :  { %v2862_v14 = vpop.f32.mrf.mxu0 }
 0xda3   :  { %v1841_v15 = vmul.f32 0.25, %v2862_v14 }
 0xda4   :  { %v1831_v16 = vpop.f32.mrf.mxu0 }
 0xda5   :  { %v1840_v17 = vmul.f32 0.25, %v1831_v16  ;;  %v1845_v18 = vsel %vm392_vm3, %v1841_v15, -inf }
 0xda6   :  { %1846 = vmax.xlane.f32.xlu1 %v1845_v18 }
 0xda7   :  { %v1842_v20 = vsel %vm388_vm4, %v1840_v17, -inf }
 0xda8   :  { %1843 = vmax.xlane.f32.xlu0 %v1842_v20 }
 0xdb7   :  { %1864 = vrot.lane.b32.xlu1 %v3294_v1, %s3019_s18  ;;  %v74_v1 = vld [vmem:[%s3853_s5 + $0x10] sm:$0xff] }
 0xdb8   :  { %2881 = vmatpush3.msra.mxu0 %v74_v1  ;;  %v3011_v1 = vld [vmem:[%s3848_s0 + $0x8] sm:$0xff] }
 0xdb9   :  { %2882 = vmatprep.subr.mxu0 %v3013_v19 }
 0xdba   :  { %2883 = vmatpush3.msra.mxu0 %v73_v32 }
 0xdbb   :  { %1109 = vrot.lane.b32.xlu1 %v3371_v24, %s3020_s19  ;;  %2884 = vmatprep.subr.mxu0 %v3013_v19  ;;  %v72_v24 = vld [vmem:[%s3853_s5] sm:$0xff] }
 0xdbc   :  { %2885 = vmatpush3.msra.mxu0 %v72_v24 }
 0xdbf   :  { %1117 = vrot.lane.b32.xlu1 %v3375_v26, %s3016_s30 }
 0xdc3   :  { %1125 = vrot.lane.b32.xlu1 %v3379_v28, %s3015_s29 }
 0xdc7   :  { %1111 = vrot.lane.b32.xlu1 %v3369_v23, %s3020_s19 }
 0xdcb   :  { %1119 = vrot.lane.b32.xlu1 %v3373_v25, %s3016_s30 }
 0xdcf   :  { %1956 = vrot.lane.b32.xlu1 %v3431_v37, %s3020_s19 }
 0xe2f   :  { %v1847_v26 = vpop.xlane.xlu1 %1846 }
 0xe30   :  { %v1849_v33 = vsub.f32 %v1841_v15, %v1847_v26 }
 0xe31   :  { %v1844_v34 = vpop.xlane.xlu0 %1843 }
 0xe32   :  { %v1852_v35 = vmul.f32 1.442695, %v1849_v33  ;;  %v1848_v36 = vsub.f32 %v1840_v17, %v1844_v34 }
 0xe33   :  { %v1865_v41 = vpop.permute.xlu1 %1864 }
 0xe34   :  { %2966 = vpow2.f32 %v1852_v35  ;;  %v1850_v42 = vmul.f32 1.442695, %v1848_v36 }
 0xe36   :  { %2968 = vpow2.f32 %v1850_v42 }
 0xe37   :  { %v1110_v43 = vpop.permute.xlu1 %1109 }
 0xe38   :  { %v1131_v23 = vsel %vm302_vm1, %v3303_v3, %v1110_v43 }
 0xe3b   :  { %v1118_v28 = vpop.permute.xlu1 %1117 }
 0xe3c   :  { %v1134_v25 = vsel %vm1133_vm8, %v1131_v23, %v1118_v28 }
 0xe3f   :  { %v1126_v44 = vpop.permute.xlu1 %1125 }
 0xe40   :  { %v1137_v37 = vsel %vm1136_vm9, %v1134_v25, %v1126_v44 }
 0xe41   :  { %v2967_v45 = vpop.eup %2966  ;;  %2887 = vmatmul.mubr.msk.f32.vlgmr.msra.gmra.mxu0 %vm133_vm0, %v1137_v37  ;;  %v98_v37 = vld [vmem:[%s3855_s9 + $0x78] sm:$0xff] }
 0xe42   :  { %v1857_v38 = vsel %vm392_vm3, %v2967_v45, 0.0  ;;  %2889 = vmatprep.mubr.msk.f32.mxu0 %vm3021_vm7, %v3013_v19  ;;  %2182 = vmatprep.subr.mxu0 %v98_v37 }
 0xe43   :  { %v2969_v40 = vpop.eup %2968  ;;  %1858 = vadd.xlane.f32.xlu0 %v1857_v38  ;;  %v1112_v6 = vpop.permute.xlu1 %1111  ;;  %v96_v38 = vld [vmem:[%s3855_s9 + $0x68] sm:$0xff] }
 0xe44   :  { %v1854_v46 = vsel %vm388_vm4, %v2969_v40, 0.0 }
 0xe47   :  { %1855 = vadd.xlane.f32.xlu0 %v1854_v46  ;;  %v1120_v8 = vpop.permute.xlu1 %1119  ;;  %v94_v46 = vld [vmem:[%s3855_s9 + $0x58] sm:$0xff] }
 0xe5d   :  { %1866 = vrot.lane.b32.xlu0 %v3287_v58, %s3019_s18 }
 0xe61   :  { %1954 = vrot.lane.b32.xlu0 %v3433_v39, %s3020_s19 }
 0xe65   :  { %1962 = vrot.lane.b32.xlu0 %v3464_v13, %s3016_s30  ;;  %v1957_v13 = vpop.permute.xlu1 %1956 }
 0xe66   :  { %v1977_v18 = vsel %vm302_vm1, %v3401_v0, %v1957_v13 }
 0xe69   :  { %1127 = vrot.lane.b32.xlu0 %v3377_v27, %s3015_s29 }
 0xecc   :  { %v1859_v3 = vpop.xlane.xlu0 %1858 }
 0xecd   :  { %2970 = vrcp.f32 %v1859_v3  ;;  %v93_v3 = vld [vmem:[%s3855_s9 + $0x50] sm:$0xff] }
 0xed0   :  { %v1856_v47 = vpop.xlane.xlu0 %1855 }
 0xed1   :  { %2972 = vrcp.f32 %v1856_v47  ;;  %v92_v47 = vld [vmem:[%s3855_s9 + $0x48] sm:$0xff] }
 0xed4   :  { %v1867_v50 = vpop.permute.xlu0 %1866 }
 0xed5   :  { %2863 = vmatprep.subr.msk.mxu1 %vm418_vm2, %v1867_v50 }
 0xed6   :  { %2864 = vmatpush3.msk.msra.mxu1 %vm418_vm2, %v1867_v50  ;;  %v91_v50 = vld [vmem:[%s3855_s9 + $0x40] sm:$0xff] }
 0xed7   :  { %2865 = vmatprep.subr.mxu1 %v1865_v41 }
 0xed8   :  { %2866 = vmatpush3.msra.mxu1 %v1865_v41  ;;  %v1955_v5 = vpop.permute.xlu0 %1954  ;;  %v3012_v41 = vld [vmem:[%s3848_s0 + $0x10] sm:$0x3] }
 0xed9   :  { %v1976_v59 = vsel %vm302_vm1, %v3403_v61, %v1955_v5 }
 0xeda   :  { %v2971_v58 = vpop.eup %2970 }
 0xedb   :  { %v1863_v55 = vmul.f32 %v2971_v58, %v2967_v45  ;;  %v97_v45 = vld [vmem:[%s3855_s9 + $0x70] sm:$0xff]  ;;  %v90_v58 = vld [vmem:[%s3855_s9 + $0x38] sm:$0xff] }
 0xedc   :  { %v1963_v7 = vpop.permute.xlu0 %1962  ;;  %2183 = vmatpush1.msra.mxu0 %v97_v45  ;;  %v120_v45 = vld [vmem:[%s3858_s11 + $0xa0] sm:$0xff] }
 0xedd   :  { %v1978_v10 = vsel %vm1133_vm8, %v1976_v59, %v1963_v7  ;;  %2184 = vmatprep.subr.mxu0 %v96_v38 }
 0xede   :  { %v2973_v53 = vpop.eup %2972 }
 0xedf   :  { %v1862_v39 = vmul.f32 %v2973_v53, %v2969_v40  ;;  %v95_v40 = vld [vmem:[%s3855_s9 + $0x60] sm:$0xff]  ;;  %v89_v53 = vld [vmem:[%s3855_s9 + $0x30] sm:$0xff] }
 0xee0   :  { %v1128_v9 = vpop.permute.xlu0 %1127  ;;  %2185 = vmatpush1.msra.mxu0 %v95_v40  ;;  %v104_v40 = vld [vmem:[%s3858_s11 + $0x20] sm:$0xff] }
 0xee1   :  { %2867 = vmatprep.mubr.msk.f32.mxu1 %vm388_vm4, %v1862_v39  ;;  %2186 = vmatprep.subr.mxu0 %v94_v46  ;;  %v88_v39 = vld [vmem:[%s3855_s9 + $0x28] sm:$0xff]  ;;  %v119_v46 = vld [vmem:[%s3858_s11 + $0x98] sm:$0xff] }
 0xee2   :  { %2868 = vmatmul.mubr.msk.f32.vlgmr.msra.gmra.mxu1 %vm388_vm4, %v1863_v55  ;;  %2187 = vmatpush1.msra.mxu0 %v93_v3  ;;  %v87_v55 = vld [vmem:[%s3855_s9 + $0x20] sm:$0xff] }
 0xee3   :  { %2188 = vmatprep.subr.mxu0 %v92_v47  ;;  %v103_v47 = vld [vmem:[%s3858_s11 + $0x18] sm:$0xff] }
 0xee4   :  { %2189 = vmatpush1.msra.mxu0 %v91_v50  ;;  %v118_v50 = vld [vmem:[%s3858_s11 + $0x90] sm:$0xff] }
 0xee5   :  { %2190 = vmatprep.subr.mxu0 %v90_v58 }
 0xee6   :  { %2191 = vmatpush1.msra.mxu0 %v89_v53  ;;  %v102_v53 = vld [vmem:[%s3858_s11 + $0x10] sm:$0xff] }
 0xee7   :  { %2192 = vmatprep.subr.mxu0 %v88_v39  ;;  %v117_v39 = vld [vmem:[%s3858_s11 + $0x88] sm:$0xff] }
 0xee8   :  { %2193 = vmatpush1.msra.mxu0 %v87_v55  ;;  %v101_v55 = vld [vmem:[%s3858_s11 + $0x8] sm:$0xff] }
 0xf01   :  { %v2063_v27 = vpop.f32.mrf.mxu0 }
 0xf02   :  { %v2077_v54 = vadd.f32 %v3010_v60, %v2063_v27  ;;  %v86_v27 = vld [vmem:[%s3855_s9 + $0x18] sm:$0xff] }
 0xf03   :  { %v2888_v51 = vpop.f32.mrf.mxu0  ;;  %2194 = vmatprep.subr.mxu0 %v86_v27 }
 0xf04   :  { %v3546_v63 = vadd.f32 %v2633_v56, %v2077_v54  ;;  %v85_v51 = vld [vmem:[%s3855_s9 + $0x10] sm:$0xff] }
 0xf05   :  { %2195 = vmatpush1.msra.mxu0 %v85_v51  ;;  %v116_v51 = vld [vmem:[%s3858_s11 + $0x80] sm:$0xff] }
 0xf06   :  { %v2089_v4 = vsel %vm133_vm0, %v3546_v63, 0.0 }
 0xfa2   :  { %v2869_v52 = vpop.f32.mrf.mxu1 }
 0xfa3   :  { %1972 = vrot.lane.b32.xlu1 %v2869_v52, %s3015_s29  ;;  %v84_v52 = vld [vmem:[%s3855_s9 + $0x8] sm:$0xff] }
 0xfa4   :  { %v1943_v62 = vpop.f32.mrf.mxu1  ;;  %2196 = vmatprep.subr.mxu0 %v84_v52  ;;  %v100_v52 = vld [vmem:[%s3858_s11] sm:$0xff] }
 0xfa5   :  { %1970 = vrot.lane.b32.xlu0 %v1943_v62, %s3015_s29  ;;  %v83_v62 = vld [vmem:[%s3855_s9] sm:$0xff] }
 0xfa6   :  { %2197 = vmatpush1.msra.mxu0 %v83_v62 }
 0xfa9   :  { %1964 = vrot.lane.b32.xlu0 %v3462_v12, %s3016_s30  ;;  %v1132_v12 = vsel %vm302_vm1, %v3301_v2, %v1112_v6 }
 0xfaa   :  { %v1135_v15 = vsel %vm1133_vm8, %v1132_v12, %v1120_v8 }
 0xfab   :  { %v1138_v17 = vsel %vm1136_vm9, %v1135_v15, %v1128_v9 }
 0xfc8   :  { %2090 = vadd.xlane.f32.xlu0 %v2089_v4 }
0x1015   :  { %v1973_v21 = vpop.permute.xlu1 %1972 }
0x1017   :  { %v1971_v11 = vpop.permute.xlu0 %1970 }
0x1018   :  { %v1980_v14 = vsel %vm1136_vm9, %v1978_v10, %v1971_v11 }
0x1019   :  { %v1984_v16 = vrot.slane %v1980_v14, 7  ;;  %v3652_v14 = vld [vmem:[%s3856_s7] ss:$0 sm:$0xff] }
0x101b   :  { %v1965_v20 = vpop.permute.xlu0 %1964  ;;  %v1988_v61 = vsel %vm418_vm2, %v1138_v17, %v1984_v16 }
0x101c   :  { %v1979_v22 = vsel %vm1133_vm8, %v1977_v18, %v1965_v20  ;;  %2890 = vmatmul.mubr.msk.f32.gmra.mxu0 %vm133_vm0, %v1988_v61  ;;  %v131_v20 = vld [vmem:[%s3858_s11 + $0xf8] sm:$0xff] }
0x101d   :  { %v1981_v2 = vsel %vm1136_vm9, %v1979_v22, %v1973_v21  ;;  %2892 = vmatprep.mubr.msk.f32.mxu0 %vm3021_vm7, %v3013_v19  ;;  %2717 = vmatprep.subr.mxu1 %v131_v20  ;;  %v115_v61 = vld [vmem:[%s3858_s11 + $0x78] sm:$0xff]  ;;  %v130_v21 = vld [vmem:[%s3858_s11 + $0xf0] sm:$0xff] }
0x101e   :  { %v1985_v29 = vrot.slane %v1981_v2, 7  ;;  %2718 = vmatpush3.msra.mxu1 %v115_v61  ;;  %v114_v22 = vld [vmem:[%s3858_s11 + $0x70] sm:$0xff]  ;;  %v129_v2 = vld [vmem:[%s3858_s11 + $0xe8] sm:$0xff] }
0x101f   :  { %2719 = vmatprep.subr.mxu1 %v130_v21 }
0x1020   :  { %v1986_v30 = vsel %vm418_vm2, %v1984_v16, %v1985_v29  ;;  %v3658_v16 = vld [vmem:[%s3857_s8] ss:$0 sm:$0xff]  ;;  %2720 = vmatpush3.msra.mxu1 %v114_v22  ;;  %v113_v29 = vld [vmem:[%s3858_s11 + $0x68] sm:$0xff] }
0x1021   :  { %2893 = vmatmul.mubr.msk.f32.gmra.mxu0 %vm133_vm0, %v1986_v30  ;;  %2721 = vmatprep.subr.mxu1 %v129_v2  ;;  %v128_v30 = vld [vmem:[%s3858_s11 + $0xe0] sm:$0xff] }
0x1022   :  { %2230 = vmatprep.mubr.f32.mxu0 %v3013_v19  ;;  %2722 = vmatpush3.msra.mxu1 %v113_v29 }
0x1023   :  { %2723 = vmatprep.subr.mxu1 %v128_v30 }
0x1051   :  { %v2091_v0 = vpop.xlane.xlu0 %2090 }
0x1052   :  { %v2098_v24 = vmul.f32 0.015625, %v2091_v0  ;;  %v112_v0 = vld [vmem:[%s3858_s11 + $0x60] sm:$0xff] }
0x1053   :  { %2724 = vmatpush3.msra.mxu1 %v112_v0 }
0x1054   :  { %v3577_v36 = vsub.f32 %v3546_v63, %v2098_v24  ;;  %v110_v24 = vld [vmem:[%s3858_s11 + $0x50] sm:$0xff] }
0x1056   :  { %v2104_v25 = vmul.f32 %v3577_v36, %v3577_v36 }
0x1058   :  { %v2107_v44 = vsel %vm133_vm0, %v2104_v25, 0.0  ;;  %v121_v25 = vld [vmem:[%s3858_s11 + $0xa8] sm:$0xff] }
0x10dc   :  { %v2068_v31 = vpop.f32.mrf.mxu0 }
0x10dd   :  { %v2078_v32 = vadd.f32 %v3011_v1, %v2068_v31  ;;  %v127_v31 = vld [vmem:[%s3858_s11 + $0xd8] sm:$0xff] }
0x10de   :  { %v2891_v26 = vpop.f32.mrf.mxu0  ;;  %2725 = vmatprep.subr.mxu1 %v127_v31  ;;  %v111_v1 = vld [vmem:[%s3858_s11 + $0x58] sm:$0xff] }
0x10df   :  { %v3572_v33 = vadd.f32 %v2633_v56, %v2078_v32  ;;  %2726 = vmatpush3.msra.mxu1 %v111_v1  ;;  %v126_v32 = vld [vmem:[%s3858_s11 + $0xd0] sm:$0xff]  ;;  %v125_v26 = vld [vmem:[%s3858_s11 + $0xc8] sm:$0xff] }
0x10e0   :  { %2727 = vmatprep.subr.mxu1 %v126_v32 }
0x10e1   :  { %v2073_v34 = vpop.f32.mrf.mxu0  ;;  %v2092_v35 = vsel %vm133_vm0, %v3572_v33, 0.0  ;;  %2728 = vmatpush3.msra.mxu1 %v110_v24 }
0x10e2   :  { %v2079_v42 = vadd.f32 %v3012_v41, %v2073_v34  ;;  %2093 = vadd.xlane.f32.xlu1 %v2092_v35  ;;  %2729 = vmatprep.subr.mxu1 %v125_v26  ;;  %v109_v34 = vld [vmem:[%s3858_s11 + $0x48] sm:$0xff]  ;;  %v124_v35 = vld [vmem:[%s3858_s11 + $0xc0] sm:$0xff]  ;;  %v123_v41 = vld [vmem:[%s3858_s11 + $0xb8] sm:$0xff] }
0x10e3   :  { %v2894_v43 = vpop.f32.mrf.mxu0  ;;  %2730 = vmatpush3.msra.mxu1 %v109_v34 }
0x10e4   :  { %v3582_v28 = vadd.f32 %v2633_v56, %v2079_v42  ;;  %2731 = vmatprep.subr.mxu1 %v124_v35  ;;  %v107_v42 = vld [vmem:[%s3858_s11 + $0x38] sm:$0xff]  ;;  %v122_v43 = vld [vmem:[%s3858_s11 + $0xb0] sm:$0xff] }
0x10e6   :  { %v2095_v23 = vsel %vm140_vm5, %v3582_v28, 0.0 }
0x10e7   :  { %2096 = vadd.xlane.f32.xlu0 %v2095_v23  ;;  %v106_v23 = vld [vmem:[%s3858_s11 + $0x30] sm:$0xff] }
0x10eb   :  { %2108 = vadd.xlane.f32.xlu0 %v2107_v44  ;;  %v105_v44 = vld [vmem:[%s3858_s11 + $0x28] sm:$0xff] }
0x116b   :  { %v2094_v60 = vpop.xlane.xlu1 %2093 }
0x116c   :  { %v2099_v54 = vmul.f32 0.015625, %v2094_v60 }
0x116e   :  { %v3638_v56 = vsub.f32 %v3572_v33, %v2099_v54 }
0x1170   :  { %v2097_v4 = vpop.xlane.xlu0 %2096  ;;  %v2105_v5 = vmul.f32 %v3638_v56, %v3638_v56 }
0x1171   :  { %v2100_v6 = vmul.f32 0.015625, %v2097_v4 }
0x1172   :  { %v2110_v7 = vsel %vm133_vm0, %v2105_v5, 0.0 }
0x1173   :  { %v3644_v8 = vsub.f32 %v3582_v28, %v2100_v6  ;;  %2111 = vadd.xlane.f32.xlu0 %v2110_v7 }
0x1174   :  { %v2109_v9 = vpop.xlane.xlu0 %2108 }
0x1175   :  { %v2116_v59 = vmul.f32 0.015625, %v2109_v9  ;;  %v2106_v10 = vmul.f32 %v3644_v8, %v3644_v8 }
0x1177   :  { %v2119_v11 = vadd.f32 1e-06, %v2116_v59  ;;  %v2113_v12 = vsel %vm140_vm5, %v2106_v10, 0.0 }
0x1178   :  { %2114 = vadd.xlane.f32.xlu1 %v2113_v12 }
0x1179   :  { %2974 = vrsqrt.f32 %v2119_v11 }
0x1186   :  { %v2975_v13 = vpop.eup %2974 }
0x1187   :  { %v2125_v15 = vmul.f32 %v2975_v13, %v3577_v36  ;;  %v108_v36 = vld [vmem:[%s3858_s11 + $0x40] sm:$0xff] }
0x1188   :  { %2732 = vmatpush3.msra.mxu1 %v108_v36 }
0x1189   :  { %v2134_v17 = vmul.f32 %v3652_v14, %v2125_v15  ;;  %2733 = vmatprep.subr.mxu1 %v123_v41 }
0x118a   :  { %2734 = vmatpush3.msra.mxu1 %v107_v42 }
0x118b   :  { %v2143_v18 = vadd.f32 %v3658_v16, %v2134_v17  ;;  %2735 = vmatprep.subr.mxu1 %v122_v43 }
0x118c   :  { %2736 = vmatpush3.msra.mxu1 %v106_v23 }
0x118d   :  { %2636 = vmatmul.mubr.msk.f32.vlgmr.msra.gmra.mxu0 %vm133_vm0, %v2143_v18  ;;  %2737 = vmatprep.subr.mxu1 %v121_v25 }
0x118e   :  { %2236 = vmatprep.mubr.f32.mxu0 %v3013_v19  ;;  %2738 = vmatpush3.msra.mxu1 %v105_v44 }
0x118f   :  { %2739 = vmatprep.subr.mxu1 %v120_v45 }
0x1190   :  { %2740 = vmatpush3.msra.mxu1 %v104_v40 }
0x1191   :  { %2741 = vmatprep.subr.mxu1 %v119_v46 }
0x1192   :  { %2742 = vmatpush3.msra.mxu1 %v103_v47 }
0x1193   :  { %2743 = vmatprep.subr.mxu1 %v118_v50 }
0x1194   :  { %2744 = vmatpush3.msra.mxu1 %v102_v53 }
0x1195   :  { %2745 = vmatprep.subr.mxu1 %v117_v39 }
0x1196   :  { %2746 = vmatpush3.msra.mxu1 %v101_v55 }
0x1197   :  { %2747 = vmatprep.subr.mxu1 %v116_v51 }
0x1198   :  { %2748 = vmatpush3.msra.mxu1 %v100_v52 }
0x11fc   :  { %v2112_v37 = vpop.xlane.xlu0 %2111 }
0x11fd   :  { %v2117_v38 = vmul.f32 0.015625, %v2112_v37 }
0x11ff   :  { %v2120_v3 = vadd.f32 1e-06, %v2117_v38 }
0x1201   :  { %2976 = vrsqrt.f32 %v2120_v3  ;;  %v2115_v58 = vpop.xlane.xlu1 %2114 }
0x1202   :  { %v2118_v27 = vmul.f32 0.015625, %v2115_v58 }
0x1204   :  { %v2121_v62 = vadd.f32 1e-06, %v2118_v27 }
0x1206   :  { %2978 = vrsqrt.f32 %v2121_v62 }
0x120e   :  { %v2977_v60 = vpop.eup %2976 }
0x120f   :  { %v2126_v54 = vmul.f32 %v2977_v60, %v3638_v56  ;;  %v99_v56 = vld [vmem:[%s3859_s10] sm:$0x3] }
0x1210   :  { %v3774_v10 = vrot.slane %v99_v56, %v196_v49 }
0x1211   :  { %v2135_v4 = vmul.f32 %v3652_v14, %v2126_v54 }
0x1213   :  { %v2979_v5 = vpop.eup %2978  ;;  %v2144_v6 = vadd.f32 %v3658_v16, %v2135_v4 }
0x1214   :  { %v2127_v7 = vmul.f32 %v2979_v5, %v3644_v8  ;;  %v3778_v8 = vrot.slane %v99_v56, %v200_v57 }
0x1215   :  { %2637 = vmatmul.mubr.msk.f32.gmra.mxu0 %vm133_vm0, %v2144_v6 }
0x1216   :  { %2242 = vmatprep.mubr.f32.mxu0 %v3013_v19  ;;  %v2136_v9 = vmul.f32 %v3652_v14, %v2127_v7 }
0x1218   :  { %v2145_v59 = vadd.f32 %v3658_v16, %v2136_v9 }
0x121a   :  { %2638 = vmatmul.mubr.msk.f32.gmra.mxu0 %vm133_vm0, %v2145_v59 }
0x124d   :  { %v2232_v11 = vpop.f32.mrf.mxu0 }
0x124e   :  { %v2233_v19 = vadd.f32 %v2232_v11, %v3774_v10 }
0x124f   :  { %v2234_v12 = vpop.f32.mrf.mxu0 }
0x1250   :  { %v2255_v13 = vmul.f32 0.70710677, %v2233_v19  ;;  %v2235_v14 = vadd.f32 %v2234_v12, %v3778_v8  ;;  %v2249_v54 = vmul.f32 0.5, %v2233_v19 }
0x1252   :  { %v2261_v15 = vand.u32 2147483647, %v2255_v13  ;;  %v2256_v16 = vmul.f32 0.70710677, %v2235_v14  ;;  %vm2381_vm10 = vcmp.ge.f32.partialorder %v2255_v13, 0.0  ;;  %v2250_v62 = vmul.f32 0.5, %v2235_v14 }
0x1254   :  { %v2267_v17 = vmul.f32 0.3275911, %v2261_v15  ;;  %v2262_v18 = vand.u32 2147483647, %v2256_v16  ;;  %v2345_v21 = vsub.f32 0.0, %v2261_v15  ;;  %vm2382_vm11 = vcmp.ge.f32.partialorder %v2256_v16, 0.0 }
0x1256   :  { %v2273_v20 = vadd.f32 1.0, %v2267_v17  ;;  %v2268_v61 = vmul.f32 0.3275911, %v2262_v18  ;;  %v2346_v48 = vsub.f32 0.0, %v2262_v18  ;;  %v2351_v57 = vmul.f32 %v2345_v21, %v2261_v15 }
0x1258   :  { %2980 = vrcp.f32 %v2273_v20  ;;  %v2274_v49 = vadd.f32 1.0, %v2268_v61  ;;  %v2352_v2 = vmul.f32 %v2346_v48, %v2262_v18  ;;  %v2357_v30 = vmul.f32 1.442695, %v2351_v57 }
0x125a   :  { %2982 = vrcp.f32 %v2274_v49  ;;  %v2359_v1 = vmul.f32 1.442695, %v2352_v2 }
0x125b   :  { %2984 = vpow2.f32 %v2357_v30 }
0x125c   :  { %2986 = vpow2.f32 %v2359_v1 }
0x1265   :  { %v2981_v22 = vpop.eup %2980 }
0x1266   :  { %v2291_v29 = vmul.f32 1.0614054, %v2981_v22 }
0x1267   :  { %v2983_v0 = vpop.eup %2982 }
0x1268   :  { %v2297_v31 = vadd.f32 -1.4531521, %v2291_v29  ;;  %v2292_v32 = vmul.f32 1.0614054, %v2983_v0  ;;  %v2985_v38 = vpop.eup %2984 }
0x1269   :  { %v2987_v47 = vpop.eup %2986 }
0x126a   :  { %v2303_v24 = vmul.f32 %v2981_v22, %v2297_v31  ;;  %v2298_v26 = vadd.f32 -1.4531521, %v2292_v32 }
0x126c   :  { %v2309_v34 = vadd.f32 1.4214138, %v2303_v24  ;;  %v2304_v35 = vmul.f32 %v2983_v0, %v2298_v26 }
0x126e   :  { %v2315_v36 = vmul.f32 %v2981_v22, %v2309_v34  ;;  %v2310_v41 = vadd.f32 1.4214138, %v2304_v35 }
0x1270   :  { %v2321_v42 = vadd.f32 -0.28449672, %v2315_v36  ;;  %v2316_v43 = vmul.f32 %v2983_v0, %v2310_v41 }
0x1272   :  { %v2327_v23 = vmul.f32 %v2981_v22, %v2321_v42  ;;  %v2322_v25 = vadd.f32 -0.28449672, %v2316_v43 }
0x1274   :  { %v2333_v44 = vadd.f32 0.2548296, %v2327_v23  ;;  %v2328_v37 = vmul.f32 %v2983_v0, %v2322_v25 }
0x1276   :  { %v2339_v45 = vmul.f32 %v2981_v22, %v2333_v44  ;;  %v2334_v40 = vadd.f32 0.2548296, %v2328_v37 }
0x1278   :  { %v2369_v46 = vmul.f32 %v2985_v38, %v2339_v45  ;;  %v2340_v3 = vmul.f32 %v2983_v0, %v2334_v40 }
0x127a   :  { %v2375_v50 = vsub.f32 1.0, %v2369_v46  ;;  %v2370_v58 = vmul.f32 %v2987_v47, %v2340_v3 }
0x127c   :  { %v2387_v53 = vsub.f32 0.0, %v2375_v50  ;;  %v2376_v39 = vsub.f32 1.0, %v2370_v58 }
0x127e   :  { %v2393_v55 = vsel %vm2381_vm10, %v2375_v50, %v2387_v53  ;;  %v2388_v27 = vsub.f32 0.0, %v2376_v39 }
0x127f   :  { %v2399_v51 = vadd.f32 1.0, %v2393_v55 }
0x1280   :  { %v2394_v52 = vsel %vm2382_vm11, %v2376_v39, %v2388_v27 }
0x1281   :  { %v2400_v60 = vadd.f32 1.0, %v2394_v52  ;;  %v2405_v5 = vmul.f32 %v2399_v51, %v2249_v54 }
0x1283   :  { %v2406_v4 = vmul.f32 %v2400_v60, %v2250_v62 }
0x1285   :  { %2475 = vmatprep.mubr.f32.mxu1 %v2406_v4 }
0x1286   :  { %2476 = vmatmul.mubr.f32.vlgmr.msra.gmra.mxu1 %v2405_v5 }
0x12d5   :  { %v2238_v6 = vpop.f32.mrf.mxu0 }
0x12d6   :  { %v3783_v7 = vadd.f32 %v2238_v6, %v3774_v10 }
0x12d7   :  { %v2240_v9 = vpop.f32.mrf.mxu0 }
0x12d8   :  { %v3786_v59 = vmul.f32 0.70710677, %v3783_v7  ;;  %v3789_v56 = vadd.f32 %v2240_v9, %v3778_v8 }
0x12da   :  { %v2263_v11 = vand.u32 2147483647, %v3786_v59  ;;  %v3793_v12 = vmul.f32 0.70710677, %v3789_v56  ;;  %v2244_v19 = vpop.f32.mrf.mxu0  ;;  %vm2383_vm12 = vcmp.ge.f32.partialorder %v3786_v59, 0.0  ;;  %v2251_v59 = vmul.f32 0.5, %v3783_v7 }
0x12db   :  { %v3796_v13 = vadd.f32 %v2244_v19, %v3774_v10 }
0x12dc   :  { %v2269_v14 = vmul.f32 0.3275911, %v2263_v11  ;;  %v2264_v15 = vand.u32 2147483647, %v3793_v12  ;;  %v2246_v16 = vpop.f32.mrf.mxu0  ;;  %v2347_v30 = vsub.f32 0.0, %v2263_v11  ;;  %vm2384_vm13 = vcmp.ge.f32.partialorder %v3793_v12, 0.0 }
0x12dd   :  { %v3800_v17 = vmul.f32 0.70710677, %v3796_v13  ;;  %v3803_v18 = vadd.f32 %v2246_v16, %v3778_v8 }
0x12de   :  { %v2275_v20 = vadd.f32 1.0, %v2269_v14  ;;  %v2270_v61 = vmul.f32 0.3275911, %v2264_v15  ;;  %v2348_v8 = vsub.f32 0.0, %v2264_v15  ;;  %v2353_v0 = vmul.f32 %v2347_v30, %v2263_v11 }
0x12df   :  { %v2265_v49 = vand.u32 2147483647, %v3800_v17  ;;  %v3807_v21 = vmul.f32 0.70710677, %v3803_v18  ;;  %vm2385_vm14 = vcmp.ge.f32.partialorder %v3800_v17, 0.0 }
0x12e0   :  { %2988 = vrcp.f32 %v2275_v20  ;;  %v2276_v10 = vadd.f32 1.0, %v2270_v61  ;;  %v2354_v32 = vmul.f32 %v2348_v8, %v2264_v15  ;;  %v2361_v24 = vmul.f32 1.442695, %v2353_v0 }
0x12e1   :  { %v2271_v48 = vmul.f32 0.3275911, %v2265_v49  ;;  %v2266_v57 = vand.u32 2147483647, %v3807_v21  ;;  %v2349_v31 = vsub.f32 0.0, %v2265_v49  ;;  %vm2386_vm15 = vcmp.ge.f32.partialorder %v3807_v21, 0.0 }
0x12e2   :  { %2990 = vrcp.f32 %v2276_v10  ;;  %v2363_v42 = vmul.f32 1.442695, %v2354_v32  ;;  %v2639_v21 = vld [vmem:[%s3860_s12] ss:$0 sm:$0xff] }
0x12e3   :  { %v2277_v22 = vadd.f32 1.0, %v2271_v48  ;;  %v2272_v2 = vmul.f32 0.3275911, %v2266_v57  ;;  %v2350_v26 = vsub.f32 0.0, %v2266_v57  ;;  %v2355_v35 = vmul.f32 %v2349_v31, %v2265_v49 }
0x12e5   :  { %2992 = vrcp.f32 %v2277_v22  ;;  %v2278_v29 = vadd.f32 1.0, %v2272_v2  ;;  %v2356_v25 = vmul.f32 %v2350_v26, %v2266_v57  ;;  %v2365_v37 = vmul.f32 1.442695, %v2355_v35 }
0x12e7   :  { %2994 = vrcp.f32 %v2278_v29  ;;  %v2367_v50 = vmul.f32 1.442695, %v2356_v25 }
0x12e8   :  { %2996 = vpow2.f32 %v2361_v24 }
0x12e9   :  { %2998 = vpow2.f32 %v2363_v42 }
0x12ea   :  { %3000 = vpow2.f32 %v2365_v37 }
0x12eb   :  { %3002 = vpow2.f32 %v2367_v50  ;;  %v2254_v50 = vmul.f32 0.5, %v3803_v18 }
0x12ed   :  { %v2989_v1 = vpop.eup %2988 }
0x12ee   :  { %v2293_v34 = vmul.f32 1.0614054, %v2989_v1 }
0x12ef   :  { %v2991_v36 = vpop.eup %2990 }
0x12f0   :  { %v2299_v41 = vadd.f32 -1.4531521, %v2293_v34  ;;  %v2294_v43 = vmul.f32 1.0614054, %v2991_v36 }
0x12f2   :  { %v2993_v23 = vpop.eup %2992  ;;  %v2305_v44 = vmul.f32 %v2989_v1, %v2299_v41  ;;  %v2300_v45 = vadd.f32 -1.4531521, %v2294_v43 }
0x12f3   :  { %v2295_v38 = vmul.f32 1.0614054, %v2993_v23 }
0x12f4   :  { %v2311_v40 = vadd.f32 1.4214138, %v2305_v44  ;;  %v2995_v46 = vpop.eup %2994  ;;  %v2306_v3 = vmul.f32 %v2991_v36, %v2300_v45 }
0x12f5   :  { %v2301_v47 = vadd.f32 -1.4531521, %v2295_v38  ;;  %v2296_v53 = vmul.f32 1.0614054, %v2995_v46  ;;  %v2997_v16 = vpop.eup %2996 }
0x12f6   :  { %v2317_v58 = vmul.f32 %v2989_v1, %v2311_v40  ;;  %v2312_v39 = vadd.f32 1.4214138, %v2306_v3  ;;  %v2999_v22 = vpop.eup %2998 }
0x12f7   :  { %v2307_v55 = vmul.f32 %v2993_v23, %v2301_v47  ;;  %v2302_v51 = vadd.f32 -1.4531521, %v2296_v53  ;;  %v3001_v0 = vpop.eup %3000 }
0x12f8   :  { %v2323_v27 = vadd.f32 -0.28449672, %v2317_v58  ;;  %v2318_v52 = vmul.f32 %v2991_v36, %v2312_v39  ;;  %v3003_v35 = vpop.eup %3002 }
0x12f9   :  { %v2313_v62 = vadd.f32 1.4214138, %v2307_v55  ;;  %v2308_v54 = vmul.f32 %v2995_v46, %v2302_v51 }
0x12fa   :  { %v2329_v60 = vmul.f32 %v2989_v1, %v2323_v27  ;;  %v2324_v4 = vadd.f32 -0.28449672, %v2318_v52 }
0x12fb   :  { %v2319_v5 = vmul.f32 %v2993_v23, %v2313_v62  ;;  %v2314_v9 = vadd.f32 1.4214138, %v2308_v54 }
0x12fc   :  { %v2335_v6 = vadd.f32 0.2548296, %v2329_v60  ;;  %v2330_v11 = vmul.f32 %v2991_v36, %v2324_v4 }
0x12fd   :  { %v2325_v19 = vadd.f32 -0.28449672, %v2319_v5  ;;  %v2320_v15 = vmul.f32 %v2995_v46, %v2314_v9 }
0x12fe   :  { %v2341_v14 = vmul.f32 %v2989_v1, %v2335_v6  ;;  %v2336_v20 = vadd.f32 0.2548296, %v2330_v11 }
0x12ff   :  { %v2331_v61 = vmul.f32 %v2993_v23, %v2325_v19  ;;  %v2326_v10 = vadd.f32 -0.28449672, %v2320_v15 }
0x1300   :  { %v2371_v49 = vmul.f32 %v2997_v16, %v2341_v14  ;;  %v2342_v48 = vmul.f32 %v2991_v36, %v2336_v20 }
0x1301   :  { %v2337_v57 = vadd.f32 0.2548296, %v2331_v61  ;;  %v2332_v29 = vmul.f32 %v2995_v46, %v2326_v10 }
0x1302   :  { %v2377_v2 = vsub.f32 1.0, %v2371_v49  ;;  %v2372_v30 = vmul.f32 %v2999_v22, %v2342_v48 }
0x1303   :  { %v2343_v8 = vmul.f32 %v2993_v23, %v2337_v57  ;;  %v2338_v32 = vadd.f32 0.2548296, %v2332_v29  ;;  %v2252_v23 = vmul.f32 0.5, %v3789_v56  ;;  %v2253_v56 = vmul.f32 0.5, %v3796_v13 }
0x1304   :  { %v2389_v31 = vsub.f32 0.0, %v2377_v2  ;;  %v2378_v24 = vsub.f32 1.0, %v2372_v30 }
0x1305   :  { %v2373_v1 = vmul.f32 %v3001_v0, %v2343_v8  ;;  %v2344_v34 = vmul.f32 %v2995_v46, %v2338_v32 }
0x1306   :  { %v2395_v26 = vsel %vm2383_vm12, %v2377_v2, %v2389_v31  ;;  %v2390_v41 = vsub.f32 0.0, %v2378_v24 }
0x1307   :  { %v2379_v42 = vsub.f32 1.0, %v2373_v1  ;;  %v2374_v36 = vmul.f32 %v3003_v35, %v2344_v34  ;;  %v2401_v25 = vadd.f32 1.0, %v2395_v26  ;;  %v2641_v26 = vld [vmem:[%s3862_s14] ss:$0 sm:$0xff] }
0x1308   :  { %v2396_v43 = vsel %vm2384_vm13, %v2378_v24, %v2390_v41  ;;  %v2640_v24 = vld [vmem:[%s3861_s13] ss:$0 sm:$0xff] }
0x1309   :  { %v2391_v44 = vsub.f32 0.0, %v2379_v42  ;;  %v2402_v37 = vadd.f32 1.0, %v2396_v43  ;;  %v2380_v45 = vsub.f32 1.0, %v2374_v36  ;;  %v2407_v3 = vmul.f32 %v2401_v25, %v2251_v59 }
0x130b   :  { %v2397_v38 = vsel %vm2385_vm14, %v2379_v42, %v2391_v44  ;;  %v2408_v40 = vmul.f32 %v2402_v37, %v2252_v23  ;;  %v2392_v46 = vsub.f32 0.0, %v2380_v45 }
0x130c   :  { %v2403_v47 = vadd.f32 1.0, %v2397_v38 }
0x130d   :  { %2480 = vmatprep.mubr.f32.mxu1 %v2408_v40  ;;  %v2398_v12 = vsel %vm2386_vm15, %v2380_v45, %v2392_v46 }
0x130e   :  { %2481 = vmatmul.mubr.f32.gmra.mxu1 %v2407_v3  ;;  %v2404_v58 = vadd.f32 1.0, %v2398_v12  ;;  %v2409_v53 = vmul.f32 %v2403_v47, %v2253_v56 }
0x1310   :  { %v2410_v17 = vmul.f32 %v2404_v58, %v2254_v50 }
0x1312   :  { %2485 = vmatprep.mubr.f32.mxu1 %v2410_v17 }
0x1313   :  { %2486 = vmatmul.mubr.f32.gmra.mxu1 %v2409_v53 }
0x1346   :  { %v2749_v7 = vpop.f32.mrf.mxu1 }
0x1348   :  { %v2750_v39 = vpop.f32.mrf.mxu1 }
0x1349   :  { %v2751_v55 = vadd.f32 %v2750_v39, %v2749_v7 }
0x134b   :  { %v2491_v27 = vadd.f32 %v2751_v55, %v3546_v63 }
0x134d   :  { %v2500_v51 = vadd.f32 %v2639_v21, %v2491_v27 }
0x134f   :  { %v2505_v18 = vsel %vm133_vm0, %v2500_v51, 0.0 }
0x1350   :  { %2506 = vadd.xlane.f32.xlu0 %v2505_v18 }
0x13ce   :  { %v2752_v52 = vpop.f32.mrf.mxu1 }
0x13d0   :  { %v2753_v62 = vpop.f32.mrf.mxu1 }
0x13d1   :  { %v2754_v13 = vadd.f32 %v2753_v62, %v2752_v52 }
0x13d3   :  { %v2492_v60 = vadd.f32 %v2754_v13, %v3572_v33  ;;  %v2755_v54 = vpop.f32.mrf.mxu1 }
0x13d5   :  { %v2756_v4 = vpop.f32.mrf.mxu1  ;;  %v2501_v5 = vadd.f32 %v2639_v21, %v2492_v60 }
0x13d6   :  { %v2757_v6 = vadd.f32 %v2756_v4, %v2755_v54 }
0x13d7   :  { %v2508_v9 = vsel %vm133_vm0, %v2501_v5, 0.0 }
0x13d8   :  { %v2493_v11 = vadd.f32 %v2757_v6, %v3582_v28  ;;  %2509 = vadd.xlane.f32.xlu1 %v2508_v9 }
0x13d9   :  { %v2507_v19 = vpop.xlane.xlu0 %2506 }
0x13da   :  { %v2514_v63 = vmul.f32 0.015625, %v2507_v19  ;;  %v2502_v14 = vadd.f32 %v2639_v21, %v2493_v11 }
0x13dc   :  { %v2517_v15 = vsub.f32 %v2500_v51, %v2514_v63  ;;  %v2511_v16 = vsel %vm140_vm5, %v2502_v14, 0.0 }
0x13dd   :  { %2512 = vadd.xlane.f32.xlu0 %v2511_v16 }
0x13de   :  { %v2520_v20 = vmul.f32 %v2517_v15, %v2517_v15 }
0x13e0   :  { %v2523_v61 = vsel %vm133_vm0, %v2520_v20, 0.0 }
0x13e1   :  { %2524 = vadd.xlane.f32.xlu1 %v2523_v61 }
0x1461   :  { %v2510_v33 = vpop.xlane.xlu1 %2509 }
0x1462   :  { %v2515_v49 = vmul.f32 0.015625, %v2510_v33 }
0x1464   :  { %v2518_v10 = vsub.f32 %v2501_v5, %v2515_v49 }
0x1466   :  { %v2513_v48 = vpop.xlane.xlu0 %2512  ;;  %v2521_v57 = vmul.f32 %v2518_v10, %v2518_v10 }
0x1467   :  { %v2516_v22 = vmul.f32 0.015625, %v2513_v48 }
0x1468   :  { %v2526_v28 = vsel %vm133_vm0, %v2521_v57, 0.0 }
0x1469   :  { %v2519_v2 = vsub.f32 %v2502_v14, %v2516_v22  ;;  %2527 = vadd.xlane.f32.xlu0 %v2526_v28 }
0x146a   :  { %v2525_v29 = vpop.xlane.xlu1 %2524 }
0x146b   :  { %v2532_v30 = vmul.f32 0.015625, %v2525_v29  ;;  %v2522_v8 = vmul.f32 %v2519_v2, %v2519_v2 }
0x146d   :  { %v2535_v0 = vadd.f32 1e-06, %v2532_v30  ;;  %v2529_v31 = vsel %vm140_vm5, %v2522_v8, 0.0 }
0x146e   :  { %2530 = vadd.xlane.f32.xlu1 %v2529_v31 }
0x146f   :  { %3004 = vrsqrt.f32 %v2535_v0 }
0x147c   :  { %v3005_v32 = vpop.eup %3004 }
0x147d   :  { %v2541_v1 = vmul.f32 %v3005_v32, %v2517_v15 }
0x147f   :  { %v2550_v34 = vmul.f32 %v2640_v24, %v2541_v1 }
0x1481   :  { %v2559_v35 = vadd.f32 %v2641_v26, %v2550_v34 }
0x1483   :  { %2562 = vst.msk [vmem:[%s3863_s15] sm:$0xff] %vm133_vm0, %v2559_v35 }
0x14f2   :  { %v2528_v41 = vpop.xlane.xlu0 %2527 }
0x14f3   :  { %v2533_v42 = vmul.f32 0.015625, %v2528_v41 }
0x14f5   :  { %v2536_v36 = vadd.f32 1e-06, %v2533_v42 }
0x14f7   :  { %3006 = vrsqrt.f32 %v2536_v36  ;;  %v2531_v43 = vpop.xlane.xlu1 %2530 }
0x14f8   :  { %v2534_v25 = vmul.f32 0.015625, %v2531_v43 }
0x14fa   :  { %v2537_v44 = vadd.f32 1e-06, %v2534_v25 }
0x14fc   :  { %3008 = vrsqrt.f32 %v2537_v44 }
0x1504   :  { %v3007_v23 = vpop.eup %3006 }
0x1505   :  { %v2542_v37 = vmul.f32 %v3007_v23, %v2518_v10 }
0x1507   :  { %v2551_v45 = vmul.f32 %v2640_v24, %v2542_v37 }
0x1509   :  { %v3009_v59 = vpop.eup %3008  ;;  %v2560_v38 = vadd.f32 %v2641_v26, %v2551_v45 }
0x150a   :  { %v2543_v40 = vmul.f32 %v3009_v59, %v2519_v2 }
0x150b   :  { %2563 = vst.msk [vmem:[%s3863_s15 + $0x8] sm:$0xff] %vm133_vm0, %v2560_v38 }
0x150c   :  { %v2552_v46 = vmul.f32 %v2640_v24, %v2543_v40 }
0x150e   :  { %v2561_v3 = vadd.f32 %v2641_v26, %v2552_v46 }
0x1510   :  { %2564 = vst.msk [vmem:[%s3863_s15 + $0x10] sm:$0x3] %vm140_vm5, %v2561_v3 }

// kernel: forward.3
= control target key start
LH: loop header
LB: loop body
LE: loop exit
PB: predicated region body
PF: predicated region fallthrough
CT: control target
= control target key end

     0   :  { %s4025_s24 = smov 0   ;;  %s4748_s0 = inlined_call_operand.vmem [shape: f32[16,48], index: 0, kind: input, shape index: {}]   ;;  %s4749_s1 = inlined_call_operand.vmem [shape: f32[48,64], index: 1, kind: input, shape index: {}]   ;;  %s4750_s2 = inlined_call_operand.vmem [shape: f32[1,64], index: 2, kind: input, shape index: {}]   ;;  %s4751_s3 = inlined_call_operand.vmem [shape: f32[1,64], index: 3, kind: input, shape index: {}]   ;;  %s4752_s4 = inlined_call_operand.vmem [shape: f32[18,64], index: 4, kind: input, shape index: {}]   ;;  %s4753_s5 = inlined_call_operand.vmem [shape: f32[3,1,64], index: 5, kind: input, shape index: {}]   ;;  %s4754_s6 = inlined_call_operand.vmem [shape: f32[3,1,64], index: 6, kind: input, shape index: {}]   ;;  %s4755_s7 = inlined_call_operand.vmem [shape: f32[3,64,192], index: 7, kind: input, shape index: {}]   ;;  %s4756_s8 = inlined_call_operand.vmem [shape: f32[3,1,192], index: 8, kind: input, shape index: {}]   ;;  %s4757_s9 = inlined_call_operand.vmem [shape: f32[3,64,64], index: 9, kind: input, shape index: {}]   ;;  %s4758_s10 = inlined_call_operand.vmem [shape: f32[3,1,64], index: 10, kind: input, shape index: {}]   ;;  %s4759_s11 = inlined_call_operand.vmem [shape: f32[3,1,64], index: 11, kind: input, shape index: {}]   ;;  %s4760_s12 = inlined_call_operand.vmem [shape: f32[3,1,64], index: 12, kind: input, shape index: {}]   ;;  %s4761_s13 = inlined_call_operand.vmem [shape: f32[3,64,256], index: 13, kind: input, shape index: {}]   ;;  %s4762_s14 = inlined_call_operand.vmem [shape: f32[3,1,256], index: 14, kind: input, shape index: {}]   ;;  %s4763_s15 = inlined_call_operand.vmem [shape: f32[3,256,64], index: 15, kind: input, shape index: {}]   ;;  %s4764_s16 = inlined_call_operand.vmem [shape: f32[3,1,64], index: 16, kind: input, shape index: {}]   ;;  %s4765_s17 = inlined_call_operand.vmem [shape: f32[18,64], index: 17, kind: output, shape index: {}]  }
   0x1   :  { %4771 = sst [smem:[#allocation4_spill]] %s4748_s0 }
   0x2   :  { %4772 = sst [smem:[#allocation5_spill]] %s4749_s1 }
   0x3   :  { %4773 = sst [smem:[#allocation6_spill]] %s4750_s2 }
   0x4   :  { %4774 = sst [smem:[#allocation7_spill]] %s4753_s5 }
   0x5   :  { %4775 = sst [smem:[#allocation8_spill]] %s4754_s6 }
   0x6   :  { %4776 = sst [smem:[#allocation9_spill]] %s4755_s7 }
   0x7   :  { %4777 = sst [smem:[#allocation10_spill]] %s4756_s8 }
   0x8   :  { %4778 = sst [smem:[#allocation11_spill]] %s4765_s17 }
   0x9 LB: > { %4779 = sst [smem:[#allocation2_spill]] %s3924_s24  ;;  %s3427_s25 = sadd.s32 4294967295, %s3924_s24   ;;  %s3924_s24 = sphi %s4025_s24, %s27_s24  }
   0xa   : > { %p3430_p0 = scmp.ge.s32.totalorder %s3924_s24, 1  ;;  %p578_p1 = scmp.lt.s32.totalorder %s3924_s24, 3 }
   0xc   : > { %p579_p2 = pnand %p3430_p0, %p578_p1 }
   0xe   : > { %582 = sbr.rel (%p579_p2) target bundleno = 5336 (0x14d8), region = 88 }
  0x13   : > { %p666_p3 = scmp.lt.s32.totalorder %s3427_s25, 2  ;;  %s4782_s7 = sld [smem:[#allocation9_spill]] }
  0x14   : > { %s4783_s8 = sld [smem:[#allocation10_spill]]  ;;  %p3441_p4 = scmp.ne.s32.totalorder %s3427_s25, 0 }
  0x15   : > { %s4033_s26 = scalar_select %p666_p3, %s3427_s25, 2 }
  0x16   : > { %s4785_s21 = sld [smem:[#allocation5_spill]] (!%p3441_p4) }
  0x17   : > { %s3518_s19 = sshll.u32 %s4033_s26, 7  ;;  %s3433_s1 = sshll.u32 %s4033_s26, 1 }
  0x18   : > { %s3519_s24 = sshll.u32 %s4033_s26, 6  ;;  %s694_s23 = scalar_lea.vmem %s4760_s12, %s4033_s26 }
  0x19   : > { %s4048_s22 = scalar_lea.vmem %s4782_s7, %s3518_s19  ;;  %s4063_s30 = scalar_lea.vmem %s4757_s9, %s3519_s24 }
  0x1a   : > { %s4053_s28 = scalar_lea.vmem %s4783_s8, %s3433_s1  ;;  %s4081_s29 = scalar_lea.vmem %s4762_s14, %s3433_s1 }
  0x1b   : > { %4784 = sst [smem:[#allocation3_spill]] %s4053_s28  ;;  %s4076_s28 = scalar_lea.vmem %s4761_s13, %s3518_s19 }
  0x1c   : > { %s3521_s5 = sshll.u32 %s4033_s26, 8  ;;  %715 = sbr.rel (%p3441_p4) target bundleno = 246 (0xf6), region = 92 }
  0x1d   : > { %s4087_s6 = scalar_lea.vmem %s4763_s15, %s3521_s5  ;;  %s4786_s24 = sld [smem:[#allocation4_spill]] (!%p3441_p4) }
  0x1e   : > { %s4788_s17 = sld [smem:[#allocation11_spill]] (!%p3441_p4) }
  0x1f   : > { %s4789_s7 = sld [smem:[#allocation6_spill]] (!%p3441_p4) }
  0x21   : > { %v723_v0 = vld [vmem:[%s4785_s21 + $0x28] sm:$0xff]  ;;  %v722_v1 = vld [vmem:[%s4785_s21 + $0x20] sm:$0xff]  ;;  %vm731_vm0 = vcmask 392192   ;;  %v721_v2 = vld [vmem:[%s4785_s21 + $0x18] sm:$0xff]  ;;  %vm816_vm1 = vcmask 516096   ;;  %vm820_vm2 = vcmask 523264  }
  0x22   : > { %3646 = vmatprep.subr.mxu0 %v723_v0  ;;  %v720_v4 = vld [vmem:[%s4785_s21 + $0x10] sm:$0xff]  ;;  %v719_v5 = vld [vmem:[%s4785_s21 + $0x8] sm:$0xff]  ;;  %v718_v6 = vld [vmem:[%s4785_s21] sm:$0xff] }
  0x23   : > { %3647 = vmatpush3.msra.mxu0 %v723_v0  ;;  %s4787_s0 = smov %s4786_s24  ;;  %v716_v3 = vld [vmem:[%s4786_s24] sm:$0xff]  ;;  %v823_v12 = vld [vmem:[%s4752_s4 + $0x9] sm:$0x1]  ;;  %v826_v16 = vld [vmem:[%s4752_s4 + $0xa] sm:$0xff] }
  0x24   : > { %3648 = vmatprep.subr.mxu0 %v722_v1  ;;  %3658 = vmatprep.mubr.msk.f32.mxu0 %vm731_vm0, %v716_v3  ;;  %v717_v7 = vld [vmem:[%s4787_s0 + $0x8] sm:$0xff]  ;;  %v813_v8 = vld [vmem:[%s4751_s3] sm:$0x1] }
  0x25   : > { %3649 = vmatpush3.msra.mxu0 %v722_v1  ;;  %v814_v9 = vld [vmem:[%s4752_s4] sm:$0x1]  ;;  %v818_v19 = vld [vmem:[%s4752_s4 + $0x1] sm:$0xff] }
  0x26   : > { %3650 = vmatprep.subr.mxu0 %v721_v2  ;;  %v815_v10 = vadd.f32 %v814_v9, %v813_v8  ;;  %v822_v11 = vld [vmem:[%s4751_s3] sm:$0x1] }
  0x27   : > { %3651 = vmatpush3.msra.mxu0 %v721_v2  ;;  %v824_v13 = vadd.f32 %v823_v12, %v822_v11  ;;  %v3442_v14 = vld [vmem:[%s4789_s7] ss:$0 sm:$0xff] }
  0x28   : > { %3652 = vmatprep.subr.mxu0 %v720_v4  ;;  %817 = vst.msk [vmem:[%s4788_s17] sm:$0x1] %vm816_vm1, %v815_v10 }
  0x29   : > { %3653 = vmatpush3.msra.mxu0 %v720_v4  ;;  %825 = vst.msk [vmem:[%s4788_s17 + $0x9] sm:$0x1] %vm816_vm1, %v824_v13 }
  0x2a   : > { %3654 = vmatprep.subr.mxu0 %v719_v5 }
  0x2b   : > { %3655 = vmatpush3.msra.mxu0 %v719_v5 }
  0x2c   : > { %3656 = vmatprep.subr.mxu0 %v718_v6 }
  0x2d   : > { %3657 = vmatpush3.msra.mxu0 %v718_v6 }
  0x2e   : > { %3659 = vmatmul.mubr.msk.f32.vlgmr.msra.gmra.mxu0 %vm731_vm0, %v717_v7 }
  0xee   : > { %v3660_v15 = vpop.f32.mrf.mxu0 }
  0xef   : > { %v810_v17 = vadd.f32 %v3660_v15, %v3442_v14 }
  0xf0   : > { %v804_v18 = vpop.f32.mrf.mxu0 }
  0xf1   : > { %v827_v20 = vadd.f32 %v826_v16, %v810_v17  ;;  %v805_v21 = vadd.f32 %v3442_v14, %v804_v18 }
  0xf3   : > { %828 = vst.msk [vmem:[%s4788_s17 + $0xa] sm:$0xff] %vm820_vm2, %v827_v20  ;;  %v819_v22 = vadd.f32 %v818_v19, %v805_v21 }
  0xf5   : > { %821 = vst.msk [vmem:[%s4788_s17 + $0x1] sm:$0xff] %vm820_vm2, %v819_v22 }
  0xf6 PF: > { %s4790_s25 = sld [smem:[#allocation11_spill]]  ;;  %vm912_vm3 = vcmask 523264   ;;  %v849_v37 = vld [vmem:[%s4048_s22 + $0x78] sm:$0xff]  ;;  %v848_v38 = vld [vmem:[%s4048_s22 + $0x70] sm:$0xff]  ;;  %v847_v39 = vld [vmem:[%s4048_s22 + $0x68] sm:$0xff]  ;;  %v3926_v42 = vmov 0.0   ;;  %v973_v6 = vlaneseq }
  0xf7   : > { %1008 = vmatprep.subr.mxu0 %v849_v37  ;;  %v846_v40 = vld [vmem:[%s4048_s22 + $0x60] sm:$0xff]  ;;  %v845_v41 = vld [vmem:[%s4048_s22 + $0x58] sm:$0xff]  ;;  %1056 = vmatprep.mubr.f32.mxu0 %v3926_v42  ;;  %v844_v43 = vld [vmem:[%s4048_s22 + $0x50] sm:$0xff]  ;;  %s4791_s27 = sld [smem:[#allocation7_spill]]  ;;  %vm1081_vm4 = vcmask 130048   ;;  %s3927_s24 = smov 64  }
  0xf8   : > { %1009 = vmatpush1.msra.mxu0 %v848_v38  ;;  %v843_v44 = vld [vmem:[%s4048_s22 + $0x48] sm:$0xff]  ;;  %v842_v45 = vld [vmem:[%s4048_s22 + $0x40] sm:$0xff]  ;;  %v841_v46 = vld [vmem:[%s4048_s22 + $0x38] sm:$0xff]  ;;  %s4793_s1 = sld [smem:[#allocation3_spill]]  ;;  %v4201_v7 = vshrl.u32 %v973_v6, 7  ;;  %vm1197_vm5 = vcmask 1040384  }
  0xf9   : > { %1010 = vmatprep.subr.mxu0 %v847_v39  ;;  %v840_v47 = vld [vmem:[%s4048_s22 + $0x30] sm:$0xff]  ;;  %v839_v48 = vld [vmem:[%s4048_s22 + $0x28] sm:$0xff]  ;;  %v838_v49 = vld [vmem:[%s4048_s22 + $0x20] sm:$0xff]  ;;  %s4794_s5 = sld [smem:[#allocation8_spill]]  ;;  %vm1171_vm6 = vcmask 65536   ;;  %vm1167_vm7 = vcmask 72704  }
  0xfa   : > { %1011 = vmatpush1.msra.mxu0 %v846_v40  ;;  %v837_v50 = vld [vmem:[%s4048_s22 + $0x18] sm:$0xff]  ;;  %v836_v51 = vld [vmem:[%s4048_s22 + $0x10] sm:$0xff]  ;;  %v835_v52 = vld [vmem:[%s4048_s22 + $0x8] sm:$0xff]  ;;  %v975_v8 = vsub.s32 0, %v4201_v7  ;;  %v979_v16 = vsub.s32 1, %v4201_v7  ;;  %vm919_vm8 = vcmask 517120  }
  0xfb   : > { %1012 = vmatprep.subr.mxu0 %v845_v41  ;;  %v834_v53 = vld [vmem:[%s4048_s22] sm:$0xff]  ;;  %s3928_s17 = smov 48   ;;  %s3929_s19 = smov 32   ;;  %vm1919_vm9 = vcmask 1046528   ;;  %vm3934_vm10 = vmmov 0   ;;  %vm1912_vm11 = vcmask 261120  }
  0xfc   : > { %v829_v23 = vld [vmem:[%s4790_s25] sm:$0xff]  ;;  %v830_v24 = vld [vmem:[%s4790_s25 + $0x8] sm:$0xff]  ;;  %1013 = vmatpush1.msra.mxu0 %v844_v43  ;;  %s3933_s22 = smov 16   ;;  %vm1915_vm12 = vcmask 392192  }
  0xfd   : > { %v913_v25 = vsel %vm912_vm3, %v829_v23, 0.0  ;;  %v916_v26 = vsel %vm912_vm3, %v830_v24, 0.0  ;;  %1014 = vmatprep.subr.mxu0 %v843_v44  ;;  %s4792_s2 = scalar_lea.vmem %s4791_s27, %s4033_s26  ;;  %s3930_s27 = smov 112  }
  0xfe   : > { %914 = vadd.xlane.f32.xlu0 %v913_v25  ;;  %1015 = vmatpush1.msra.mxu0 %v842_v45  ;;  %v4184_v61 = vld [vmem:[%s4792_s2] ss:$0 sm:$0xff]  ;;  %s3931_s2 = smov 96  }
  0xff   : > { %1016 = vmatprep.subr.mxu0 %v841_v46  ;;  %s4795_s20 = scalar_lea.vmem %s4794_s5, %s4033_s26  ;;  %v850_v9 = vld [vmem:[%s4793_s1] sm:$0x3]  ;;  %s3932_s1 = smov 80  }
 0x100   : > { %1017 = vmatpush1.msra.mxu0 %v840_v47  ;;  %v4191_v63 = vld [vmem:[%s4795_s20] ss:$0 sm:$0xff]  ;;  %v4207_v10 = vrot.slane %v850_v9, %v975_v8  ;;  %v4226_v20 = vrot.slane %v850_v9, %v979_v16 }
 0x101   : > { %1018 = vmatprep.subr.mxu0 %v839_v48 }
 0x102   : > { %917 = vadd.xlane.f32.xlu0 %v916_v26  ;;  %1019 = vmatpush1.msra.mxu0 %v838_v49  ;;  %v831_v26 = vld [vmem:[%s4790_s25 + $0x10] sm:$0x3] }
 0x103   : > { %1020 = vmatprep.subr.mxu0 %v837_v50 }
 0x104   : > { %1021 = vmatpush1.msra.mxu0 %v836_v51 }
 0x105   : > { %1022 = vmatprep.subr.mxu0 %v835_v52 }
 0x106   : > { %1023 = vmatpush1.msra.mxu0 %v834_v53 }
 0x187   : > { %v915_v27 = vpop.xlane.xlu0 %914 }
 0x188   : > { %v924_v28 = vmul.f32 0.015625, %v915_v27 }
 0x18a   : > { %v927_v29 = vsub.f32 %v829_v23, %v924_v28 }
 0x18b   : > { %v918_v30 = vpop.xlane.xlu0 %917 }
 0x18c   : > { %v925_v31 = vmul.f32 0.015625, %v918_v30  ;;  %v930_v32 = vmul.f32 %v927_v29, %v927_v29  ;;  %v920_v30 = vsel %vm919_vm8, %v831_v26, 0.0 }
 0x18e   : > { %v928_v33 = vsub.f32 %v830_v24, %v925_v31  ;;  %v933_v34 = vsel %vm912_vm3, %v930_v32, 0.0 }
 0x18f   : > { %934 = vadd.xlane.f32.xlu1 %v933_v34 }
 0x190   : > { %v931_v35 = vmul.f32 %v928_v33, %v928_v33 }
 0x192   : > { %v936_v36 = vsel %vm912_vm3, %v931_v35, 0.0 }
 0x193   : > { %937 = vadd.xlane.f32.xlu1 %v936_v36 }
 0x218   : > { %v935_v54 = vpop.xlane.xlu1 %934 }
 0x219   : > { %v942_v55 = vmul.f32 0.015625, %v935_v54 }
 0x21b   : > { %v945_v56 = vadd.f32 1e-06, %v942_v55 }
 0x21c   : > { %v938_v57 = vpop.xlane.xlu1 %937 }
 0x21d   : > { %3815 = vrsqrt.f32 %v945_v56  ;;  %v943_v58 = vmul.f32 0.015625, %v938_v57 }
 0x21f   : > { %v946_v59 = vadd.f32 1e-06, %v943_v58 }
 0x221   : > { %3817 = vrsqrt.f32 %v946_v59 }
 0x22a   : > { %v3816_v60 = vpop.eup %3815 }
 0x22b   : > { %v951_v62 = vmul.f32 %v3816_v60, %v927_v29 }
 0x22d   : > { %v960_v0 = vmul.f32 %v4184_v61, %v951_v62 }
 0x22e   : > { %v3818_v1 = vpop.eup %3817 }
 0x22f   : > { %v969_v2 = vadd.f32 %v4191_v63, %v960_v0  ;;  %v952_v3 = vmul.f32 %v3818_v1, %v928_v33 }
 0x231   : > { %3447 = vmatmul.mubr.msk.f32.vlgmr.msra.gmra.mxu0 %vm912_vm3, %v969_v2  ;;  %v961_v4 = vmul.f32 %v4184_v61, %v952_v3 }
 0x232   : > { %1062 = vmatprep.mubr.f32.mxu0 %v3926_v42 }
 0x233   : > { %v970_v5 = vadd.f32 %v4191_v63, %v961_v4 }
 0x235   : > { %3448 = vmatmul.mubr.msk.f32.gmra.mxu0 %vm912_vm3, %v970_v5 }
 0x236   : > { %1068 = vmatprep.mubr.f32.mxu0 %v3926_v42 }
 0x2f1   : > { %v1058_v11 = vpop.f32.mrf.mxu0 }
 0x2f2   : > { %v4210_v12 = vadd.f32 %v1058_v11, %v4207_v10 }
 0x2f3   : > { %v1060_v13 = vpop.f32.mrf.mxu0 }
 0x2f4   : > { %3665 = vmatprep.mubr.msk.f32.mxu1 %vm1081_vm4, %v4210_v12  ;;  %1077 = vrot.lane.b32.xlu1 %v4210_v12, %s3927_s24  ;;  %v4236_v22 = vadd.f32 %v1060_v13, %v4226_v20 }
 0x2f5   : > { %v1064_v14 = vpop.f32.mrf.mxu0 }
 0x2f6   : > { %v4217_v15 = vadd.f32 %v1064_v14, %v4207_v10 }
 0x2f7   : > { %v1066_v18 = vpop.f32.mrf.mxu0 }
 0x2f8   : > { %1079 = vrot.lane.b32.xlu0 %v4217_v15, %s3927_s24  ;;  %v4230_v21 = vadd.f32 %v1066_v18, %v4226_v20 }
 0x2fa   : > { %v2035_v18 = vrot.slane %v4230_v21, 1 }
 0x366   : > { %v1078_v19 = vpop.permute.xlu1 %1077 }
 0x36a   : > { %v1080_v17 = vpop.permute.xlu0 %1079 }
 0x36b   : > { %3661 = vmatprep.subr.msk.mxu1 %vm1081_vm4, %v1080_v17 }
 0x36c   : > { %3662 = vmatpush3.xpose.msk.msra.mxu1 %vm1081_vm4, %v1080_v17 }
 0x36d   : > { %3663 = vmatprep.subr.msk.mxu1 %vm1081_vm4, %v1078_v19 }
 0x370   : > { %3664 = vmatpush3.xpose.msk.msra.mxu1 %vm1081_vm4, %v1078_v19 }
 0x371   : > { %3668 = vmatprep.subr.msk.mxu1 %vm1197_vm5, %v4230_v21 }
 0x373   : > { %3666 = vmatmul.mubr.msk.f32.vlgmr.msra.gmra.mxu1 %vm1081_vm4, %v4217_v15 }
 0x374   : > { %3669 = vmatpush3.msk.msra.mxu1 %vm1197_vm5, %v4230_v21 }
 0x375   : > { %3670 = vmatprep.subr.mxu1 %v4236_v22 }
 0x376   : > { %3671 = vmatpush3.msra.mxu1 %v4236_v22 }
 0x433   : > { %v3667_v23 = vpop.f32.mrf.mxu1 }
 0x434   : > { %v1166_v24 = vmul.f32 0.25, %v3667_v23 }
 0x435   : > { %v1156_v25 = vpop.f32.mrf.mxu1 }
 0x436   : > { %v1165_v27 = vmul.f32 0.25, %v1156_v25  ;;  %v1172_v28 = vsel %vm1171_vm6, %v1166_v24, -inf }
 0x437   : > { %1173 = vmax.xlane.f32.xlu0 %v1172_v28 }
 0x438   : > { %v1168_v29 = vsel %vm1167_vm7, %v1165_v27, -inf }
 0x439   : > { %1169 = vmax.xlane.f32.xlu1 %v1168_v29 }
 0x43b   : > { %921 = vadd.xlane.f32.xlu0 %v920_v30 }
 0x451   : > { %1282 = vrot.lane.b32.xlu0 %v4217_v15, %s3928_s17 }
 0x4c0   : > { %v1174_v31 = vpop.xlane.xlu0 %1173 }
 0x4c1   : > { %v1176_v44 = vsub.f32 %v1166_v24, %v1174_v31 }
 0x4c2   : > { %v1170_v32 = vpop.xlane.xlu1 %1169 }
 0x4c3   : > { %v1175_v33 = vsub.f32 %v1165_v27, %v1170_v32  ;;  %v1179_v45 = vmul.f32 1.442695, %v1176_v44 }
 0x4c4   : > { %v922_v34 = vpop.xlane.xlu0 %921 }
 0x4c5   : > { %v1177_v35 = vmul.f32 1.442695, %v1175_v33  ;;  %v926_v36 = vmul.f32 0.015625, %v922_v34 }
 0x4c7   : > { %3819 = vpow2.f32 %v1177_v35  ;;  %v929_v37 = vsub.f32 %v831_v26, %v926_v36 }
 0x4c8   : > { %v4252_v38 = vpop.permute.xlu0 %1282  ;;  %3821 = vpow2.f32 %v1179_v45 }
 0x4c9   : > { %3675 = vmatprep.subr.msk.mxu1 %vm1081_vm4, %v4252_v38  ;;  %v932_v39 = vmul.f32 %v929_v37, %v929_v37 }
 0x4cb   : > { %v939_v40 = vsel %vm919_vm8, %v932_v39, 0.0 }
 0x4cc   : > { %940 = vadd.xlane.f32.xlu1 %v939_v40 }
 0x4d4   : > { %v3820_v41 = vpop.eup %3819 }
 0x4d5   : > { %v1181_v43 = vsel %vm1167_vm7, %v3820_v41, 0.0  ;;  %v3822_v46 = vpop.eup %3821 }
 0x4d6   : > { %1182 = vadd.xlane.f32.xlu0 %v1181_v43  ;;  %v1184_v47 = vsel %vm1171_vm6, %v3822_v46, 0.0 }
 0x4dd   : > { %1486 = vrot.lane.b32.xlu1 %v4217_v15, %s3929_s19 }
 0x4e1   : > { %1280 = vrot.lane.b32.xlu1 %v4210_v12, %s3928_s17 }
 0x4e5   : > { %1484 = vrot.lane.b32.xlu1 %v4210_v12, %s3929_s19 }
 0x4ec   : > { %1276 = vrot.lane.b32.xlu0 %v4210_v12, %s3930_s27 }
 0x4f0   : > { %1480 = vrot.lane.b32.xlu0 %v4210_v12, %s3931_s2 }
 0x4f4   : > { %1482 = vrot.lane.b32.xlu0 %v4217_v15, %s3931_s2 }
 0x4f8   : > { %1683 = vrot.lane.b32.xlu0 %v4210_v12, %s3932_s1 }
 0x509   : > { %1185 = vadd.xlane.f32.xlu1 %v1184_v47 }
 0x51a   : > { %1278 = vrot.lane.b32.xlu1 %v4217_v15, %s3930_s27 }
 0x51e   : > { %1689 = vrot.lane.b32.xlu1 %v4217_v15, %s3933_s22 }
 0x522   : > { %1687 = vrot.lane.b32.xlu1 %v4210_v12, %s3933_s22 }
 0x526   : > { %1685 = vrot.lane.b32.xlu1 %v4217_v15, %s3932_s1 }
 0x555   : > { %v941_v48 = vpop.xlane.xlu1 %940 }
 0x556   : > { %v944_v49 = vmul.f32 0.015625, %v941_v48 }
 0x558   : > { %v947_v50 = vadd.f32 1e-06, %v944_v49 }
 0x559   : > { %v1487_v51 = vpop.permute.xlu1 %1486 }
 0x55a   : > { %3823 = vrsqrt.f32 %v947_v50  ;;  %3689 = vmatprep.subr.msk.mxu0 %vm1081_vm4, %v1487_v51 }
 0x55b   : > { %3690 = vmatpush3.xpose.msk.msra.mxu0 %vm1081_vm4, %v1487_v51 }
 0x55d   : > { %v1281_v52 = vpop.permute.xlu1 %1280 }
 0x55f   : > { %v1183_v53 = vpop.xlane.xlu0 %1182 }
 0x560   : > { %3825 = vrcp.f32 %v1183_v53 }
 0x561   : > { %v1485_v54 = vpop.permute.xlu1 %1484 }
 0x562   : > { %3691 = vmatprep.subr.msk.mxu0 %vm1081_vm4, %v1485_v54 }
 0x563   : > { %v1277_v55 = vpop.permute.xlu0 %1276  ;;  %3692 = vmatpush3.xpose.msk.msra.mxu0 %vm1081_vm4, %v1485_v54 }
 0x567   : > { %v3824_v56 = vpop.eup %3823  ;;  %v1481_v57 = vpop.permute.xlu0 %1480 }
 0x568   : > { %v953_v58 = vmul.f32 %v3824_v56, %v929_v37 }
 0x56a   : > { %v962_v59 = vmul.f32 %v4184_v61, %v953_v58 }
 0x56b   : > { %v1483_v60 = vpop.permute.xlu0 %1482 }
 0x56c   : > { %v971_v62 = vadd.f32 %v4191_v63, %v962_v59 }
 0x56d   : > { %v3826_v0 = vpop.eup %3825 }
 0x56e   : > { %3449 = vmatmul.mubr.msk.f32.gmra.mxu0 %vm912_vm3, %v971_v62  ;;  %v1189_v1 = vmul.f32 %v3826_v0, %v3820_v41 }
 0x56f   : > { %3693 = vmatprep.mubr.msk.f32.mxu0 %vm1081_vm4, %v1481_v57  ;;  %v1684_v2 = vpop.permute.xlu0 %1683 }
 0x570   : > { %3672 = vmatprep.mubr.msk.f32.mxu1 %vm1167_vm7, %v1189_v1 }
 0x572   : > { %3694 = vmatmul.mubr.msk.f32.vlgmr.msra.gmra.mxu0 %vm1081_vm4, %v1483_v60 }
 0x573   : > { %3707 = vmatprep.mubr.msk.f32.mxu0 %vm1081_vm4, %v1684_v2 }
 0x592   : > { %v1186_v3 = vpop.xlane.xlu1 %1185 }
 0x593   : > { %3827 = vrcp.f32 %v1186_v3 }
 0x596   : > { %v1279_v4 = vpop.permute.xlu1 %1278 }
 0x59a   : > { %v1690_v61 = vpop.permute.xlu1 %1689 }
 0x59b   : > { %3703 = vmatprep.subr.msk.mxu0 %vm1081_vm4, %v1690_v61 }
 0x59c   : > { %3704 = vmatpush3.xpose.msk.msra.mxu0 %vm1081_vm4, %v1690_v61 }
 0x59e   : > { %v1688_v63 = vpop.permute.xlu1 %1687 }
 0x59f   : > { %3705 = vmatprep.subr.msk.mxu0 %vm1081_vm4, %v1688_v63 }
 0x5a0   : > { %v3828_v5 = vpop.eup %3827  ;;  %3706 = vmatpush3.xpose.msk.msra.mxu0 %vm1081_vm4, %v1688_v63 }
 0x5a1   : > { %v1190_v6 = vmul.f32 %v3828_v5, %v3822_v46 }
 0x5a2   : > { %v1686_v9 = vpop.permute.xlu1 %1685 }
 0x5a3   : > { %3673 = vmatmul.mubr.msk.f32.vlgmr.msra.gmra.mxu1 %vm1167_vm7, %v1190_v6  ;;  %3708 = vmatmul.mubr.msk.f32.vlgmr.msra.gmra.mxu0 %vm1081_vm4, %v1686_v9 }
 0x5a4   : > { %3676 = vmatpush3.xpose.msk.msra.mxu1 %vm1081_vm4, %v4252_v38  ;;  %3679 = vmatprep.mubr.msk.f32.mxu1 %vm1081_vm4, %v1277_v55 }
 0x5a5   : > { %3677 = vmatprep.subr.msk.mxu1 %vm1081_vm4, %v1281_v52 }
 0x5a8   : > { %3678 = vmatpush3.xpose.msk.msra.mxu1 %vm1081_vm4, %v1281_v52 }
 0x5ab   : > { %3680 = vmatmul.mubr.msk.f32.vlgmr.msra.gmra.mxu1 %vm1081_vm4, %v1279_v4 }
 0x62e   : > { %v4304_v11 = vpop.f32.mrf.mxu0 }
 0x630   : > { %v1072_v12 = vpop.f32.mrf.mxu0 }
 0x631   : > { %v1073_v13 = vadd.f32 %v1072_v12, %v4226_v20  ;;  %v1071_v12 = vadd.f32 %v4304_v11, %v4207_v10 }
 0x632   : > { %v3695_v14 = vpop.f32.mrf.mxu0 }
 0x633   : > { %v4307_v17 = vrot.slane %v1073_v13, 1  ;;  %v1572_v34 = vmul.f32 0.25, %v3695_v14  ;;  %v4354_v13 = vrot.slane %v1071_v12, 1  ;;  %v1920_v14 = vrot.slane %v4217_v15, 1 }
 0x634   : > { %v1562_v19 = vpop.f32.mrf.mxu0 }
 0x635   : > { %v1571_v23 = vmul.f32 0.25, %v1562_v19  ;;  %3724 = vmatprep.subr.msk.mxu0 %vm1197_vm5, %v4307_v17  ;;  %v4314_v24 = vsel %vm1919_vm9, %v2035_v18, %v4307_v17  ;;  %v1576_v39 = vsel %vm1171_vm6, %v1572_v34, -inf  ;;  %v4363_v18 = vsel %vm1919_vm9, %v1920_v14, %v4354_v13 }
 0x636   : > { %3725 = vmatpush3.msk.msra.mxu0 %vm1197_vm5, %v4307_v17 }
 0x637   : > { %3726 = vmatprep.subr.mxu0 %v4314_v24  ;;  %v1573_v20 = vsel %vm1167_vm7, %v1571_v23, -inf }
 0x638   : > { %1574 = vmax.xlane.f32.xlu0 %v1573_v20  ;;  %3727 = vmatpush3.msra.mxu0 %v4314_v24 }
 0x663   : > { %v4321_v25 = vpop.f32.mrf.mxu1  ;;  %v3709_v27 = vpop.f32.mrf.mxu0 }
 0x664   : > { %v1775_v31 = vmul.f32 0.25, %v3709_v27 }
 0x665   : > { %v4323_v26 = vpop.f32.mrf.mxu1  ;;  %v1765_v36 = vpop.f32.mrf.mxu0 }
 0x666   : > { %v1779_v37 = vsel %vm1171_vm6, %v1775_v31, -inf  ;;  %v1774_v38 = vmul.f32 0.25, %v1765_v36 }
 0x668   : > { %v1776_v40 = vsel %vm1167_vm7, %v1774_v38, -inf }
 0x66b   : > { %v3681_v28 = vpop.f32.mrf.mxu1 }
 0x66c   : > { %v1368_v29 = vmul.f32 0.25, %v3681_v28 }
 0x66d   : > { %v1358_v30 = vpop.f32.mrf.mxu1 }
 0x66e   : > { %v1367_v32 = vmul.f32 0.25, %v1358_v30  ;;  %v1372_v33 = vsel %vm1171_vm6, %v1368_v29, -inf }
 0x66f   : > { %1373 = vmax.xlane.f32.xlu1 %v1372_v33 }
 0x670   : > { %v1369_v35 = vsel %vm1167_vm7, %v1367_v32, -inf }
 0x671   : > { %1370 = vmax.xlane.f32.xlu0 %v1369_v35 }
 0x673   : > { %1780 = vmax.xlane.f32.xlu1 %v1779_v37 }
 0x675   : > { %1577 = vmax.xlane.f32.xlu0 %v1576_v39 }
 0x679   : > { %1777 = vmax.xlane.f32.xlu0 %v1776_v40 }
 0x6c1   : > { %v1575_v41 = vpop.xlane.xlu0 %1574 }
 0x6c2   : > { %v1579_v43 = vsub.f32 %v1571_v23, %v1575_v41 }
 0x6c4   : > { %v1581_v44 = vmul.f32 1.442695, %v1579_v43 }
 0x6c6   : > { %3829 = vpow2.f32 %v1581_v44 }
 0x6d3   : > { %v4330_v45 = vpop.eup %3829 }
 0x6d4   : > { %v1585_v46 = vsel %vm1167_vm7, %v4330_v45, 0.0 }
 0x6d5   : > { %1586 = vadd.xlane.f32.xlu0 %v1585_v46 }
 0x6f8   : > { %v1374_v47 = vpop.xlane.xlu1 %1373 }
 0x6f9   : > { %v1376_v53 = vsub.f32 %v1368_v29, %v1374_v47 }
 0x6fa   : > { %v1371_v48 = vpop.xlane.xlu0 %1370 }
 0x6fb   : > { %v1375_v54 = vsub.f32 %v1367_v32, %v1371_v48  ;;  %v1379_v59 = vmul.f32 1.442695, %v1376_v53 }
 0x6fc   : > { %v1781_v49 = vpop.xlane.xlu1 %1780 }
 0x6fd   : > { %v1783_v50 = vsub.f32 %v1775_v31, %v1781_v49  ;;  %v1377_v60 = vmul.f32 1.442695, %v1375_v54 }
 0x6fe   : > { %v1578_v51 = vpop.xlane.xlu0 %1577 }
 0x6ff   : > { %v1580_v52 = vsub.f32 %v1572_v34, %v1578_v51  ;;  %v1786_v55 = vmul.f32 1.442695, %v1783_v50 }
 0x701   : > { %v1583_v56 = vmul.f32 1.442695, %v1580_v52 }
 0x702   : > { %v1778_v57 = vpop.xlane.xlu0 %1777 }
 0x703   : > { %3831 = vpow2.f32 %v1583_v56  ;;  %v1782_v58 = vsub.f32 %v1774_v38, %v1778_v57 }
 0x704   : > { %3833 = vpow2.f32 %v1786_v55 }
 0x705   : > { %v1784_v62 = vmul.f32 1.442695, %v1782_v58 }
 0x707   : > { %3835 = vpow2.f32 %v1784_v62 }
 0x708   : > { %3837 = vpow2.f32 %v1379_v59 }
 0x709   : > { %3839 = vpow2.f32 %v1377_v60 }
 0x710   : > { %v3832_v0 = vpop.eup %3831 }
 0x711   : > { %v1588_v1 = vsel %vm1171_vm6, %v3832_v0, 0.0  ;;  %v4335_v2 = vpop.eup %3833 }
 0x712   : > { %1589 = vadd.xlane.f32.xlu1 %v1588_v1  ;;  %v1791_v63 = vsel %vm1171_vm6, %v4335_v2, 0.0 }
 0x714   : > { %v3836_v3 = vpop.eup %3835 }
 0x715   : > { %v3838_v4 = vpop.eup %3837  ;;  %v1788_v61 = vsel %vm1167_vm7, %v3836_v3, 0.0 }
 0x716   : > { %v3840_v5 = vpop.eup %3839  ;;  %1789 = vadd.xlane.f32.xlu0 %v1788_v61  ;;  %1792 = vadd.xlane.f32.xlu1 %v1791_v63  ;;  %v1384_v9 = vsel %vm1171_vm6, %v3838_v4, 0.0 }
 0x717   : > { %v1381_v6 = vsel %vm1167_vm7, %v3840_v5, 0.0 }
 0x71a   : > { %1382 = vadd.xlane.f32.xlu0 %v1381_v6  ;;  %1385 = vadd.xlane.f32.xlu1 %v1384_v9 }
 0x72b   : > { %1392 = vrot.lane.b32.xlu1 %v4236_v22, %s3930_s27 }
 0x72f   : > { %1597 = vrot.lane.b32.xlu1 %v4230_v21, %s3931_s2 }
 0x730   : > { %1394 = vrot.lane.b32.xlu0 %v4230_v21, %s3930_s27 }
 0x733   : > { %1595 = vrot.lane.b32.xlu1 %v4236_v22, %s3931_s2 }
 0x734   : > { %1800 = vrot.lane.b32.xlu0 %v4230_v21, %s3932_s1 }
 0x737   : > { %1798 = vrot.lane.b32.xlu1 %v4236_v22, %s3932_s1 }
 0x738   : > { %1925 = vrot.lane.b32.xlu0 %v4354_v13, %s3927_s24 }
 0x73b   : > { %1923 = vrot.lane.b32.xlu1 %v4363_v18, %s3927_s24  ;;  %s4796_s24 = scalar_lea.vmem %s4758_s10, %s4033_s26 }
 0x75e   : > { %v1587_v10 = vpop.xlane.xlu0 %1586 }
 0x75f   : > { %3841 = vrcp.f32 %v1587_v10 }
 0x76c   : > { %v3842_v28 = vpop.eup %3841 }
 0x76d   : > { %v1593_v35 = vmul.f32 %v3842_v28, %v4330_v45 }
 0x79b   : > { %v1590_v11 = vpop.xlane.xlu1 %1589 }
 0x79f   : > { %v1790_v21 = vpop.xlane.xlu0 %1789  ;;  %v1793_v19 = vpop.xlane.xlu1 %1792 }
 0x7a3   : > { %v1383_v23 = vpop.xlane.xlu0 %1382  ;;  %v1386_v20 = vpop.xlane.xlu1 %1385 }
 0x7a4   : > { %3843 = vrcp.f32 %v1383_v23 }
 0x7a5   : > { %3845 = vrcp.f32 %v1386_v20 }
 0x7a6   : > { %3847 = vrcp.f32 %v1590_v11 }
 0x7a7   : > { %v1395_v15 = vpop.permute.xlu0 %1394  ;;  %v1393_v22 = vpop.permute.xlu1 %1392  ;;  %3849 = vrcp.f32 %v1790_v21 }
 0x7a8   : > { %3682 = vmatprep.subr.msk.mxu1 %vm1197_vm5, %v1395_v15  ;;  %3851 = vrcp.f32 %v1793_v19 }
 0x7a9   : > { %3683 = vmatpush3.msk.msra.mxu1 %vm1197_vm5, %v1395_v15 }
 0x7aa   : > { %3684 = vmatprep.subr.mxu1 %v1393_v22 }
 0x7ab   : > { %3685 = vmatpush3.msra.mxu1 %v1393_v22  ;;  %v1598_v27 = vpop.permute.xlu1 %1597  ;;  %v1801_v37 = vpop.permute.xlu0 %1800 }
 0x7ac   : > { %3696 = vmatprep.subr.msk.mxu1 %vm1197_vm5, %v1598_v27 }
 0x7af   : > { %v1596_v31 = vpop.permute.xlu1 %1595  ;;  %v1926_v44 = vpop.permute.xlu0 %1925 }
 0x7b1   : > { %v3844_v29 = vpop.eup %3843 }
 0x7b2   : > { %v3846_v30 = vpop.eup %3845  ;;  %v1389_v32 = vmul.f32 %v3844_v29, %v3840_v5 }
 0x7b3   : > { %v1390_v33 = vmul.f32 %v3846_v30, %v3838_v4  ;;  %v3848_v34 = vpop.eup %3847  ;;  %v1799_v40 = vpop.permute.xlu1 %1798 }
 0x7b4   : > { %3686 = vmatprep.mubr.msk.f32.mxu1 %vm1167_vm7, %v1389_v32  ;;  %v3850_v36 = vpop.eup %3849  ;;  %v1594_v38 = vmul.f32 %v3848_v34, %v3832_v0 }
 0x7b5   : > { %3687 = vmatmul.mubr.msk.f32.vlgmr.msra.gmra.mxu1 %vm1167_vm7, %v1390_v33  ;;  %v3852_v39 = vpop.eup %3851  ;;  %v1796_v41 = vmul.f32 %v3850_v36, %v3836_v3 }
 0x7b6   : > { %3697 = vmatpush3.msk.msra.mxu1 %vm1197_vm5, %v1598_v27  ;;  %3700 = vmatprep.mubr.msk.f32.mxu1 %vm1167_vm7, %v1593_v35  ;;  %v1797_v43 = vmul.f32 %v3852_v39, %v4335_v2 }
 0x7b7   : > { %3698 = vmatprep.subr.mxu1 %v1596_v31  ;;  %v1924_v45 = vpop.permute.xlu1 %1923 }
 0x7b8   : > { %3699 = vmatpush3.msra.mxu1 %v1596_v31 }
 0x7b9   : > { %3710 = vmatprep.subr.msk.mxu1 %vm1197_vm5, %v1801_v37  ;;  %3701 = vmatmul.mubr.msk.f32.vlgmr.msra.gmra.mxu1 %vm1167_vm7, %v1594_v38 }
 0x7ba   : > { %3711 = vmatpush3.msk.msra.mxu1 %vm1197_vm5, %v1801_v37  ;;  %3714 = vmatprep.mubr.msk.f32.mxu1 %vm1167_vm7, %v1796_v41 }
 0x7bb   : > { %3712 = vmatprep.subr.mxu1 %v1799_v40 }
 0x7bc   : > { %3713 = vmatpush3.msra.mxu1 %v1799_v40 }
 0x7bd   : > { %3717 = vmatprep.subr.msk.mxu1 %vm1081_vm4, %v1926_v44  ;;  %3715 = vmatmul.mubr.msk.f32.vlgmr.msra.gmra.mxu1 %vm1167_vm7, %v1797_v43 }
 0x7be   : > { %3718 = vmatpush3.xpose.msk.msra.mxu1 %vm1081_vm4, %v1926_v44  ;;  %3721 = vmatprep.mubr.msk.f32.mxu1 %vm1081_vm4, %v4363_v18 }
 0x7bf   : > { %3719 = vmatprep.subr.msk.mxu1 %vm1081_vm4, %v1924_v45 }
 0x7c2   : > { %3720 = vmatpush3.xpose.msk.msra.mxu1 %vm1081_vm4, %v1924_v45 }
 0x7c5   : > { %3722 = vmatmul.mubr.msk.f32.vlgmr.msra.gmra.mxu1 %vm1081_vm4, %v4354_v13 }
 0x875   : > { %v4389_v46 = vpop.f32.mrf.mxu1 }
 0x877   : > { %v4391_v47 = vpop.f32.mrf.mxu1 }
 0x879   : > { %v4393_v48 = vpop.f32.mrf.mxu1 }
 0x87b   : > { %v4395_v49 = vpop.f32.mrf.mxu1 }
 0x87d   : > { %v4397_v50 = vpop.f32.mrf.mxu1 }
 0x87f   : > { %v4399_v51 = vpop.f32.mrf.mxu1 }
 0x885   : > { %v3723_v52 = vpop.f32.mrf.mxu1 }
 0x886   : > { %v2011_v53 = vmul.f32 0.25, %v3723_v52 }
 0x887   : > { %v2001_v54 = vpop.f32.mrf.mxu1 }
 0x888   : > { %v2010_v55 = vmul.f32 0.25, %v2001_v54  ;;  %v2015_v56 = vsel %vm1171_vm6, %v2011_v53, -inf }
 0x889   : > { %2016 = vmax.xlane.f32.xlu1 %v2015_v56 }
 0x88a   : > { %v2012_v57 = vsel %vm1167_vm7, %v2010_v55, -inf }
 0x88b   : > { %2013 = vmax.xlane.f32.xlu0 %v2012_v57 }
 0x89a   : > { %2126 = vrot.lane.b32.xlu1 %v4363_v18, %s3928_s17 }
 0x89e   : > { %2122 = vrot.lane.b32.xlu1 %v4363_v18, %s3930_s27 }
 0x8a2   : > { %2124 = vrot.lane.b32.xlu1 %v4354_v13, %s3930_s27 }
 0x912   : > { %v2017_v58 = vpop.xlane.xlu1 %2016 }
 0x913   : > { %v2019_v59 = vsub.f32 %v2011_v53, %v2017_v58 }
 0x914   : > { %v2014_v60 = vpop.xlane.xlu0 %2013 }
 0x915   : > { %v2022_v62 = vmul.f32 1.442695, %v2019_v59  ;;  %v2018_v0 = vsub.f32 %v2010_v55, %v2014_v60 }
 0x916   : > { %v2127_v9 = vpop.permute.xlu1 %2126 }
 0x917   : > { %3853 = vpow2.f32 %v2022_v62  ;;  %v2020_v1 = vmul.f32 1.442695, %v2018_v0 }
 0x919   : > { %3855 = vpow2.f32 %v2020_v1 }
 0x91a   : > { %v2123_v21 = vpop.permute.xlu1 %2122 }
 0x91e   : > { %v2125_v19 = vpop.permute.xlu1 %2124 }
 0x924   : > { %v3854_v2 = vpop.eup %3853 }
 0x925   : > { %v2027_v3 = vsel %vm1171_vm6, %v3854_v2, 0.0 }
 0x926   : > { %v3856_v4 = vpop.eup %3855  ;;  %2028 = vadd.xlane.f32.xlu0 %v2027_v3 }
 0x927   : > { %v2024_v61 = vsel %vm1167_vm7, %v3856_v4, 0.0 }
 0x92a   : > { %2025 = vadd.xlane.f32.xlu0 %v2024_v61 }
 0x940   : > { %2128 = vrot.lane.b32.xlu0 %v4354_v13, %s3928_s17 }
 0x9af   : > { %v2029_v63 = vpop.xlane.xlu0 %2028 }
 0x9b0   : > { %3857 = vrcp.f32 %v2029_v63 }
 0x9b3   : > { %v2026_v5 = vpop.xlane.xlu0 %2025 }
 0x9b4   : > { %3859 = vrcp.f32 %v2026_v5 }
 0x9b7   : > { %v2129_v6 = vpop.permute.xlu0 %2128 }
 0x9b8   : > { %3731 = vmatprep.subr.msk.mxu0 %vm1081_vm4, %v2129_v6 }
 0x9bd   : > { %v3858_v12 = vpop.eup %3857 }
 0x9be   : > { %v2033_v11 = vmul.f32 %v3858_v12, %v3854_v2 }
 0x9c1   : > { %v3860_v14 = vpop.eup %3859 }
 0x9c2   : > { %v2032_v10 = vmul.f32 %v3860_v14, %v3856_v4 }
 0x9c4   : > { %3728 = vmatprep.mubr.msk.f32.mxu0 %vm1167_vm7, %v2032_v10 }
 0x9c5   : > { %3729 = vmatmul.mubr.msk.f32.vlgmr.msra.gmra.mxu0 %vm1167_vm7, %v2033_v11 }
 0x9c6   : > { %3732 = vmatpush3.xpose.msk.msra.mxu0 %vm1081_vm4, %v2129_v6  ;;  %3735 = vmatprep.mubr.msk.f32.mxu0 %vm1081_vm4, %v2123_v21 }
 0x9c7   : > { %3733 = vmatprep.subr.msk.mxu0 %vm1081_vm4, %v2127_v9 }
 0x9ca   : > { %3734 = vmatpush3.xpose.msk.msra.mxu0 %vm1081_vm4, %v2127_v9 }
 0x9cd   : > { %3736 = vmatmul.mubr.msk.f32.vlgmr.msra.gmra.mxu0 %vm1081_vm4, %v2125_v19 }
 0xa85   : > { %v4421_v23 = vpop.f32.mrf.mxu0 }
 0xa87   : > { %v4423_v20 = vpop.f32.mrf.mxu0 }
 0xa8d   : > { %v3737_v15 = vpop.f32.mrf.mxu0 }
 0xa8e   : > { %v2214_v22 = vmul.f32 0.25, %v3737_v15 }
 0xa8f   : > { %v2204_v27 = vpop.f32.mrf.mxu0 }
 0xa90   : > { %v2213_v28 = vmul.f32 0.25, %v2204_v27  ;;  %v2218_v29 = vsel %vm1171_vm6, %v2214_v22, -inf }
 0xa91   : > { %2219 = vmax.xlane.f32.xlu1 %v2218_v29 }
 0xa92   : > { %v2215_v30 = vsel %vm1167_vm7, %v2213_v28, -inf }
 0xa93   : > { %2216 = vmax.xlane.f32.xlu0 %v2215_v30 }
 0xaa2   : > { %2237 = vrot.lane.b32.xlu1 %v4314_v24, %s3930_s27 }
 0xaa6   : > { %2331 = vrot.lane.b32.xlu1 %v4354_v13, %s3929_s19 }
 0xaaa   : > { %2329 = vrot.lane.b32.xlu1 %v4363_v18, %s3929_s19 }
 0xaae   : > { %2327 = vrot.lane.b32.xlu1 %v4354_v13, %s3931_s2 }
 0xb1a   : > { %v2220_v31 = vpop.xlane.xlu1 %2219 }
 0xb1b   : > { %v2222_v32 = vsub.f32 %v2214_v22, %v2220_v31 }
 0xb1c   : > { %v2217_v33 = vpop.xlane.xlu0 %2216 }
 0xb1d   : > { %v2225_v34 = vmul.f32 1.442695, %v2222_v32  ;;  %v2221_v35 = vsub.f32 %v2213_v28, %v2217_v33 }
 0xb1e   : > { %v2238_v44 = vpop.permute.xlu1 %2237 }
 0xb1f   : > { %3861 = vpow2.f32 %v2225_v34  ;;  %v2223_v36 = vmul.f32 1.442695, %v2221_v35 }
 0xb21   : > { %3863 = vpow2.f32 %v2223_v36 }
 0xb22   : > { %v2332_v52 = vpop.permute.xlu1 %2331 }
 0xb26   : > { %v2330_v58 = vpop.permute.xlu1 %2329 }
 0xb2a   : > { %v2328_v59 = vpop.permute.xlu1 %2327 }
 0xb2c   : > { %v3862_v37 = vpop.eup %3861 }
 0xb2d   : > { %v2230_v38 = vsel %vm1171_vm6, %v3862_v37, 0.0 }
 0xb2e   : > { %v3864_v39 = vpop.eup %3863  ;;  %2231 = vadd.xlane.f32.xlu0 %v2230_v38 }
 0xb2f   : > { %v2227_v40 = vsel %vm1167_vm7, %v3864_v39, 0.0 }
 0xb32   : > { %2228 = vadd.xlane.f32.xlu0 %v2227_v40 }
 0xb48   : > { %2239 = vrot.lane.b32.xlu0 %v4307_v17, %s3930_s27 }
 0xb4c   : > { %2325 = vrot.lane.b32.xlu0 %v4363_v18, %s3931_s2 }
 0xbb7   : > { %v2232_v41 = vpop.xlane.xlu0 %2231 }
 0xbb8   : > { %3865 = vrcp.f32 %v2232_v41 }
 0xbbb   : > { %v2229_v43 = vpop.xlane.xlu0 %2228 }
 0xbbc   : > { %3867 = vrcp.f32 %v2229_v43 }
 0xbbf   : > { %v2240_v45 = vpop.permute.xlu0 %2239 }
 0xbc0   : > { %3738 = vmatprep.subr.msk.mxu1 %vm1197_vm5, %v2240_v45 }
 0xbc1   : > { %3739 = vmatpush3.msk.msra.mxu1 %vm1197_vm5, %v2240_v45  ;;  %v857_v45 = vld [vmem:[%s4063_s30 + $0x30] sm:$0xff] }
 0xbc2   : > { %3740 = vmatprep.subr.mxu1 %v2238_v44 }
 0xbc3   : > { %3741 = vmatpush3.msra.mxu1 %v2238_v44  ;;  %v2326_v57 = vpop.permute.xlu0 %2325  ;;  %v858_v44 = vld [vmem:[%s4063_s30 + $0x38] sm:$0xff] }
 0xbc4   : > { %3745 = vmatprep.subr.msk.mxu1 %vm1081_vm4, %v2332_v52 }
 0xbc5   : > { %v3866_v53 = vpop.eup %3865 }
 0xbc6   : > { %v2236_v56 = vmul.f32 %v3866_v53, %v3862_v37  ;;  %v855_v53 = vld [vmem:[%s4063_s30 + $0x20] sm:$0xff] }
 0xbc9   : > { %v3868_v54 = vpop.eup %3867 }
 0xbca   : > { %v2235_v55 = vmul.f32 %v3868_v54, %v3864_v39  ;;  %v854_v54 = vld [vmem:[%s4063_s30 + $0x18] sm:$0xff] }
 0xbcc   : > { %3742 = vmatprep.mubr.msk.f32.mxu1 %vm1167_vm7, %v2235_v55  ;;  %v853_v55 = vld [vmem:[%s4063_s30 + $0x10] sm:$0xff] }
 0xbcd   : > { %3743 = vmatmul.mubr.msk.f32.vlgmr.msra.gmra.mxu1 %vm1167_vm7, %v2236_v56  ;;  %v852_v56 = vld [vmem:[%s4063_s30 + $0x8] sm:$0xff] }
 0xbce   : > { %3746 = vmatpush3.xpose.msk.msra.mxu1 %vm1081_vm4, %v2332_v52  ;;  %3749 = vmatprep.mubr.msk.f32.mxu1 %vm1081_vm4, %v2326_v57  ;;  %v856_v52 = vld [vmem:[%s4063_s30 + $0x28] sm:$0xff] }
 0xbcf   : > { %3747 = vmatprep.subr.msk.mxu1 %vm1081_vm4, %v2330_v58 }
 0xbd2   : > { %3748 = vmatpush3.xpose.msk.msra.mxu1 %vm1081_vm4, %v2330_v58 }
 0xbd5   : > { %3750 = vmatmul.mubr.msk.f32.vlgmr.msra.gmra.mxu1 %vm1081_vm4, %v2328_v59 }
 0xc8d   : > { %v4451_v60 = vpop.f32.mrf.mxu1 }
 0xc8f   : > { %v4453_v62 = vpop.f32.mrf.mxu1 }
 0xc95   : > { %v3751_v0 = vpop.f32.mrf.mxu1 }
 0xc96   : > { %v2417_v1 = vmul.f32 0.25, %v3751_v0 }
 0xc97   : > { %v2407_v2 = vpop.f32.mrf.mxu1 }
 0xc98   : > { %v2416_v3 = vmul.f32 0.25, %v2407_v2  ;;  %v2421_v4 = vsel %vm1171_vm6, %v2417_v1, -inf }
 0xc99   : > { %2422 = vmax.xlane.f32.xlu1 %v2421_v4 }
 0xc9a   : > { %v2418_v61 = vsel %vm1167_vm7, %v2416_v3, -inf }
 0xc9b   : > { %2419 = vmax.xlane.f32.xlu0 %v2418_v61 }
 0xcaa   : > { %2440 = vrot.lane.b32.xlu1 %v4314_v24, %s3931_s2 }
 0xcae   : > { %2534 = vrot.lane.b32.xlu1 %v4354_v13, %s3933_s22 }
 0xcb2   : > { %2532 = vrot.lane.b32.xlu1 %v4363_v18, %s3933_s22 }
 0xcb6   : > { %2530 = vrot.lane.b32.xlu1 %v4354_v13, %s3932_s1 }
 0xd22   : > { %v2423_v63 = vpop.xlane.xlu1 %2422 }
 0xd23   : > { %v2425_v5 = vsub.f32 %v2417_v1, %v2423_v63 }
 0xd24   : > { %v2420_v6 = vpop.xlane.xlu0 %2419 }
 0xd25   : > { %v2428_v9 = vmul.f32 1.442695, %v2425_v5  ;;  %v2424_v12 = vsub.f32 %v2416_v3, %v2420_v6 }
 0xd26   : > { %v2441_v22 = vpop.permute.xlu1 %2440 }
 0xd27   : > { %3869 = vpow2.f32 %v2428_v9  ;;  %v2426_v14 = vmul.f32 1.442695, %v2424_v12 }
 0xd29   : > { %3871 = vpow2.f32 %v2426_v14 }
 0xd2a   : > { %v2535_v28 = vpop.permute.xlu1 %2534 }
 0xd2e   : > { %v2533_v33 = vpop.permute.xlu1 %2532 }
 0xd32   : > { %v2531_v34 = vpop.permute.xlu1 %2530 }
 0xd34   : > { %v3870_v10 = vpop.eup %3869 }
 0xd35   : > { %v2433_v11 = vsel %vm1171_vm6, %v3870_v10, 0.0 }
 0xd36   : > { %v3872_v21 = vpop.eup %3871  ;;  %2434 = vadd.xlane.f32.xlu0 %v2433_v11 }
 0xd37   : > { %v2430_v19 = vsel %vm1167_vm7, %v3872_v21, 0.0 }
 0xd3a   : > { %2431 = vadd.xlane.f32.xlu0 %v2430_v19  ;;  %v3915_v19 = vld [vmem:[%s4790_s25] sm:$0xff] }
 0xd50   : > { %2442 = vrot.lane.b32.xlu0 %v4307_v17, %s3931_s2  ;;  %s4797_s2 = scalar_lea.vmem %s4759_s11, %s4033_s26 }
 0xd54   : > { %2528 = vrot.lane.b32.xlu0 %v4363_v18, %s3932_s1 }
 0xdbf   : > { %v2435_v13 = vpop.xlane.xlu0 %2434 }
 0xdc0   : > { %3873 = vrcp.f32 %v2435_v13 }
 0xdc3   : > { %v2432_v15 = vpop.xlane.xlu0 %2431 }
 0xdc4   : > { %3875 = vrcp.f32 %v2432_v15  ;;  %v3509_v15 = vld [vmem:[%s4796_s24] ss:$0 sm:$0xff] }
 0xdc7   : > { %v2443_v27 = vpop.permute.xlu0 %2442 }
 0xdc8   : > { %3752 = vmatprep.subr.msk.mxu0 %vm1197_vm5, %v2443_v27 }
 0xdc9   : > { %3753 = vmatpush3.msk.msra.mxu0 %vm1197_vm5, %v2443_v27 }
 0xdca   : > { %3754 = vmatprep.subr.mxu0 %v2441_v22 }
 0xdcb   : > { %3755 = vmatpush3.msra.mxu0 %v2441_v22  ;;  %v2529_v18 = vpop.permute.xlu0 %2528 }
 0xdcc   : > { %3759 = vmatprep.subr.msk.mxu0 %vm1081_vm4, %v2535_v28 }
 0xdcd   : > { %v3874_v29 = vpop.eup %3873 }
 0xdce   : > { %v2439_v32 = vmul.f32 %v3874_v29, %v3870_v10 }
 0xdd1   : > { %v3876_v30 = vpop.eup %3875 }
 0xdd2   : > { %v2438_v31 = vmul.f32 %v3876_v30, %v3872_v21 }
 0xdd4   : > { %3756 = vmatprep.mubr.msk.f32.mxu0 %vm1167_vm7, %v2438_v31 }
 0xdd5   : > { %3757 = vmatmul.mubr.msk.f32.vlgmr.msra.gmra.mxu0 %vm1167_vm7, %v2439_v32 }
 0xdd6   : > { %3760 = vmatpush3.xpose.msk.msra.mxu0 %vm1081_vm4, %v2535_v28  ;;  %3763 = vmatprep.mubr.msk.f32.mxu0 %vm1081_vm4, %v2529_v18 }
 0xdd7   : > { %3761 = vmatprep.subr.msk.mxu0 %vm1081_vm4, %v2533_v33 }
 0xdda   : > { %3762 = vmatpush3.xpose.msk.msra.mxu0 %vm1081_vm4, %v2533_v33 }
 0xddb   : > { %3773 = vmatprep.subr.mxu0 %v3926_v42 }
 0xddd   : > { %3764 = vmatmul.mubr.msk.f32.vlgmr.msra.gmra.mxu0 %vm1081_vm4, %v2531_v34 }
 0xdde   : > { %3774 = vmatpush3.msra.mxu0 %v858_v44  ;;  %3789 = vmatprep.mubr.msk.f32.mxu0 %vm3934_vm10, %v3926_v42 }
 0xddf   : > { %3775 = vmatprep.subr.mxu0 %v3926_v42 }
 0xde0   : > { %3776 = vmatpush3.msra.mxu0 %v857_v45 }
 0xde1   : > { %3777 = vmatprep.subr.mxu0 %v3926_v42 }
 0xde2   : > { %3778 = vmatpush3.msra.mxu0 %v856_v52 }
 0xde3   : > { %3779 = vmatprep.subr.mxu0 %v3926_v42 }
 0xde4   : > { %3780 = vmatpush3.msra.mxu0 %v855_v53 }
 0xde5   : > { %3781 = vmatprep.subr.mxu0 %v3926_v42 }
 0xde6   : > { %3782 = vmatpush3.msra.mxu0 %v854_v54 }
 0xde7   : > { %3783 = vmatprep.subr.mxu0 %v3926_v42 }
 0xde8   : > { %3784 = vmatpush3.msra.mxu0 %v853_v55  ;;  %v3916_v55 = vld [vmem:[%s4790_s25 + $0x8] sm:$0xff] }
 0xde9   : > { %3785 = vmatprep.subr.mxu0 %v3926_v42 }
 0xdea   : > { %3786 = vmatpush3.msra.mxu0 %v852_v56 }
 0xdeb   : > { %3787 = vmatprep.subr.mxu0 %v3926_v42 }
 0xe95   : > { %v4482_v35 = vpop.f32.mrf.mxu0 }
 0xe97   : > { %v4484_v36 = vpop.f32.mrf.mxu0 }
 0xe9d   : > { %v3765_v37 = vpop.f32.mrf.mxu0 }
 0xe9e   : > { %v2620_v38 = vmul.f32 0.25, %v3765_v37 }
 0xe9f   : > { %v2610_v39 = vpop.f32.mrf.mxu0 }
 0xea0   : > { %v2619_v40 = vmul.f32 0.25, %v2610_v39  ;;  %v2624_v41 = vsel %vm1171_vm6, %v2620_v38, -inf }
 0xea1   : > { %2625 = vmax.xlane.f32.xlu1 %v2624_v41 }
 0xea2   : > { %v2621_v43 = vsel %vm1167_vm7, %v2619_v40, -inf }
 0xea3   : > { %2622 = vmax.xlane.f32.xlu0 %v2621_v43 }
 0xeb2   : > { %2643 = vrot.lane.b32.xlu1 %v4314_v24, %s3932_s1  ;;  %v851_v24 = vld [vmem:[%s4063_s30] sm:$0xff] }
 0xeb3   : > { %3788 = vmatpush3.msra.mxu0 %v851_v24 }
 0xeb6   : > { %1888 = vrot.lane.b32.xlu1 %v4391_v47, %s3933_s22 }
 0xeba   : > { %1896 = vrot.lane.b32.xlu1 %v4395_v49, %s3929_s19 }
 0xebe   : > { %1904 = vrot.lane.b32.xlu1 %v4399_v51, %s3928_s17 }
 0xec2   : > { %1890 = vrot.lane.b32.xlu1 %v4389_v46, %s3933_s22 }
 0xec6   : > { %1898 = vrot.lane.b32.xlu1 %v4393_v48, %s3929_s19 }
 0xeca   : > { %2735 = vrot.lane.b32.xlu1 %v4451_v60, %s3933_s22 }
 0xf2a   : > { %v2626_v47 = vpop.xlane.xlu1 %2625 }
 0xf2b   : > { %v2628_v49 = vsub.f32 %v2620_v38, %v2626_v47 }
 0xf2c   : > { %v2623_v57 = vpop.xlane.xlu0 %2622 }
 0xf2d   : > { %v2631_v58 = vmul.f32 1.442695, %v2628_v49  ;;  %v2627_v59 = vsub.f32 %v2619_v40, %v2623_v57 }
 0xf2e   : > { %v2644_v0 = vpop.permute.xlu1 %2643 }
 0xf2f   : > { %3877 = vpow2.f32 %v2631_v58  ;;  %v2629_v1 = vmul.f32 1.442695, %v2627_v59 }
 0xf31   : > { %3879 = vpow2.f32 %v2629_v1 }
 0xf32   : > { %v1889_v2 = vpop.permute.xlu1 %1888 }
 0xf33   : > { %v1910_v46 = vsel %vm1081_vm4, %v4323_v26, %v1889_v2 }
 0xf36   : > { %v1897_v51 = vpop.permute.xlu1 %1896 }
 0xf37   : > { %v1913_v48 = vsel %vm1912_vm11, %v1910_v46, %v1897_v51 }
 0xf3a   : > { %v1905_v3 = vpop.permute.xlu1 %1904 }
 0xf3b   : > { %v1916_v60 = vsel %vm1915_vm12, %v1913_v48, %v1905_v3 }
 0xf3c   : > { %v3878_v4 = vpop.eup %3877  ;;  %3790 = vmatmul.mubr.msk.f32.vlgmr.msra.gmra.mxu0 %vm912_vm3, %v1916_v60  ;;  %v877_v60 = vld [vmem:[%s4076_s28 + $0x78] sm:$0xff] }
 0xf3d   : > { %v2636_v61 = vsel %vm1171_vm6, %v3878_v4, 0.0  ;;  %3792 = vmatprep.mubr.msk.f32.mxu0 %vm3934_vm10, %v3926_v42  ;;  %2961 = vmatprep.subr.mxu0 %v877_v60 }
 0xf3e   : > { %v3880_v63 = vpop.eup %3879  ;;  %2637 = vadd.xlane.f32.xlu0 %v2636_v61  ;;  %v1891_v29 = vpop.permute.xlu1 %1890  ;;  %v875_v61 = vld [vmem:[%s4076_s28 + $0x68] sm:$0xff] }
 0xf3f   : > { %v2633_v5 = vsel %vm1167_vm7, %v3880_v63, 0.0 }
 0xf42   : > { %2634 = vadd.xlane.f32.xlu0 %v2633_v5  ;;  %v1899_v31 = vpop.permute.xlu1 %1898  ;;  %v873_v5 = vld [vmem:[%s4076_s28 + $0x58] sm:$0xff] }
 0xf58   : > { %2645 = vrot.lane.b32.xlu0 %v4307_v17, %s3932_s1 }
 0xf5c   : > { %2733 = vrot.lane.b32.xlu0 %v4453_v62, %s3933_s22 }
 0xf60   : > { %2741 = vrot.lane.b32.xlu0 %v4484_v36, %s3929_s19  ;;  %v2736_v36 = vpop.permute.xlu1 %2735 }
 0xf61   : > { %v2756_v41 = vsel %vm1081_vm4, %v4421_v23, %v2736_v36 }
 0xf64   : > { %1906 = vrot.lane.b32.xlu0 %v4397_v50, %s3928_s17 }
 0xfc7   : > { %v2638_v26 = vpop.xlane.xlu0 %2637 }
 0xfc8   : > { %3881 = vrcp.f32 %v2638_v26  ;;  %v872_v26 = vld [vmem:[%s4076_s28 + $0x50] sm:$0xff] }
 0xfcb   : > { %v2635_v6 = vpop.xlane.xlu0 %2634 }
 0xfcc   : > { %3883 = vrcp.f32 %v2635_v6  ;;  %v871_v6 = vld [vmem:[%s4076_s28 + $0x48] sm:$0xff] }
 0xfcf   : > { %v2646_v9 = vpop.permute.xlu0 %2645 }
 0xfd0   : > { %3766 = vmatprep.subr.msk.mxu1 %vm1197_vm5, %v2646_v9 }
 0xfd1   : > { %3767 = vmatpush3.msk.msra.mxu1 %vm1197_vm5, %v2646_v9  ;;  %v870_v9 = vld [vmem:[%s4076_s28 + $0x40] sm:$0xff] }
 0xfd2   : > { %3768 = vmatprep.subr.mxu1 %v2644_v0 }
 0xfd3   : > { %3769 = vmatpush3.msra.mxu1 %v2644_v0  ;;  %v2734_v28 = vpop.permute.xlu0 %2733  ;;  %v3917_v0 = vld [vmem:[%s4790_s25 + $0x10] sm:$0x3] }
 0xfd4   : > { %v2755_v18 = vsel %vm1081_vm4, %v4423_v20, %v2734_v28 }
 0xfd5   : > { %v3882_v17 = vpop.eup %3881 }
 0xfd6   : > { %v2642_v14 = vmul.f32 %v3882_v17, %v3878_v4  ;;  %v876_v4 = vld [vmem:[%s4076_s28 + $0x70] sm:$0xff]  ;;  %v869_v17 = vld [vmem:[%s4076_s28 + $0x38] sm:$0xff] }
 0xfd7   : > { %v2742_v30 = vpop.permute.xlu0 %2741  ;;  %2962 = vmatpush1.msra.mxu0 %v876_v4  ;;  %v899_v4 = vld [vmem:[%s4087_s6 + $0xa0] sm:$0xff] }
 0xfd8   : > { %v2757_v33 = vsel %vm1912_vm11, %v2755_v18, %v2742_v30  ;;  %2963 = vmatprep.subr.mxu0 %v875_v61 }
 0xfd9   : > { %v3884_v62 = vpop.eup %3883 }
 0xfda   : > { %v2641_v12 = vmul.f32 %v3884_v62, %v3880_v63  ;;  %v874_v63 = vld [vmem:[%s4076_s28 + $0x60] sm:$0xff]  ;;  %v868_v62 = vld [vmem:[%s4076_s28 + $0x30] sm:$0xff] }
 0xfdb   : > { %v1907_v32 = vpop.permute.xlu0 %1906  ;;  %2964 = vmatpush1.msra.mxu0 %v874_v63  ;;  %v883_v63 = vld [vmem:[%s4087_s6 + $0x20] sm:$0xff] }
 0xfdc   : > { %3770 = vmatprep.mubr.msk.f32.mxu1 %vm1167_vm7, %v2641_v12  ;;  %2965 = vmatprep.subr.mxu0 %v873_v5  ;;  %v867_v12 = vld [vmem:[%s4076_s28 + $0x28] sm:$0xff]  ;;  %v898_v5 = vld [vmem:[%s4087_s6 + $0x98] sm:$0xff] }
 0xfdd   : > { %3771 = vmatmul.mubr.msk.f32.vlgmr.msra.gmra.mxu1 %vm1167_vm7, %v2642_v14  ;;  %2966 = vmatpush1.msra.mxu0 %v872_v26  ;;  %v866_v14 = vld [vmem:[%s4076_s28 + $0x20] sm:$0xff] }
 0xfde   : > { %2967 = vmatprep.subr.mxu0 %v871_v6  ;;  %v882_v6 = vld [vmem:[%s4087_s6 + $0x18] sm:$0xff] }
 0xfdf   : > { %2968 = vmatpush1.msra.mxu0 %v870_v9  ;;  %v897_v9 = vld [vmem:[%s4087_s6 + $0x90] sm:$0xff] }
 0xfe0   : > { %2969 = vmatprep.subr.mxu0 %v869_v17 }
 0xfe1   : > { %2970 = vmatpush1.msra.mxu0 %v868_v62  ;;  %v881_v62 = vld [vmem:[%s4087_s6 + $0x10] sm:$0xff] }
 0xfe2   : > { %2971 = vmatprep.subr.mxu0 %v867_v12  ;;  %v896_v12 = vld [vmem:[%s4087_s6 + $0x88] sm:$0xff] }
 0xfe3   : > { %2972 = vmatpush1.msra.mxu0 %v866_v14  ;;  %v880_v14 = vld [vmem:[%s4087_s6 + $0x8] sm:$0xff] }
 0xffc   : > { %v2842_v50 = vpop.f32.mrf.mxu0 }
 0xffd   : > { %v2856_v13 = vadd.f32 %v3915_v19, %v2842_v50  ;;  %v865_v50 = vld [vmem:[%s4076_s28 + $0x18] sm:$0xff] }
 0xffe   : > { %v3791_v10 = vpop.f32.mrf.mxu0  ;;  %2973 = vmatprep.subr.mxu0 %v865_v50 }
 0xfff   : > { %v4552_v22 = vadd.f32 %v3509_v15, %v2856_v13  ;;  %v864_v10 = vld [vmem:[%s4076_s28 + $0x10] sm:$0xff] }
0x1000   : > { %2974 = vmatpush1.msra.mxu0 %v864_v10  ;;  %v895_v10 = vld [vmem:[%s4087_s6 + $0x80] sm:$0xff] }
0x1001   : > { %v2868_v27 = vsel %vm912_vm3, %v4552_v22, 0.0 }
0x109d   : > { %v3772_v11 = vpop.f32.mrf.mxu1 }
0x109e   : > { %2751 = vrot.lane.b32.xlu1 %v3772_v11, %s3928_s17  ;;  %v863_v11 = vld [vmem:[%s4076_s28 + $0x8] sm:$0xff] }
0x109f   : > { %v2722_v21 = vpop.f32.mrf.mxu1  ;;  %2975 = vmatprep.subr.mxu0 %v863_v11  ;;  %v879_v11 = vld [vmem:[%s4087_s6] sm:$0xff] }
0x10a0   : > { %2749 = vrot.lane.b32.xlu0 %v2722_v21, %s3928_s17  ;;  %v862_v21 = vld [vmem:[%s4076_s28] sm:$0xff] }
0x10a1   : > { %2976 = vmatpush1.msra.mxu0 %v862_v21 }
0x10a4   : > { %2743 = vrot.lane.b32.xlu0 %v4482_v35, %s3929_s19  ;;  %v1911_v35 = vsel %vm1081_vm4, %v4321_v25, %v1891_v29 }
0x10a5   : > { %v1914_v38 = vsel %vm1912_vm11, %v1911_v35, %v1899_v31 }
0x10a6   : > { %v1917_v40 = vsel %vm1915_vm12, %v1914_v38, %v1907_v32 }
0x10c3   : > { %2869 = vadd.xlane.f32.xlu0 %v2868_v27 }
0x1110   : > { %v2752_v44 = vpop.permute.xlu1 %2751 }
0x1112   : > { %v2750_v34 = vpop.permute.xlu0 %2749 }
0x1113   : > { %v2759_v37 = vsel %vm1915_vm12, %v2757_v33, %v2750_v34 }
0x1114   : > { %v2763_v39 = vrot.slane %v2759_v37, 7  ;;  %v4624_v37 = vld [vmem:[%s4797_s2] ss:$0 sm:$0xff] }
0x1116   : > { %v2744_v43 = vpop.permute.xlu0 %2743  ;;  %v2767_v20 = vsel %vm1197_vm5, %v1917_v40, %v2763_v39 }
0x1117   : > { %v2758_v45 = vsel %vm1912_vm11, %v2756_v41, %v2744_v43  ;;  %3793 = vmatmul.mubr.msk.f32.gmra.mxu0 %vm912_vm3, %v2767_v20  ;;  %v910_v43 = vld [vmem:[%s4087_s6 + $0xf8] sm:$0xff] }
0x1118   : > { %v2760_v25 = vsel %vm1915_vm12, %v2758_v45, %v2752_v44  ;;  %3795 = vmatprep.mubr.msk.f32.mxu0 %vm3934_vm10, %v3926_v42  ;;  %3605 = vmatprep.subr.mxu1 %v910_v43  ;;  %v894_v20 = vld [vmem:[%s4087_s6 + $0x78] sm:$0xff]  ;;  %v909_v44 = vld [vmem:[%s4087_s6 + $0xf0] sm:$0xff] }
0x1119   : > { %v2764_v52 = vrot.slane %v2760_v25, 7  ;;  %3606 = vmatpush3.msra.mxu1 %v894_v20  ;;  %v893_v45 = vld [vmem:[%s4087_s6 + $0x70] sm:$0xff]  ;;  %v908_v25 = vld [vmem:[%s4087_s6 + $0xe8] sm:$0xff] }
0x111a   : > { %3607 = vmatprep.subr.mxu1 %v909_v44 }
0x111b   : > { %v2765_v53 = vsel %vm1197_vm5, %v2763_v39, %v2764_v52  ;;  %v4631_v39 = vld [vmem:[%s694_s23] ss:$0 sm:$0xff]  ;;  %3608 = vmatpush3.msra.mxu1 %v893_v45  ;;  %v892_v52 = vld [vmem:[%s4087_s6 + $0x68] sm:$0xff] }
0x111c   : > { %3796 = vmatmul.mubr.msk.f32.gmra.mxu0 %vm912_vm3, %v2765_v53  ;;  %3609 = vmatprep.subr.mxu1 %v908_v25  ;;  %v907_v53 = vld [vmem:[%s4087_s6 + $0xe0] sm:$0xff] }
0x111d   : > { %3009 = vmatprep.mubr.f32.mxu0 %v3926_v42  ;;  %3610 = vmatpush3.msra.mxu1 %v892_v52 }
0x111e   : > { %3611 = vmatprep.subr.mxu1 %v907_v53 }
0x114c   : > { %v2870_v23 = vpop.xlane.xlu0 %2869 }
0x114d   : > { %v2877_v24 = vmul.f32 0.015625, %v2870_v23  ;;  %v891_v23 = vld [vmem:[%s4087_s6 + $0x60] sm:$0xff] }
0x114e   : > { %3612 = vmatpush3.msra.mxu1 %v891_v23 }
0x114f   : > { %v2880_v59 = vsub.f32 %v4552_v22, %v2877_v24  ;;  %v889_v24 = vld [vmem:[%s4087_s6 + $0x50] sm:$0xff] }
0x1151   : > { %v2883_v48 = vmul.f32 %v2880_v59, %v2880_v59 }
0x1153   : > { %v2886_v3 = vsel %vm912_vm3, %v2883_v48, 0.0  ;;  %v900_v48 = vld [vmem:[%s4087_s6 + $0xa8] sm:$0xff] }
0x11d7   : > { %v2847_v54 = vpop.f32.mrf.mxu0 }
0x11d8   : > { %v2857_v56 = vadd.f32 %v3916_v55, %v2847_v54  ;;  %v906_v54 = vld [vmem:[%s4087_s6 + $0xd8] sm:$0xff] }
0x11d9   : > { %v3794_v47 = vpop.f32.mrf.mxu0  ;;  %3613 = vmatprep.subr.mxu1 %v906_v54  ;;  %v890_v55 = vld [vmem:[%s4087_s6 + $0x58] sm:$0xff] }
0x11da   : > { %v4578_v49 = vadd.f32 %v3509_v15, %v2857_v56  ;;  %3614 = vmatpush3.msra.mxu1 %v890_v55  ;;  %v905_v56 = vld [vmem:[%s4087_s6 + $0xd0] sm:$0xff]  ;;  %v904_v47 = vld [vmem:[%s4087_s6 + $0xc8] sm:$0xff] }
0x11db   : > { %3615 = vmatprep.subr.mxu1 %v905_v56 }
0x11dc   : > { %v2852_v57 = vpop.f32.mrf.mxu0  ;;  %v2871_v58 = vsel %vm912_vm3, %v4578_v49, 0.0  ;;  %3616 = vmatpush3.msra.mxu1 %v889_v24 }
0x11dd   : > { %v2858_v1 = vadd.f32 %v3917_v0, %v2852_v57  ;;  %2872 = vadd.xlane.f32.xlu1 %v2871_v58  ;;  %3617 = vmatprep.subr.mxu1 %v904_v47  ;;  %v888_v57 = vld [vmem:[%s4087_s6 + $0x48] sm:$0xff]  ;;  %v903_v58 = vld [vmem:[%s4087_s6 + $0xc0] sm:$0xff]  ;;  %v902_v0 = vld [vmem:[%s4087_s6 + $0xb8] sm:$0xff] }
0x11de   : > { %v3797_v2 = vpop.f32.mrf.mxu0  ;;  %3618 = vmatpush3.msra.mxu1 %v888_v57 }
0x11df   : > { %v4586_v51 = vadd.f32 %v3509_v15, %v2858_v1  ;;  %3619 = vmatprep.subr.mxu1 %v903_v58  ;;  %v886_v1 = vld [vmem:[%s4087_s6 + $0x38] sm:$0xff]  ;;  %v901_v2 = vld [vmem:[%s4087_s6 + $0xb0] sm:$0xff] }
0x11e1   : > { %v2874_v46 = vsel %vm919_vm8, %v4586_v51, 0.0 }
0x11e2   : > { %2875 = vadd.xlane.f32.xlu0 %v2874_v46  ;;  %v885_v46 = vld [vmem:[%s4087_s6 + $0x30] sm:$0xff] }
0x11e6   : > { %2887 = vadd.xlane.f32.xlu0 %v2886_v3  ;;  %v884_v3 = vld [vmem:[%s4087_s6 + $0x28] sm:$0xff] }
0x1266   : > { %v2873_v19 = vpop.xlane.xlu1 %2872 }
0x1267   : > { %v2878_v13 = vmul.f32 0.015625, %v2873_v19 }
0x1269   : > { %v4608_v15 = vsub.f32 %v4578_v49, %v2878_v13 }
0x126b   : > { %v2876_v27 = vpop.xlane.xlu0 %2875  ;;  %v2884_v28 = vmul.f32 %v4608_v15, %v4608_v15 }
0x126c   : > { %v2879_v29 = vmul.f32 0.015625, %v2876_v27 }
0x126d   : > { %v2889_v30 = vsel %vm912_vm3, %v2884_v28, 0.0 }
0x126e   : > { %v4614_v31 = vsub.f32 %v4586_v51, %v2879_v29  ;;  %2890 = vadd.xlane.f32.xlu0 %v2889_v30 }
0x126f   : > { %v2888_v32 = vpop.xlane.xlu0 %2887 }
0x1270   : > { %v2895_v18 = vmul.f32 0.015625, %v2888_v32  ;;  %v2885_v33 = vmul.f32 %v4614_v31, %v4614_v31 }
0x1272   : > { %v2898_v34 = vadd.f32 1e-06, %v2895_v18  ;;  %v2892_v35 = vsel %vm919_vm8, %v2885_v33, 0.0  ;;  %v878_v33 = vld [vmem:[%s4081_s29] sm:$0x3] }
0x1273   : > { %2893 = vadd.xlane.f32.xlu1 %v2892_v35 }
0x1274   : > { %3885 = vrsqrt.f32 %v2898_v34  ;;  %v4685_v34 = vrot.slane %v878_v33, %v979_v16 }
0x1281   : > { %v3886_v36 = vpop.eup %3885 }
0x1282   : > { %v2904_v38 = vmul.f32 %v3886_v36, %v2880_v59  ;;  %v887_v59 = vld [vmem:[%s4087_s6 + $0x40] sm:$0xff]  ;;  %s4798_s6 = scalar_lea.vmem %s4764_s16, %s4033_s26 }
0x1283   : > { %3620 = vmatpush3.msra.mxu1 %v887_v59 }
0x1284   : > { %v2913_v40 = vmul.f32 %v4624_v37, %v2904_v38  ;;  %3621 = vmatprep.subr.mxu1 %v902_v0 }
0x1285   : > { %3622 = vmatpush3.msra.mxu1 %v886_v1 }
0x1286   : > { %v2922_v41 = vadd.f32 %v4631_v39, %v2913_v40  ;;  %3623 = vmatprep.subr.mxu1 %v901_v2 }
0x1287   : > { %3624 = vmatpush3.msra.mxu1 %v885_v46 }
0x1288   : > { %3512 = vmatmul.mubr.msk.f32.vlgmr.msra.gmra.mxu0 %vm912_vm3, %v2922_v41  ;;  %3625 = vmatprep.subr.mxu1 %v900_v48 }
0x1289   : > { %3015 = vmatprep.mubr.f32.mxu0 %v3926_v42  ;;  %3626 = vmatpush3.msra.mxu1 %v884_v3 }
0x128a   : > { %3627 = vmatprep.subr.mxu1 %v899_v4 }
0x128b   : > { %3628 = vmatpush3.msra.mxu1 %v883_v63 }
0x128c   : > { %3629 = vmatprep.subr.mxu1 %v898_v5 }
0x128d   : > { %3630 = vmatpush3.msra.mxu1 %v882_v6 }
0x128e   : > { %3631 = vmatprep.subr.mxu1 %v897_v9 }
0x128f   : > { %3632 = vmatpush3.msra.mxu1 %v881_v62 }
0x1290   : > { %3633 = vmatprep.subr.mxu1 %v896_v12 }
0x1291   : > { %3634 = vmatpush3.msra.mxu1 %v880_v14 }
0x1292   : > { %3635 = vmatprep.subr.mxu1 %v895_v10 }
0x1293   : > { %3636 = vmatpush3.msra.mxu1 %v879_v11 }
0x12f7   : > { %v2891_v60 = vpop.xlane.xlu0 %2890 }
0x12f8   : > { %v2896_v61 = vmul.f32 0.015625, %v2891_v60 }
0x12fa   : > { %v2899_v26 = vadd.f32 1e-06, %v2896_v61 }
0x12fc   : > { %3887 = vrsqrt.f32 %v2899_v26  ;;  %v2894_v17 = vpop.xlane.xlu1 %2893 }
0x12fd   : > { %v2897_v50 = vmul.f32 0.015625, %v2894_v17 }
0x12ff   : > { %v2900_v21 = vadd.f32 1e-06, %v2897_v50 }
0x1301   : > { %3889 = vrsqrt.f32 %v2900_v21 }
0x1309   : > { %v3888_v19 = vpop.eup %3887 }
0x130a   : > { %v2905_v13 = vmul.f32 %v3888_v19, %v4608_v15  ;;  %v4681_v15 = vrot.slane %v878_v33, %v975_v8 }
0x130c   : > { %v2914_v27 = vmul.f32 %v4624_v37, %v2905_v13 }
0x130e   : > { %v3890_v28 = vpop.eup %3889  ;;  %v2923_v29 = vadd.f32 %v4631_v39, %v2914_v27 }
0x130f   : > { %v2906_v30 = vmul.f32 %v3890_v28, %v4614_v31 }
0x1310   : > { %3513 = vmatmul.mubr.msk.f32.gmra.mxu0 %vm912_vm3, %v2923_v29 }
0x1311   : > { %3021 = vmatprep.mubr.f32.mxu0 %v3926_v42  ;;  %v2915_v32 = vmul.f32 %v4624_v37, %v2906_v30 }
0x1313   : > { %v2924_v18 = vadd.f32 %v4631_v39, %v2915_v32 }
0x1315   : > { %3514 = vmatmul.mubr.msk.f32.gmra.mxu0 %vm912_vm3, %v2924_v18 }
0x1348   : > { %v3011_v31 = vpop.f32.mrf.mxu0 }
0x1349   : > { %v3012_v35 = vadd.f32 %v3011_v31, %v4681_v15 }
0x134a   : > { %v3013_v36 = vpop.f32.mrf.mxu0 }
0x134b   : > { %v3034_v42 = vmul.f32 0.70710677, %v3012_v35  ;;  %v3014_v37 = vadd.f32 %v3013_v36, %v4685_v34  ;;  %v3028_v13 = vmul.f32 0.5, %v3012_v35 }
0x134d   : > { %v3040_v38 = vand.u32 2147483647, %v3034_v42  ;;  %v3035_v39 = vmul.f32 0.70710677, %v3014_v37  ;;  %vm3160_vm13 = vcmp.ge.f32.partialorder %v3034_v42, 0.0  ;;  %v3029_v21 = vmul.f32 0.5, %v3014_v37 }
0x134f   : > { %v3046_v40 = vmul.f32 0.3275911, %v3040_v38  ;;  %v3041_v41 = vand.u32 2147483647, %v3035_v39  ;;  %v3124_v44 = vsub.f32 0.0, %v3040_v38  ;;  %vm3161_vm14 = vcmp.ge.f32.partialorder %v3035_v39, 0.0 }
0x1351   : > { %v3052_v43 = vadd.f32 1.0, %v3046_v40  ;;  %v3047_v20 = vmul.f32 0.3275911, %v3041_v41  ;;  %v3125_v7 = vsub.f32 0.0, %v3041_v41  ;;  %v3130_v16 = vmul.f32 %v3124_v44, %v3040_v38 }
0x1353   : > { %3891 = vrcp.f32 %v3052_v43  ;;  %v3053_v8 = vadd.f32 1.0, %v3047_v20  ;;  %v3131_v25 = vmul.f32 %v3125_v7, %v3041_v41  ;;  %v3136_v53 = vmul.f32 1.442695, %v3130_v16 }
0x1355   : > { %3893 = vrcp.f32 %v3053_v8  ;;  %v3138_v55 = vmul.f32 1.442695, %v3131_v25 }
0x1356   : > { %3895 = vpow2.f32 %v3136_v53 }
0x1357   : > { %3897 = vpow2.f32 %v3138_v55 }
0x1360   : > { %v3892_v45 = vpop.eup %3891 }
0x1361   : > { %v3070_v52 = vmul.f32 1.0614054, %v3892_v45 }
0x1362   : > { %v3894_v23 = vpop.eup %3893 }
0x1363   : > { %v3076_v54 = vadd.f32 -1.4531521, %v3070_v52  ;;  %v3071_v56 = vmul.f32 1.0614054, %v3894_v23  ;;  %v3896_v61 = vpop.eup %3895 }
0x1364   : > { %v3898_v6 = vpop.eup %3897 }
0x1365   : > { %v3082_v24 = vmul.f32 %v3892_v45, %v3076_v54  ;;  %v3077_v47 = vadd.f32 -1.4531521, %v3071_v56 }
0x1367   : > { %v3088_v57 = vadd.f32 1.4214138, %v3082_v24  ;;  %v3083_v58 = vmul.f32 %v3894_v23, %v3077_v47 }
0x1369   : > { %v3094_v59 = vmul.f32 %v3892_v45, %v3088_v57  ;;  %v3089_v0 = vadd.f32 1.4214138, %v3083_v58 }
0x136b   : > { %v3100_v1 = vadd.f32 -0.28449672, %v3094_v59  ;;  %v3095_v2 = vmul.f32 %v3894_v23, %v3089_v0 }
0x136d   : > { %v3106_v46 = vmul.f32 %v3892_v45, %v3100_v1  ;;  %v3101_v48 = vadd.f32 -0.28449672, %v3095_v2 }
0x136f   : > { %v3112_v3 = vadd.f32 0.2548296, %v3106_v46  ;;  %v3107_v60 = vmul.f32 %v3894_v23, %v3101_v48 }
0x1371   : > { %v3118_v4 = vmul.f32 %v3892_v45, %v3112_v3  ;;  %v3113_v63 = vadd.f32 0.2548296, %v3107_v60 }
0x1373   : > { %v3148_v5 = vmul.f32 %v3896_v61, %v3118_v4  ;;  %v3119_v26 = vmul.f32 %v3894_v23, %v3113_v63 }
0x1375   : > { %v3154_v9 = vsub.f32 1.0, %v3148_v5  ;;  %v3149_v17 = vmul.f32 %v3898_v6, %v3119_v26 }
0x1377   : > { %v3166_v62 = vsub.f32 0.0, %v3154_v9  ;;  %v3155_v12 = vsub.f32 1.0, %v3149_v17 }
0x1379   : > { %v3172_v14 = vsel %vm3160_vm13, %v3154_v9, %v3166_v62  ;;  %v3167_v50 = vsub.f32 0.0, %v3155_v12 }
0x137a   : > { %v3178_v10 = vadd.f32 1.0, %v3172_v14 }
0x137b   : > { %v3173_v11 = vsel %vm3161_vm14, %v3155_v12, %v3167_v50 }
0x137c   : > { %v3179_v19 = vadd.f32 1.0, %v3173_v11  ;;  %v3184_v28 = vmul.f32 %v3178_v10, %v3028_v13 }
0x137e   : > { %v3185_v27 = vmul.f32 %v3179_v19, %v3029_v21 }
0x1380   : > { %3254 = vmatprep.mubr.f32.mxu1 %v3185_v27 }
0x1381   : > { %3255 = vmatmul.mubr.f32.vlgmr.msra.gmra.mxu1 %v3184_v28 }
0x13d0   : > { %v3017_v29 = vpop.f32.mrf.mxu0 }
0x13d1   : > { %v4690_v30 = vadd.f32 %v3017_v29, %v4681_v15 }
0x13d2   : > { %v3019_v32 = vpop.f32.mrf.mxu0 }
0x13d3   : > { %v4693_v18 = vmul.f32 0.70710677, %v4690_v30  ;;  %v4696_v33 = vadd.f32 %v3019_v32, %v4685_v34 }
0x13d5   : > { %v3042_v31 = vand.u32 2147483647, %v4693_v18  ;;  %v4700_v36 = vmul.f32 0.70710677, %v4696_v33  ;;  %v3023_v35 = vpop.f32.mrf.mxu0  ;;  %vm3162_vm15 = vcmp.ge.f32.partialorder %v4693_v18, 0.0  ;;  %v3030_v18 = vmul.f32 0.5, %v4690_v30 }
0x13d6   : > { %v4703_v42 = vadd.f32 %v3023_v35, %v4681_v15 }
0x13d7   : > { %v3048_v37 = vmul.f32 0.3275911, %v3042_v31  ;;  %v3043_v38 = vand.u32 2147483647, %v4700_v36  ;;  %v3025_v39 = vpop.f32.mrf.mxu0  ;;  %v3126_v53 = vsub.f32 0.0, %v3042_v31  ;;  %vm3163_vm0 = vcmp.ge.f32.partialorder %v4700_v36, 0.0 }
0x13d8   : > { %v4707_v40 = vmul.f32 0.70710677, %v4703_v42  ;;  %v4710_v41 = vadd.f32 %v3025_v39, %v4685_v34 }
0x13d9   : > { %v3054_v43 = vadd.f32 1.0, %v3048_v37  ;;  %v3049_v20 = vmul.f32 0.3275911, %v3043_v38  ;;  %v3127_v34 = vsub.f32 0.0, %v3043_v38  ;;  %v3132_v23 = vmul.f32 %v3126_v53, %v3042_v31 }
0x13da   : > { %v3044_v8 = vand.u32 2147483647, %v4707_v40  ;;  %v4714_v44 = vmul.f32 0.70710677, %v4710_v41  ;;  %vm3164_vm1 = vcmp.ge.f32.partialorder %v4707_v40, 0.0  ;;  %v3032_v40 = vmul.f32 0.5, %v4703_v42 }
0x13db   : > { %3899 = vrcp.f32 %v3054_v43  ;;  %v3055_v15 = vadd.f32 1.0, %v3049_v20  ;;  %v3133_v56 = vmul.f32 %v3127_v34, %v3043_v38  ;;  %v3140_v24 = vmul.f32 1.442695, %v3132_v23 }
0x13dc   : > { %v3050_v7 = vmul.f32 0.3275911, %v3044_v8  ;;  %v3045_v16 = vand.u32 2147483647, %v4714_v44  ;;  %v3128_v54 = vsub.f32 0.0, %v3044_v8  ;;  %vm3165_vm2 = vcmp.ge.f32.partialorder %v4714_v44, 0.0 }
0x13dd   : > { %3901 = vrcp.f32 %v3055_v15  ;;  %v3142_v1 = vmul.f32 1.442695, %v3133_v56  ;;  %v3515_v44 = vld [vmem:[%s4798_s6] ss:$0 sm:$0xff] }
0x13de   : > { %v3056_v45 = vadd.f32 1.0, %v3050_v7  ;;  %v3051_v25 = vmul.f32 0.3275911, %v3045_v16  ;;  %v3129_v47 = vsub.f32 0.0, %v3045_v16  ;;  %v3134_v58 = vmul.f32 %v3128_v54, %v3044_v8 }
0x13e0   : > { %3903 = vrcp.f32 %v3056_v45  ;;  %v3057_v52 = vadd.f32 1.0, %v3051_v25  ;;  %v3135_v48 = vmul.f32 %v3129_v47, %v3045_v16  ;;  %v3144_v60 = vmul.f32 1.442695, %v3134_v58 }
0x13e2   : > { %3905 = vrcp.f32 %v3057_v52  ;;  %v3146_v9 = vmul.f32 1.442695, %v3135_v48 }
0x13e3   : > { %3907 = vpow2.f32 %v3140_v24 }
0x13e4   : > { %3909 = vpow2.f32 %v3142_v1 }
0x13e5   : > { %3911 = vpow2.f32 %v3144_v60 }
0x13e6   : > { %3913 = vpow2.f32 %v3146_v9  ;;  %v3033_v9 = vmul.f32 0.5, %v4710_v41 }
0x13e8   : > { %v3900_v55 = vpop.eup %3899 }
0x13e9   : > { %v3072_v57 = vmul.f32 1.0614054, %v3900_v55 }
0x13ea   : > { %v3902_v59 = vpop.eup %3901 }
0x13eb   : > { %v3078_v0 = vadd.f32 -1.4531521, %v3072_v57  ;;  %v3073_v2 = vmul.f32 1.0614054, %v3902_v59 }
0x13ed   : > { %v3904_v46 = vpop.eup %3903  ;;  %v3084_v3 = vmul.f32 %v3900_v55, %v3078_v0  ;;  %v3079_v4 = vadd.f32 -1.4531521, %v3073_v2 }
0x13ee   : > { %v3074_v61 = vmul.f32 1.0614054, %v3904_v46 }
0x13ef   : > { %v3090_v63 = vadd.f32 1.4214138, %v3084_v3  ;;  %v3906_v5 = vpop.eup %3905  ;;  %v3085_v26 = vmul.f32 %v3902_v59, %v3079_v4 }
0x13f0   : > { %v3080_v6 = vadd.f32 -1.4531521, %v3074_v61  ;;  %v3075_v62 = vmul.f32 1.0614054, %v3906_v5  ;;  %v3908_v39 = vpop.eup %3907 }
0x13f1   : > { %v3096_v17 = vmul.f32 %v3900_v55, %v3090_v63  ;;  %v3091_v12 = vadd.f32 1.4214138, %v3085_v26  ;;  %v3910_v45 = vpop.eup %3909 }
0x13f2   : > { %v3086_v14 = vmul.f32 %v3904_v46, %v3080_v6  ;;  %v3081_v10 = vadd.f32 -1.4531521, %v3075_v62  ;;  %v3912_v23 = vpop.eup %3911 }
0x13f3   : > { %v3102_v50 = vadd.f32 -0.28449672, %v3096_v17  ;;  %v3097_v11 = vmul.f32 %v3902_v59, %v3091_v12  ;;  %v3914_v58 = vpop.eup %3913 }
0x13f4   : > { %v3092_v21 = vadd.f32 1.4214138, %v3086_v14  ;;  %v3087_v13 = vmul.f32 %v3906_v5, %v3081_v10 }
0x13f5   : > { %v3108_v19 = vmul.f32 %v3900_v55, %v3102_v50  ;;  %v3103_v27 = vadd.f32 -0.28449672, %v3097_v11 }
0x13f6   : > { %v3098_v28 = vmul.f32 %v3904_v46, %v3092_v21  ;;  %v3093_v32 = vadd.f32 1.4214138, %v3087_v13 }
0x13f7   : > { %v3114_v29 = vadd.f32 0.2548296, %v3108_v19  ;;  %v3109_v31 = vmul.f32 %v3902_v59, %v3103_v27 }
0x13f8   : > { %v3104_v35 = vadd.f32 -0.28449672, %v3098_v28  ;;  %v3099_v38 = vmul.f32 %v3906_v5, %v3093_v32 }
0x13f9   : > { %v3120_v37 = vmul.f32 %v3900_v55, %v3114_v29  ;;  %v3115_v43 = vadd.f32 0.2548296, %v3109_v31 }
0x13fa   : > { %v3110_v20 = vmul.f32 %v3904_v46, %v3104_v35  ;;  %v3105_v15 = vadd.f32 -0.28449672, %v3099_v38 }
0x13fb   : > { %v3150_v8 = vmul.f32 %v3908_v39, %v3120_v37  ;;  %v3121_v7 = vmul.f32 %v3902_v59, %v3115_v43 }
0x13fc   : > { %v3116_v16 = vadd.f32 0.2548296, %v3110_v20  ;;  %v3111_v52 = vmul.f32 %v3906_v5, %v3105_v15 }
0x13fd   : > { %v3156_v25 = vsub.f32 1.0, %v3150_v8  ;;  %v3151_v53 = vmul.f32 %v3910_v45, %v3121_v7 }
0x13fe   : > { %v3122_v34 = vmul.f32 %v3904_v46, %v3116_v16  ;;  %v3117_v56 = vadd.f32 0.2548296, %v3111_v52  ;;  %v3031_v46 = vmul.f32 0.5, %v4696_v33 }
0x13ff   : > { %v3168_v54 = vsub.f32 0.0, %v3156_v25  ;;  %v3157_v24 = vsub.f32 1.0, %v3151_v53 }
0x1400   : > { %v3152_v55 = vmul.f32 %v3912_v23, %v3122_v34  ;;  %v3123_v57 = vmul.f32 %v3906_v5, %v3117_v56 }
0x1401   : > { %v3174_v47 = vsel %vm3162_vm15, %v3156_v25, %v3168_v54  ;;  %v3169_v0 = vsub.f32 0.0, %v3157_v24 }
0x1402   : > { %v3158_v1 = vsub.f32 1.0, %v3152_v55  ;;  %v3153_v59 = vmul.f32 %v3914_v58, %v3123_v57  ;;  %v3180_v48 = vadd.f32 1.0, %v3174_v47 }
0x1403   : > { %v3175_v2 = vsel %vm3163_vm0, %v3157_v24, %v3169_v0 }
0x1404   : > { %v3170_v3 = vsub.f32 0.0, %v3158_v1  ;;  %v3181_v60 = vadd.f32 1.0, %v3175_v2  ;;  %v3159_v4 = vsub.f32 1.0, %v3153_v59  ;;  %v3186_v26 = vmul.f32 %v3180_v48, %v3030_v18 }
0x1406   : > { %v3176_v61 = vsel %vm3164_vm1, %v3158_v1, %v3170_v3  ;;  %v3187_v63 = vmul.f32 %v3181_v60, %v3031_v46  ;;  %v3171_v5 = vsub.f32 0.0, %v3159_v4 }
0x1407   : > { %v3182_v6 = vadd.f32 1.0, %v3176_v61 }
0x1408   : > { %3259 = vmatprep.mubr.f32.mxu1 %v3187_v63  ;;  %v3177_v36 = vsel %vm3165_vm2, %v3159_v4, %v3171_v5 }
0x1409   : > { %3260 = vmatmul.mubr.f32.gmra.mxu1 %v3186_v26  ;;  %v3183_v33 = vadd.f32 1.0, %v3177_v36  ;;  %v3188_v62 = vmul.f32 %v3182_v6, %v3032_v40 }
0x140b   : > { %v3189_v17 = vmul.f32 %v3183_v33, %v3033_v9 }
0x140d   : > { %3264 = vmatprep.mubr.f32.mxu1 %v3189_v17 }
0x140e   : > { %3265 = vmatmul.mubr.f32.gmra.mxu1 %v3188_v62 }
0x1441   : > { %v3637_v30 = vpop.f32.mrf.mxu1 }
0x1443   : > { %v3638_v12 = vpop.f32.mrf.mxu1 }
0x1444   : > { %v3639_v14 = vadd.f32 %v3638_v12, %v3637_v30 }
0x1446   : > { %v3270_v50 = vadd.f32 %v3639_v14, %v4552_v22 }
0x1448   : > { %v3279_v10 = vadd.f32 %v3515_v44, %v3270_v50 }
0x144a   : > { %3282 = vst.msk [vmem:[%s4790_s25] sm:$0xff] %vm912_vm3, %v3279_v10 }
0x14c9   : > { %v3640_v42 = vpop.f32.mrf.mxu1 }
0x14cb   : > { %v3641_v41 = vpop.f32.mrf.mxu1 }
0x14cc   : > { %v3642_v11 = vadd.f32 %v3641_v41, %v3640_v42 }
0x14ce   : > { %v3271_v21 = vadd.f32 %v3642_v11, %v4578_v49  ;;  %v3643_v19 = vpop.f32.mrf.mxu1 }
0x14d0   : > { %v3280_v13 = vadd.f32 %v3515_v44, %v3271_v21  ;;  %v3644_v27 = vpop.f32.mrf.mxu1 }
0x14d1   : > { %v3645_v28 = vadd.f32 %v3644_v27, %v3643_v19 }
0x14d2   : > { %3283 = vst.msk [vmem:[%s4790_s25 + $0x8] sm:$0xff] %vm912_vm3, %v3280_v13 }
0x14d3   : > { %v3272_v22 = vadd.f32 %v3645_v28, %v4586_v51 }
0x14d5   : > { %v3281_v29 = vadd.f32 %v3515_v44, %v3272_v22 }
0x14d7   : > { %3284 = vst.msk [vmem:[%s4790_s25 + $0x10] sm:$0x3] %vm919_vm8, %v3281_v29 }
0x14d8 PF: > { %s4799_s18 = sld [smem:[#allocation2_spill]] }
0x14de   : > { %s27_s24 = sadd.s32 1, %s4799_s18  }
0x14df   : > { %p24_p5 = scmp.ge.s32.totalorder %s27_s24, 4  }
0x14e1   :  { %26 = sbr.rel (!%p24_p5) target bundleno = 9 (0x9), region = 151 }

// kernel: forward.5
= control target key start
LH: loop header
LB: loop body
LE: loop exit
PB: predicated region body
PF: predicated region fallthrough
CT: control target
= control target key end

     0   :  { %vm133_vm0 = vcmask 523264   ;;  %v8777_v10 = vmov 0.0   ;;  %v193_v33 = vlaneseq  ;;  %vm7229_vm1 = vmmov 0   ;;  %s7231_s27 = smov 48   ;;  %s7232_s28 = smov 112   ;;  %s8759_s0 = inlined_call_operand.vmem [shape: f32[24,64], index: 0, kind: input, shape index: {}]   ;;  %s8760_s3 = inlined_call_operand.vmem [shape: f32[64,192], index: 3, kind: input, shape index: {}]   ;;  %s8761_s1 = inlined_call_operand.vmem [shape: f32[1,64], index: 1, kind: input, shape index: {}]   ;;  %s8762_s2 = inlined_call_operand.vmem [shape: f32[1,64], index: 2, kind: input, shape index: {}]   ;;  %s8763_s4 = inlined_call_operand.vmem [shape: f32[1,192], index: 4, kind: input, shape index: {}]   ;;  %s8764_s5 = inlined_call_operand.vmem [shape: f32[64,64], index: 5, kind: input, shape index: {}]   ;;  %s8765_s6 = inlined_call_operand.vmem [shape: f32[1,64], index: 6, kind: input, shape index: {}]   ;;  %s8766_s9 = inlined_call_operand.vmem [shape: f32[64,256], index: 9, kind: input, shape index: {}]   ;;  %s8767_s7 = inlined_call_operand.vmem [shape: f32[1,64], index: 7, kind: input, shape index: {}]   ;;  %s8768_s8 = inlined_call_operand.vmem [shape: f32[1,64], index: 8, kind: input, shape index: {}]   ;;  %s8769_s11 = inlined_call_operand.vmem [shape: f32[256,64], index: 11, kind: input, shape index: {}]   ;;  %s8770_s10 = inlined_call_operand.vmem [shape: f32[1,256], index: 10, kind: input, shape index: {}]   ;;  %s8771_s12 = inlined_call_operand.vmem [shape: f32[1,64], index: 12, kind: input, shape index: {}]   ;;  %s8772_s13 = inlined_call_operand.vmem [shape: f32[1,64], index: 13, kind: input, shape index: {}]   ;;  %s8773_s14 = inlined_call_operand.vmem [shape: f32[1,64], index: 14, kind: input, shape index: {}]   ;;  %s8774_s15 = inlined_call_operand.vmem [shape: f32[24,64], index: 15, kind: output, shape index: {}]  }
   0x1   :  { %v50_v0 = vld [vmem:[%s8759_s0] sm:$0xff]  ;;  %v70_v7 = vld [vmem:[%s8760_s3 + $0x78] sm:$0xff]  ;;  %v69_v8 = vld [vmem:[%s8760_s3 + $0x70] sm:$0xff]  ;;  %276 = vmatprep.mubr.f32.mxu0 %v8777_v10  ;;  %6701 = vmatprep.subr.mxu1 %v8777_v10  ;;  %vm298_vm2 = vcmask 130048   ;;  %vm390_vm3 = vcmask 1042432   ;;  %vm374_vm4 = vcmask 18432  }
   0x2   :  { %v134_v1 = vsel %vm133_vm0, %v50_v0, 0.0  ;;  %v68_v9 = vld [vmem:[%s8760_s3 + $0x68] sm:$0xff]  ;;  %228 = vmatprep.subr.mxu0 %v70_v7  ;;  %v67_v11 = vld [vmem:[%s8760_s3 + $0x60] sm:$0xff]  ;;  %v66_v12 = vld [vmem:[%s8760_s3 + $0x58] sm:$0xff]  ;;  %v7387_v34 = vshrl.u32 %v193_v33, 7  ;;  %6703 = vmatprep.mubr.msk.f32.mxu1 %vm7229_vm1, %v8777_v10  ;;  %s7233_s16 = smov 32  }
   0x3   :  { %135 = vadd.xlane.f32.xlu0 %v134_v1  ;;  %229 = vmatpush1.msra.mxu0 %v69_v8  ;;  %v65_v13 = vld [vmem:[%s8760_s3 + $0x50] sm:$0xff]  ;;  %v64_v14 = vld [vmem:[%s8760_s3 + $0x48] sm:$0xff]  ;;  %v63_v15 = vld [vmem:[%s8760_s3 + $0x40] sm:$0xff]  ;;  %s7234_s17 = smov 16   ;;  %vm386_vm5 = vcmask 23552   ;;  %s7235_s18 = smov 96  }
   0x4   :  { %230 = vmatprep.subr.mxu0 %v68_v9  ;;  %v62_v16 = vld [vmem:[%s8760_s3 + $0x38] sm:$0xff]  ;;  %v61_v17 = vld [vmem:[%s8760_s3 + $0x30] sm:$0xff]  ;;  %v60_v18 = vld [vmem:[%s8760_s3 + $0x28] sm:$0xff]  ;;  %8784 = vst [vmem:[#allocation2_spill] sm:$0xff] %v7387_v34  ;;  %v8776_v35 = vsub.s32 0, %v7387_v34  ;;  %v8775_v40 = vsub.s32 1, %v7387_v34 }
   0x5   :  { %231 = vmatpush1.msra.mxu0 %v67_v11  ;;  %v59_v19 = vld [vmem:[%s8760_s3 + $0x20] sm:$0xff]  ;;  %v58_v20 = vld [vmem:[%s8760_s3 + $0x18] sm:$0xff]  ;;  %v57_v21 = vld [vmem:[%s8760_s3 + $0x10] sm:$0xff]  ;;  %s7236_s19 = smov 80   ;;  %vm1664_vm6 = vcmask 1041408   ;;  %vm3714_vm7 = vcmask 1040384  }
   0x6   :  { %232 = vmatprep.subr.mxu0 %v66_v12  ;;  %v56_v22 = vld [vmem:[%s8760_s3 + $0x8] sm:$0xff]  ;;  %v55_v23 = vld [vmem:[%s8760_s3] sm:$0xff]  ;;  %s7230_s3 = smov 64   ;;  %v52_v49 = vld [vmem:[%s8759_s0 + $0x10] sm:$0xff]  ;;  %vm978_vm8 = vcmask 261120   ;;  %vm980_vm9 = vcmask 392192  }
   0x7   :  { %233 = vmatpush1.msra.mxu0 %v65_v13  ;;  %v7376_v28 = vld [vmem:[%s8761_s1] ss:$0 sm:$0xff]  ;;  %v140_v50 = vsel %vm133_vm0, %v52_v49, 0.0  ;;  %v51_v56 = vld [vmem:[%s8759_s0 + $0x8] sm:$0xff]  ;;  %vm5785_vm10 = vcmask 1045504   ;;  %vm5788_vm11 = vcmask 1043456  }
   0x8   :  { %234 = vmatprep.subr.mxu0 %v64_v14  ;;  %v7381_v30 = vld [vmem:[%s8762_s2] ss:$0 sm:$0xff]  ;;  %v137_v57 = vsel %vm133_vm0, %v51_v56, 0.0  ;;  %vm5790_vm12 = vcmask 1046528   ;;  %vm5793_vm13 = vcmask 1044480  }
   0x9   :  { %235 = vmatpush1.msra.mxu0 %v63_v15  ;;  %v71_v36 = vld [vmem:[%s8763_s4] sm:$0x3] }
   0xa   :  { %236 = vmatprep.subr.mxu0 %v62_v16  ;;  %v7397_v37 = vrot.slane %v71_v36, %v8776_v35  ;;  %v7407_v41 = vrot.slane %v71_v36, %v8775_v40 }
   0xb   :  { %237 = vmatpush1.msra.mxu0 %v61_v17 }
   0xc   :  { %238 = vmatprep.subr.mxu0 %v60_v18 }
   0xd   :  { %239 = vmatpush1.msra.mxu0 %v59_v19 }
   0xe   :  { %240 = vmatprep.subr.mxu0 %v58_v20 }
   0xf   :  { %241 = vmatpush1.msra.mxu0 %v57_v21 }
  0x10   :  { %242 = vmatprep.subr.mxu0 %v56_v22 }
  0x11   :  { %243 = vmatpush1.msra.mxu0 %v55_v23 }
  0x12   :  { %6731 = vmatprep.subr.mxu0 %v8777_v10 }
  0x8c   :  { %v136_v2 = vpop.xlane.xlu0 %135 }
  0x8d   :  { %v144_v3 = vmul.f32 0.015625, %v136_v2 }
  0x8f   :  { %v147_v4 = vsub.f32 %v50_v0, %v144_v3 }
  0x91   :  { %v150_v5 = vmul.f32 %v147_v4, %v147_v4 }
  0x93   :  { %v153_v6 = vsel %vm133_vm0, %v150_v5, 0.0 }
  0x94   :  { %154 = vadd.xlane.f32.xlu0 %v153_v6 }
 0x11d   :  { %v155_v24 = vpop.xlane.xlu0 %154 }
 0x11e   :  { %v162_v25 = vmul.f32 0.015625, %v155_v24 }
 0x120   :  { %v165_v26 = vadd.f32 1e-06, %v162_v25 }
 0x122   :  { %7055 = vrsqrt.f32 %v165_v26 }
 0x12f   :  { %v7056_v27 = vpop.eup %7055 }
 0x130   :  { %v171_v29 = vmul.f32 %v7056_v27, %v147_v4 }
 0x132   :  { %v180_v31 = vmul.f32 %v7376_v28, %v171_v29 }
 0x134   :  { %v189_v32 = vadd.f32 %v7381_v30, %v180_v31 }
 0x136   :  { %6378 = vmatmul.mubr.msk.f32.vlgmr.msra.gmra.mxu0 %vm133_vm0, %v189_v32 }
 0x137   :  { %282 = vmatprep.mubr.f32.mxu0 %v8777_v10 }
 0x1f6   :  { %v278_v38 = vpop.f32.mrf.mxu0 }
 0x1f7   :  { %v7400_v39 = vadd.f32 %v278_v38, %v7397_v37 }
 0x1f8   :  { %v280_v42 = vpop.f32.mrf.mxu0 }
 0x1f9   :  { %296 = vrot.lane.b32.xlu1 %v7400_v39, %s7230_s3  ;;  %v7412_v44 = vadd.f32 %v280_v42, %v7407_v41  ;;  %v7438_v58 = vrot.slane %v7400_v39, 3 }
 0x26b   :  { %v297_v43 = vpop.permute.xlu1 %296 }
 0x26c   :  { %6702 = vmatpush3.xpose.msk.msra.mxu1 %vm298_vm2, %v297_v43 }
 0x26d   :  { %6706 = vmatprep.subr.mxu1 %v8777_v10 }
 0x26f   :  { %6704 = vmatmul.mubr.msk.f32.vlgmr.msra.gmra.mxu1 %vm298_vm2, %v7400_v39 }
 0x270   :  { %6707 = vmatpush3.msk.msra.mxu1 %vm390_vm3, %v7412_v44  ;;  %6708 = vmatprep.mubr.msk.f32.mxu1 %vm7229_vm1, %v8777_v10 }
 0x271   :  { %6711 = vmatprep.subr.mxu1 %v8777_v10 }
 0x32f   :  { %v369_v45 = vpop.f32.mrf.mxu1 }
 0x330   :  { %v373_v46 = vmul.f32 0.25, %v369_v45 }
 0x331   :  { %v6705_v47 = vpop.f32.mrf.mxu1 }
 0x332   :  { %v375_v48 = vsel %vm374_vm4, %v373_v46, -inf }
 0x333   :  { %376 = vmax.xlane.f32.xlu1 %v375_v48 }
 0x337   :  { %141 = vadd.xlane.f32.xlu1 %v140_v50 }
 0x3bc   :  { %v377_v51 = vpop.xlane.xlu1 %376 }
 0x3bd   :  { %v378_v52 = vsub.f32 %v373_v46, %v377_v51  ;;  %v1665_v51 = vrot.slane %v7400_v39, 6 }
 0x3bf   :  { %v379_v53 = vmul.f32 1.442695, %v378_v52 }
 0x3c0   :  { %v142_v0 = vpop.xlane.xlu1 %141 }
 0x3c1   :  { %7057 = vpow2.f32 %v379_v53  ;;  %v146_v1 = vmul.f32 0.015625, %v142_v0 }
 0x3c3   :  { %v149_v4 = vsub.f32 %v52_v49, %v146_v1 }
 0x3c5   :  { %v152_v7 = vmul.f32 %v149_v4, %v149_v4 }
 0x3c7   :  { %v159_v9 = vsel %vm133_vm0, %v152_v7, 0.0 }
 0x3ce   :  { %v7058_v54 = vpop.eup %7057 }
 0x3cf   :  { %v381_v55 = vsel %vm374_vm4, %v7058_v54, 0.0 }
 0x3d0   :  { %382 = vadd.xlane.f32.xlu0 %v381_v55 }
 0x3e6   :  { %466 = vrot.lane.b32.xlu0 %v7400_v39, %s7231_s27 }
 0x3ea   :  { %464 = vrot.lane.b32.xlu0 %v7400_v39, %s7232_s28 }
 0x409   :  { %138 = vadd.xlane.f32.xlu0 %v137_v57 }
 0x41f   :  { %633 = vrot.lane.b32.xlu0 %v7400_v39, %s7233_s16 }
 0x423   :  { %1149 = vrot.lane.b32.xlu0 %v7438_v58, %s7231_s27 }
 0x427   :  { %1316 = vrot.lane.b32.xlu0 %v7438_v58, %s7233_s16 }
 0x42b   :  { %1483 = vrot.lane.b32.xlu0 %v7438_v58, %s7234_s17 }
 0x459   :  { %v383_v59 = vpop.xlane.xlu0 %382 }
 0x45a   :  { %7059 = vrcp.f32 %v383_v59 }
 0x45d   :  { %v467_v61 = vpop.permute.xlu0 %466 }
 0x461   :  { %v465_v63 = vpop.permute.xlu0 %464 }
 0x467   :  { %v7060_v60 = vpop.eup %7059 }
 0x468   :  { %v385_v62 = vmul.f32 %v7060_v60, %v7058_v54 }
 0x46a   :  { %6709 = vmatmul.mubr.msk.f32.vlgmr.msra.gmra.mxu1 %vm386_vm5, %v385_v62 }
 0x46b   :  { %6712 = vmatpush3.xpose.msk.msra.mxu1 %vm298_vm2, %v467_v61  ;;  %6713 = vmatprep.mubr.msk.f32.mxu1 %vm7229_vm1, %v8777_v10 }
 0x46c   :  { %6716 = vmatprep.subr.mxu1 %v8777_v10 }
 0x46e   :  { %6714 = vmatmul.mubr.msk.f32.vlgmr.msra.gmra.mxu1 %vm298_vm2, %v465_v63 }
 0x46f   :  { %6718 = vmatprep.mubr.msk.f32.mxu1 %vm7229_vm1, %v8777_v10 }
 0x492   :  { %v139_v2 = vpop.xlane.xlu0 %138 }
 0x493   :  { %v145_v3 = vmul.f32 0.015625, %v139_v2 }
 0x495   :  { %v148_v5 = vsub.f32 %v51_v56, %v145_v3 }
 0x496   :  { %v7487_v36 = vpop.permute.xlu0 %633 }
 0x497   :  { %v151_v6 = vmul.f32 %v148_v5, %v148_v5 }
 0x499   :  { %v156_v8 = vsel %vm133_vm0, %v151_v6, 0.0 }
 0x49a   :  { %157 = vadd.xlane.f32.xlu1 %v156_v8  ;;  %v1150_v43 = vpop.permute.xlu0 %1149 }
 0x49e   :  { %160 = vadd.xlane.f32.xlu1 %v159_v9 }
 0x4af   :  { %554 = vrot.lane.b32.xlu1 %v7412_v44, %s7232_s28 }
 0x4b3   :  { %631 = vrot.lane.b32.xlu1 %v7400_v39, %s7235_s18 }
 0x4b7   :  { %800 = vrot.lane.b32.xlu1 %v7400_v39, %s7234_s17 }
 0x4bb   :  { %798 = vrot.lane.b32.xlu1 %v7400_v39, %s7236_s19 }
 0x4bf   :  { %983 = vrot.lane.b32.xlu1 %v7438_v58, %s7230_s3 }
 0x4c3   :  { %1147 = vrot.lane.b32.xlu1 %v7438_v58, %s7232_s28 }
 0x4c7   :  { %1314 = vrot.lane.b32.xlu1 %v7438_v58, %s7235_s18 }
 0x4cb   :  { %1481 = vrot.lane.b32.xlu1 %v7438_v58, %s7236_s19 }
 0x523   :  { %v158_v11 = vpop.xlane.xlu1 %157 }
 0x524   :  { %v163_v12 = vmul.f32 0.015625, %v158_v11 }
 0x526   :  { %v166_v13 = vadd.f32 1e-06, %v163_v12 }
 0x527   :  { %v161_v14 = vpop.xlane.xlu1 %160 }
 0x528   :  { %7061 = vrsqrt.f32 %v166_v13  ;;  %v164_v15 = vmul.f32 0.015625, %v161_v14 }
 0x52a   :  { %v167_v16 = vadd.f32 1e-06, %v164_v15  ;;  %v7472_v17 = vpop.f32.mrf.mxu1 }
 0x52b   :  { %8785 = vst [vmem:[#allocation3_spill] sm:$0xff] %v7472_v17  ;;  %v555_v18 = vpop.permute.xlu1 %554 }
 0x52c   :  { %7063 = vrsqrt.f32 %v167_v16  ;;  %v6710_v19 = vpop.f32.mrf.mxu1  ;;  %6717 = vmatpush3.msk.msra.mxu1 %vm390_vm3, %v555_v18 }
 0x52d   :  { %6721 = vmatprep.subr.mxu1 %v8777_v10 }
 0x52e   :  { %v7476_v20 = vpop.f32.mrf.mxu1 }
 0x52f   :  { %v7478_v21 = vpop.permute.xlu1 %631  ;;  %v7584_v12 = vmul.f32 0.25, %v7476_v20 }
 0x530   :  { %v6715_v22 = vpop.f32.mrf.mxu1 }
 0x531   :  { %v543_v13 = vsel %vm374_vm4, %v7584_v12, -inf }
 0x533   :  { %v801_v23 = vpop.permute.xlu1 %800 }
 0x534   :  { %6732 = vmatpush3.xpose.msk.msra.mxu0 %vm298_vm2, %v801_v23 }
 0x535   :  { %v7062_v24 = vpop.eup %7061  ;;  %6741 = vmatprep.subr.mxu0 %v8777_v10 }
 0x536   :  { %v172_v25 = vmul.f32 %v7062_v24, %v148_v5 }
 0x537   :  { %v799_v32 = vpop.permute.xlu1 %798 }
 0x538   :  { %v181_v26 = vmul.f32 %v7376_v28, %v172_v25 }
 0x539   :  { %v7064_v27 = vpop.eup %7063 }
 0x53a   :  { %v190_v29 = vadd.f32 %v7381_v30, %v181_v26  ;;  %v173_v31 = vmul.f32 %v7064_v27, %v149_v4 }
 0x53b   :  { %v984_v42 = vpop.permute.xlu1 %983 }
 0x53c   :  { %6379 = vmatmul.mubr.msk.f32.gmra.mxu0 %vm133_vm0, %v190_v29  ;;  %v182_v33 = vmul.f32 %v7376_v28, %v173_v31 }
 0x53d   :  { %288 = vmatprep.mubr.f32.mxu0 %v8777_v10 }
 0x53e   :  { %v191_v38 = vadd.f32 %v7381_v30, %v182_v33  ;;  %v1317_v30 = vpop.permute.xlu0 %1316 }
 0x53f   :  { %v1148_v28 = vpop.permute.xlu1 %1147 }
 0x540   :  { %6380 = vmatmul.mubr.msk.f32.gmra.mxu0 %vm133_vm0, %v191_v38 }
 0x541   :  { %6733 = vmatprep.mubr.msk.f32.mxu0 %vm7229_vm1, %v8777_v10 }
 0x542   :  { %v1484_v46 = vpop.permute.xlu0 %1483 }
 0x543   :  { %v1315_v45 = vpop.permute.xlu1 %1314 }
 0x544   :  { %6734 = vmatmul.mubr.msk.f32.vlgmr.msra.gmra.mxu0 %vm298_vm2, %v799_v32 }
 0x545   :  { %6742 = vmatpush3.xpose.msk.msra.mxu0 %vm298_vm2, %v984_v42  ;;  %6743 = vmatprep.mubr.msk.f32.mxu0 %vm7229_vm1, %v8777_v10 }
 0x546   :  { %6751 = vmatprep.subr.mxu0 %v8777_v10 }
 0x547   :  { %v1482_v47 = vpop.permute.xlu1 %1481 }
 0x548   :  { %6744 = vmatmul.mubr.msk.f32.vlgmr.msra.gmra.mxu0 %vm298_vm2, %v7438_v58 }
 0x549   :  { %6752 = vmatpush3.xpose.msk.msra.mxu0 %vm298_vm2, %v1150_v43  ;;  %6753 = vmatprep.mubr.msk.f32.mxu0 %vm7229_vm1, %v8777_v10 }
 0x54a   :  { %6761 = vmatprep.subr.mxu0 %v8777_v10 }
 0x54c   :  { %6754 = vmatmul.mubr.msk.f32.vlgmr.msra.gmra.mxu0 %vm298_vm2, %v1148_v28 }
 0x54d   :  { %6762 = vmatpush3.xpose.msk.msra.mxu0 %vm298_vm2, %v1317_v30  ;;  %6763 = vmatprep.mubr.msk.f32.mxu0 %vm7229_vm1, %v8777_v10 }
 0x54e   :  { %6771 = vmatprep.subr.mxu0 %v8777_v10 }
 0x550   :  { %6764 = vmatmul.mubr.msk.f32.vlgmr.msra.gmra.mxu0 %vm298_vm2, %v1315_v45 }
 0x551   :  { %6772 = vmatpush3.xpose.msk.msra.mxu0 %vm298_vm2, %v1484_v46  ;;  %6773 = vmatprep.mubr.msk.f32.mxu0 %vm7229_vm1, %v8777_v10 }
 0x552   :  { %6781 = vmatprep.subr.mxu0 %v8777_v10 }
 0x554   :  { %6774 = vmatmul.mubr.msk.f32.vlgmr.msra.gmra.mxu0 %vm298_vm2, %v1482_v47 }
 0x555   :  { %6783 = vmatprep.mubr.msk.f32.mxu0 %vm7229_vm1, %v8777_v10 }
 0x5fc   :  { %v284_v48 = vpop.f32.mrf.mxu0 }
 0x5fd   :  { %v285_v49 = vadd.f32 %v284_v48, %v7397_v37 }
 0x5fe   :  { %v286_v50 = vpop.f32.mrf.mxu0 }
 0x5ff   :  { %v1666_v52 = vrot.slane %v285_v49, 6  ;;  %v7523_v55 = vadd.f32 %v286_v50, %v7407_v41  ;;  %v7547_v63 = vrot.slane %v285_v49, 1  ;;  %v7565_v6 = vrot.slane %v285_v49, 4 }
 0x600   :  { %v290_v53 = vpop.f32.mrf.mxu0  ;;  %v3715_v9 = vrot.slane %v285_v49, 7 }
 0x601   :  { %v7520_v54 = vsel %vm1664_vm6, %v1665_v51, %v1666_v52  ;;  %v3807_v59 = vrot.slane %v7523_v55, 7  ;;  %v291_v7 = vadd.f32 %v290_v53, %v7397_v37 }
 0x602   :  { %v292_v56 = vpop.f32.mrf.mxu0  ;;  %1668 = vrot.lane.b32.xlu0 %v7520_v54, %s7230_s3  ;;  %1837 = vrot.lane.b32.xlu1 %v7520_v54, %s7231_s27 }
 0x603   :  { %v7530_v57 = vadd.f32 %v292_v56, %v7407_v41  ;;  %v3716_v8 = vrot.slane %v291_v7, 7  ;;  %v7588_v37 = vrot.slane %v291_v7, 2  ;;  %v7600_v14 = vrot.slane %v291_v7, 5 }
 0x604   :  { %v7532_v58 = vpop.f32.mrf.mxu0 }
 0x605   :  { %v3808_v39 = vrot.slane %v7530_v57, 7  ;;  %v7577_v11 = vsel %vm3714_vm7, %v3715_v9, %v3716_v8  ;;  %v7756_v8 = vmul.f32 0.25, %v7532_v58 }
 0x606   :  { %v6735_v60 = vpop.f32.mrf.mxu0  ;;  %1835 = vrot.lane.b32.xlu0 %v7520_v54, %s7232_s28  ;;  %2004 = vrot.lane.b32.xlu1 %v7520_v54, %s7233_s16 }
 0x607   :  { %v7541_v61 = vsel %vm3714_vm7, %v3807_v59, %v3808_v39 }
 0x608   :  { %v1055_v62 = vpop.f32.mrf.mxu0 }
 0x609   :  { %v7626_v15 = vmul.f32 0.25, %v1055_v62 }
 0x60a   :  { %2002 = vrot.lane.b32.xlu0 %v7520_v54, %s7235_s18  ;;  %2171 = vrot.lane.b32.xlu1 %v7520_v54, %s7234_s17  ;;  %v6745_v41 = vpop.f32.mrf.mxu0 }
 0x60b   :  { %v1060_v18 = vsel %vm374_vm4, %v7626_v15, -inf }
 0x60c   :  { %v1221_v0 = vpop.f32.mrf.mxu0 }
 0x60d   :  { %v7630_v16 = vmul.f32 0.25, %v1221_v0 }
 0x60e   :  { %2169 = vrot.lane.b32.xlu0 %v7520_v54, %s7236_s19  ;;  %2352 = vrot.lane.b32.xlu1 %v7547_v63, %s7230_s3  ;;  %v6755_v1 = vpop.f32.mrf.mxu0 }
 0x60f   :  { %v1226_v23 = vsel %vm374_vm4, %v7630_v16, -inf }
 0x610   :  { %v7553_v2 = vpop.f32.mrf.mxu0 }
 0x611   :  { %v7759_v9 = vmul.f32 0.25, %v7553_v2 }
 0x612   :  { %2518 = vrot.lane.b32.xlu0 %v7547_v63, %s7231_s27  ;;  %2516 = vrot.lane.b32.xlu1 %v7547_v63, %s7232_s28  ;;  %v6765_v3 = vpop.f32.mrf.mxu0 }
 0x614   :  { %v1555_v4 = vpop.f32.mrf.mxu0 }
 0x615   :  { %v7634_v19 = vmul.f32 0.25, %v1555_v4 }
 0x616   :  { %2685 = vrot.lane.b32.xlu0 %v7547_v63, %s7233_s16  ;;  %2683 = vrot.lane.b32.xlu1 %v7547_v63, %s7235_s18  ;;  %v6775_v5 = vpop.f32.mrf.mxu0 }
 0x617   :  { %v1560_v26 = vsel %vm374_vm4, %v7634_v19, -inf }
 0x61a   :  { %2852 = vrot.lane.b32.xlu0 %v7547_v63, %s7234_s17 }
 0x61e   :  { %3033 = vrot.lane.b32.xlu0 %v7565_v6, %s7230_s3 }
 0x622   :  { %3197 = vrot.lane.b32.xlu0 %v7565_v6, %s7232_s28 }
 0x626   :  { %3364 = vrot.lane.b32.xlu0 %v7565_v6, %s7235_s18 }
 0x62a   :  { %3531 = vrot.lane.b32.xlu0 %v7565_v6, %s7236_s19 }
 0x62e   :  { %3887 = vrot.lane.b32.xlu0 %v7577_v11, %s7231_s27 }
 0x632   :  { %4054 = vrot.lane.b32.xlu0 %v7577_v11, %s7233_s16 }
 0x636   :  { %4221 = vrot.lane.b32.xlu0 %v7577_v11, %s7234_s17 }
 0x63a   :  { %4402 = vrot.lane.b32.xlu0 %v7588_v37, %s7230_s3  ;;  %544 = vmax.xlane.f32.xlu1 %v543_v13 }
 0x63e   :  { %4566 = vrot.lane.b32.xlu0 %v7588_v37, %s7232_s28 }
 0x642   :  { %4733 = vrot.lane.b32.xlu0 %v7588_v37, %s7235_s18 }
 0x646   :  { %4900 = vrot.lane.b32.xlu0 %v7588_v37, %s7236_s19 }
 0x64a   :  { %5249 = vrot.lane.b32.xlu0 %v7600_v14, %s7231_s27 }
 0x64b   :  { %2850 = vrot.lane.b32.xlu1 %v7547_v63, %s7236_s19 }
 0x64e   :  { %5416 = vrot.lane.b32.xlu0 %v7600_v14, %s7233_s16 }
 0x64f   :  { %3199 = vrot.lane.b32.xlu1 %v7565_v6, %s7231_s27 }
 0x652   :  { %5583 = vrot.lane.b32.xlu0 %v7600_v14, %s7234_s17 }
 0x653   :  { %3366 = vrot.lane.b32.xlu1 %v7565_v6, %s7233_s16 }
 0x657   :  { %3533 = vrot.lane.b32.xlu1 %v7565_v6, %s7234_s17 }
 0x65b   :  { %3718 = vrot.lane.b32.xlu1 %v7577_v11, %s7230_s3 }
 0x65f   :  { %3885 = vrot.lane.b32.xlu1 %v7577_v11, %s7232_s28 }
 0x663   :  { %4052 = vrot.lane.b32.xlu1 %v7577_v11, %s7235_s18 }
 0x667   :  { %4219 = vrot.lane.b32.xlu1 %v7577_v11, %s7236_s19 }
 0x66b   :  { %4568 = vrot.lane.b32.xlu1 %v7588_v37, %s7231_s27 }
 0x66f   :  { %4735 = vrot.lane.b32.xlu1 %v7588_v37, %s7233_s16 }
 0x671   :  { %1061 = vmax.xlane.f32.xlu0 %v1060_v18 }
 0x674   :  { %v1669_v20 = vpop.permute.xlu0 %1668  ;;  %v1838_v22 = vpop.permute.xlu1 %1837 }
 0x675   :  { %1227 = vmax.xlane.f32.xlu0 %v1226_v23  ;;  %6782 = vmatpush3.xpose.msk.msra.mxu0 %vm298_vm2, %v1669_v20 }
 0x676   :  { %6791 = vmatprep.subr.mxu0 %v8777_v10 }
 0x678   :  { %v1836_v24 = vpop.permute.xlu0 %1835  ;;  %6784 = vmatmul.mubr.msk.f32.vlgmr.msra.gmra.mxu0 %vm298_vm2, %v7520_v54  ;;  %v2005_v25 = vpop.permute.xlu1 %2004 }
 0x679   :  { %1561 = vmax.xlane.f32.xlu0 %v1560_v26  ;;  %6792 = vmatpush3.xpose.msk.msra.mxu0 %vm298_vm2, %v1838_v22 }
 0x67a   :  { %6793 = vmatprep.mubr.msk.f32.mxu0 %vm7229_vm1, %v8777_v10  ;;  %6801 = vmatprep.subr.mxu0 %v8777_v10 }
 0x67c   :  { %v2003_v27 = vpop.permute.xlu0 %2002  ;;  %6794 = vmatmul.mubr.msk.f32.vlgmr.msra.gmra.mxu0 %vm298_vm2, %v1836_v24  ;;  %v2172_v29 = vpop.permute.xlu1 %2171 }
 0x67d   :  { %6802 = vmatpush3.xpose.msk.msra.mxu0 %vm298_vm2, %v2005_v25  ;;  %6803 = vmatprep.mubr.msk.f32.mxu0 %vm7229_vm1, %v8777_v10 }
 0x67e   :  { %6811 = vmatprep.subr.mxu0 %v8777_v10 }
 0x680   :  { %v2170_v31 = vpop.permute.xlu0 %2169  ;;  %6804 = vmatmul.mubr.msk.f32.vlgmr.msra.gmra.mxu0 %vm298_vm2, %v2003_v27  ;;  %v2353_v32 = vpop.permute.xlu1 %2352 }
 0x681   :  { %6812 = vmatpush3.xpose.msk.msra.mxu0 %vm298_vm2, %v2172_v29  ;;  %6813 = vmatprep.mubr.msk.f32.mxu0 %vm7229_vm1, %v8777_v10 }
 0x682   :  { %6821 = vmatprep.subr.mxu0 %v8777_v10 }
 0x684   :  { %v2519_v33 = vpop.permute.xlu0 %2518  ;;  %6814 = vmatmul.mubr.msk.f32.vlgmr.msra.gmra.mxu0 %vm298_vm2, %v2170_v31  ;;  %v2517_v38 = vpop.permute.xlu1 %2516 }
 0x685   :  { %6822 = vmatpush3.xpose.msk.msra.mxu0 %vm298_vm2, %v2353_v32  ;;  %6823 = vmatprep.mubr.msk.f32.mxu0 %vm7229_vm1, %v8777_v10 }
 0x686   :  { %6831 = vmatprep.subr.mxu0 %v8777_v10 }
 0x688   :  { %6824 = vmatmul.mubr.msk.f32.vlgmr.msra.gmra.mxu0 %vm298_vm2, %v7547_v63  ;;  %v2686_v42 = vpop.permute.xlu0 %2685  ;;  %v2684_v43 = vpop.permute.xlu1 %2683 }
 0x689   :  { %6832 = vmatpush3.xpose.msk.msra.mxu0 %vm298_vm2, %v2519_v33  ;;  %6833 = vmatprep.mubr.msk.f32.mxu0 %vm7229_vm1, %v8777_v10 }
 0x68a   :  { %6841 = vmatprep.subr.mxu0 %v8777_v10 }
 0x68c   :  { %6834 = vmatmul.mubr.msk.f32.vlgmr.msra.gmra.mxu0 %vm298_vm2, %v2517_v38  ;;  %v2853_v28 = vpop.permute.xlu0 %2852 }
 0x68d   :  { %6842 = vmatpush3.xpose.msk.msra.mxu0 %vm298_vm2, %v2686_v42  ;;  %6843 = vmatprep.mubr.msk.f32.mxu0 %vm7229_vm1, %v8777_v10 }
 0x68e   :  { %6851 = vmatprep.subr.mxu0 %v8777_v10 }
 0x690   :  { %6844 = vmatmul.mubr.msk.f32.vlgmr.msra.gmra.mxu0 %vm298_vm2, %v2684_v43  ;;  %v3034_v30 = vpop.permute.xlu0 %3033 }
 0x691   :  { %6852 = vmatpush3.xpose.msk.msra.mxu0 %vm298_vm2, %v2853_v28  ;;  %6853 = vmatprep.mubr.msk.f32.mxu0 %vm7229_vm1, %v8777_v10 }
 0x692   :  { %6861 = vmatprep.subr.mxu0 %v8777_v10 }
 0x694   :  { %v3198_v45 = vpop.permute.xlu0 %3197 }
 0x698   :  { %v3365_v50 = vpop.permute.xlu0 %3364 }
 0x69c   :  { %v3532_v52 = vpop.permute.xlu0 %3531 }
 0x6a0   :  { %v3888_v39 = vpop.permute.xlu0 %3887 }
 0x6a4   :  { %v4055_v62 = vpop.permute.xlu0 %4054 }
 0x6a8   :  { %v4222_v0 = vpop.permute.xlu0 %4221 }
 0x6ac   :  { %v4403_v3 = vpop.permute.xlu0 %4402 }
 0x6b0   :  { %v4567_v5 = vpop.permute.xlu0 %4566 }
 0x6b4   :  { %v4734_v7 = vpop.permute.xlu0 %4733 }
 0x6c3   :  { %v545_v46 = vpop.xlane.xlu1 %544 }
 0x6c4   :  { %v546_v47 = vsub.f32 %v7584_v12, %v545_v46  ;;  %v1393_v12 = vsel %vm374_vm4, %v7759_v9, -inf }
 0x6c6   :  { %v547_v48 = vmul.f32 1.442695, %v546_v47 }
 0x6c7   :  { %v2851_v49 = vpop.permute.xlu1 %2850 }
 0x6c8   :  { %7065 = vpow2.f32 %v547_v48  ;;  %6854 = vmatmul.mubr.msk.f32.vlgmr.msra.gmra.mxu0 %vm298_vm2, %v2851_v49 }
 0x6c9   :  { %6862 = vmatpush3.xpose.msk.msra.mxu0 %vm298_vm2, %v3034_v30  ;;  %6863 = vmatprep.mubr.msk.f32.mxu0 %vm7229_vm1, %v8777_v10 }
 0x6ca   :  { %6871 = vmatprep.subr.mxu0 %v8777_v10 }
 0x6cb   :  { %v3200_v51 = vpop.permute.xlu1 %3199 }
 0x6cc   :  { %6864 = vmatmul.mubr.msk.f32.vlgmr.msra.gmra.mxu0 %vm298_vm2, %v7565_v6 }
 0x6cd   :  { %6872 = vmatpush3.xpose.msk.msra.mxu0 %vm298_vm2, %v3200_v51  ;;  %6873 = vmatprep.mubr.msk.f32.mxu0 %vm7229_vm1, %v8777_v10 }
 0x6ce   :  { %6881 = vmatprep.subr.mxu0 %v8777_v10 }
 0x6cf   :  { %v3367_v53 = vpop.permute.xlu1 %3366 }
 0x6d0   :  { %6874 = vmatmul.mubr.msk.f32.vlgmr.msra.gmra.mxu0 %vm298_vm2, %v3198_v45 }
 0x6d1   :  { %6882 = vmatpush3.xpose.msk.msra.mxu0 %vm298_vm2, %v3367_v53  ;;  %6883 = vmatprep.mubr.msk.f32.mxu0 %vm7229_vm1, %v8777_v10  ;;  %v4901_v53 = vpop.permute.xlu0 %4900 }
 0x6d2   :  { %6891 = vmatprep.subr.mxu0 %v8777_v10 }
 0x6d3   :  { %v3534_v54 = vpop.permute.xlu1 %3533 }
 0x6d4   :  { %6884 = vmatmul.mubr.msk.f32.vlgmr.msra.gmra.mxu0 %vm298_vm2, %v3365_v50 }
 0x6d5   :  { %v7697_v56 = vpop.eup %7065  ;;  %6892 = vmatpush3.xpose.msk.msra.mxu0 %vm298_vm2, %v3534_v54  ;;  %6893 = vmatprep.mubr.msk.f32.mxu0 %vm7229_vm1, %v8777_v10 }
 0x6d6   :  { %v549_v59 = vsel %vm374_vm4, %v7697_v56, 0.0  ;;  %6901 = vmatprep.subr.mxu0 %v8777_v10 }
 0x6d7   :  { %550 = vadd.xlane.f32.xlu1 %v549_v59  ;;  %v3719_v60 = vpop.permute.xlu1 %3718 }
 0x6d8   :  { %6894 = vmatmul.mubr.msk.f32.vlgmr.msra.gmra.mxu0 %vm298_vm2, %v3532_v52 }
 0x6d9   :  { %6902 = vmatpush3.xpose.msk.msra.mxu0 %vm298_vm2, %v3719_v60  ;;  %6903 = vmatprep.mubr.msk.f32.mxu0 %vm7229_vm1, %v8777_v10 }
 0x6da   :  { %6911 = vmatprep.subr.mxu0 %v8777_v10 }
 0x6db   :  { %v3886_v41 = vpop.permute.xlu1 %3885 }
 0x6dc   :  { %6904 = vmatmul.mubr.msk.f32.vlgmr.msra.gmra.mxu0 %vm298_vm2, %v7577_v11  ;;  %v877_v11 = vsel %vm374_vm4, %v7756_v8, -inf }
 0x6dd   :  { %6912 = vmatpush3.xpose.msk.msra.mxu0 %vm298_vm2, %v3888_v39  ;;  %6913 = vmatprep.mubr.msk.f32.mxu0 %vm7229_vm1, %v8777_v10  ;;  %v5250_v39 = vpop.permute.xlu0 %5249 }
 0x6de   :  { %6921 = vmatprep.subr.mxu0 %v8777_v10 }
 0x6df   :  { %v4053_v63 = vpop.permute.xlu1 %4052 }
 0x6e0   :  { %6914 = vmatmul.mubr.msk.f32.vlgmr.msra.gmra.mxu0 %vm298_vm2, %v3886_v41 }
 0x6e1   :  { %6922 = vmatpush3.xpose.msk.msra.mxu0 %vm298_vm2, %v4055_v62  ;;  %6923 = vmatprep.mubr.msk.f32.mxu0 %vm7229_vm1, %v8777_v10  ;;  %v5417_v41 = vpop.permute.xlu0 %5416 }
 0x6e2   :  { %6931 = vmatprep.subr.mxu0 %v8777_v10 }
 0x6e3   :  { %v4220_v1 = vpop.permute.xlu1 %4219 }
 0x6e4   :  { %6924 = vmatmul.mubr.msk.f32.vlgmr.msra.gmra.mxu0 %vm298_vm2, %v4053_v63 }
 0x6e5   :  { %6932 = vmatpush3.xpose.msk.msra.mxu0 %vm298_vm2, %v4222_v0  ;;  %6933 = vmatprep.mubr.msk.f32.mxu0 %vm7229_vm1, %v8777_v10 }
 0x6e6   :  { %6941 = vmatprep.subr.mxu0 %v8777_v10 }
 0x6e7   :  { %v4569_v4 = vpop.permute.xlu1 %4568 }
 0x6e8   :  { %4902 = vrot.lane.b32.xlu1 %v7588_v37, %s7234_s17  ;;  %6934 = vmatmul.mubr.msk.f32.vlgmr.msra.gmra.mxu0 %vm298_vm2, %v4220_v1 }
 0x6e9   :  { %6942 = vmatpush3.xpose.msk.msra.mxu0 %vm298_vm2, %v4403_v3  ;;  %6943 = vmatprep.mubr.msk.f32.mxu0 %vm7229_vm1, %v8777_v10 }
 0x6ea   :  { %6951 = vmatprep.subr.mxu0 %v8777_v10 }
 0x6eb   :  { %v4736_v6 = vpop.permute.xlu1 %4735 }
 0x6ec   :  { %5083 = vrot.lane.b32.xlu1 %v7600_v14, %s7230_s3  ;;  %6944 = vmatmul.mubr.msk.f32.vlgmr.msra.gmra.mxu0 %vm298_vm2, %v7588_v37 }
 0x6ed   :  { %6952 = vmatpush3.xpose.msk.msra.mxu0 %vm298_vm2, %v4569_v4  ;;  %6953 = vmatprep.mubr.msk.f32.mxu0 %vm7229_vm1, %v8777_v10 }
 0x6ee   :  { %6961 = vmatprep.subr.mxu0 %v8777_v10 }
 0x6f0   :  { %5247 = vrot.lane.b32.xlu1 %v7600_v14, %s7232_s28  ;;  %6954 = vmatmul.mubr.msk.f32.vlgmr.msra.gmra.mxu0 %vm298_vm2, %v4567_v5 }
 0x6f1   :  { %6962 = vmatpush3.xpose.msk.msra.mxu0 %vm298_vm2, %v4736_v6  ;;  %6963 = vmatprep.mubr.msk.f32.mxu0 %vm7229_vm1, %v8777_v10 }
 0x6f2   :  { %6971 = vmatprep.subr.mxu0 %v8777_v10 }
 0x6f4   :  { %5414 = vrot.lane.b32.xlu1 %v7600_v14, %s7235_s18  ;;  %6964 = vmatmul.mubr.msk.f32.vlgmr.msra.gmra.mxu0 %vm298_vm2, %v4734_v7 }
 0x6f5   :  { %6973 = vmatprep.mubr.msk.f32.mxu0 %vm7229_vm1, %v8777_v10 }
 0x6f8   :  { %5581 = vrot.lane.b32.xlu1 %v7600_v14, %s7236_s19 }
 0x71c   :  { %878 = vmax.xlane.f32.xlu1 %v877_v11 }
 0x720   :  { %1394 = vmax.xlane.f32.xlu1 %v1393_v12 }
 0x738   :  { %v1740_v37 = vpop.f32.mrf.mxu0 }
 0x739   :  { %v7765_v13 = vmul.f32 0.25, %v1740_v37 }
 0x73a   :  { %v6785_v18 = vpop.f32.mrf.mxu0 }
 0x73b   :  { %v1745_v20 = vsel %vm374_vm4, %v7765_v13, -inf }
 0x73c   :  { %v1909_v58 = vpop.f32.mrf.mxu0  ;;  %1746 = vmax.xlane.f32.xlu1 %v1745_v20 }
 0x73d   :  { %v7769_v22 = vmul.f32 0.25, %v1909_v58 }
 0x73e   :  { %v6795_v2 = vpop.f32.mrf.mxu0 }
 0x73f   :  { %v1914_v23 = vsel %vm374_vm4, %v7769_v22, -inf }
 0x740   :  { %1915 = vmax.xlane.f32.xlu0 %v1914_v23  ;;  %v2076_v24 = vpop.f32.mrf.mxu0 }
 0x741   :  { %v7773_v25 = vmul.f32 0.25, %v2076_v24 }
 0x742   :  { %v6805_v26 = vpop.f32.mrf.mxu0 }
 0x743   :  { %v2081_v27 = vsel %vm374_vm4, %v7773_v25, -inf }
 0x744   :  { %v2243_v29 = vpop.f32.mrf.mxu0  ;;  %2082 = vmax.xlane.f32.xlu1 %v2081_v27 }
 0x745   :  { %v7777_v31 = vmul.f32 0.25, %v2243_v29 }
 0x746   :  { %v6815_v32 = vpop.f32.mrf.mxu0 }
 0x747   :  { %v2248_v33 = vsel %vm374_vm4, %v7777_v31, -inf }
 0x748   :  { %2249 = vmax.xlane.f32.xlu0 %v2248_v33  ;;  %v2424_v38 = vpop.f32.mrf.mxu0 }
 0x749   :  { %v7781_v42 = vmul.f32 0.25, %v2424_v38 }
 0x74a   :  { %v6825_v43 = vpop.f32.mrf.mxu0 }
 0x74b   :  { %v2429_v28 = vsel %vm374_vm4, %v7781_v42, -inf }
 0x74c   :  { %v2590_v30 = vpop.f32.mrf.mxu0  ;;  %2430 = vmax.xlane.f32.xlu1 %v2429_v28 }
 0x74d   :  { %v7785_v45 = vmul.f32 0.25, %v2590_v30 }
 0x74e   :  { %v6835_v46 = vpop.f32.mrf.mxu0 }
 0x74f   :  { %v2595_v47 = vsel %vm374_vm4, %v7785_v45, -inf }
 0x750   :  { %2596 = vmax.xlane.f32.xlu0 %v2595_v47  ;;  %v2757_v48 = vpop.f32.mrf.mxu0 }
 0x751   :  { %v7789_v49 = vmul.f32 0.25, %v2757_v48 }
 0x752   :  { %v6845_v50 = vpop.f32.mrf.mxu0 }
 0x753   :  { %v2762_v51 = vsel %vm374_vm4, %v7789_v49, -inf }
 0x754   :  { %2763 = vmax.xlane.f32.xlu1 %v2762_v51 }
 0x760   :  { %v551_v52 = vpop.xlane.xlu1 %550 }
 0x761   :  { %7067 = vrcp.f32 %v551_v52 }
 0x764   :  { %v4903_v54 = vpop.permute.xlu1 %4902 }
 0x765   :  { %6972 = vmatpush3.xpose.msk.msra.mxu0 %vm298_vm2, %v4903_v54 }
 0x766   :  { %6981 = vmatprep.subr.mxu0 %v8777_v10 }
 0x768   :  { %6974 = vmatmul.mubr.msk.f32.vlgmr.msra.gmra.mxu0 %vm298_vm2, %v4901_v53  ;;  %v5084_v59 = vpop.permute.xlu1 %5083 }
 0x769   :  { %6982 = vmatpush3.xpose.msk.msra.mxu0 %vm298_vm2, %v5084_v59  ;;  %6983 = vmatprep.mubr.msk.f32.mxu0 %vm7229_vm1, %v8777_v10 }
 0x76a   :  { %6991 = vmatprep.subr.mxu0 %v8777_v10 }
 0x76c   :  { %6984 = vmatmul.mubr.msk.f32.vlgmr.msra.gmra.mxu0 %vm298_vm2, %v7600_v14  ;;  %v5248_v60 = vpop.permute.xlu1 %5247  ;;  %v5584_v14 = vpop.permute.xlu0 %5583 }
 0x76d   :  { %6992 = vmatpush3.xpose.msk.msra.mxu0 %vm298_vm2, %v5250_v39  ;;  %6993 = vmatprep.mubr.msk.f32.mxu0 %vm7229_vm1, %v8777_v10 }
 0x76e   :  { %v7068_v62 = vpop.eup %7067  ;;  %7001 = vmatprep.subr.mxu0 %v8777_v10 }
 0x76f   :  { %v553_v63 = vmul.f32 %v7068_v62, %v7697_v56 }
 0x770   :  { %6994 = vmatmul.mubr.msk.f32.vlgmr.msra.gmra.mxu0 %vm298_vm2, %v5248_v60  ;;  %v5415_v0 = vpop.permute.xlu1 %5414  ;;  %v1062_v43 = vpop.xlane.xlu0 %1061 }
 0x771   :  { %6719 = vmatmul.mubr.msk.f32.vlgmr.msra.gmra.mxu1 %vm386_vm5, %v553_v63  ;;  %7002 = vmatpush3.xpose.msk.msra.mxu0 %vm298_vm2, %v5417_v41  ;;  %v1063_v50 = vsub.f32 %v7626_v15, %v1062_v43 }
 0x772   :  { %6722 = vmatpush3.xpose.msk.msra.mxu1 %vm298_vm2, %v7487_v36  ;;  %7003 = vmatprep.mubr.msk.f32.mxu0 %vm7229_vm1, %v8777_v10 }
 0x773   :  { %6723 = vmatprep.mubr.msk.f32.mxu1 %vm7229_vm1, %v8777_v10  ;;  %7011 = vmatprep.subr.mxu0 %v8777_v10  ;;  %v1064_v62 = vmul.f32 1.442695, %v1063_v50 }
 0x774   :  { %7004 = vmatmul.mubr.msk.f32.vlgmr.msra.gmra.mxu0 %vm298_vm2, %v5415_v0  ;;  %6726 = vmatprep.subr.mxu1 %v8777_v10  ;;  %v5582_v36 = vpop.permute.xlu1 %5581  ;;  %v1228_v52 = vpop.xlane.xlu0 %1227 }
 0x775   :  { %6724 = vmatmul.mubr.msk.f32.vlgmr.msra.gmra.mxu1 %vm298_vm2, %v7478_v21  ;;  %7012 = vmatpush3.xpose.msk.msra.mxu0 %vm298_vm2, %v5584_v14  ;;  %v1229_v41 = vsub.f32 %v7630_v16, %v1228_v52 }
 0x776   :  { %7013 = vmatprep.mubr.msk.f32.mxu0 %vm7229_vm1, %v8777_v10  ;;  %6728 = vmatprep.mubr.msk.f32.mxu1 %vm7229_vm1, %v8777_v10 }
 0x778   :  { %7014 = vmatmul.mubr.msk.f32.vlgmr.msra.gmra.mxu0 %vm298_vm2, %v5582_v36 }
 0x788   :  { %v2924_v56 = vpop.f32.mrf.mxu0 }
 0x789   :  { %v7827_v1 = vmul.f32 0.25, %v2924_v56 }
 0x78a   :  { %v6855_v3 = vpop.f32.mrf.mxu0 }
 0x78b   :  { %v2929_v4 = vsel %vm374_vm4, %v7827_v1, -inf }
 0x78c   :  { %2930 = vmax.xlane.f32.xlu0 %v2929_v4  ;;  %v3105_v21 = vpop.f32.mrf.mxu0 }
 0x78d   :  { %v7831_v5 = vmul.f32 0.25, %v3105_v21  ;;  %v1562_v21 = vpop.xlane.xlu0 %1561 }
 0x78e   :  { %v6865_v6 = vpop.f32.mrf.mxu0 }
 0x78f   :  { %v3110_v7 = vsel %vm374_vm4, %v7831_v5, -inf }
 0x790   :  { %3111 = vmax.xlane.f32.xlu1 %v3110_v7  ;;  %v3271_v11 = vpop.f32.mrf.mxu0 }
 0x791   :  { %v7835_v12 = vmul.f32 0.25, %v3271_v11  ;;  %v1563_v11 = vsub.f32 %v7634_v19, %v1562_v21 }
 0x792   :  { %v6875_v37 = vpop.f32.mrf.mxu0 }
 0x793   :  { %v3276_v18 = vsel %vm374_vm4, %v7835_v12, -inf }
 0x794   :  { %3277 = vmax.xlane.f32.xlu0 %v3276_v18  ;;  %v3438_v20 = vpop.f32.mrf.mxu0 }
 0x795   :  { %v7839_v58 = vmul.f32 0.25, %v3438_v20 }
 0x796   :  { %v6885_v2 = vpop.f32.mrf.mxu0 }
 0x797   :  { %v3443_v23 = vsel %vm374_vm4, %v7839_v58, -inf }
 0x798   :  { %3444 = vmax.xlane.f32.xlu1 %v3443_v23  ;;  %v3605_v24 = vpop.f32.mrf.mxu0  ;;  %v1564_v23 = vmul.f32 1.442695, %v1563_v11 }
 0x799   :  { %v7843_v26 = vmul.f32 0.25, %v3605_v24 }
 0x79a   :  { %v6895_v27 = vpop.f32.mrf.mxu0 }
 0x79b   :  { %v3610_v29 = vsel %vm374_vm4, %v7843_v26, -inf }
 0x79c   :  { %3611 = vmax.xlane.f32.xlu0 %v3610_v29  ;;  %v3790_v32 = vpop.f32.mrf.mxu0 }
 0x79d   :  { %v7847_v33 = vmul.f32 0.25, %v3790_v32 }
 0x79e   :  { %v6905_v38 = vpop.f32.mrf.mxu0 }
 0x79f   :  { %v3795_v28 = vsel %vm374_vm4, %v7847_v33, -inf }
 0x7a0   :  { %3796 = vmax.xlane.f32.xlu1 %v3795_v28  ;;  %v3959_v30 = vpop.f32.mrf.mxu0 }
 0x7a1   :  { %v7851_v46 = vmul.f32 0.25, %v3959_v30 }
 0x7a2   :  { %v6915_v47 = vpop.f32.mrf.mxu0 }
 0x7a3   :  { %v3964_v48 = vsel %vm374_vm4, %v7851_v46, -inf }
 0x7a4   :  { %3965 = vmax.xlane.f32.xlu0 %v3964_v48  ;;  %v4126_v51 = vpop.f32.mrf.mxu0 }
 0x7a5   :  { %v7856_v53 = vmul.f32 0.25, %v4126_v51  ;;  %v879_v54 = vpop.xlane.xlu1 %878 }
 0x7a6   :  { %v880_v39 = vsub.f32 %v7756_v8, %v879_v54  ;;  %v6925_v59 = vpop.f32.mrf.mxu0  ;;  %v1230_v8 = vmul.f32 1.442695, %v1229_v41 }
 0x7a7   :  { %v4131_v60 = vsel %vm374_vm4, %v7856_v53, -inf }
 0x7a8   :  { %v881_v63 = vmul.f32 1.442695, %v880_v39  ;;  %4132 = vmax.xlane.f32.xlu1 %v4131_v60  ;;  %v4293_v0 = vpop.f32.mrf.mxu0 }
 0x7a9   :  { %v7862_v14 = vmul.f32 0.25, %v4293_v0  ;;  %v1395_v15 = vpop.xlane.xlu1 %1394 }
 0x7aa   :  { %7069 = vpow2.f32 %v881_v63  ;;  %v6935_v36 = vpop.f32.mrf.mxu0  ;;  %v1396_v3 = vsub.f32 %v7759_v9, %v1395_v15 }
 0x7ab   :  { %v4298_v56 = vsel %vm374_vm4, %v7862_v14, -inf  ;;  %7071 = vpow2.f32 %v1064_v62 }
 0x7ac   :  { %4299 = vmax.xlane.f32.xlu0 %v4298_v56  ;;  %v4474_v4 = vpop.f32.mrf.mxu0  ;;  %7073 = vpow2.f32 %v1230_v8  ;;  %v1397_v37 = vmul.f32 1.442695, %v1396_v3 }
 0x7ad   :  { %v7867_v6 = vmul.f32 0.25, %v4474_v4 }
 0x7ae   :  { %v6945_v16 = vpop.f32.mrf.mxu0  ;;  %7075 = vpow2.f32 %v1397_v37 }
 0x7af   :  { %v4479_v7 = vsel %vm374_vm4, %v7867_v6, -inf  ;;  %7077 = vpow2.f32 %v1564_v23 }
 0x7b0   :  { %4480 = vmax.xlane.f32.xlu1 %v4479_v7  ;;  %v4640_v18 = vpop.f32.mrf.mxu0 }
 0x7b1   :  { %v7872_v20 = vmul.f32 0.25, %v4640_v18 }
 0x7b2   :  { %v6955_v2 = vpop.f32.mrf.mxu0 }
 0x7b3   :  { %v4645_v9 = vsel %vm374_vm4, %v7872_v20, -inf }
 0x7b4   :  { %4646 = vmax.xlane.f32.xlu1 %v4645_v9  ;;  %v4807_v24 = vpop.f32.mrf.mxu0 }
 0x7b5   :  { %v7876_v27 = vmul.f32 0.25, %v4807_v24 }
 0x7b6   :  { %v6965_v29 = vpop.f32.mrf.mxu0 }
 0x7b7   :  { %v7878_v32 = vpop.eup %7069  ;;  %v4812_v19 = vsel %vm374_vm4, %v7876_v27, -inf }
 0x7b8   :  { %4813 = vmax.xlane.f32.xlu1 %v4812_v19  ;;  %v883_v38 = vsel %vm374_vm4, %v7878_v32, 0.0  ;;  %v7884_v43 = vpop.eup %7071 }
 0x7b9   :  { %884 = vadd.xlane.f32.xlu0 %v883_v38  ;;  %v1066_v28 = vsel %vm374_vm4, %v7884_v43, 0.0  ;;  %v7888_v30 = vpop.eup %7073 }
 0x7ba   :  { %v1232_v47 = vsel %vm374_vm4, %v7888_v30, 0.0 }
 0x7bb   :  { %v7892_v48 = vpop.eup %7075 }
 0x7bc   :  { %v1399_v50 = vsel %vm374_vm4, %v7892_v48, 0.0  ;;  %v7896_v51 = vpop.eup %7077 }
 0x7bd   :  { %1067 = vadd.xlane.f32.xlu0 %v1066_v28  ;;  %v1566_v59 = vsel %vm374_vm4, %v7896_v51, 0.0 }
 0x7c1   :  { %1233 = vadd.xlane.f32.xlu0 %v1232_v47 }
 0x7c5   :  { %1400 = vadd.xlane.f32.xlu0 %v1399_v50  ;;  %v1747_v52 = vpop.xlane.xlu1 %1746 }
 0x7c6   :  { %v1748_v54 = vsub.f32 %v7765_v13, %v1747_v52 }
 0x7c8   :  { %v1749_v39 = vmul.f32 1.442695, %v1748_v54 }
 0x7c9   :  { %1567 = vadd.xlane.f32.xlu0 %v1566_v59  ;;  %v1916_v41 = vpop.xlane.xlu0 %1915 }
 0x7ca   :  { %7079 = vpow2.f32 %v1749_v39  ;;  %v1917_v63 = vsub.f32 %v7769_v22, %v1916_v41 }
 0x7cc   :  { %v1918_v13 = vmul.f32 1.442695, %v1917_v63 }
 0x7cd   :  { %v2083_v39 = vpop.xlane.xlu1 %2082 }
 0x7ce   :  { %7081 = vpow2.f32 %v1918_v13  ;;  %v2084_v59 = vsub.f32 %v7773_v25, %v2083_v39 }
 0x7d1   :  { %v2250_v41 = vpop.xlane.xlu0 %2249 }
 0x7d2   :  { %v2251_v63 = vsub.f32 %v7777_v31, %v2250_v41 }
 0x7d7   :  { %v7901_v60 = vpop.eup %7079 }
 0x7d8   :  { %v1751_v62 = vsel %vm374_vm4, %v7901_v60, 0.0 }
 0x7d9   :  { %1752 = vadd.xlane.f32.xlu0 %v1751_v62  ;;  %v2085_v62 = vmul.f32 1.442695, %v2084_v59 }
 0x7db   :  { %v7930_v52 = vpop.eup %7081  ;;  %7083 = vpow2.f32 %v2085_v62 }
 0x7dc   :  { %v1920_v54 = vsel %vm374_vm4, %v7930_v52, 0.0 }
 0x828   :  { %v4974_v0 = vpop.f32.mrf.mxu0 }
 0x829   :  { %v7906_v15 = vmul.f32 0.25, %v4974_v0  ;;  %v2431_v0 = vpop.xlane.xlu1 %2430 }
 0x82a   :  { %v6975_v36 = vpop.f32.mrf.mxu0  ;;  %v2432_v13 = vsub.f32 %v7781_v42, %v2431_v0  ;;  %v7954_v42 = vrot.slane %v7412_v44, 3 }
 0x82b   :  { %v4979_v56 = vsel %vm374_vm4, %v7906_v15, -inf  ;;  %v2252_v36 = vmul.f32 1.442695, %v2251_v63 }
 0x82c   :  { %4980 = vmax.xlane.f32.xlu1 %v4979_v56  ;;  %v5155_v8 = vpop.f32.mrf.mxu0  ;;  %v2433_v56 = vmul.f32 1.442695, %v2432_v13 }
 0x82d   :  { %v7910_v3 = vmul.f32 0.25, %v5155_v8  ;;  %7085 = vpow2.f32 %v2252_v36  ;;  %v7941_v8 = vpop.eup %7083 }
 0x82e   :  { %v6985_v4 = vpop.f32.mrf.mxu0  ;;  %7087 = vpow2.f32 %v2433_v56  ;;  %v2087_v25 = vsel %vm374_vm4, %v7941_v8, 0.0 }
 0x82f   :  { %v5160_v21 = vsel %vm374_vm4, %v7910_v3, -inf }
 0x830   :  { %5161 = vmax.xlane.f32.xlu1 %v5160_v21  ;;  %v5321_v16 = vpop.f32.mrf.mxu0 }
 0x831   :  { %v7914_v22 = vmul.f32 0.25, %v5321_v16  ;;  %v7916_v7 = vpop.f32.mrf.mxu1 }
 0x832   :  { %v6995_v11 = vpop.f32.mrf.mxu0 }
 0x833   :  { %v6720_v37 = vpop.f32.mrf.mxu1  ;;  %v5326_v18 = vsel %vm374_vm4, %v7914_v22, -inf  ;;  %v2597_v11 = vpop.xlane.xlu0 %2596 }
 0x834   :  { %5327 = vmax.xlane.f32.xlu1 %v5326_v18  ;;  %v5488_v2 = vpop.f32.mrf.mxu0  ;;  %v2598_v37 = vsub.f32 %v7785_v45, %v2597_v11 }
 0x835   :  { %v7920_v9 = vmul.f32 0.25, %v5488_v2  ;;  %v7922_v23 = vpop.f32.mrf.mxu1 }
 0x836   :  { %v7005_v24 = vpop.f32.mrf.mxu0  ;;  %v2599_v2 = vmul.f32 1.442695, %v2598_v37 }
 0x837   :  { %v6725_v29 = vpop.f32.mrf.mxu1  ;;  %v5493_v19 = vsel %vm374_vm4, %v7920_v9, -inf  ;;  %v2931_v18 = vpop.xlane.xlu0 %2930 }
 0x838   :  { %5494 = vmax.xlane.f32.xlu1 %v5493_v19  ;;  %v5655_v38 = vpop.f32.mrf.mxu0  ;;  %v2932_v24 = vsub.f32 %v7827_v1, %v2931_v18  ;;  %7089 = vpow2.f32 %v2599_v2  ;;  %v2764_v29 = vpop.xlane.xlu1 %2763 }
 0x839   :  { %v7926_v28 = vmul.f32 0.25, %v5655_v38 }
 0x83a   :  { %v7015_v47 = vpop.f32.mrf.mxu0  ;;  %v7945_v4 = vpop.eup %7085  ;;  %v2933_v19 = vmul.f32 1.442695, %v2932_v24 }
 0x83b   :  { %v5660_v50 = vsel %vm374_vm4, %v7926_v28, -inf  ;;  %v2254_v21 = vsel %vm374_vm4, %v7945_v4, 0.0  ;;  %v7949_v16 = vpop.eup %7087  ;;  %v2765_v47 = vsub.f32 %v7789_v49, %v2764_v29  ;;  %v3278_v29 = vpop.xlane.xlu0 %3277 }
 0x83c   :  { %5661 = vmax.xlane.f32.xlu0 %v5660_v50  ;;  %v2435_v31 = vsel %vm374_vm4, %v7949_v16, 0.0  ;;  %7091 = vpow2.f32 %v2933_v19  ;;  %v3112_v38 = vpop.xlane.xlu1 %3111 }
 0x83d   :  { %v3113_v45 = vsub.f32 %v7831_v5, %v3112_v38 }
 0x83f   :  { %v3114_v59 = vmul.f32 1.442695, %v3113_v45  ;;  %v3612_v38 = vpop.xlane.xlu0 %3611 }
 0x840   :  { %1921 = vadd.xlane.f32.xlu0 %v1920_v54  ;;  %v3445_v50 = vpop.xlane.xlu1 %3444  ;;  %v2766_v54 = vmul.f32 1.442695, %v2765_v47  ;;  %v3613_v45 = vsub.f32 %v7843_v26, %v3612_v38 }
 0x842   :  { %7093 = vpow2.f32 %v2766_v54 }
 0x843   :  { %7095 = vpow2.f32 %v3114_v59  ;;  %v3614_v59 = vmul.f32 1.442695, %v3613_v45 }
 0x844   :  { %v7966_v39 = vpop.xlane.xlu1 %3796 }
 0x845   :  { %v7968_v1 = vpop.eup %7089 }
 0x846   :  { %v2601_v41 = vsel %vm374_vm4, %v7968_v1, 0.0 }
 0x848   :  { %v7970_v62 = vpop.xlane.xlu1 %4132 }
 0x849   :  { %721 = vrot.lane.b32.xlu1 %v7412_v44, %s7235_s18  ;;  %v7974_v63 = vpop.eup %7091 }
 0x84a   :  { %v2935_v5 = vsel %vm374_vm4, %v7974_v63, 0.0 }
 0x84c   :  { %v7976_v49 = vpop.xlane.xlu1 %4480 }
 0x84f   :  { %v7982_v36 = vpop.eup %7093 }
 0x850   :  { %v7980_v0 = vpop.xlane.xlu1 %4646  ;;  %v2768_v56 = vsel %vm374_vm4, %v7982_v36, 0.0 }
 0x854   :  { %v7984_v13 = vpop.xlane.xlu1 %4813 }
 0x856   :  { %888 = vrot.lane.b32.xlu0 %v7412_v44, %s7236_s19 }
 0x86d   :  { %2088 = vadd.xlane.f32.xlu1 %v2087_v25  ;;  %v7988_v25 = vpop.eup %7095 }
 0x86e   :  { %v3116_v37 = vsel %vm374_vm4, %v7988_v25, 0.0 }
 0x875   :  { %2255 = vadd.xlane.f32.xlu0 %v2254_v21  ;;  %v1758_v21 = vrot.slane %v7523_v55, 6 }
 0x879   :  { %2436 = vadd.xlane.f32.xlu0 %v2435_v31  ;;  %v1757_v31 = vrot.slane %v7412_v44, 6  ;;  %v3279_v44 = vsub.f32 %v7835_v12, %v3278_v29 }
 0x87b   :  { %v7997_v18 = vsel %vm1664_vm6, %v1757_v31, %v1758_v21  ;;  %v3280_v54 = vmul.f32 1.442695, %v3279_v44  ;;  %v8027_v31 = vrot.slane %v7523_v55, 1  ;;  %v3446_v44 = vsub.f32 %v7839_v58, %v3445_v50 }
 0x87d   :  { %7097 = vpow2.f32 %v3280_v54  ;;  %v3798_v54 = vsub.f32 %v7847_v33, %v7966_v39 }
 0x87e   :  { %1237 = vrot.lane.b32.xlu1 %v7954_v42, %s7232_s28  ;;  %7099 = vpow2.f32 %v3614_v59 }
 0x87f   :  { %v3799_v45 = vmul.f32 1.442695, %v3798_v54 }
 0x88f   :  { %1404 = vrot.lane.b32.xlu0 %v7954_v42, %s7235_s18 }
 0x893   :  { %1571 = vrot.lane.b32.xlu0 %v7954_v42, %s7236_s19 }
 0x8a2   :  { %2602 = vadd.xlane.f32.xlu1 %v2601_v41  ;;  %v8013_v41 = vpop.eup %7097 }
 0x8a3   :  { %v3282_v12 = vsel %vm374_vm4, %v8013_v41, 0.0 }
 0x8a6   :  { %2936 = vadd.xlane.f32.xlu1 %v2935_v5  ;;  %v8017_v5 = vpop.eup %7099 }
 0x8a7   :  { %v3616_v26 = vsel %vm374_vm4, %v8017_v5, 0.0 }
 0x8b2   :  { %2769 = vadd.xlane.f32.xlu0 %v2768_v56  ;;  %v8022_v56 = vmul.f32 0.25, %v7922_v23 }
 0x8b4   :  { %v710_v21 = vsel %vm374_vm4, %v8022_v56, -inf }
 0x8b5   :  { %v7992_v11 = vpop.xlane.xlu1 %4980 }
 0x8b6   :  { %3117 = vadd.xlane.f32.xlu0 %v3116_v37  ;;  %v3966_v37 = vpop.xlane.xlu0 %3965 }
 0x8b7   :  { %1925 = vrot.lane.b32.xlu1 %v7997_v18, %s7232_s28  ;;  %v3967_v59 = vsub.f32 %v7851_v46, %v3966_v37 }
 0x8b9   :  { %v8001_v2 = vpop.xlane.xlu1 %5161 }
 0x8ba   :  { %v4300_v29 = vpop.xlane.xlu0 %4299 }
 0x8bb   :  { %v4301_v23 = vsub.f32 %v7862_v14, %v4300_v29 }
 0x8bd   :  { %v8003_v24 = vpop.xlane.xlu1 %5327  ;;  %v4302_v38 = vmul.f32 1.442695, %v4301_v23 }
 0x8be   :  { %v8050_v33 = vpop.xlane.xlu0 %884 }
 0x8bf   :  { %7101 = vpow2.f32 %v4302_v38 }
 0x8c1   :  { %v8005_v19 = vpop.xlane.xlu1 %5494 }
 0x8c2   :  { %v8060_v37 = vpop.xlane.xlu0 %1067 }
 0x8c5   :  { %v722_v47 = vpop.permute.xlu1 %721 }
 0x8c6   :  { %6727 = vmatpush3.msk.msra.mxu1 %vm390_vm3, %v722_v47  ;;  %v3447_v47 = vmul.f32 1.442695, %v3446_v44  ;;  %v8066_v44 = vpop.xlane.xlu0 %1233 }
 0x8c7   :  { %6736 = vmatprep.subr.mxu1 %v8777_v10 }
 0x8c8   :  { %7103 = vpow2.f32 %v3447_v47  ;;  %v8071_v47 = vrot.slane %v7523_v55, 4 }
 0x8c9   :  { %7105 = vpow2.f32 %v3799_v45 }
 0x8ca   :  { %v8075_v54 = vpop.xlane.xlu0 %1400 }
 0x8cc   :  { %2092 = vrot.lane.b32.xlu0 %v7997_v18, %s7235_s18  ;;  %v8044_v14 = vpop.eup %7101 }
 0x8cd   :  { %8786 = vst [vmem:[#allocation4_spill] sm:$0xff] %v8044_v14  ;;  %v4304_v58 = vsel %vm374_vm4, %v8044_v14, 0.0 }
 0x8ce   :  { %v8077_v45 = vpop.xlane.xlu0 %1567 }
 0x8d5   :  { %v8048_v50 = vpop.eup %7103 }
 0x8d6   :  { %v3449_v46 = vsel %vm374_vm4, %v8048_v50, 0.0  ;;  %v8054_v39 = vpop.eup %7105 }
 0x8db   :  { %3283 = vadd.xlane.f32.xlu1 %v3282_v12  ;;  %v3968_v12 = vmul.f32 1.442695, %v3967_v59  ;;  %v4648_v59 = vsub.f32 %v7872_v20, %v7980_v0 }
 0x8dd   :  { %7107 = vpow2.f32 %v3968_v12  ;;  %v8081_v12 = vpop.xlane.xlu0 %1752 }
 0x8df   :  { %3617 = vadd.xlane.f32.xlu1 %v3616_v26  ;;  %v4134_v26 = vsub.f32 %v7856_v53, %v7970_v62  ;;  %v3801_v53 = vsel %vm374_vm4, %v8054_v39, 0.0 }
 0x8ea   :  { %v8058_v62 = vpop.eup %7107 }
 0x8eb   :  { %711 = vmax.xlane.f32.xlu0 %v710_v21  ;;  %v4135_v21 = vmul.f32 1.442695, %v4134_v26  ;;  %v3970_v29 = vsel %vm374_vm4, %v8058_v62, 0.0  ;;  %v4649_v26 = vmul.f32 1.442695, %v4648_v59 }
 0x8ed   :  { %7109 = vpow2.f32 %v4135_v21  ;;  %v4982_v21 = vsub.f32 %v7906_v15, %v7992_v11 }
 0x8ee   :  { %7111 = vpow2.f32 %v4649_v26 }
 0x8ef   :  { %v4983_v55 = vmul.f32 1.442695, %v4982_v21 }
 0x8f0   :  { %2606 = vrot.lane.b32.xlu1 %v8027_v31, %s7232_s28 }
 0x8f1   :  { %7113 = vpow2.f32 %v4983_v55 }
 0x8f4   :  { %2773 = vrot.lane.b32.xlu1 %v8027_v31, %s7235_s18 }
 0x8f8   :  { %2940 = vrot.lane.b32.xlu1 %v8027_v31, %s7236_s19 }
 0x8fa   :  { %v8064_v23 = vpop.eup %7109 }
 0x8fb   :  { %v4137_v38 = vsel %vm374_vm4, %v8064_v23, 0.0 }
 0x901   :  { %2259 = vrot.lane.b32.xlu0 %v7997_v18, %s7236_s19 }
 0x91c   :  { %4305 = vadd.xlane.f32.xlu1 %v4304_v58  ;;  %v5662_v58 = vpop.xlane.xlu0 %5661 }
 0x91d   :  { %v5663_v10 = vsub.f32 %v7926_v28, %v5662_v58 }
 0x91f   :  { %v5664_v34 = vmul.f32 1.442695, %v5663_v10  ;;  %v4482_v10 = vsub.f32 %v7867_v6, %v7976_v49  ;;  %v5163_v6 = vsub.f32 %v7910_v3, %v8001_v2  ;;  %v5329_v49 = vsub.f32 %v7914_v22, %v8003_v24 }
 0x920   :  { %3450 = vadd.xlane.f32.xlu0 %v3449_v46  ;;  %v8085_v46 = vpop.xlane.xlu0 %1921 }
 0x921   :  { %v5330_v58 = vmul.f32 1.442695, %v5329_v49  ;;  %v2089_v49 = vpop.xlane.xlu1 %2088 }
 0x924   :  { %3802 = vadd.xlane.f32.xlu0 %v3801_v53  ;;  %v8087_v53 = vpop.permute.xlu0 %888 }
 0x928   :  { %3971 = vadd.xlane.f32.xlu0 %v3970_v29  ;;  %v8089_v29 = vpop.eup %7111 }
 0x929   :  { %8787 = vst [vmem:[#allocation5_spill] sm:$0xff] %v8089_v29  ;;  %v4651_v20 = vsel %vm374_vm4, %v8089_v29, 0.0  ;;  %v8095_v0 = vpop.eup %7113 }
 0x92a   :  { %8788 = vst [vmem:[#allocation6_spill] sm:$0xff] %v8095_v0  ;;  %v4985_v15 = vsel %vm374_vm4, %v8095_v0, 0.0 }
 0x92c   :  { %4138 = vadd.xlane.f32.xlu0 %v4137_v38  ;;  %v8091_v38 = vpop.xlane.xlu0 %2255 }
 0x92d   :  { %3454 = vrot.lane.b32.xlu1 %v8071_v47, %s7235_s18 }
 0x930   :  { %v8097_v59 = vpop.xlane.xlu0 %2436 }
 0x934   :  { %v8101_v11 = vpop.permute.xlu0 %1404 }
 0x938   :  { %v8103_v26 = vpop.permute.xlu0 %1571 }
 0x93c   :  { %v8105_v21 = vpop.xlane.xlu0 %2769 }
 0x940   :  { %v8109_v55 = vpop.xlane.xlu0 %3117 }
 0x951   :  { %4652 = vadd.xlane.f32.xlu1 %v4651_v20  ;;  %v8115_v20 = vpop.permute.xlu0 %2092 }
 0x955   :  { %4986 = vadd.xlane.f32.xlu1 %v4985_v15 }
 0x966   :  { %3975 = vrot.lane.b32.xlu1 %v7541_v61, %s7232_s28 }
 0x96a   :  { %4142 = vrot.lane.b32.xlu1 %v7541_v61, %s7235_s18 }
 0x96e   :  { %4309 = vrot.lane.b32.xlu1 %v7541_v61, %s7236_s19 }
 0x974   :  { %v712_v15 = vpop.xlane.xlu0 %711 }
 0x975   :  { %v713_v40 = vsub.f32 %v8022_v56, %v712_v15  ;;  %v4815_v56 = vsub.f32 %v7876_v27, %v7984_v13 }
 0x977   :  { %v714_v35 = vmul.f32 1.442695, %v713_v40  ;;  %v8127_v40 = vrot.slane %v7530_v57, 5 }
 0x978   :  { %v8159_v2 = vpop.permute.xlu0 %2259 }
 0x979   :  { %7115 = vpow2.f32 %v714_v35 }
 0x97a   :  { %7117 = vpow2.f32 %v5664_v34  ;;  %v4483_v34 = vmul.f32 1.442695, %v4482_v10 }
 0x97c   :  { %7119 = vpow2.f32 %v4483_v34 }
 0x986   :  { %v7116_v17 = vpop.eup %7115 }
 0x987   :  { %v716_v0 = vsel %vm374_vm4, %v7116_v17, 0.0  ;;  %v8120_v29 = vpop.eup %7117 }
 0x988   :  { %717 = vadd.xlane.f32.xlu0 %v716_v0  ;;  %v5666_v14 = vsel %vm374_vm4, %v8120_v29, 0.0  ;;  %v5496_v0 = vsub.f32 %v7920_v9, %v8005_v19 }
 0x989   :  { %v8135_v35 = vpop.eup %7119 }
 0x98a   :  { %v4485_v28 = vsel %vm374_vm4, %v8135_v35, 0.0  ;;  %v5497_v15 = vmul.f32 1.442695, %v5496_v0 }
 0x992   :  { %5667 = vadd.xlane.f32.xlu1 %v5666_v14  ;;  %v4816_v14 = vmul.f32 1.442695, %v4815_v56 }
 0x994   :  { %7121 = vpow2.f32 %v4816_v14 }
 0x99e   :  { %3287 = vrot.lane.b32.xlu0 %v8071_v47, %s7232_s28 }
 0x9a1   :  { %v8149_v10 = vpop.eup %7121 }
 0x9a2   :  { %v4818_v27 = vsel %vm374_vm4, %v8149_v10, 0.0 }
 0x9a3   :  { %5504 = vrot.lane.b32.xlu1 %v8127_v40, %s7235_s18 }
 0x9a7   :  { %966 = vrot.lane.b32.xlu1 %v7916_v7, %s7234_s17  ;;  %v5164_v7 = vmul.f32 1.442695, %v5163_v6 }
 0x9a9   :  { %7123 = vpow2.f32 %v5164_v7  ;;  %v8165_v19 = vpop.xlane.xlu0 %3450  ;;  %v8176_v7 = vrot.slane %v7530_v57, 2  ;;  %v1238_v57 = vpop.permute.xlu1 %1237 }
 0x9aa   :  { %7125 = vpow2.f32 %v5330_v58 }
 0x9ab   :  { %7127 = vpow2.f32 %v5497_v15 }
 0x9b6   :  { %v8153_v13 = vpop.eup %7123 }
 0x9b7   :  { %v5166_v3 = vsel %vm374_vm4, %v8153_v13, 0.0  ;;  %v8157_v22 = vpop.eup %7125 }
 0x9b8   :  { %v5332_v9 = vsel %vm374_vm4, %v8157_v22, 0.0  ;;  %v8163_v24 = vpop.eup %7127 }
 0x9b9   :  { %v5499_v34 = vsel %vm374_vm4, %v8163_v24, 0.0 }
 0x9bd   :  { %4486 = vadd.xlane.f32.xlu0 %v4485_v28  ;;  %v8169_v28 = vpop.xlane.xlu0 %3802 }
 0x9c1   :  { %v8171_v56 = vpop.xlane.xlu0 %3971 }
 0x9c5   :  { %v8173_v14 = vpop.xlane.xlu0 %4138 }
 0x9d3   :  { %3621 = vrot.lane.b32.xlu0 %v8071_v47, %s7236_s19 }
 0x9f2   :  { %4819 = vadd.xlane.f32.xlu0 %v4818_v27 }
 0x9f6   :  { %5167 = vadd.xlane.f32.xlu0 %v5166_v3 }
 0x9fa   :  { %5333 = vadd.xlane.f32.xlu0 %v5332_v9 }
 0x9fe   :  { %5500 = vadd.xlane.f32.xlu0 %v5499_v34 }
 0xa11   :  { %v718_v6 = vpop.xlane.xlu0 %717 }
 0xa12   :  { %7129 = vrcp.f32 %v718_v6 }
 0xa13   :  { %7131 = vrcp.f32 %v8050_v33 }
 0xa14   :  { %4656 = vrot.lane.b32.xlu0 %v8176_v7, %s7232_s28  ;;  %7133 = vrcp.f32 %v8060_v37  ;;  %v8789_v37 = vmov 0.0  }
 0xa15   :  { %7135 = vrcp.f32 %v8066_v44  ;;  %v2603_v44 = vpop.xlane.xlu1 %2602 }
 0xa16   :  { %7137 = vrcp.f32 %v8075_v54 }
 0xa17   :  { %7139 = vrcp.f32 %v8077_v45 }
 0xa18   :  { %4823 = vrot.lane.b32.xlu0 %v8176_v7, %s7235_s18  ;;  %7141 = vrcp.f32 %v8081_v12 }
 0xa19   :  { %v2937_v15 = vpop.xlane.xlu1 %2936  ;;  %7143 = vrcp.f32 %v8085_v46 }
 0xa1a   :  { %7145 = vrcp.f32 %v2089_v49 }
 0xa1b   :  { %7147 = vrcp.f32 %v8091_v38 }
 0xa1c   :  { %4990 = vrot.lane.b32.xlu0 %v8176_v7, %s7236_s19  ;;  %7149 = vrcp.f32 %v8097_v59 }
 0xa1d   :  { %7151 = vrcp.f32 %v2603_v44 }
 0xa1e   :  { %7153 = vrcp.f32 %v8105_v21 }
 0xa1f   :  { %v7130_v58 = vpop.eup %7129  ;;  %7155 = vrcp.f32 %v2937_v15 }
 0xa20   :  { %5337 = vrot.lane.b32.xlu0 %v8127_v40, %s7232_s28  ;;  %v720_v33 = vmul.f32 %v7130_v58, %v7116_v17  ;;  %v7132_v0 = vpop.eup %7131  ;;  %7157 = vrcp.f32 %v8109_v55 }
 0xa21   :  { %v887_v54 = vmul.f32 %v7132_v0, %v7878_v32  ;;  %v7134_v17 = vpop.eup %7133 }
 0xa22   :  { %6729 = vmatmul.mubr.msk.f32.vlgmr.msra.gmra.mxu1 %vm386_vm5, %v720_v33  ;;  %v1070_v45 = vmul.f32 %v7134_v17, %v7884_v43  ;;  %v1926_v43 = vpop.permute.xlu1 %1925 }
 0xa23   :  { %6737 = vmatpush3.msk.msra.mxu1 %vm390_vm3, %v8087_v53  ;;  %6738 = vmatprep.mubr.msk.f32.mxu1 %vm7229_vm1, %v8789_v37  ;;  %v7136_v53 = vpop.eup %7135 }
 0xa24   :  { %5671 = vrot.lane.b32.xlu0 %v8127_v40, %s7236_s19  ;;  %6746 = vmatprep.subr.mxu1 %v8789_v37  ;;  %v1236_v32 = vmul.f32 %v7136_v53, %v7888_v30 }
 0xa26   :  { %6739 = vmatmul.mubr.msk.f32.vlgmr.msra.gmra.mxu1 %vm386_vm5, %v887_v54  ;;  %v3284_v30 = vpop.xlane.xlu1 %3283 }
 0xa27   :  { %6747 = vmatpush3.msk.msra.mxu1 %vm390_vm3, %v7954_v42  ;;  %6748 = vmatprep.mubr.msk.f32.mxu1 %vm7229_vm1, %v8789_v37  ;;  %v7138_v42 = vpop.eup %7137  ;;  %7159 = vrcp.f32 %v3284_v30 }
 0xa28   :  { %6756 = vmatprep.subr.mxu1 %v8789_v37  ;;  %v1403_v12 = vmul.f32 %v7138_v42, %v7892_v48  ;;  %v7140_v46 = vpop.eup %7139  ;;  %7161 = vrcp.f32 %v8165_v19 }
 0xa29   :  { %v7142_v27 = vpop.eup %7141 }
 0xa2a   :  { %6749 = vmatmul.mubr.msk.f32.vlgmr.msra.gmra.mxu1 %vm386_vm5, %v1070_v45  ;;  %v1755_v48 = vmul.f32 %v7142_v27, %v7901_v60  ;;  %v7144_v38 = vpop.eup %7143 }
 0xa2b   :  { %6757 = vmatpush3.msk.msra.mxu1 %vm390_vm3, %v1238_v57  ;;  %6758 = vmatprep.mubr.msk.f32.mxu1 %vm7229_vm1, %v8789_v37 }
 0xa2c   :  { %6766 = vmatprep.subr.mxu1 %v8789_v37 }
 0xa2e   :  { %6759 = vmatmul.mubr.msk.f32.vlgmr.msra.gmra.mxu1 %vm386_vm5, %v1236_v32 }
 0xa2f   :  { %6767 = vmatpush3.msk.msra.mxu1 %vm390_vm3, %v8101_v11  ;;  %6768 = vmatprep.mubr.msk.f32.mxu1 %vm7229_vm1, %v8789_v37  ;;  %v1570_v11 = vmul.f32 %v7140_v46, %v7896_v51  ;;  %v1924_v51 = vmul.f32 %v7144_v38, %v7930_v52 }
 0xa30   :  { %6776 = vmatprep.subr.mxu1 %v8789_v37 }
 0xa32   :  { %6769 = vmatmul.mubr.msk.f32.vlgmr.msra.gmra.mxu1 %vm386_vm5, %v1403_v12 }
 0xa33   :  { %6777 = vmatpush3.msk.msra.mxu1 %vm390_vm3, %v8103_v26  ;;  %6778 = vmatprep.mubr.msk.f32.mxu1 %vm7229_vm1, %v8789_v37  ;;  %v3618_v26 = vpop.xlane.xlu1 %3617 }
 0xa34   :  { %6786 = vmatprep.subr.mxu1 %v8789_v37  ;;  %7163 = vrcp.f32 %v3618_v26 }
 0xa35   :  { %7165 = vrcp.f32 %v8169_v28 }
 0xa36   :  { %6779 = vmatmul.mubr.msk.f32.vlgmr.msra.gmra.mxu1 %vm386_vm5, %v1570_v11  ;;  %7167 = vrcp.f32 %v8171_v56  ;;  %v8791_v11 = vld [vmem:[#allocation5_spill] sm:$0xff] }
 0xa37   :  { %6787 = vmatpush3.msk.msra.mxu1 %vm390_vm3, %v7997_v18  ;;  %6788 = vmatprep.mubr.msk.f32.mxu1 %vm7229_vm1, %v8789_v37  ;;  %v7146_v18 = vpop.eup %7145  ;;  %v2607_v60 = vpop.permute.xlu1 %2606  ;;  %7169 = vrcp.f32 %v8173_v14 }
 0xa38   :  { %6796 = vmatprep.subr.mxu1 %v8789_v37  ;;  %v2091_v59 = vmul.f32 %v7146_v18, %v7941_v8  ;;  %v7148_v3 = vpop.eup %7147 }
 0xa39   :  { %v2258_v52 = vmul.f32 %v7148_v3, %v7945_v4  ;;  %v7150_v21 = vpop.eup %7149 }
 0xa3a   :  { %6789 = vmatmul.mubr.msk.f32.vlgmr.msra.gmra.mxu1 %vm386_vm5, %v1755_v48  ;;  %v2439_v8 = vmul.f32 %v7150_v21, %v7949_v16 }
 0xa3b   :  { %6797 = vmatpush3.msk.msra.mxu1 %vm390_vm3, %v1926_v43  ;;  %6798 = vmatprep.mubr.msk.f32.mxu1 %vm7229_vm1, %v8789_v37 }
 0xa3c   :  { %6806 = vmatprep.subr.mxu1 %v8789_v37 }
 0xa3e   :  { %6799 = vmatmul.mubr.msk.f32.vlgmr.msra.gmra.mxu1 %vm386_vm5, %v1924_v51 }
 0xa3f   :  { %6807 = vmatpush3.msk.msra.mxu1 %vm390_vm3, %v8115_v20  ;;  %6808 = vmatprep.mubr.msk.f32.mxu1 %vm7229_vm1, %v8789_v37  ;;  %v2774_v20 = vpop.permute.xlu1 %2773 }
 0xa40   :  { %6816 = vmatprep.subr.mxu1 %v8789_v37 }
 0xa42   :  { %6809 = vmatmul.mubr.msk.f32.vlgmr.msra.gmra.mxu1 %vm386_vm5, %v2091_v59 }
 0xa43   :  { %6817 = vmatpush3.msk.msra.mxu1 %vm390_vm3, %v8159_v2  ;;  %6818 = vmatprep.mubr.msk.f32.mxu1 %vm7229_vm1, %v8789_v37  ;;  %v7152_v2 = vpop.eup %7151  ;;  %v2941_v4 = vpop.permute.xlu1 %2940 }
 0xa44   :  { %6826 = vmatprep.subr.mxu1 %v8789_v37  ;;  %v7154_v9 = vpop.eup %7153 }
 0xa45   :  { %v2772_v55 = vmul.f32 %v7154_v9, %v7982_v36  ;;  %v7156_v34 = vpop.eup %7155  ;;  %v3288_v36 = vpop.permute.xlu0 %3287 }
 0xa46   :  { %6819 = vmatmul.mubr.msk.f32.vlgmr.msra.gmra.mxu1 %vm386_vm5, %v2258_v52  ;;  %v7158_v6 = vpop.eup %7157 }
 0xa47   :  { %6827 = vmatpush3.msk.msra.mxu1 %vm390_vm3, %v8027_v31  ;;  %6828 = vmatprep.mubr.msk.f32.mxu1 %vm7229_vm1, %v8789_v37  ;;  %v2605_v31 = vmul.f32 %v7152_v2, %v7968_v1  ;;  %v4306_v16 = vpop.xlane.xlu1 %4305  ;;  %v2939_v1 = vmul.f32 %v7156_v34, %v7974_v63  ;;  %v3120_v19 = vmul.f32 %v7158_v6, %v7988_v25  ;;  %v7160_v58 = vpop.eup %7159 }
 0xa48   :  { %6836 = vmatprep.subr.mxu1 %v8789_v37  ;;  %v7162_v28 = vpop.eup %7161  ;;  %7171 = vrcp.f32 %v4306_v16 }
 0xa49   :  { %v4487_v63 = vpop.xlane.xlu0 %4486  ;;  %v3453_v56 = vmul.f32 %v7162_v28, %v8048_v50  ;;  %v7164_v33 = vpop.eup %7163  ;;  %v74_v28 = vld [vmem:[%s8764_s5 + $0x10] sm:$0xff] }
 0xa4a   :  { %6829 = vmatmul.mubr.msk.f32.vlgmr.msra.gmra.mxu1 %vm386_vm5, %v2439_v8  ;;  %v7166_v14 = vpop.eup %7165  ;;  %7173 = vrcp.f32 %v4487_v63 }
 0xa4b   :  { %6837 = vmatpush3.msk.msra.mxu1 %vm390_vm3, %v2607_v60  ;;  %6838 = vmatprep.mubr.msk.f32.mxu1 %vm7229_vm1, %v8789_v37  ;;  %v3455_v49 = vpop.permute.xlu1 %3454  ;;  %v3805_v50 = vmul.f32 %v7166_v14, %v8054_v39  ;;  %v7168_v54 = vpop.eup %7167  ;;  %v8792_v60 = vld [vmem:[#allocation6_spill] sm:$0xff] }
 0xa4c   :  { %6846 = vmatprep.subr.mxu1 %v8789_v37  ;;  %v7170_v17 = vpop.eup %7169 }
 0xa4d   :  { %v3622_v0 = vpop.permute.xlu0 %3621  ;;  %v4141_v39 = vmul.f32 %v7170_v17, %v8064_v23 }
 0xa4e   :  { %6839 = vmatmul.mubr.msk.f32.vlgmr.msra.gmra.mxu1 %vm386_vm5, %v2605_v31 }
 0xa4f   :  { %6847 = vmatpush3.msk.msra.mxu1 %vm390_vm3, %v2774_v20  ;;  %6848 = vmatprep.mubr.msk.f32.mxu1 %vm7229_vm1, %v8789_v37  ;;  %v4653_v57 = vpop.xlane.xlu1 %4652 }
 0xa50   :  { %6856 = vmatprep.subr.mxu1 %v8789_v37  ;;  %7175 = vrcp.f32 %v4653_v57 }
 0xa52   :  { %6849 = vmatmul.mubr.msk.f32.vlgmr.msra.gmra.mxu1 %vm386_vm5, %v2772_v55 }
 0xa53   :  { %6857 = vmatpush3.msk.msra.mxu1 %vm390_vm3, %v2941_v4  ;;  %6858 = vmatprep.mubr.msk.f32.mxu1 %vm7229_vm1, %v8789_v37  ;;  %v4987_v25 = vpop.xlane.xlu1 %4986 }
 0xa54   :  { %6866 = vmatprep.subr.mxu1 %v8789_v37 }
 0xa55   :  { %v7172_v45 = vpop.eup %7171 }
 0xa56   :  { %6859 = vmatmul.mubr.msk.f32.vlgmr.msra.gmra.mxu1 %vm386_vm5, %v2939_v1 }
 0xa57   :  { %6867 = vmatpush3.msk.msra.mxu1 %vm390_vm3, %v8071_v47  ;;  %6868 = vmatprep.mubr.msk.f32.mxu1 %vm7229_vm1, %v8789_v37  ;;  %v3286_v47 = vmul.f32 %v7160_v58, %v8013_v41  ;;  %v3620_v41 = vmul.f32 %v7164_v33, %v8017_v5  ;;  %v3976_v44 = vpop.permute.xlu1 %3975  ;;  %v7174_v32 = vpop.eup %7173  ;;  %v76_v58 = vld [vmem:[%s8764_s5 + $0x20] sm:$0xff]  ;;  %v73_v33 = vld [vmem:[%s8764_s5 + $0x8] sm:$0xff] }
 0xa58   :  { %6876 = vmatprep.subr.mxu1 %v8789_v37  ;;  %v4489_v23 = vmul.f32 %v7174_v32, %v8135_v35 }
 0xa5a   :  { %6869 = vmatmul.mubr.msk.f32.vlgmr.msra.gmra.mxu1 %vm386_vm5, %v3120_v19  ;;  %v77_v19 = vld [vmem:[%s8764_s5 + $0x28] sm:$0xff] }
 0xa5b   :  { %6877 = vmatpush3.msk.msra.mxu1 %vm390_vm3, %v3288_v36  ;;  %6878 = vmatprep.mubr.msk.f32.mxu1 %vm7229_vm1, %v8789_v37  ;;  %v4143_v5 = vpop.permute.xlu1 %4142 }
 0xa5c   :  { %6886 = vmatprep.subr.mxu1 %v8789_v37 }
 0xa5d   :  { %v7176_v46 = vpop.eup %7175 }
 0xa5e   :  { %6879 = vmatmul.mubr.msk.f32.vlgmr.msra.gmra.mxu1 %vm386_vm5, %v3286_v47  ;;  %v4655_v35 = vmul.f32 %v7176_v46, %v8791_v11  ;;  %v75_v47 = vld [vmem:[%s8764_s5 + $0x18] sm:$0xff] }
 0xa5f   :  { %6887 = vmatpush3.msk.msra.mxu1 %vm390_vm3, %v3455_v49  ;;  %6888 = vmatprep.mubr.msk.f32.mxu1 %vm7229_vm1, %v8789_v37  ;;  %v4310_v53 = vpop.permute.xlu1 %4309  ;;  %v78_v49 = vld [vmem:[%s8764_s5 + $0x30] sm:$0xff] }
 0xa60   :  { %6896 = vmatprep.subr.mxu1 %v8789_v37 }
 0xa62   :  { %6889 = vmatmul.mubr.msk.f32.vlgmr.msra.gmra.mxu1 %vm386_vm5, %v3453_v56 }
 0xa63   :  { %6897 = vmatpush3.msk.msra.mxu1 %vm390_vm3, %v3622_v0  ;;  %6898 = vmatprep.mubr.msk.f32.mxu1 %vm7229_vm1, %v8789_v37  ;;  %v5668_v51 = vpop.xlane.xlu1 %5667  ;;  %v72_v0 = vld [vmem:[%s8764_s5] sm:$0xff] }
 0xa64   :  { %6906 = vmatprep.subr.mxu1 %v8789_v37 }
 0xa66   :  { %6899 = vmatmul.mubr.msk.f32.vlgmr.msra.gmra.mxu1 %vm386_vm5, %v3620_v41 }
 0xa67   :  { %6907 = vmatpush3.msk.msra.mxu1 %vm390_vm3, %v7541_v61  ;;  %6908 = vmatprep.mubr.msk.f32.mxu1 %vm7229_vm1, %v8789_v37  ;;  %v3974_v61 = vmul.f32 %v7168_v54, %v8058_v62  ;;  %v8790_v62 = vld [vmem:[#allocation4_spill] sm:$0xff]  ;;  %v5505_v8 = vpop.permute.xlu1 %5504 }
 0xa68   :  { %6916 = vmatprep.subr.mxu1 %v8789_v37  ;;  %v4308_v15 = vmul.f32 %v7172_v45, %v8790_v62 }
 0xa6a   :  { %6909 = vmatmul.mubr.msk.f32.vlgmr.msra.gmra.mxu1 %vm386_vm5, %v3805_v50 }
 0xa6b   :  { %6917 = vmatpush3.msk.msra.mxu1 %vm390_vm3, %v3976_v44  ;;  %6918 = vmatprep.mubr.msk.f32.mxu1 %vm7229_vm1, %v8789_v37 }
 0xa6c   :  { %6926 = vmatprep.subr.mxu1 %v8789_v37 }
 0xa6e   :  { %6919 = vmatmul.mubr.msk.f32.vlgmr.msra.gmra.mxu1 %vm386_vm5, %v3974_v61 }
 0xa6f   :  { %6927 = vmatpush3.msk.msra.mxu1 %vm390_vm3, %v4143_v5  ;;  %6928 = vmatprep.mubr.msk.f32.mxu1 %vm7229_vm1, %v8789_v37 }
 0xa70   :  { %6936 = vmatprep.subr.mxu1 %v8789_v37 }
 0xa72   :  { %6929 = vmatmul.mubr.msk.f32.vlgmr.msra.gmra.mxu1 %vm386_vm5, %v4141_v39 }
 0xa73   :  { %6937 = vmatpush3.msk.msra.mxu1 %vm390_vm3, %v4310_v53  ;;  %6938 = vmatprep.mubr.msk.f32.mxu1 %vm7229_vm1, %v8789_v37 }
 0xa74   :  { %6946 = vmatprep.subr.mxu1 %v8789_v37 }
 0xa76   :  { %6939 = vmatmul.mubr.msk.f32.vlgmr.msra.gmra.mxu1 %vm386_vm5, %v4308_v15 }
 0xa77   :  { %6947 = vmatpush3.msk.msra.mxu1 %vm390_vm3, %v8176_v7  ;;  %6948 = vmatprep.mubr.msk.f32.mxu1 %vm7229_vm1, %v8789_v37 }
 0xa78   :  { %6956 = vmatprep.subr.mxu1 %v8789_v37 }
 0xa7a   :  { %6949 = vmatmul.mubr.msk.f32.vlgmr.msra.gmra.mxu1 %vm386_vm5, %v4489_v23 }
 0xa7b   :  { %v4820_v42 = vpop.xlane.xlu0 %4819  ;;  %6958 = vmatprep.mubr.msk.f32.mxu1 %vm7229_vm1, %v8789_v37 }
 0xa7c   :  { %7177 = vrcp.f32 %v4820_v42 }
 0xa7d   :  { %7179 = vrcp.f32 %v4987_v25 }
 0xa7f   :  { %v5168_v43 = vpop.xlane.xlu0 %5167 }
 0xa80   :  { %7181 = vrcp.f32 %v5168_v43 }
 0xa83   :  { %v5334_v12 = vpop.xlane.xlu0 %5333 }
 0xa84   :  { %7183 = vrcp.f32 %v5334_v12 }
 0xa87   :  { %v5501_v7 = vpop.xlane.xlu0 %5500 }
 0xa88   :  { %7185 = vrcp.f32 %v5501_v7 }
 0xa89   :  { %v7178_v27 = vpop.eup %7177  ;;  %7187 = vrcp.f32 %v5668_v51 }
 0xa8a   :  { %v4822_v38 = vmul.f32 %v7178_v27, %v8149_v10  ;;  %v7180_v26 = vpop.eup %7179 }
 0xa8b   :  { %v4657_v30 = vpop.permute.xlu0 %4656  ;;  %v4989_v59 = vmul.f32 %v7180_v26, %v8792_v60 }
 0xa8c   :  { %6957 = vmatpush3.msk.msra.mxu1 %vm390_vm3, %v4657_v30 }
 0xa8d   :  { %6959 = vmatmul.mubr.msk.f32.vlgmr.msra.gmra.mxu1 %vm386_vm5, %v4655_v35  ;;  %6966 = vmatprep.subr.mxu1 %v8789_v37  ;;  %v7182_v3 = vpop.eup %7181 }
 0xa8e   :  { %6968 = vmatprep.mubr.msk.f32.mxu1 %vm7229_vm1, %v8789_v37  ;;  %v5170_v52 = vmul.f32 %v7182_v3, %v8153_v13 }
 0xa8f   :  { %v4824_v48 = vpop.permute.xlu0 %4823 }
 0xa90   :  { %6967 = vmatpush3.msk.msra.mxu1 %vm390_vm3, %v4824_v48 }
 0xa91   :  { %6969 = vmatmul.mubr.msk.f32.vlgmr.msra.gmra.mxu1 %vm386_vm5, %v4822_v38  ;;  %6976 = vmatprep.subr.mxu1 %v8789_v37  ;;  %v7184_v21 = vpop.eup %7183 }
 0xa92   :  { %6978 = vmatprep.mubr.msk.f32.mxu1 %vm7229_vm1, %v8789_v37 }
 0xa93   :  { %v4991_v18 = vpop.permute.xlu0 %4990 }
 0xa94   :  { %6977 = vmatpush3.msk.msra.mxu1 %vm390_vm3, %v4991_v18 }
 0xa95   :  { %6979 = vmatmul.mubr.msk.f32.vlgmr.msra.gmra.mxu1 %vm386_vm5, %v4989_v59  ;;  %6986 = vmatprep.subr.mxu1 %v8789_v37  ;;  %v7186_v20 = vpop.eup %7185 }
 0xa96   :  { %6987 = vmatpush3.msk.msra.mxu1 %vm390_vm3, %v8127_v40  ;;  %6988 = vmatprep.mubr.msk.f32.mxu1 %vm7229_vm1, %v8789_v37  ;;  %v5336_v40 = vmul.f32 %v7184_v21, %v8157_v22  ;;  %v5503_v13 = vmul.f32 %v7186_v20, %v8163_v24  ;;  %v7188_v2 = vpop.eup %7187 }
 0xa97   :  { %v5338_v10 = vpop.permute.xlu0 %5337  ;;  %6996 = vmatprep.subr.mxu1 %v8789_v37  ;;  %v5670_v22 = vmul.f32 %v7188_v2, %v8120_v29  ;;  %v79_v29 = vld [vmem:[%s8764_s5 + $0x38] sm:$0xff] }
 0xa99   :  { %6989 = vmatmul.mubr.msk.f32.vlgmr.msra.gmra.mxu1 %vm386_vm5, %v5170_v52 }
 0xa9a   :  { %6997 = vmatpush3.msk.msra.mxu1 %vm390_vm3, %v5338_v10  ;;  %6998 = vmatprep.mubr.msk.f32.mxu1 %vm7229_vm1, %v8789_v37 }
 0xa9b   :  { %7006 = vmatprep.subr.mxu1 %v8789_v37  ;;  %v5672_v4 = vpop.permute.xlu0 %5671 }
 0xa9d   :  { %6999 = vmatmul.mubr.msk.f32.vlgmr.msra.gmra.mxu1 %vm386_vm5, %v5336_v40 }
 0xa9e   :  { %7007 = vmatpush3.msk.msra.mxu1 %vm390_vm3, %v5505_v8  ;;  %7008 = vmatprep.mubr.msk.f32.mxu1 %vm7229_vm1, %v8789_v37 }
 0xa9f   :  { %7016 = vmatprep.subr.mxu1 %v8789_v37 }
 0xaa1   :  { %7009 = vmatmul.mubr.msk.f32.vlgmr.msra.gmra.mxu1 %vm386_vm5, %v5503_v13 }
 0xaa2   :  { %7017 = vmatpush3.msk.msra.mxu1 %vm390_vm3, %v5672_v4  ;;  %7018 = vmatprep.mubr.msk.f32.mxu1 %vm7229_vm1, %v8789_v37 }
 0xaa3   :  { %7021 = vmatprep.subr.mxu1 %v8789_v37 }
 0xaa5   :  { %7019 = vmatmul.mubr.msk.f32.vlgmr.msra.gmra.mxu1 %vm386_vm5, %v5670_v22 }
 0xaa6   :  { %7037 = vmatprep.mubr.msk.f32.mxu1 %vm7229_vm1, %v8789_v37  ;;  %7022 = vmatpush3.msra.mxu1 %v79_v29 }
 0xaa7   :  { %7023 = vmatprep.subr.mxu1 %v8789_v37 }
 0xaa8   :  { %7024 = vmatpush3.msra.mxu1 %v78_v49  ;;  %v967_v49 = vpop.permute.xlu1 %966 }
 0xaa9   :  { %7025 = vmatprep.subr.mxu1 %v8789_v37 }
 0xaaa   :  { %7026 = vmatpush3.msra.mxu1 %v77_v19 }
 0xaab   :  { %7027 = vmatprep.subr.mxu1 %v8789_v37 }
 0xaac   :  { %7028 = vmatpush3.msra.mxu1 %v76_v58 }
 0xaad   :  { %7029 = vmatprep.subr.mxu1 %v8789_v37 }
 0xaae   :  { %7030 = vmatpush3.msra.mxu1 %v75_v47 }
 0xaaf   :  { %7031 = vmatprep.subr.mxu1 %v8789_v37 }
 0xab0   :  { %7032 = vmatpush3.msra.mxu1 %v74_v28 }
 0xab1   :  { %7033 = vmatprep.subr.mxu1 %v8789_v37 }
 0xab2   :  { %7034 = vmatpush3.msra.mxu1 %v73_v33 }
 0xab3   :  { %7035 = vmatprep.subr.mxu1 %v8789_v37 }
 0xab4   :  { %7036 = vmatpush3.msra.mxu1 %v72_v0  ;;  %v8793_v0 = vld [vmem:[#allocation3_spill] sm:$0xff] }
 0xae2   :  { %v794_v31 = vpop.f32.mrf.mxu1 }
 0xae3   :  { %970 = vrot.lane.b32.xlu0 %v794_v31, %s7233_s16 }
 0xae4   :  { %v6730_v24 = vpop.f32.mrf.mxu1 }
 0xae6   :  { %v961_v9 = vpop.f32.mrf.mxu1 }
 0xae7   :  { %974 = vrot.lane.b32.xlu1 %v961_v9, %s7231_s27 }
 0xae8   :  { %v6740_v16 = vpop.f32.mrf.mxu1 }
 0xaea   :  { %v8394_v55 = vpop.f32.mrf.mxu1 }
 0xaec   :  { %v6750_v34 = vpop.f32.mrf.mxu1 }
 0xaee   :  { %v1310_v1 = vpop.f32.mrf.mxu1 }
 0xaef   :  { %1649 = vrot.lane.b32.xlu0 %v1310_v1, %s7234_s17 }
 0xaf0   :  { %v6760_v6 = vpop.f32.mrf.mxu1 }
 0xaf2   :  { %v1477_v36 = vpop.f32.mrf.mxu1 }
 0xaf3   :  { %1653 = vrot.lane.b32.xlu0 %v1477_v36, %s7233_s16 }
 0xaf4   :  { %v6770_v57 = vpop.f32.mrf.mxu1 }
 0xaf6   :  { %v1644_v63 = vpop.f32.mrf.mxu1 }
 0xaf7   :  { %1657 = vrot.lane.b32.xlu0 %v1644_v63, %s7231_s27 }
 0xaf8   :  { %v6780_v25 = vpop.f32.mrf.mxu1 }
 0xafa   :  { %v8422_v56 = vpop.f32.mrf.mxu1 }
 0xafc   :  { %v6790_v41 = vpop.f32.mrf.mxu1 }
 0xafd   :  { %v977_v41 = vsel %vm298_vm2, %v8793_v0, %v967_v49 }
 0xafe   :  { %v1998_v14 = vpop.f32.mrf.mxu1 }
 0xaff   :  { %2337 = vrot.lane.b32.xlu0 %v1998_v14, %s7234_s17 }
 0xb00   :  { %v6800_v44 = vpop.f32.mrf.mxu1 }
 0xb02   :  { %v2165_v50 = vpop.f32.mrf.mxu1 }
 0xb03   :  { %2341 = vrot.lane.b32.xlu1 %v2165_v50, %s7233_s16 }
 0xb04   :  { %v6810_v54 = vpop.f32.mrf.mxu1 }
 0xb06   :  { %v2332_v5 = vpop.f32.mrf.mxu1 }
 0xb07   :  { %2345 = vrot.lane.b32.xlu1 %v2332_v5, %s7231_s27 }
 0xb08   :  { %v6820_v61 = vpop.f32.mrf.mxu1 }
 0xb0a   :  { %v8435_v17 = vpop.f32.mrf.mxu1 }
 0xb0c   :  { %v6830_v39 = vpop.f32.mrf.mxu1 }
 0xb0e   :  { %v2679_v45 = vpop.f32.mrf.mxu1 }
 0xb0f   :  { %3018 = vrot.lane.b32.xlu0 %v2679_v45, %s7234_s17 }
 0xb10   :  { %v6840_v53 = vpop.f32.mrf.mxu1 }
 0xb12   :  { %v2846_v62 = vpop.f32.mrf.mxu1 }
 0xb13   :  { %3022 = vrot.lane.b32.xlu0 %v2846_v62, %s7233_s16 }
 0xb14   :  { %v6850_v15 = vpop.f32.mrf.mxu1 }
 0xb16   :  { %v3013_v32 = vpop.f32.mrf.mxu1 }
 0xb17   :  { %3026 = vrot.lane.b32.xlu0 %v3013_v32, %s7231_s27 }
 0xb18   :  { %v6860_v23 = vpop.f32.mrf.mxu1 }
 0xb1a   :  { %v8440_v42 = vpop.f32.mrf.mxu1 }
 0xb1c   :  { %v6870_v43 = vpop.f32.mrf.mxu1 }
 0xb1e   :  { %v3360_v12 = vpop.f32.mrf.mxu1 }
 0xb1f   :  { %3699 = vrot.lane.b32.xlu1 %v3360_v12, %s7234_s17 }
 0xb20   :  { %v6880_v7 = vpop.f32.mrf.mxu1 }
 0xb22   :  { %v3527_v46 = vpop.f32.mrf.mxu1 }
 0xb23   :  { %3703 = vrot.lane.b32.xlu1 %v3527_v46, %s7233_s16 }
 0xb24   :  { %v6890_v30 = vpop.f32.mrf.mxu1 }
 0xb26   :  { %v3694_v11 = vpop.f32.mrf.mxu1 }
 0xb27   :  { %3707 = vrot.lane.b32.xlu1 %v3694_v11, %s7231_s27 }
 0xb28   :  { %v6900_v35 = vpop.f32.mrf.mxu1 }
 0xb2a   :  { %v8445_v27 = vpop.f32.mrf.mxu1 }
 0xb2c   :  { %v6910_v48 = vpop.f32.mrf.mxu1 }
 0xb2e   :  { %v4048_v38 = vpop.f32.mrf.mxu1 }
 0xb2f   :  { %4387 = vrot.lane.b32.xlu0 %v4048_v38, %s7234_s17 }
 0xb30   :  { %v6920_v26 = vpop.f32.mrf.mxu1 }
 0xb32   :  { %v4215_v51 = vpop.f32.mrf.mxu1 }
 0xb33   :  { %4391 = vrot.lane.b32.xlu0 %v4215_v51, %s7233_s16 }
 0xb34   :  { %v6930_v18 = vpop.f32.mrf.mxu1 }
 0xb36   :  { %v4382_v60 = vpop.f32.mrf.mxu1 }
 0xb37   :  { %4395 = vrot.lane.b32.xlu1 %v4382_v60, %s7231_s27 }
 0xb38   :  { %v6940_v59 = vpop.f32.mrf.mxu1 }
 0xb3a   :  { %v8450_v3 = vpop.f32.mrf.mxu1 }
 0xb3c   :  { %v6950_v10 = vpop.f32.mrf.mxu1 }
 0xb4d   :  { %v4729_v52 = vpop.f32.mrf.mxu1 }
 0xb4e   :  { %5068 = vrot.lane.b32.xlu0 %v4729_v52, %s7234_s17 }
 0xb4f   :  { %v6960_v21 = vpop.f32.mrf.mxu1 }
 0xb51   :  { %v4896_v40 = vpop.f32.mrf.mxu1 }
 0xb52   :  { %5072 = vrot.lane.b32.xlu1 %v4896_v40, %s7233_s16 }
 0xb53   :  { %v6970_v20 = vpop.f32.mrf.mxu1 }
 0xb55   :  { %v5063_v8 = vpop.f32.mrf.mxu1  ;;  %v971_v24 = vpop.permute.xlu0 %970 }
 0xb56   :  { %5076 = vrot.lane.b32.xlu1 %v5063_v8, %s7231_s27  ;;  %v979_v50 = vsel %vm978_vm8, %v977_v41, %v971_v24  ;;  %v7227_v41 = vld [vmem:[%s8759_s0 + $0x10] sm:$0xff] }
 0xb57   :  { %v6980_v13 = vpop.f32.mrf.mxu1 }
 0xb59   :  { %v8455_v2 = vpop.f32.mrf.mxu1  ;;  %v975_v36 = vpop.permute.xlu1 %974 }
 0xb5a   :  { %v981_v54 = vsel %vm980_vm9, %v979_v50, %v975_v36 }
 0xb5b   :  { %v6990_v4 = vpop.f32.mrf.mxu1 }
 0xb5d   :  { %v5410_v22 = vpop.f32.mrf.mxu1 }
 0xb5e   :  { %5749 = vrot.lane.b32.xlu0 %v5410_v22, %s7234_s17 }
 0xb5f   :  { %v7000_v31 = vpop.f32.mrf.mxu1 }
 0xb61   :  { %v5577_v9 = vpop.f32.mrf.mxu1  ;;  %v1650_v34 = vpop.permute.xlu0 %1649 }
 0xb62   :  { %5753 = vrot.lane.b32.xlu0 %v5577_v9, %s7233_s16  ;;  %v1660_v58 = vsel %vm298_vm2, %v8394_v55, %v1650_v34 }
 0xb63   :  { %v7010_v16 = vpop.f32.mrf.mxu1 }
 0xb65   :  { %v5744_v1 = vpop.f32.mrf.mxu1  ;;  %v1654_v6 = vpop.permute.xlu0 %1653 }
 0xb66   :  { %5757 = vrot.lane.b32.xlu1 %v5744_v1, %s7231_s27  ;;  %v1661_v57 = vsel %vm978_vm8, %v1660_v58, %v1654_v6 }
 0xb67   :  { %v7020_v29 = vpop.f32.mrf.mxu1 }
 0xb69   :  { %v1658_v19 = vpop.permute.xlu0 %1657 }
 0xb6a   :  { %v1662_v63 = vsel %vm980_vm9, %v1661_v57, %v1658_v19 }
 0xb6b   :  { %v5764_v25 = vrot.slane %v1662_v63, 5  ;;  %v7226_v63 = vld [vmem:[%s8759_s0 + $0x8] sm:$0xff] }
 0xb6d   :  { %v5784_v61 = vsel %vm390_vm3, %v981_v54, %v5764_v25 }
 0xb71   :  { %v2338_v47 = vpop.permute.xlu0 %2337 }
 0xb72   :  { %v2348_v33 = vsel %vm298_vm2, %v8422_v56, %v2338_v47 }
 0xb75   :  { %v2342_v28 = vpop.permute.xlu1 %2341 }
 0xb76   :  { %v2349_v14 = vsel %vm978_vm8, %v2348_v33, %v2342_v28 }
 0xb79   :  { %v2346_v44 = vpop.permute.xlu1 %2345 }
 0xb7a   :  { %v2350_v55 = vsel %vm980_vm9, %v2349_v14, %v2346_v44 }
 0xb7b   :  { %v5767_v5 = vrot.slane %v2350_v55, 2 }
 0xb7d   :  { %v5786_v39 = vsel %vm5785_vm10, %v5784_v61, %v5767_v5 }
 0xb7e   :  { %7038 = vmatmul.mubr.msk.f32.vlgmr.msra.gmra.mxu1 %vm133_vm0, %v5786_v39 }
 0xb7f   :  { %7040 = vmatprep.mubr.msk.f32.mxu1 %vm7229_vm1, %v8789_v37 }
 0xb81   :  { %v3019_v56 = vpop.permute.xlu0 %3018 }
 0xb82   :  { %v3029_v23 = vsel %vm298_vm2, %v8435_v17, %v3019_v56 }
 0xb85   :  { %v3023_v53 = vpop.permute.xlu0 %3022 }
 0xb86   :  { %v3030_v12 = vsel %vm978_vm8, %v3029_v23, %v3023_v53  ;;  %v97_v53 = vld [vmem:[%s8766_s9 + $0x70] sm:$0xff] }
 0xb87   :  { %v93_v23 = vld [vmem:[%s8766_s9 + $0x50] sm:$0xff] }
 0xb89   :  { %v3027_v15 = vpop.permute.xlu0 %3026 }
 0xb8a   :  { %v3031_v46 = vsel %vm980_vm9, %v3030_v12, %v3027_v15  ;;  %v95_v15 = vld [vmem:[%s8766_s9 + $0x60] sm:$0xff] }
 0xb8b   :  { %v5770_v48 = vrot.slane %v3031_v46, 7  ;;  %v91_v12 = vld [vmem:[%s8766_s9 + $0x40] sm:$0xff]  ;;  %v89_v46 = vld [vmem:[%s8766_s9 + $0x30] sm:$0xff] }
 0xb91   :  { %v3700_v45 = vpop.permute.xlu1 %3699 }
 0xb92   :  { %v3710_v7 = vsel %vm298_vm2, %v8440_v42, %v3700_v45  ;;  %v5787_v42 = vsel %vm3714_vm7, %v5767_v5, %v5770_v48  ;;  %v98_v45 = vld [vmem:[%s8766_s9 + $0x78] sm:$0xff]  ;;  %v85_v48 = vld [vmem:[%s8766_s9 + $0x10] sm:$0xff] }
 0xb93   :  { %5989 = vmatprep.subr.mxu1 %v98_v45  ;;  %v125_v45 = vld [vmem:[%s8769_s11 + $0xc8] sm:$0xff] }
 0xb94   :  { %5990 = vmatpush1.msra.mxu1 %v97_v53  ;;  %v109_v53 = vld [vmem:[%s8769_s11 + $0x48] sm:$0xff] }
 0xb95   :  { %v3704_v62 = vpop.permute.xlu1 %3703 }
 0xb96   :  { %v3711_v30 = vsel %vm978_vm8, %v3710_v7, %v3704_v62  ;;  %v96_v62 = vld [vmem:[%s8766_s9 + $0x68] sm:$0xff]  ;;  %v90_v7 = vld [vmem:[%s8766_s9 + $0x38] sm:$0xff] }
 0xb97   :  { %5991 = vmatprep.subr.mxu1 %v96_v62  ;;  %v124_v62 = vld [vmem:[%s8769_s11 + $0xc0] sm:$0xff] }
 0xb98   :  { %5992 = vmatpush1.msra.mxu1 %v95_v15  ;;  %v108_v15 = vld [vmem:[%s8769_s11 + $0x40] sm:$0xff] }
 0xb99   :  { %v3708_v43 = vpop.permute.xlu1 %3707 }
 0xb9a   :  { %v3712_v11 = vsel %vm980_vm9, %v3711_v30, %v3708_v43  ;;  %v92_v43 = vld [vmem:[%s8766_s9 + $0x48] sm:$0xff] }
 0xb9b   :  { %v5773_v38 = vrot.slane %v3712_v11, 4  ;;  %v88_v30 = vld [vmem:[%s8766_s9 + $0x28] sm:$0xff]  ;;  %v87_v11 = vld [vmem:[%s8766_s9 + $0x20] sm:$0xff] }
 0xb9d   :  { %v5789_v59 = vsel %vm5788_vm11, %v5787_v42, %v5773_v38  ;;  %v84_v38 = vld [vmem:[%s8766_s9 + $0x8] sm:$0xff] }
 0xba1   :  { %v4388_v32 = vpop.permute.xlu0 %4387 }
 0xba2   :  { %v4398_v26 = vsel %vm298_vm2, %v8445_v27, %v4388_v32  ;;  %v94_v32 = vld [vmem:[%s8766_s9 + $0x58] sm:$0xff] }
 0xba3   :  { %5993 = vmatprep.subr.mxu1 %v94_v32  ;;  %v123_v32 = vld [vmem:[%s8769_s11 + $0xb8] sm:$0xff] }
 0xba4   :  { %5994 = vmatpush1.msra.mxu1 %v93_v23  ;;  %v107_v23 = vld [vmem:[%s8769_s11 + $0x38] sm:$0xff] }
 0xba5   :  { %v4392_v35 = vpop.permute.xlu0 %4391  ;;  %5995 = vmatprep.subr.mxu1 %v92_v43  ;;  %v122_v43 = vld [vmem:[%s8769_s11 + $0xb0] sm:$0xff] }
 0xba6   :  { %v4399_v17 = vsel %vm978_vm8, %v4398_v26, %v4392_v35  ;;  %5996 = vmatpush1.msra.mxu1 %v91_v12  ;;  %v86_v35 = vld [vmem:[%s8766_s9 + $0x18] sm:$0xff]  ;;  %v83_v26 = vld [vmem:[%s8766_s9] sm:$0xff]  ;;  %v106_v12 = vld [vmem:[%s8769_s11 + $0x30] sm:$0xff] }
 0xba7   :  { %5997 = vmatprep.subr.mxu1 %v90_v7  ;;  %v121_v7 = vld [vmem:[%s8769_s11 + $0xa8] sm:$0xff] }
 0xba8   :  { %5998 = vmatpush1.msra.mxu1 %v89_v46  ;;  %v105_v46 = vld [vmem:[%s8769_s11 + $0x28] sm:$0xff] }
 0xba9   :  { %v4396_v51 = vpop.permute.xlu1 %4395  ;;  %5999 = vmatprep.subr.mxu1 %v88_v30  ;;  %v120_v30 = vld [vmem:[%s8769_s11 + $0xa0] sm:$0xff] }
 0xbaa   :  { %v4400_v18 = vsel %vm980_vm9, %v4399_v17, %v4396_v51  ;;  %6000 = vmatpush1.msra.mxu1 %v87_v11  ;;  %v104_v11 = vld [vmem:[%s8769_s11 + $0x20] sm:$0xff] }
 0xbab   :  { %v5776_v60 = vrot.slane %v4400_v18, 1  ;;  %6001 = vmatprep.subr.mxu1 %v86_v35  ;;  %v119_v35 = vld [vmem:[%s8769_s11 + $0x98] sm:$0xff] }
 0xbac   :  { %6002 = vmatpush1.msra.mxu1 %v85_v48  ;;  %v103_v48 = vld [vmem:[%s8769_s11 + $0x18] sm:$0xff] }
 0xbad   :  { %v5791_v10 = vsel %vm5790_vm12, %v5789_v59, %v5776_v60  ;;  %6003 = vmatprep.subr.mxu1 %v84_v38  ;;  %v118_v38 = vld [vmem:[%s8769_s11 + $0x90] sm:$0xff] }
 0xbae   :  { %7041 = vmatmul.mubr.msk.f32.gmra.mxu1 %vm133_vm0, %v5791_v10 }
 0xbaf   :  { %7043 = vmatprep.mubr.msk.f32.mxu1 %vm7229_vm1, %v8789_v37  ;;  %6004 = vmatpush1.msra.mxu1 %v83_v26  ;;  %v102_v26 = vld [vmem:[%s8769_s11 + $0x10] sm:$0xff] }
 0xbc0   :  { %v5069_v21 = vpop.permute.xlu0 %5068 }
 0xbc1   :  { %v5079_v20 = vsel %vm298_vm2, %v8450_v3, %v5069_v21  ;;  %v6512_v3 = vld [vmem:[%s8765_s6] ss:$0 sm:$0xff] }
 0xbc4   :  { %v5073_v52 = vpop.permute.xlu1 %5072 }
 0xbc5   :  { %v5080_v8 = vsel %vm978_vm8, %v5079_v20, %v5073_v52 }
 0xbc8   :  { %v5077_v40 = vpop.permute.xlu1 %5076 }
 0xbc9   :  { %v5081_v13 = vsel %vm980_vm9, %v5080_v8, %v5077_v40 }
 0xbca   :  { %v5779_v22 = vrot.slane %v5081_v13, 6 }
 0xbcc   :  { %v5792_v1 = vsel %vm1664_vm6, %v5776_v60, %v5779_v22 }
 0xbd0   :  { %v5750_v27 = vpop.permute.xlu0 %5749 }
 0xbd1   :  { %v5760_v31 = vsel %vm298_vm2, %v8455_v2, %v5750_v27  ;;  %v7225_v2 = vld [vmem:[%s8759_s0] sm:$0xff] }
 0xbd4   :  { %v5754_v4 = vpop.permute.xlu0 %5753 }
 0xbd5   :  { %v5761_v24 = vsel %vm978_vm8, %v5760_v31, %v5754_v4  ;;  %v6513_v4 = vld [vmem:[%s8767_s7] ss:$0 sm:$0xff] }
 0xbd6   :  { %v6514_v31 = vld [vmem:[%s8768_s8] ss:$0 sm:$0xff] }
 0xbd8   :  { %v5758_v9 = vpop.permute.xlu1 %5757 }
 0xbd9   :  { %v5762_v16 = vsel %vm980_vm9, %v5761_v24, %v5758_v9 }
 0xbda   :  { %v5782_v34 = vrot.slane %v5762_v16, 3 }
 0xbdc   :  { %v5794_v29 = vsel %vm5793_vm13, %v5792_v1, %v5782_v34 }
 0xbdd   :  { %7044 = vmatmul.mubr.msk.f32.gmra.mxu1 %vm133_vm0, %v5794_v29 }
 0xbde   :  { %6037 = vmatprep.mubr.f32.mxu1 %v8789_v37 }
 0xc3e   :  { %v5870_v6 = vpop.f32.mrf.mxu1 }
 0xc3f   :  { %v5884_v49 = vadd.f32 %v7225_v2, %v5870_v6 }
 0xc40   :  { %v7039_v36 = vpop.f32.mrf.mxu1 }
 0xc41   :  { %v8509_v19 = vadd.f32 %v6512_v3, %v5884_v49 }
 0xc43   :  { %v5896_v58 = vsel %vm133_vm0, %v8509_v19, 0.0 }
 0xc44   :  { %5897 = vadd.xlane.f32.xlu0 %v5896_v58 }
 0xc6e   :  { %v5875_v57 = vpop.f32.mrf.mxu1 }
 0xc6f   :  { %v5885_v47 = vadd.f32 %v7226_v63, %v5875_v57 }
 0xc70   :  { %v7042_v28 = vpop.f32.mrf.mxu1 }
 0xc71   :  { %v8516_v25 = vadd.f32 %v6512_v3, %v5885_v47  ;;  %v131_v47 = vld [vmem:[%s8769_s11 + $0xf8] sm:$0xff] }
 0xc72   :  { %6660 = vmatprep.subr.mxu0 %v131_v47  ;;  %v115_v28 = vld [vmem:[%s8769_s11 + $0x78] sm:$0xff] }
 0xc73   :  { %v5899_v33 = vsel %vm133_vm0, %v8516_v25, 0.0  ;;  %6661 = vmatpush3.msra.mxu0 %v115_v28 }
 0xc74   :  { %5900 = vadd.xlane.f32.xlu1 %v5899_v33 }
 0xc9d   :  { %v5880_v0 = vpop.f32.mrf.mxu1 }
 0xc9e   :  { %v5886_v14 = vadd.f32 %v7227_v41, %v5880_v0  ;;  %v114_v0 = vld [vmem:[%s8769_s11 + $0x70] sm:$0xff] }
 0xc9f   :  { %v7045_v44 = vpop.f32.mrf.mxu1 }
 0xca0   :  { %v8523_v50 = vadd.f32 %v6512_v3, %v5886_v14  ;;  %v129_v14 = vld [vmem:[%s8769_s11 + $0xe8] sm:$0xff] }
 0xca1   :  { %v113_v44 = vld [vmem:[%s8769_s11 + $0x68] sm:$0xff] }
 0xca2   :  { %v5902_v55 = vsel %vm133_vm0, %v8523_v50, 0.0 }
 0xca3   :  { %5903 = vadd.xlane.f32.xlu0 %v5902_v55  ;;  %v128_v55 = vld [vmem:[%s8769_s11 + $0xe0] sm:$0xff] }
 0xccd   :  { %v5898_v54 = vpop.xlane.xlu0 %5897 }
 0xcce   :  { %v5905_v5 = vmul.f32 0.015625, %v5898_v54  ;;  %v112_v54 = vld [vmem:[%s8769_s11 + $0x60] sm:$0xff] }
 0xcd0   :  { %v5908_v61 = vsub.f32 %v8509_v19, %v5905_v5  ;;  %v127_v5 = vld [vmem:[%s8769_s11 + $0xd8] sm:$0xff] }
 0xcd2   :  { %v5911_v39 = vmul.f32 %v5908_v61, %v5908_v61 }
 0xcd4   :  { %v5914_v56 = vsel %vm133_vm0, %v5911_v39, 0.0  ;;  %v126_v39 = vld [vmem:[%s8769_s11 + $0xd0] sm:$0xff] }
 0xcd5   :  { %5915 = vadd.xlane.f32.xlu0 %v5914_v56  ;;  %v110_v56 = vld [vmem:[%s8769_s11 + $0x50] sm:$0xff] }
 0xcfd   :  { %v5901_v17 = vpop.xlane.xlu1 %5900 }
 0xcfe   :  { %v5906_v51 = vmul.f32 0.015625, %v5901_v17  ;;  %v117_v17 = vld [vmem:[%s8769_s11 + $0x88] sm:$0xff] }
 0xd00   :  { %v5909_v18 = vsub.f32 %v8516_v25, %v5906_v51  ;;  %v101_v51 = vld [vmem:[%s8769_s11 + $0x8] sm:$0xff] }
 0xd02   :  { %v5912_v42 = vmul.f32 %v5909_v18, %v5909_v18 }
 0xd04   :  { %v5917_v60 = vsel %vm133_vm0, %v5912_v42, 0.0  ;;  %v100_v42 = vld [vmem:[%s8769_s11] sm:$0xff] }
 0xd05   :  { %5918 = vadd.xlane.f32.xlu0 %v5917_v60  ;;  %v99_v60 = vld [vmem:[%s8770_s10] sm:$0x3] }
 0xd2c   :  { %v5904_v59 = vpop.xlane.xlu0 %5903 }
 0xd2d   :  { %v5907_v10 = vmul.f32 0.015625, %v5904_v59  ;;  %v8794_v59 = vld [vmem:[#allocation2_spill] sm:$0xff] }
 0xd2f   :  { %v5910_v52 = vsub.f32 %v8523_v50, %v5907_v10  ;;  %v8795_v10 = vsub.s32 0, %v8794_v59 }
 0xd31   :  { %v5913_v21 = vmul.f32 %v5910_v52, %v5910_v52 }
 0xd33   :  { %v5920_v27 = vsel %vm133_vm0, %v5913_v21, 0.0  ;;  %v8796_v21 = vsub.s32 1, %v8794_v59 }
 0xd34   :  { %5921 = vadd.xlane.f32.xlu1 %v5920_v27 }
 0xd35   :  { %v8697_v27 = vrot.slane %v99_v60, %v8796_v21 }
 0xd5e   :  { %v5916_v40 = vpop.xlane.xlu0 %5915 }
 0xd5f   :  { %v5923_v20 = vmul.f32 0.015625, %v5916_v40 }
 0xd61   :  { %v5926_v8 = vadd.f32 1e-06, %v5923_v20 }
 0xd63   :  { %7189 = vrsqrt.f32 %v5926_v8 }
 0xd70   :  { %v7190_v13 = vpop.eup %7189 }
 0xd71   :  { %v5932_v22 = vmul.f32 %v7190_v13, %v5908_v61  ;;  %v111_v61 = vld [vmem:[%s8769_s11 + $0x58] sm:$0xff] }
 0xd73   :  { %v5941_v24 = vmul.f32 %v6513_v4, %v5932_v22 }
 0xd75   :  { %v5950_v9 = vadd.f32 %v6514_v31, %v5941_v24 }
 0xd77   :  { %6515 = vmatmul.mubr.msk.f32.vlgmr.msra.gmra.mxu1 %vm133_vm0, %v5950_v9 }
 0xd78   :  { %6043 = vmatprep.mubr.f32.mxu1 %v8789_v37 }
 0xd8e   :  { %v5919_v16 = vpop.xlane.xlu0 %5918 }
 0xd8f   :  { %v5924_v34 = vmul.f32 0.015625, %v5919_v16 }
 0xd91   :  { %v5927_v1 = vadd.f32 1e-06, %v5924_v34 }
 0xd93   :  { %7191 = vrsqrt.f32 %v5927_v1 }
 0xda0   :  { %v7192_v29 = vpop.eup %7191 }
 0xda1   :  { %v5933_v3 = vmul.f32 %v7192_v29, %v5909_v18  ;;  %v116_v18 = vld [vmem:[%s8769_s11 + $0x80] sm:$0xff] }
 0xda3   :  { %v5942_v6 = vmul.f32 %v6513_v4, %v5933_v3 }
 0xda5   :  { %v5951_v2 = vadd.f32 %v6514_v31, %v5942_v6 }
 0xda7   :  { %6516 = vmatmul.mubr.msk.f32.gmra.mxu1 %vm133_vm0, %v5951_v2 }
 0xda8   :  { %6049 = vmatprep.mubr.f32.mxu1 %v8789_v37  ;;  %v130_v37 = vld [vmem:[%s8769_s11 + $0xf0] sm:$0xff] }
 0xda9   :  { %6662 = vmatprep.subr.mxu0 %v130_v37 }
 0xdaa   :  { %6663 = vmatpush3.msra.mxu0 %v114_v0 }
 0xdab   :  { %6664 = vmatprep.subr.mxu0 %v129_v14 }
 0xdac   :  { %6665 = vmatpush3.msra.mxu0 %v113_v44 }
 0xdad   :  { %6666 = vmatprep.subr.mxu0 %v128_v55 }
 0xdae   :  { %6667 = vmatpush3.msra.mxu0 %v112_v54 }
 0xdaf   :  { %6668 = vmatprep.subr.mxu0 %v127_v5 }
 0xdb0   :  { %6669 = vmatpush3.msra.mxu0 %v111_v61 }
 0xdb1   :  { %6670 = vmatprep.subr.mxu0 %v126_v39 }
 0xdb2   :  { %6671 = vmatpush3.msra.mxu0 %v110_v56 }
 0xdb3   :  { %6672 = vmatprep.subr.mxu0 %v125_v45 }
 0xdb4   :  { %6673 = vmatpush3.msra.mxu0 %v109_v53 }
 0xdb5   :  { %6674 = vmatprep.subr.mxu0 %v124_v62 }
 0xdb6   :  { %6675 = vmatpush3.msra.mxu0 %v108_v15 }
 0xdb7   :  { %6676 = vmatprep.subr.mxu0 %v123_v32 }
 0xdb8   :  { %6677 = vmatpush3.msra.mxu0 %v107_v23 }
 0xdb9   :  { %6678 = vmatprep.subr.mxu0 %v122_v43 }
 0xdba   :  { %6679 = vmatpush3.msra.mxu0 %v106_v12 }
 0xdbb   :  { %6680 = vmatprep.subr.mxu0 %v121_v7 }
 0xdbc   :  { %6681 = vmatpush3.msra.mxu0 %v105_v46 }
 0xdbd   :  { %v5922_v49 = vpop.xlane.xlu1 %5921  ;;  %6682 = vmatprep.subr.mxu0 %v120_v30 }
 0xdbe   :  { %v5925_v36 = vmul.f32 0.015625, %v5922_v49  ;;  %6683 = vmatpush3.msra.mxu0 %v104_v11 }
 0xdbf   :  { %6684 = vmatprep.subr.mxu0 %v119_v35 }
 0xdc0   :  { %v5928_v58 = vadd.f32 1e-06, %v5925_v36  ;;  %6685 = vmatpush3.msra.mxu0 %v103_v48 }
 0xdc1   :  { %6686 = vmatprep.subr.mxu0 %v118_v38 }
 0xdc2   :  { %7193 = vrsqrt.f32 %v5928_v58  ;;  %6687 = vmatpush3.msra.mxu0 %v102_v26 }
 0xdc3   :  { %6688 = vmatprep.subr.mxu0 %v117_v17 }
 0xdc4   :  { %6689 = vmatpush3.msra.mxu0 %v101_v51 }
 0xdc5   :  { %6690 = vmatprep.subr.mxu0 %v116_v18 }
 0xdc6   :  { %6691 = vmatpush3.msra.mxu0 %v100_v42 }
 0xdcf   :  { %v7194_v57 = vpop.eup %7193 }
 0xdd0   :  { %v5934_v63 = vmul.f32 %v7194_v57, %v5910_v52  ;;  %v8693_v52 = vrot.slane %v99_v60, %v8795_v10 }
 0xdd2   :  { %v5943_v33 = vmul.f32 %v6513_v4, %v5934_v63 }
 0xdd4   :  { %v5952_v41 = vadd.f32 %v6514_v31, %v5943_v33 }
 0xdd6   :  { %6517 = vmatmul.mubr.msk.f32.gmra.mxu1 %vm133_vm0, %v5952_v41 }
 0xe37   :  { %v6039_v40 = vpop.f32.mrf.mxu1 }
 0xe38   :  { %v6040_v20 = vadd.f32 %v6039_v40, %v8693_v52 }
 0xe39   :  { %v6041_v8 = vpop.f32.mrf.mxu1 }
 0xe3a   :  { %v6062_v13 = vmul.f32 0.70710677, %v6040_v20  ;;  %v6042_v4 = vadd.f32 %v6041_v8, %v8697_v27  ;;  %v6056_v21 = vmul.f32 0.5, %v6040_v20 }
 0xe3c   :  { %v6068_v22 = vand.u32 2147483647, %v6062_v13  ;;  %v6063_v31 = vmul.f32 0.70710677, %v6042_v4  ;;  %vm6188_vm14 = vcmp.ge.f32.partialorder %v6062_v13, 0.0  ;;  %v6057_v59 = vmul.f32 0.5, %v6042_v4 }
 0xe3e   :  { %v6074_v24 = vmul.f32 0.3275911, %v6068_v22  ;;  %v6069_v9 = vand.u32 2147483647, %v6063_v31  ;;  %v6152_v29 = vsub.f32 0.0, %v6068_v22  ;;  %vm6189_vm15 = vcmp.ge.f32.partialorder %v6063_v31, 0.0 }
 0xe40   :  { %v6080_v16 = vadd.f32 1.0, %v6074_v24  ;;  %v6075_v34 = vmul.f32 0.3275911, %v6069_v9  ;;  %v6153_v3 = vsub.f32 0.0, %v6069_v9  ;;  %v6158_v6 = vmul.f32 %v6152_v29, %v6068_v22 }
 0xe42   :  { %7195 = vrcp.f32 %v6080_v16  ;;  %v6081_v1 = vadd.f32 1.0, %v6075_v34  ;;  %v6159_v49 = vmul.f32 %v6153_v3, %v6069_v9  ;;  %v6164_v58 = vmul.f32 1.442695, %v6158_v6 }
 0xe44   :  { %7197 = vrcp.f32 %v6081_v1  ;;  %v6166_v47 = vmul.f32 1.442695, %v6159_v49 }
 0xe45   :  { %7199 = vpow2.f32 %v6164_v58 }
 0xe46   :  { %7201 = vpow2.f32 %v6166_v47 }
 0xe4f   :  { %v7196_v2 = vpop.eup %7195 }
 0xe50   :  { %v6098_v36 = vmul.f32 1.0614054, %v7196_v2 }
 0xe51   :  { %v7198_v57 = vpop.eup %7197 }
 0xe52   :  { %v6104_v63 = vadd.f32 -1.4531521, %v6098_v36  ;;  %v6099_v28 = vmul.f32 1.0614054, %v7198_v57  ;;  %v7200_v53 = vpop.eup %7199 }
 0xe53   :  { %v7202_v23 = vpop.eup %7201 }
 0xe54   :  { %v6110_v33 = vmul.f32 %v7196_v2, %v6104_v63  ;;  %v6105_v37 = vadd.f32 -1.4531521, %v6099_v28 }
 0xe56   :  { %v6116_v0 = vadd.f32 1.4214138, %v6110_v33  ;;  %v6111_v41 = vmul.f32 %v7198_v57, %v6105_v37 }
 0xe58   :  { %v6122_v14 = vmul.f32 %v7196_v2, %v6116_v0  ;;  %v6117_v44 = vadd.f32 1.4214138, %v6111_v41 }
 0xe5a   :  { %v6128_v55 = vadd.f32 -0.28449672, %v6122_v14  ;;  %v6123_v54 = vmul.f32 %v7198_v57, %v6117_v44 }
 0xe5c   :  { %v6134_v5 = vmul.f32 %v7196_v2, %v6128_v55  ;;  %v6129_v61 = vadd.f32 -0.28449672, %v6123_v54 }
 0xe5e   :  { %v6140_v39 = vadd.f32 0.2548296, %v6134_v5  ;;  %v6135_v56 = vmul.f32 %v7198_v57, %v6129_v61 }
 0xe60   :  { %v6146_v45 = vmul.f32 %v7196_v2, %v6140_v39  ;;  %v6141_v62 = vadd.f32 0.2548296, %v6135_v56 }
 0xe62   :  { %v6176_v15 = vmul.f32 %v7200_v53, %v6146_v45  ;;  %v6147_v32 = vmul.f32 %v7198_v57, %v6141_v62 }
 0xe64   :  { %v6182_v43 = vsub.f32 1.0, %v6176_v15  ;;  %v6177_v12 = vmul.f32 %v7202_v23, %v6147_v32 }
 0xe66   :  { %v6194_v7 = vsub.f32 0.0, %v6182_v43  ;;  %v6183_v30 = vsub.f32 1.0, %v6177_v12 }
 0xe67   :  { %v6045_v46 = vpop.f32.mrf.mxu1 }
 0xe68   :  { %v8702_v11 = vadd.f32 %v6045_v46, %v8693_v52  ;;  %v6200_v35 = vsel %vm6188_vm14, %v6182_v43, %v6194_v7  ;;  %v6195_v38 = vsub.f32 0.0, %v6183_v30 }
 0xe69   :  { %v6047_v48 = vpop.f32.mrf.mxu1  ;;  %v6206_v18 = vadd.f32 1.0, %v6200_v35 }
 0xe6a   :  { %v8705_v26 = vmul.f32 0.70710677, %v8702_v11  ;;  %v8708_v17 = vadd.f32 %v6047_v48, %v8697_v27  ;;  %v6201_v51 = vsel %vm6189_vm15, %v6183_v30, %v6195_v38 }
 0xe6b   :  { %v6207_v10 = vadd.f32 1.0, %v6201_v51  ;;  %v6212_v22 = vmul.f32 %v6206_v18, %v6056_v21 }
 0xe6c   :  { %v6070_v42 = vand.u32 2147483647, %v8705_v26  ;;  %v8712_v60 = vmul.f32 0.70710677, %v8708_v17  ;;  %vm6190_vm1 = vcmp.ge.f32.partialorder %v8705_v26, 0.0  ;;  %v6058_v26 = vmul.f32 0.5, %v8702_v11 }
 0xe6d   :  { %v6213_v13 = vmul.f32 %v6207_v10, %v6057_v59  ;;  %v6059_v59 = vmul.f32 0.5, %v8708_v17 }
 0xe6e   :  { %v6076_v40 = vmul.f32 0.3275911, %v6070_v42  ;;  %v6071_v8 = vand.u32 2147483647, %v8712_v60  ;;  %v6154_v16 = vsub.f32 0.0, %v6070_v42  ;;  %vm6191_vm2 = vcmp.ge.f32.partialorder %v8712_v60, 0.0 }
 0xe6f   :  { %6282 = vmatprep.mubr.f32.mxu0 %v6213_v13 }
 0xe70   :  { %v6082_v31 = vadd.f32 1.0, %v6076_v40  ;;  %v6077_v24 = vmul.f32 0.3275911, %v6071_v8  ;;  %6283 = vmatmul.mubr.f32.vlgmr.msra.gmra.mxu0 %v6212_v22  ;;  %v6155_v34 = vsub.f32 0.0, %v6071_v8  ;;  %v6160_v1 = vmul.f32 %v6154_v16, %v6070_v42 }
 0xe72   :  { %7203 = vrcp.f32 %v6082_v31  ;;  %v6083_v9 = vadd.f32 1.0, %v6077_v24  ;;  %v6161_v3 = vmul.f32 %v6155_v34, %v6071_v8  ;;  %v6168_v4 = vmul.f32 1.442695, %v6160_v1 }
 0xe74   :  { %7205 = vrcp.f32 %v6083_v9  ;;  %v6170_v49 = vmul.f32 1.442695, %v6161_v3 }
 0xe75   :  { %7207 = vpow2.f32 %v6168_v4 }
 0xe76   :  { %7209 = vpow2.f32 %v6170_v49 }
 0xe7f   :  { %v7204_v29 = vpop.eup %7203 }
 0xe80   :  { %v6100_v6 = vmul.f32 1.0614054, %v7204_v29 }
 0xe81   :  { %v7206_v20 = vpop.eup %7205 }
 0xe82   :  { %v6106_v2 = vadd.f32 -1.4531521, %v6100_v6  ;;  %v6101_v36 = vmul.f32 1.0614054, %v7206_v20  ;;  %v7208_v5 = vpop.eup %7207 }
 0xe83   :  { %v7210_v45 = vpop.eup %7209 }
 0xe84   :  { %v6112_v58 = vmul.f32 %v7204_v29, %v6106_v2  ;;  %v6107_v57 = vadd.f32 -1.4531521, %v6101_v36 }
 0xe86   :  { %v6118_v63 = vadd.f32 1.4214138, %v6112_v58  ;;  %v6113_v47 = vmul.f32 %v7206_v20, %v6107_v57 }
 0xe88   :  { %v6124_v28 = vmul.f32 %v7204_v29, %v6118_v63  ;;  %v6119_v33 = vadd.f32 1.4214138, %v6113_v47 }
 0xe8a   :  { %v6130_v37 = vadd.f32 -0.28449672, %v6124_v28  ;;  %v6125_v0 = vmul.f32 %v7206_v20, %v6119_v33 }
 0xe8c   :  { %v6136_v41 = vmul.f32 %v7204_v29, %v6130_v37  ;;  %v6131_v14 = vadd.f32 -0.28449672, %v6125_v0 }
 0xe8e   :  { %v6142_v44 = vadd.f32 0.2548296, %v6136_v41  ;;  %v6137_v55 = vmul.f32 %v7206_v20, %v6131_v14 }
 0xe90   :  { %v6148_v54 = vmul.f32 %v7204_v29, %v6142_v44  ;;  %v6143_v61 = vadd.f32 0.2548296, %v6137_v55 }
 0xe92   :  { %v6178_v39 = vmul.f32 %v7208_v5, %v6148_v54  ;;  %v6149_v56 = vmul.f32 %v7206_v20, %v6143_v61 }
 0xe94   :  { %v6184_v53 = vsub.f32 1.0, %v6178_v39  ;;  %v6179_v62 = vmul.f32 %v7210_v45, %v6149_v56 }
 0xe96   :  { %v6051_v15 = vpop.f32.mrf.mxu1  ;;  %v6196_v32 = vsub.f32 0.0, %v6184_v53  ;;  %v6185_v43 = vsub.f32 1.0, %v6179_v62 }
 0xe97   :  { %v8716_v23 = vadd.f32 %v6051_v15, %v8693_v52 }
 0xe98   :  { %v6053_v12 = vpop.f32.mrf.mxu1  ;;  %v6197_v30 = vsub.f32 0.0, %v6185_v43  ;;  %v6202_v35 = vsel %vm6190_vm1, %v6184_v53, %v6196_v32 }
 0xe99   :  { %v6066_v7 = vmul.f32 0.70710677, %v8716_v23  ;;  %v8721_v46 = vadd.f32 %v6053_v12, %v8697_v27  ;;  %v6208_v42 = vadd.f32 1.0, %v6202_v35  ;;  %v6060_v32 = vmul.f32 0.5, %v8716_v23 }
 0xe9a   :  { %v6203_v51 = vsel %vm6191_vm2, %v6185_v43, %v6197_v30 }
 0xe9b   :  { %v6072_v48 = vand.u32 2147483647, %v6066_v7  ;;  %v6067_v38 = vmul.f32 0.70710677, %v8721_v46  ;;  %v6209_v10 = vadd.f32 1.0, %v6203_v51  ;;  %v6214_v13 = vmul.f32 %v6208_v42, %v6058_v26 }
 0xe9c   :  { %vm6192_vm3 = vcmp.ge.f32.partialorder %v6066_v7, 0.0  ;;  %v6061_v62 = vmul.f32 0.5, %v8721_v46  ;;  %v6518_v7 = vld [vmem:[%s8771_s12] ss:$0 sm:$0xff] }
 0xe9d   :  { %v6078_v18 = vmul.f32 0.3275911, %v6072_v48  ;;  %v6073_v52 = vand.u32 2147483647, %v6067_v38  ;;  %v6215_v27 = vmul.f32 %v6209_v10, %v6059_v59  ;;  %v6156_v60 = vsub.f32 0.0, %v6072_v48 }
 0xe9e   :  { %vm6193_vm4 = vcmp.ge.f32.partialorder %v6067_v38, 0.0 }
 0xe9f   :  { %v6084_v21 = vadd.f32 1.0, %v6078_v18  ;;  %v6079_v40 = vmul.f32 0.3275911, %v6073_v52  ;;  %6287 = vmatprep.mubr.f32.mxu0 %v6215_v27  ;;  %v6157_v22 = vsub.f32 0.0, %v6073_v52  ;;  %v6162_v31 = vmul.f32 %v6156_v60, %v6072_v48 }
 0xea0   :  { %6288 = vmatmul.mubr.f32.gmra.mxu0 %v6214_v13 }
 0xea1   :  { %7211 = vrcp.f32 %v6084_v21  ;;  %v6085_v8 = vadd.f32 1.0, %v6079_v40  ;;  %v6163_v9 = vmul.f32 %v6157_v22, %v6073_v52  ;;  %v6172_v16 = vmul.f32 1.442695, %v6162_v31 }
 0xea3   :  { %7213 = vrcp.f32 %v6085_v8  ;;  %v6174_v29 = vmul.f32 1.442695, %v6163_v9 }
 0xea4   :  { %7215 = vpow2.f32 %v6172_v16 }
 0xea5   :  { %7217 = vpow2.f32 %v6174_v29 }
 0xeae   :  { %v7212_v24 = vpop.eup %7211 }
 0xeaf   :  { %v6102_v34 = vmul.f32 1.0614054, %v7212_v24 }
 0xeb0   :  { %v7214_v17 = vpop.eup %7213 }
 0xeb1   :  { %v6108_v1 = vadd.f32 -1.4531521, %v6102_v34  ;;  %v6103_v11 = vmul.f32 1.0614054, %v7214_v17  ;;  %v7216_v37 = vpop.eup %7215 }
 0xeb2   :  { %v7218_v44 = vpop.eup %7217 }
 0xeb3   :  { %v6114_v3 = vmul.f32 %v7212_v24, %v6108_v1  ;;  %v6109_v4 = vadd.f32 -1.4531521, %v6103_v11 }
 0xeb5   :  { %v6120_v6 = vadd.f32 1.4214138, %v6114_v3  ;;  %v6115_v20 = vmul.f32 %v7214_v17, %v6109_v4 }
 0xeb7   :  { %v6126_v2 = vmul.f32 %v7212_v24, %v6120_v6  ;;  %v6121_v49 = vadd.f32 1.4214138, %v6115_v20 }
 0xeb9   :  { %v6132_v36 = vadd.f32 -0.28449672, %v6126_v2  ;;  %v6127_v58 = vmul.f32 %v7214_v17, %v6121_v49  ;;  %v6519_v49 = vld [vmem:[%s8772_s13] ss:$0 sm:$0xff] }
 0xebb   :  { %v6138_v57 = vmul.f32 %v7212_v24, %v6132_v36  ;;  %v6133_v63 = vadd.f32 -0.28449672, %v6127_v58  ;;  %v6520_v58 = vld [vmem:[%s8773_s14] ss:$0 sm:$0xff] }
 0xebd   :  { %v6144_v47 = vadd.f32 0.2548296, %v6138_v57  ;;  %v6139_v28 = vmul.f32 %v7214_v17, %v6133_v63 }
 0xebf   :  { %v6150_v33 = vmul.f32 %v7212_v24, %v6144_v47  ;;  %v6145_v0 = vadd.f32 0.2548296, %v6139_v28 }
 0xec1   :  { %v6180_v41 = vmul.f32 %v7216_v37, %v6150_v33  ;;  %v6151_v14 = vmul.f32 %v7214_v17, %v6145_v0 }
 0xec3   :  { %v6186_v55 = vsub.f32 1.0, %v6180_v41  ;;  %v6181_v54 = vmul.f32 %v7218_v44, %v6151_v14 }
 0xec5   :  { %v6198_v5 = vsub.f32 0.0, %v6186_v55  ;;  %v6187_v61 = vsub.f32 1.0, %v6181_v54 }
 0xec7   :  { %v6204_v39 = vsel %vm6192_vm3, %v6186_v55, %v6198_v5  ;;  %v6199_v56 = vsub.f32 0.0, %v6187_v61 }
 0xec8   :  { %v6210_v53 = vadd.f32 1.0, %v6204_v39 }
 0xec9   :  { %v6205_v45 = vsel %vm6193_vm4, %v6187_v61, %v6199_v56 }
 0xeca   :  { %v6211_v15 = vadd.f32 1.0, %v6205_v45  ;;  %v6216_v12 = vmul.f32 %v6210_v53, %v6060_v32 }
 0xecc   :  { %v6217_v43 = vmul.f32 %v6211_v15, %v6061_v62 }
 0xece   :  { %6292 = vmatprep.mubr.f32.mxu0 %v6217_v43 }
 0xecf   :  { %6293 = vmatmul.mubr.f32.gmra.mxu0 %v6216_v12 }
 0xf30   :  { %v6692_v30 = vpop.f32.mrf.mxu0 }
 0xf32   :  { %v6693_v35 = vpop.f32.mrf.mxu0 }
 0xf33   :  { %v6694_v48 = vadd.f32 %v6693_v35, %v6692_v30 }
 0xf35   :  { %v6298_v38 = vadd.f32 %v6694_v48, %v8509_v19 }
 0xf37   :  { %v6307_v51 = vadd.f32 %v6518_v7, %v6298_v38 }
 0xf39   :  { %v6312_v18 = vsel %vm133_vm0, %v6307_v51, 0.0 }
 0xf3a   :  { %6313 = vadd.xlane.f32.xlu0 %v6312_v18 }
 0xf60   :  { %v6695_v46 = vpop.f32.mrf.mxu0 }
 0xf62   :  { %v6696_v52 = vpop.f32.mrf.mxu0 }
 0xf63   :  { %v6697_v23 = vadd.f32 %v6696_v52, %v6695_v46 }
 0xf65   :  { %v6299_v42 = vadd.f32 %v6697_v23, %v8516_v25 }
 0xf67   :  { %v6308_v59 = vadd.f32 %v6518_v7, %v6299_v42 }
 0xf69   :  { %v6315_v10 = vsel %vm133_vm0, %v6308_v59, 0.0 }
 0xf6a   :  { %6316 = vadd.xlane.f32.xlu1 %v6315_v10 }
 0xf8f   :  { %v6698_v26 = vpop.f32.mrf.mxu0 }
 0xf91   :  { %v6699_v21 = vpop.f32.mrf.mxu0 }
 0xf92   :  { %v6700_v40 = vadd.f32 %v6699_v21, %v6698_v26 }
 0xf94   :  { %v6300_v27 = vadd.f32 %v6700_v40, %v8523_v50 }
 0xf96   :  { %v6309_v8 = vadd.f32 %v6518_v7, %v6300_v27 }
 0xf98   :  { %v6318_v19 = vsel %vm133_vm0, %v6309_v8, 0.0 }
 0xf99   :  { %6319 = vadd.xlane.f32.xlu0 %v6318_v19 }
 0xfc3   :  { %v6314_v13 = vpop.xlane.xlu0 %6313 }
 0xfc4   :  { %v6321_v60 = vmul.f32 0.015625, %v6314_v13 }
 0xfc6   :  { %v6324_v22 = vsub.f32 %v6307_v51, %v6321_v60 }
 0xfc8   :  { %v6327_v31 = vmul.f32 %v6324_v22, %v6324_v22 }
 0xfca   :  { %v6330_v24 = vsel %vm133_vm0, %v6327_v31, 0.0 }
 0xfcb   :  { %6331 = vadd.xlane.f32.xlu1 %v6330_v24 }
 0xff3   :  { %v6317_v25 = vpop.xlane.xlu1 %6316 }
 0xff4   :  { %v6322_v9 = vmul.f32 0.015625, %v6317_v25 }
 0xff6   :  { %v6325_v16 = vsub.f32 %v6308_v59, %v6322_v9 }
 0xff8   :  { %v6328_v34 = vmul.f32 %v6325_v16, %v6325_v16 }
 0xffa   :  { %v6333_v17 = vsel %vm133_vm0, %v6328_v34, 0.0 }
 0xffb   :  { %6334 = vadd.xlane.f32.xlu0 %v6333_v17 }
0x1022   :  { %v6320_v1 = vpop.xlane.xlu0 %6319 }
0x1023   :  { %v6323_v50 = vmul.f32 0.015625, %v6320_v1 }
0x1025   :  { %v6326_v29 = vsub.f32 %v6309_v8, %v6323_v50 }
0x1027   :  { %v6329_v11 = vmul.f32 %v6326_v29, %v6326_v29 }
0x1029   :  { %v6336_v3 = vsel %vm133_vm0, %v6329_v11, 0.0 }
0x102a   :  { %6337 = vadd.xlane.f32.xlu1 %v6336_v3 }
0x1054   :  { %v6332_v4 = vpop.xlane.xlu1 %6331 }
0x1055   :  { %v6339_v6 = vmul.f32 0.015625, %v6332_v4 }
0x1057   :  { %v6342_v20 = vadd.f32 1e-06, %v6339_v6 }
0x1059   :  { %7219 = vrsqrt.f32 %v6342_v20 }
0x1066   :  { %v7220_v2 = vpop.eup %7219 }
0x1067   :  { %v6348_v36 = vmul.f32 %v7220_v2, %v6324_v22 }
0x1069   :  { %v6357_v57 = vmul.f32 %v6519_v49, %v6348_v36 }
0x106b   :  { %v6366_v63 = vadd.f32 %v6520_v58, %v6357_v57 }
0x106d   :  { %6369 = vst.msk [vmem:[%s8774_s15] sm:$0xff] %vm133_vm0, %v6366_v63 }
0x1084   :  { %v6335_v47 = vpop.xlane.xlu0 %6334 }
0x1085   :  { %v6340_v28 = vmul.f32 0.015625, %v6335_v47 }
0x1087   :  { %v6343_v33 = vadd.f32 1e-06, %v6340_v28 }
0x1089   :  { %7221 = vrsqrt.f32 %v6343_v33 }
0x1096   :  { %v7222_v37 = vpop.eup %7221 }
0x1097   :  { %v6349_v0 = vmul.f32 %v7222_v37, %v6325_v16 }
0x1099   :  { %v6358_v41 = vmul.f32 %v6519_v49, %v6349_v0 }
0x109b   :  { %v6367_v14 = vadd.f32 %v6520_v58, %v6358_v41 }
0x109d   :  { %6370 = vst.msk [vmem:[%s8774_s15 + $0x8] sm:$0xff] %vm133_vm0, %v6367_v14 }
0x10b3   :  { %v6338_v44 = vpop.xlane.xlu1 %6337 }
0x10b4   :  { %v6341_v55 = vmul.f32 0.015625, %v6338_v44 }
0x10b6   :  { %v6344_v54 = vadd.f32 1e-06, %v6341_v55 }
0x10b8   :  { %7223 = vrsqrt.f32 %v6344_v54 }
0x10c5   :  { %v7224_v5 = vpop.eup %7223 }
0x10c6   :  { %v6350_v61 = vmul.f32 %v7224_v5, %v6326_v29 }
0x10c8   :  { %v6359_v39 = vmul.f32 %v6519_v49, %v6350_v61 }
0x10ca   :  { %v6368_v56 = vadd.f32 %v6520_v58, %v6359_v39 }
0x10cc   :  { %6371 = vst.msk [vmem:[%s8774_s15 + $0x10] sm:$0xff] %vm133_vm0, %v6368_v56 }

</bundles_post_ra>
